<compile_context>
chip_gen: v6e
topology: v6e:2x2x1
jax: 0.10.0
libtpu: 0.0.40
codegen_flags: <defaults>
</compile_context>

<pallas_src>
import functools

import jax
import jax.numpy as jnp
from jax.experimental import pallas as pl
from jax.experimental.pallas import tpu as pltpu

BN_EPS = 1e-5
TM_MAX = 512      # max rows (flattened N*D*H*W positions) per grid step
TK_SINGLE = 1024  # K <= this -> single K tile
TK = 512          # K tile when K is large
TN_SPLIT = 256    # Cout tile when Cout >= 512 (v7x 2-TC sharding)


def _round_up(x, m):
    return ((x + m - 1) // m) * m


# ----------------------------------------------------------------------------
# Pallas kernels
# ----------------------------------------------------------------------------
def _mm_bias_kernel(x_ref, w_ref, b_ref, o_ref, acc_ref, *, relu):
    """out = relu?( sum_k (x_k @ w_k) + bias ); bf16 matmul, f32 accumulate."""
    @pl.when(pl.program_id(2) == 0)
    def _():
        acc_ref[...] = jnp.zeros_like(acc_ref)

    acc_ref[...] += jnp.dot(x_ref[...], w_ref[...],
                            preferred_element_type=jnp.float32)

    @pl.when(pl.program_id(2) == pl.num_programs(2) - 1)
    def _():
        y = acc_ref[...] + b_ref[...]
        if relu:
            y = jnp.maximum(y, 0.0)
        o_ref[...] = y


def _mm_bias_res_kernel(x_ref, w_ref, b_ref, r_ref, o_ref, acc_ref, *, relu):
    """out = relu?( sum_k (x_k @ w_k) + bias + residual )."""
    @pl.when(pl.program_id(2) == 0)
    def _():
        acc_ref[...] = jnp.zeros_like(acc_ref)

    acc_ref[...] += jnp.dot(x_ref[...], w_ref[...],
                            preferred_element_type=jnp.float32)

    @pl.when(pl.program_id(2) == pl.num_programs(2) - 1)
    def _():
        y = acc_ref[...] + b_ref[...] + r_ref[...]
        if relu:
            y = jnp.maximum(y, 0.0)
        o_ref[...] = y


def _max3_kernel(x_ref, o_ref):
    """x: (3, TM, C) stacked 1-D pooling taps -> elementwise max over taps."""
    x = x_ref[...]
    o_ref[...] = jnp.maximum(jnp.maximum(x[0], x[1]), x[2])


# ----------------------------------------------------------------------------
# Pallas wrappers
# ----------------------------------------------------------------------------
def _fused_matmul(xm, wm, bias, residual=None, relu=True):
    """(M, K) @ (K, Cout) with fused bias / residual / ReLU.

    Tiling: M (parallel) x Cout (parallel) x K (arbitrary reduction with a
    VMEM f32 accumulator).  Operands are cast to bf16; output is f32.
    """
    M, K = xm.shape
    Cout = wm.shape[1]

    # --- M tiling (adaptive: avoid padding waste on tiny late-stage layers)
    tm = min(TM_MAX, _round_up(max(M, 8), 8))
    Mp = _round_up(M, tm)

    # --- K tiling
    if K > TK_SINGLE:
        tk = TK
        Kp = _round_up(K, tk)
    else:
        tk = K
        Kp = K

    # --- Cout tiling
    tn = TN_SPLIT if (Cout % TN_SPLIT == 0 and Cout > TN_SPLIT) else Cout

    xm_b = jnp.pad(xm.astype(jnp.bfloat16), ((0, Mp - M), (0, Kp - K)))
    wm_b = jnp.pad(wm.astype(jnp.bfloat16), ((0, Kp - K), (0, 0)))
    bias2 = bias.reshape(1, Cout).astype(jnp.float32)

    grid = (Mp // tm, Cout // tn, Kp // tk)

    in_specs = [
        pl.BlockSpec((tm, tk), lambda i, j, k: (i, k)),
        pl.BlockSpec((tk, tn), lambda i, j, k: (k, j)),
        pl.BlockSpec((1, tn), lambda i, j, k: (0, j)),
    ]
    args = [xm_b, wm_b, bias2]
    if residual is not None:
        res_p = jnp.pad(residual.astype(jnp.float32), ((0, Mp - M), (0, 0)))
        in_specs.append(pl.BlockSpec((tm, tn), lambda i, j, k: (i, j)))
        args.append(res_p)
        kernel = functools.partial(_mm_bias_res_kernel, relu=relu)
    else:
        kernel = functools.partial(_mm_bias_kernel, relu=relu)

    out = pl.pallas_call(
        kernel,
        out_shape=jax.ShapeDtypeStruct((Mp, Cout), jnp.float32),
        grid_spec=pltpu.PrefetchScalarGridSpec(
            num_scalar_prefetch=0,
            grid=grid,
            in_specs=in_specs,
            out_specs=pl.BlockSpec((tm, tn), lambda i, j, k: (i, j)),
            scratch_shapes=[pltpu.VMEM((tm, tn), jnp.float32)],
        ),
        compiler_params=pltpu.CompilerParams(
            dimension_semantics=("parallel", "parallel", "arbitrary"),
        ),
    )(*args)
    if Mp != M:
        out = out[:M]
    return out


def _im2col3d(x, k, stride, pad):
    """x: (N, D, H, W, C) -> patches (N, OD, OH, OW, k^3 * C). dilation=1."""
    N, D, H, W, C = x.shape
    xp = jnp.pad(x, ((0, 0), (pad, pad), (pad, pad), (pad, pad), (0, 0)))
    OD = (D + 2 * pad - k) // stride + 1
    OH = (H + 2 * pad - k) // stride + 1
    OW = (W + 2 * pad - k) // stride + 1
    patches = []
    for i in range(k):
        for j in range(k):
            for l in range(k):
                patches.append(
                    xp[:,
                       i:i + (OD - 1) * stride + 1:stride,
                       j:j + (OH - 1) * stride + 1:stride,
                       l:l + (OW - 1) * stride + 1:stride, :])
    cols = jnp.concatenate(patches, axis=-1)
    return cols, (OD, OH, OW)


def conv3d_bn_act(x, w, scale, bias, *, stride=1, pad=0, relu=True, residual=None):
    """x: (N, D, H, W, Cin) NDHWC; w: (Cout, Cin, k, k, k) (PyTorch layout).

    BatchNorm is folded: scale goes into the weights (f32) before the bf16
    cast, bias is added inside the Pallas kernel.
    """
    Cout, Cin, kd, kh, kw = w.shape
    N = x.shape[0]
    xb = x.astype(jnp.bfloat16)               # cast before any staging
    if kd == 1:
        # 1x1x1 conv: plain (strided) channel matmul, no im2col gather.
        if stride != 1:
            xb = xb[:, ::stride, ::stride, ::stride, :]
        OD, OH, OW = xb.shape[1:4]
        xm = xb.reshape(N * OD * OH * OW, Cin)
    else:
        cols, (OD, OH, OW) = _im2col3d(xb, kd, stride, pad)
        xm = cols.reshape(N * OD * OH * OW, kd * kh * kw * Cin)
    M = N * OD * OH * OW
    # Weight to (kd, kh, kw, Cin, Cout) matching the im2col tap/channel order,
    # then fold BN scale (f32).
    wm = jnp.transpose(w, (2, 3, 4, 1, 0)).reshape(kd * kh * kw * Cin, Cout)
    wm = wm * scale.reshape(1, Cout)
    res_m = residual.reshape(M, Cout) if residual is not None else None
    out = _fused_matmul(xm, wm, bias, residual=res_m, relu=relu)
    return out.reshape(N, OD, OH, OW, Cout)


def _pool1d_3s2p1(x, axis):
    """1-D max pool (kernel 3, stride 2, pad 1) along `axis` of NDHWC (f32)."""
    neg = jnp.finfo(jnp.float32).min
    pads = [(0, 0)] * x.ndim
    pads[axis] = (1, 1)
    xp = jnp.pad(x, pads, constant_values=neg)
    size = x.shape[axis]
    out_size = (size - 1) // 2 + 1
    taps = []
    for t in range(3):
        idx = [slice(None)] * x.ndim
        idx[axis] = slice(t, t + (out_size - 1) * 2 + 1, 2)
        taps.append(xp[tuple(idx)])
    st = jnp.stack(taps, axis=0)                      # (3, N, ..., C)
    out_shape = st.shape[1:]
    C = out_shape[-1]
    M = 1
    for s in out_shape[:-1]:
        M *= s
    st2 = st.reshape(3, M, C)
    tm = min(TM_MAX, _round_up(max(M, 8), 8))
    Mp = _round_up(M, tm)
    st2 = jnp.pad(st2, ((0, 0), (0, Mp - M), (0, 0)))
    out = pl.pallas_call(
        _max3_kernel,
        out_shape=jax.ShapeDtypeStruct((Mp, C), jnp.float32),
        grid=(Mp // tm,),
        in_specs=[pl.BlockSpec((3, tm, C), lambda i: (0, i, 0))],
        out_specs=pl.BlockSpec((tm, C), lambda i: (i, 0)),
        compiler_params=pltpu.CompilerParams(
            dimension_semantics=("parallel",)),
    )(st2)
    return out[:M].reshape(out_shape)


def maxpool3d(x):
    """MaxPool3d(kernel_size=3, stride=2, padding=1), separable per axis."""
    for axis in (1, 2, 3):
        x = _pool1d_3s2p1(x, axis)
    return x


# ----------------------------------------------------------------------------
# Parameter construction (deterministic, Kaiming-normal fan_out like PyTorch)
# ----------------------------------------------------------------------------
def _kaiming_conv(key, cout, cin, k):
    fan_out = cout * k * k * k
    std = (2.0 / fan_out) ** 0.5
    return jax.random.normal(key, (cout, cin, k, k, k), jnp.float32) * std


def _bn_params(c):
    # inference-mode BN with gamma=1, beta=0, running_mean=0, running_var=1
    scale = jnp.full((c,), 1.0 / jnp.sqrt(1.0 + BN_EPS), jnp.float32)
    bias = jnp.zeros((c,), jnp.float32)
    return scale, bias


def _make_bottleneck_params(key, inplanes, planes, stride, downsample):
    width = planes  # groups=1, base_width=64
    exp = 4
    keys = jax.random.split(key, 4)
    p = {
        "conv1_w": _kaiming_conv(keys[0], width, inplanes, 1),
        "bn1": _bn_params(width),
        "conv2_w": _kaiming_conv(keys[1], width, width, 3),
        "bn2": _bn_params(width),
        "conv3_w": _kaiming_conv(keys[2], planes * exp, width, 1),
        "bn3": _bn_params(planes * exp),
        "stride": stride,
    }
    if downsample:
        p["ds_w"] = _kaiming_conv(keys[3], planes * exp, inplanes, 1)
        p["ds_bn"] = _bn_params(planes * exp)
    return p


def _make_layer_params(key, inplanes, planes, blocks, stride):
    keys = jax.random.split(key, blocks)
    downsample = (stride != 1) or (inplanes != planes * 4)
    params = [_make_bottleneck_params(keys[0], inplanes, planes, stride, downsample)]
    inplanes = planes * 4
    for b in range(1, blocks):
        params.append(_make_bottleneck_params(keys[b], inplanes, planes, 1, False))
    return params, inplanes


def init_resnet3d_params(key, layers=(2, 1, 1)):
    keys = jax.random.split(key, 5)
    params = {
        "conv0_w": _kaiming_conv(keys[0], 32, 1, 3),     # Conv3d(1, 32, k=3, p=1)
        "bn0": _bn_params(32),
        "conv1_w": _kaiming_conv(keys[1], 64, 32, 7),    # Conv3d(32, 64, k=7, s=2, p=3)
        "bn1": _bn_params(64),
    }
    inplanes = 64
    params["layer1"], inplanes = _make_layer_params(keys[2], inplanes, 64, layers[0], 1)
    params["layer2"], inplanes = _make_layer_params(keys[3], inplanes, 128, layers[1], 2)
    params["layer3"], inplanes = _make_layer_params(keys[4], inplanes, 256, layers[2], 2)
    return params


# ----------------------------------------------------------------------------
# Forward pass
# ----------------------------------------------------------------------------
def bottleneck_forward(x, p):
    out = conv3d_bn_act(x, p["conv1_w"], *p["bn1"], stride=1, pad=0, relu=True)
    out = conv3d_bn_act(out, p["conv2_w"], *p["bn2"], stride=p["stride"], pad=1, relu=True)
    if "ds_w" in p:
        identity = conv3d_bn_act(x, p["ds_w"], *p["ds_bn"],
                                 stride=p["stride"], pad=0, relu=False)
    else:
        identity = x
    # conv3 + bn3, residual add, then ReLU (all fused in one Pallas kernel)
    out = conv3d_bn_act(out, p["conv3_w"], *p["bn3"], stride=1, pad=0,
                        relu=True, residual=identity)
    return out


def resnet3d_forward(params, x_ncdhw):
    x = jnp.transpose(x_ncdhw, (0, 2, 3, 4, 1)).astype(jnp.float32)  # -> NDHWC
    x0 = conv3d_bn_act(x, params["conv0_w"], *params["bn0"], stride=1, pad=1, relu=True)
    x1 = conv3d_bn_act(x0, params["conv1_w"], *params["bn1"], stride=2, pad=3, relu=True)
    xm = maxpool3d(x1)
    x2 = xm
    for p in params["layer1"]:
        x2 = bottleneck_forward(x2, p)
    x3 = x2
    for p in params["layer2"]:
        x3 = bottleneck_forward(x3, p)
    x4 = x3
    for p in params["layer3"]:
        x4 = bottleneck_forward(x4, p)
    to_ncdhw = lambda t: jnp.transpose(t, (0, 4, 1, 2, 3))
    return tuple(to_ncdhw(t) for t in (x0, x1, x2, x3, x4))


if __name__ == "__main__":
    key = jax.random.PRNGKey(0)
    pkey, xkey = jax.random.split(key)
    params = init_resnet3d_params(pkey, layers=(2, 1, 1))
    # PyTorch-style NCDHW input with 1 channel (as required by conv0).
    x = jax.random.normal(xkey, (2, 1, 8, 8, 8), jnp.float32)

    # jit the whole forward (weights closed over so Python-int hyperparams like
    # stride stay static) so the XLA glue (pads / gathers / casts) fuses.
    forward = jax.jit(lambda inp: resnet3d_forward(params, inp))
    outs = forward(x)
    outs = jax.block_until_ready(outs)
    # expected shapes:
    #   x0: (2, 32, 8, 8, 8)   x1: (2, 64, 4, 4, 4)
    #   x2: (2, 256, 2, 2, 2)  x3: (2, 512, 1, 1, 1)  x4: (2, 1024, 1, 1, 1)
    assert outs[0].shape == (2, 32, 8, 8, 8)
    assert outs[1].shape == (2, 64, 4, 4, 4)
    assert outs[2].shape == (2, 256, 2, 2, 2)
    assert outs[3].shape == (2, 512, 1, 1, 1)
    assert outs[4].shape == (2, 1024, 1, 1, 1)
    print("KERNEL_OK")
</pallas_src>

<mosaic_0001>
module attributes {stable_mosaic.version = 11 : i64} {
  func.func @_mm_bias_kernel(%arg0: i32, %arg1: i32, %arg2: i32, %arg3: memref<512x27xbf16, #tpu.memory_space<vmem>>, %arg4: memref<27x32xbf16, #tpu.memory_space<vmem>>, %arg5: memref<1x32xf32, #tpu.memory_space<vmem>>, %arg6: memref<512x32xf32, #tpu.memory_space<vmem>>, %arg7: memref<512x32xf32, #tpu.memory_space<vmem>>) attributes {dimension_semantics = [#tpu.dimension_semantics<parallel>, #tpu.dimension_semantics<parallel>, #tpu.dimension_semantics<arbitrary>], iteration_bounds = array<i64: 2, 1, 1>, scalar_prefetch = 0 : i64, scratch_operands = 1 : i64, tpu.core_type = #tpu.core_type<tc>, window_params = [{transform_indices = @transform_0, window_bounds = array<i64: 512, 27>}, {transform_indices = @transform_1, window_bounds = array<i64: 27, 32>}, {transform_indices = @transform_2, window_bounds = array<i64: 1, 32>}, {transform_indices = @transform_3, window_bounds = array<i64: 512, 32>}]} {
    %c0_i32 = arith.constant 0 : i32
    %0 = arith.cmpi eq, %arg2, %c0_i32 : i32
    %1 = arith.extui %0 : i1 to i32
    %c0_i32_0 = arith.constant 0 : i32
    %2 = arith.cmpi ne, %1, %c0_i32_0 : i32
    scf.if %2 {
      %cst_10 = arith.constant 0.000000e+00 : f32
      %12 = vector.broadcast %cst_10 : f32 to vector<512x32xf32>
      %c0_11 = arith.constant 0 : index
      %c0_12 = arith.constant 0 : index
      %13 = vector.load %arg7[%c0_11, %c0_12] : memref<512x32xf32, #tpu.memory_space<vmem>>, vector<512x32xf32>
      tpu.vector_store %arg7[%c0_11, %c0_12], %12 {strides = array<i32>} : memref<512x32xf32, #tpu.memory_space<vmem>>, vector<512x32xf32>,
    } else {
    }
    %c0 = arith.constant 0 : index
    %c0_1 = arith.constant 0 : index
    %3 = vector.load %arg7[%c0, %c0_1] : memref<512x32xf32, #tpu.memory_space<vmem>>, vector<512x32xf32>
    %c0_2 = arith.constant 0 : index
    %c0_3 = arith.constant 0 : index
    %4 = vector.load %arg3[%c0_2, %c0_3] : memref<512x27xbf16, #tpu.memory_space<vmem>>, vector<512x27xbf16>
    %c0_4 = arith.constant 0 : index
    %c0_5 = arith.constant 0 : index
    %5 = vector.load %arg4[%c0_4, %c0_5] : memref<27x32xbf16, #tpu.memory_space<vmem>>, vector<27x32xbf16>
    %cst = arith.constant dense<0.000000e+00> : vector<512x32xf32>
    %6 = tpu.matmul %4, %5, %cst {dimension_numbers = #tpu.dot_dimension_numbers<[1], [0], [0], [1], [0, 0, 1, 1], [], []>} : vector<512x27xbf16>, vector<27x32xbf16>, vector<512x32xf32> -> vector<512x32xf32>
    %7 = arith.addf %3, %6 : vector<512x32xf32>
    %c0_6 = arith.constant 0 : index
    %c0_7 = arith.constant 0 : index
    %8 = vector.load %arg7[%c0_6, %c0_7] : memref<512x32xf32, #tpu.memory_space<vmem>>, vector<512x32xf32>
    tpu.vector_store %arg7[%c0_6, %c0_7], %7 {strides = array<i32>} : memref<512x32xf32, #tpu.memory_space<vmem>>, vector<512x32xf32>,
    %c0_i32_8 = arith.constant 0 : i32
    %9 = arith.cmpi eq, %arg2, %c0_i32_8 : i32
    %10 = arith.extui %9 : i1 to i32
    %c0_i32_9 = arith.constant 0 : i32
    %11 = arith.cmpi ne, %10, %c0_i32_9 : i32
    scf.if %11 {
      %c0_10 = arith.constant 0 : index
      %c0_11 = arith.constant 0 : index
      %12 = vector.load %arg7[%c0_10, %c0_11] : memref<512x32xf32, #tpu.memory_space<vmem>>, vector<512x32xf32>
      %c0_12 = arith.constant 0 : index
      %c0_13 = arith.constant 0 : index
      %13 = vector.load %arg5[%c0_12, %c0_13] : memref<1x32xf32, #tpu.memory_space<vmem>>, vector<1x32xf32>
      %14 = vector.broadcast %13 : vector<1x32xf32> to vector<512x32xf32>
      %15 = arith.addf %12, %14 : vector<512x32xf32>
      %cst_14 = arith.constant 0.000000e+00 : f32
      %16 = vector.broadcast %cst_14 : f32 to vector<512x32xf32>
      %17 = arith.maximumf %15, %16 : vector<512x32xf32>
      %c0_15 = arith.constant 0 : index
      %c0_16 = arith.constant 0 : index
      %18 = vector.load %arg6[%c0_15, %c0_16] : memref<512x32xf32, #tpu.memory_space<vmem>>, vector<512x32xf32>
      tpu.vector_store %arg6[%c0_15, %c0_16], %17 {strides = array<i32>} : memref<512x32xf32, #tpu.memory_space<vmem>>, vector<512x32xf32>,
    } else {
    }
    return
  }
  func.func @transform_0(%arg0: i32, %arg1: i32, %arg2: i32) -> (i32, i32) {
    %c0_i32 = arith.constant 0 : i32
    return %arg0, %arg2 : i32, i32
  }
  func.func @transform_1(%arg0: i32, %arg1: i32, %arg2: i32) -> (i32, i32) {
    %c0_i32 = arith.constant 0 : i32
    return %arg2, %arg1 : i32, i32
  }
  func.func @transform_2(%arg0: i32, %arg1: i32, %arg2: i32) -> (i32, i32) {
    %c0_i32 = arith.constant 0 : i32
    %c0_i32_0 = arith.constant 0 : i32
    return %c0_i32, %arg1 : i32, i32
  }
  func.func @transform_3(%arg0: i32, %arg1: i32, %arg2: i32) -> (i32, i32) {
    %c0_i32 = arith.constant 0 : i32
    return %arg0, %arg1 : i32, i32
  }
}

module attributes {stable_mosaic.version = 11 : i64} {
  func.func @_mm_bias_kernel(%arg0: i32, %arg1: i32, %arg2: i32, %arg3: memref<128x512xbf16, #tpu.memory_space<vmem>>, %arg4: memref<512x64xbf16, #tpu.memory_space<vmem>>, %arg5: memref<1x64xf32, #tpu.memory_space<vmem>>, %arg6: memref<128x64xf32, #tpu.memory_space<vmem>>, %arg7: memref<128x64xf32, #tpu.memory_space<vmem>>) attributes {dimension_semantics = [#tpu.dimension_semantics<parallel>, #tpu.dimension_semantics<parallel>, #tpu.dimension_semantics<arbitrary>], iteration_bounds = array<i64: 1, 1, 22>, scalar_prefetch = 0 : i64, scratch_operands = 1 : i64, tpu.core_type = #tpu.core_type<tc>, window_params = [{transform_indices = @transform_0, window_bounds = array<i64: 128, 512>}, {transform_indices = @transform_1, window_bounds = array<i64: 512, 64>}, {transform_indices = @transform_2, window_bounds = array<i64: 1, 64>}, {transform_indices = @transform_3, window_bounds = array<i64: 128, 64>}]} {
    %c0_i32 = arith.constant 0 : i32
    %0 = arith.cmpi eq, %arg2, %c0_i32 : i32
    %1 = arith.extui %0 : i1 to i32
    %c0_i32_0 = arith.constant 0 : i32
    %2 = arith.cmpi ne, %1, %c0_i32_0 : i32
    scf.if %2 {
      %cst_9 = arith.constant 0.000000e+00 : f32
      %12 = vector.broadcast %cst_9 : f32 to vector<128x64xf32>
      %c0_10 = arith.constant 0 : index
      %c0_11 = arith.constant 0 : index
      %13 = vector.load %arg7[%c0_10, %c0_11] : memref<128x64xf32, #tpu.memory_space<vmem>>, vector<128x64xf32>
      tpu.vector_store %arg7[%c0_10, %c0_11], %12 {strides = array<i32>} : memref<128x64xf32, #tpu.memory_space<vmem>>, vector<128x64xf32>,
    } else {
    }
    %c0 = arith.constant 0 : index
    %c0_1 = arith.constant 0 : index
    %3 = vector.load %arg7[%c0, %c0_1] : memref<128x64xf32, #tpu.memory_space<vmem>>, vector<128x64xf32>
    %c0_2 = arith.constant 0 : index
    %c0_3 = arith.constant 0 : index
    %4 = vector.load %arg3[%c0_2, %c0_3] : memref<128x512xbf16, #tpu.memory_space<vmem>>, vector<128x512xbf16>
    %c0_4 = arith.constant 0 : index
    %c0_5 = arith.constant 0 : index
    %5 = vector.load %arg4[%c0_4, %c0_5] : memref<512x64xbf16, #tpu.memory_space<vmem>>, vector<512x64xbf16>
    %cst = arith.constant dense<0.000000e+00> : vector<128x64xf32>
    %6 = tpu.matmul %4, %5, %cst {dimension_numbers = #tpu.dot_dimension_numbers<[1], [0], [0], [1], [0, 0, 1, 1], [], []>} : vector<128x512xbf16>, vector<512x64xbf16>, vector<128x64xf32> -> vector<128x64xf32>
    %7 = arith.addf %3, %6 : vector<128x64xf32>
    %c0_6 = arith.constant 0 : index
    %c0_7 = arith.constant 0 : index
    %8 = vector.load %arg7[%c0_6, %c0_7] : memref<128x64xf32, #tpu.memory_space<vmem>>, vector<128x64xf32>
    tpu.vector_store %arg7[%c0_6, %c0_7], %7 {strides = array<i32>} : memref<128x64xf32, #tpu.memory_space<vmem>>, vector<128x64xf32>,
    %c21_i32 = arith.constant 21 : i32
    %9 = arith.cmpi eq, %arg2, %c21_i32 : i32
    %10 = arith.extui %9 : i1 to i32
    %c0_i32_8 = arith.constant 0 : i32
    %11 = arith.cmpi ne, %10, %c0_i32_8 : i32
    scf.if %11 {
      %c0_9 = arith.constant 0 : index
      %c0_10 = arith.constant 0 : index
      %12 = vector.load %arg7[%c0_9, %c0_10] : memref<128x64xf32, #tpu.memory_space<vmem>>, vector<128x64xf32>
      %c0_11 = arith.constant 0 : index
      %c0_12 = arith.constant 0 : index
      %13 = vector.load %arg5[%c0_11, %c0_12] : memref<1x64xf32, #tpu.memory_space<vmem>>, vector<1x64xf32>
      %14 = vector.broadcast %13 : vector<1x64xf32> to vector<128x64xf32>
      %15 = arith.addf %12, %14 : vector<128x64xf32>
      %cst_13 = arith.constant 0.000000e+00 : f32
      %16 = vector.broadcast %cst_13 : f32 to vector<128x64xf32>
      %17 = arith.maximumf %15, %16 : vector<128x64xf32>
      %c0_14 = arith.constant 0 : index
      %c0_15 = arith.constant 0 : index
      %18 = vector.load %arg6[%c0_14, %c0_15] : memref<128x64xf32, #tpu.memory_space<vmem>>, vector<128x64xf32>
      tpu.vector_store %arg6[%c0_14, %c0_15], %17 {strides = array<i32>} : memref<128x64xf32, #tpu.memory_space<vmem>>, vector<128x64xf32>,
    } else {
    }
    return
  }
  func.func @transform_0(%arg0: i32, %arg1: i32, %arg2: i32) -> (i32, i32) {
    %c0_i32 = arith.constant 0 : i32
    return %arg0, %arg2 : i32, i32
  }
  func.func @transform_1(%arg0: i32, %arg1: i32, %arg2: i32) -> (i32, i32) {
    %c0_i32 = arith.constant 0 : i32
    return %arg2, %arg1 : i32, i32
  }
  func.func @transform_2(%arg0: i32, %arg1: i32, %arg2: i32) -> (i32, i32) {
    %c0_i32 = arith.constant 0 : i32
    %c0_i32_0 = arith.constant 0 : i32
    return %c0_i32, %arg1 : i32, i32
  }
  func.func @transform_3(%arg0: i32, %arg1: i32, %arg2: i32) -> (i32, i32) {
    %c0_i32 = arith.constant 0 : i32
    return %arg0, %arg1 : i32, i32
  }
}

module attributes {stable_mosaic.version = 11 : i64} {
  func.func @_max3_kernel(%arg0: i32, %arg1: memref<3x64x64xf32, #tpu.memory_space<vmem>>, %arg2: memref<64x64xf32, #tpu.memory_space<vmem>>) attributes {dimension_semantics = [#tpu.dimension_semantics<parallel>], iteration_bounds = array<i64: 1>, scalar_prefetch = 0 : i64, scratch_operands = 0 : i64, tpu.core_type = #tpu.core_type<tc>, window_params = [{transform_indices = @transform_0, window_bounds = array<i64: 3, 64, 64>}, {transform_indices = @transform_1, window_bounds = array<i64: 64, 64>}]} {
    %c0 = arith.constant 0 : index
    %c0_0 = arith.constant 0 : index
    %c0_1 = arith.constant 0 : index
    %0 = vector.load %arg1[%c0, %c0_0, %c0_1] : memref<3x64x64xf32, #tpu.memory_space<vmem>>, vector<3x64x64xf32>
    %1 = vector.extract_strided_slice %0 {offsets = [0, 0, 0], sizes = [1, 64, 64], strides = [1, 1, 1]} : vector<3x64x64xf32> to vector<1x64x64xf32>
    %2 = vector.shape_cast %1 : vector<1x64x64xf32> to vector<64x64xf32>
    %3 = vector.extract_strided_slice %0 {offsets = [1, 0, 0], sizes = [1, 64, 64], strides = [1, 1, 1]} : vector<3x64x64xf32> to vector<1x64x64xf32>
    %4 = vector.shape_cast %3 : vector<1x64x64xf32> to vector<64x64xf32>
    %5 = arith.maximumf %2, %4 : vector<64x64xf32>
    %6 = vector.extract_strided_slice %0 {offsets = [2, 0, 0], sizes = [1, 64, 64], strides = [1, 1, 1]} : vector<3x64x64xf32> to vector<1x64x64xf32>
    %7 = vector.shape_cast %6 : vector<1x64x64xf32> to vector<64x64xf32>
    %8 = arith.maximumf %5, %7 : vector<64x64xf32>
    %c0_2 = arith.constant 0 : index
    %c0_3 = arith.constant 0 : index
    %9 = vector.load %arg2[%c0_2, %c0_3] : memref<64x64xf32, #tpu.memory_space<vmem>>, vector<64x64xf32>
    tpu.vector_store %arg2[%c0_2, %c0_3], %8 {strides = array<i32>} : memref<64x64xf32, #tpu.memory_space<vmem>>, vector<64x64xf32>,
    return
  }
  func.func @transform_0(%arg0: i32) -> (i32, i32, i32) {
    %c0_i32 = arith.constant 0 : i32
    %c0_i32_0 = arith.constant 0 : i32
    %c0_i32_1 = arith.constant 0 : i32
    return %c0_i32, %arg0, %c0_i32_0 : i32, i32, i32
  }
  func.func @transform_1(%arg0: i32) -> (i32, i32) {
    %c0_i32 = arith.constant 0 : i32
    %c0_i32_0 = arith.constant 0 : i32
    return %arg0, %c0_i32 : i32, i32
  }
}

module attributes {stable_mosaic.version = 11 : i64} {
  func.func @_max3_kernel(%arg0: i32, %arg1: memref<3x32x64xf32, #tpu.memory_space<vmem>>, %arg2: memref<32x64xf32, #tpu.memory_space<vmem>>) attributes {dimension_semantics = [#tpu.dimension_semantics<parallel>], iteration_bounds = array<i64: 1>, scalar_prefetch = 0 : i64, scratch_operands = 0 : i64, tpu.core_type = #tpu.core_type<tc>, window_params = [{transform_indices = @transform_0, window_bounds = array<i64: 3, 32, 64>}, {transform_indices = @transform_1, window_bounds = array<i64: 32, 64>}]} {
    %c0 = arith.constant 0 : index
    %c0_0 = arith.constant 0 : index
    %c0_1 = arith.constant 0 : index
    %0 = vector.load %arg1[%c0, %c0_0, %c0_1] : memref<3x32x64xf32, #tpu.memory_space<vmem>>, vector<3x32x64xf32>
    %1 = vector.extract_strided_slice %0 {offsets = [0, 0, 0], sizes = [1, 32, 64], strides = [1, 1, 1]} : vector<3x32x64xf32> to vector<1x32x64xf32>
    %2 = vector.shape_cast %1 : vector<1x32x64xf32> to vector<32x64xf32>
    %3 = vector.extract_strided_slice %0 {offsets = [1, 0, 0], sizes = [1, 32, 64], strides = [1, 1, 1]} : vector<3x32x64xf32> to vector<1x32x64xf32>
    %4 = vector.shape_cast %3 : vector<1x32x64xf32> to vector<32x64xf32>
    %5 = arith.maximumf %2, %4 : vector<32x64xf32>
    %6 = vector.extract_strided_slice %0 {offsets = [2, 0, 0], sizes = [1, 32, 64], strides = [1, 1, 1]} : vector<3x32x64xf32> to vector<1x32x64xf32>
    %7 = vector.shape_cast %6 : vector<1x32x64xf32> to vector<32x64xf32>
    %8 = arith.maximumf %5, %7 : vector<32x64xf32>
    %c0_2 = arith.constant 0 : index
    %c0_3 = arith.constant 0 : index
    %9 = vector.load %arg2[%c0_2, %c0_3] : memref<32x64xf32, #tpu.memory_space<vmem>>, vector<32x64xf32>
    tpu.vector_store %arg2[%c0_2, %c0_3], %8 {strides = array<i32>} : memref<32x64xf32, #tpu.memory_space<vmem>>, vector<32x64xf32>,
    return
  }
  func.func @transform_0(%arg0: i32) -> (i32, i32, i32) {
    %c0_i32 = arith.constant 0 : i32
    %c0_i32_0 = arith.constant 0 : i32
    %c0_i32_1 = arith.constant 0 : i32
    return %c0_i32, %arg0, %c0_i32_0 : i32, i32, i32
  }
  func.func @transform_1(%arg0: i32) -> (i32, i32) {
    %c0_i32 = arith.constant 0 : i32
    %c0_i32_0 = arith.constant 0 : i32
    return %arg0, %c0_i32 : i32, i32
  }
}

module attributes {stable_mosaic.version = 11 : i64} {
  func.func @_mm_bias_kernel(%arg0: i32, %arg1: i32, %arg2: i32, %arg3: memref<16x64xbf16, #tpu.memory_space<vmem>>, %arg4: memref<64x64xbf16, #tpu.memory_space<vmem>>, %arg5: memref<1x64xf32, #tpu.memory_space<vmem>>, %arg6: memref<16x64xf32, #tpu.memory_space<vmem>>, %arg7: memref<16x64xf32, #tpu.memory_space<vmem>>) attributes {dimension_semantics = [#tpu.dimension_semantics<parallel>, #tpu.dimension_semantics<parallel>, #tpu.dimension_semantics<arbitrary>], iteration_bounds = array<i64: 1, 1, 1>, scalar_prefetch = 0 : i64, scratch_operands = 1 : i64, tpu.core_type = #tpu.core_type<tc>, window_params = [{transform_indices = @transform_0, window_bounds = array<i64: 16, 64>}, {transform_indices = @transform_1, window_bounds = array<i64: 64, 64>}, {transform_indices = @transform_2, window_bounds = array<i64: 1, 64>}, {transform_indices = @transform_3, window_bounds = array<i64: 16, 64>}]} {
    %c0_i32 = arith.constant 0 : i32
    %0 = arith.cmpi eq, %arg2, %c0_i32 : i32
    %1 = arith.extui %0 : i1 to i32
    %c0_i32_0 = arith.constant 0 : i32
    %2 = arith.cmpi ne, %1, %c0_i32_0 : i32
    scf.if %2 {
      %cst_10 = arith.constant 0.000000e+00 : f32
      %12 = vector.broadcast %cst_10 : f32 to vector<16x64xf32>
      %c0_11 = arith.constant 0 : index
      %c0_12 = arith.constant 0 : index
      %13 = vector.load %arg7[%c0_11, %c0_12] : memref<16x64xf32, #tpu.memory_space<vmem>>, vector<16x64xf32>
      tpu.vector_store %arg7[%c0_11, %c0_12], %12 {strides = array<i32>} : memref<16x64xf32, #tpu.memory_space<vmem>>, vector<16x64xf32>,
    } else {
    }
    %c0 = arith.constant 0 : index
    %c0_1 = arith.constant 0 : index
    %3 = vector.load %arg7[%c0, %c0_1] : memref<16x64xf32, #tpu.memory_space<vmem>>, vector<16x64xf32>
    %c0_2 = arith.constant 0 : index
    %c0_3 = arith.constant 0 : index
    %4 = vector.load %arg3[%c0_2, %c0_3] : memref<16x64xbf16, #tpu.memory_space<vmem>>, vector<16x64xbf16>
    %c0_4 = arith.constant 0 : index
    %c0_5 = arith.constant 0 : index
    %5 = vector.load %arg4[%c0_4, %c0_5] : memref<64x64xbf16, #tpu.memory_space<vmem>>, vector<64x64xbf16>
    %cst = arith.constant dense<0.000000e+00> : vector<16x64xf32>
    %6 = tpu.matmul %4, %5, %cst {dimension_numbers = #tpu.dot_dimension_numbers<[1], [0], [0], [1], [0, 0, 1, 1], [], []>} : vector<16x64xbf16>, vector<64x64xbf16>, vector<16x64xf32> -> vector<16x64xf32>
    %7 = arith.addf %3, %6 : vector<16x64xf32>
    %c0_6 = arith.constant 0 : index
    %c0_7 = arith.constant 0 : index
    %8 = vector.load %arg7[%c0_6, %c0_7] : memref<16x64xf32, #tpu.memory_space<vmem>>, vector<16x64xf32>
    tpu.vector_store %arg7[%c0_6, %c0_7], %7 {strides = array<i32>} : memref<16x64xf32, #tpu.memory_space<vmem>>, vector<16x64xf32>,
    %c0_i32_8 = arith.constant 0 : i32
    %9 = arith.cmpi eq, %arg2, %c0_i32_8 : i32
    %10 = arith.extui %9 : i1 to i32
    %c0_i32_9 = arith.constant 0 : i32
    %11 = arith.cmpi ne, %10, %c0_i32_9 : i32
    scf.if %11 {
      %c0_10 = arith.constant 0 : index
      %c0_11 = arith.constant 0 : index
      %12 = vector.load %arg7[%c0_10, %c0_11] : memref<16x64xf32, #tpu.memory_space<vmem>>, vector<16x64xf32>
      %c0_12 = arith.constant 0 : index
      %c0_13 = arith.constant 0 : index
      %13 = vector.load %arg5[%c0_12, %c0_13] : memref<1x64xf32, #tpu.memory_space<vmem>>, vector<1x64xf32>
      %14 = vector.broadcast %13 : vector<1x64xf32> to vector<16x64xf32>
      %15 = arith.addf %12, %14 : vector<16x64xf32>
      %cst_14 = arith.constant 0.000000e+00 : f32
      %16 = vector.broadcast %cst_14 : f32 to vector<16x64xf32>
      %17 = arith.maximumf %15, %16 : vector<16x64xf32>
      %c0_15 = arith.constant 0 : index
      %c0_16 = arith.constant 0 : index
      %18 = vector.load %arg6[%c0_15, %c0_16] : memref<16x64xf32, #tpu.memory_space<vmem>>, vector<16x64xf32>
      tpu.vector_store %arg6[%c0_15, %c0_16], %17 {strides = array<i32>} : memref<16x64xf32, #tpu.memory_space<vmem>>, vector<16x64xf32>,
    } else {
    }
    return
  }
  func.func @transform_0(%arg0: i32, %arg1: i32, %arg2: i32) -> (i32, i32) {
    %c0_i32 = arith.constant 0 : i32
    return %arg0, %arg2 : i32, i32
  }
  func.func @transform_1(%arg0: i32, %arg1: i32, %arg2: i32) -> (i32, i32) {
    %c0_i32 = arith.constant 0 : i32
    return %arg2, %arg1 : i32, i32
  }
  func.func @transform_2(%arg0: i32, %arg1: i32, %arg2: i32) -> (i32, i32) {
    %c0_i32 = arith.constant 0 : i32
    %c0_i32_0 = arith.constant 0 : i32
    return %c0_i32, %arg1 : i32, i32
  }
  func.func @transform_3(%arg0: i32, %arg1: i32, %arg2: i32) -> (i32, i32) {
    %c0_i32 = arith.constant 0 : i32
    return %arg0, %arg1 : i32, i32
  }
}

module attributes {stable_mosaic.version = 11 : i64} {
  func.func @_max3_kernel(%arg0: i32, %arg1: memref<3x16x64xf32, #tpu.memory_space<vmem>>, %arg2: memref<16x64xf32, #tpu.memory_space<vmem>>) attributes {dimension_semantics = [#tpu.dimension_semantics<parallel>], iteration_bounds = array<i64: 1>, scalar_prefetch = 0 : i64, scratch_operands = 0 : i64, tpu.core_type = #tpu.core_type<tc>, window_params = [{transform_indices = @transform_0, window_bounds = array<i64: 3, 16, 64>}, {transform_indices = @transform_1, window_bounds = array<i64: 16, 64>}]} {
    %c0 = arith.constant 0 : index
    %c0_0 = arith.constant 0 : index
    %c0_1 = arith.constant 0 : index
    %0 = vector.load %arg1[%c0, %c0_0, %c0_1] : memref<3x16x64xf32, #tpu.memory_space<vmem>>, vector<3x16x64xf32>
    %1 = vector.extract_strided_slice %0 {offsets = [0, 0, 0], sizes = [1, 16, 64], strides = [1, 1, 1]} : vector<3x16x64xf32> to vector<1x16x64xf32>
    %2 = vector.shape_cast %1 : vector<1x16x64xf32> to vector<16x64xf32>
    %3 = vector.extract_strided_slice %0 {offsets = [1, 0, 0], sizes = [1, 16, 64], strides = [1, 1, 1]} : vector<3x16x64xf32> to vector<1x16x64xf32>
    %4 = vector.shape_cast %3 : vector<1x16x64xf32> to vector<16x64xf32>
    %5 = arith.maximumf %2, %4 : vector<16x64xf32>
    %6 = vector.extract_strided_slice %0 {offsets = [2, 0, 0], sizes = [1, 16, 64], strides = [1, 1, 1]} : vector<3x16x64xf32> to vector<1x16x64xf32>
    %7 = vector.shape_cast %6 : vector<1x16x64xf32> to vector<16x64xf32>
    %8 = arith.maximumf %5, %7 : vector<16x64xf32>
    %c0_2 = arith.constant 0 : index
    %c0_3 = arith.constant 0 : index
    %9 = vector.load %arg2[%c0_2, %c0_3] : memref<16x64xf32, #tpu.memory_space<vmem>>, vector<16x64xf32>
    tpu.vector_store %arg2[%c0_2, %c0_3], %8 {strides = array<i32>} : memref<16x64xf32, #tpu.memory_space<vmem>>, vector<16x64xf32>,
    return
  }
  func.func @transform_0(%arg0: i32) -> (i32, i32, i32) {
    %c0_i32 = arith.constant 0 : i32
    %c0_i32_0 = arith.constant 0 : i32
    %c0_i32_1 = arith.constant 0 : i32
    return %c0_i32, %arg0, %c0_i32_0 : i32, i32, i32
  }
  func.func @transform_1(%arg0: i32) -> (i32, i32) {
    %c0_i32 = arith.constant 0 : i32
    %c0_i32_0 = arith.constant 0 : i32
    return %arg0, %c0_i32 : i32, i32
  }
}

module attributes {stable_mosaic.version = 11 : i64} {
  func.func @_mm_bias_kernel(%arg0: i32, %arg1: i32, %arg2: i32, %arg3: memref<16x512xbf16, #tpu.memory_space<vmem>>, %arg4: memref<512x64xbf16, #tpu.memory_space<vmem>>, %arg5: memref<1x64xf32, #tpu.memory_space<vmem>>, %arg6: memref<16x64xf32, #tpu.memory_space<vmem>>, %arg7: memref<16x64xf32, #tpu.memory_space<vmem>>) attributes {dimension_semantics = [#tpu.dimension_semantics<parallel>, #tpu.dimension_semantics<parallel>, #tpu.dimension_semantics<arbitrary>], iteration_bounds = array<i64: 1, 1, 4>, scalar_prefetch = 0 : i64, scratch_operands = 1 : i64, tpu.core_type = #tpu.core_type<tc>, window_params = [{transform_indices = @transform_0, window_bounds = array<i64: 16, 512>}, {transform_indices = @transform_1, window_bounds = array<i64: 512, 64>}, {transform_indices = @transform_2, window_bounds = array<i64: 1, 64>}, {transform_indices = @transform_3, window_bounds = array<i64: 16, 64>}]} {
    %c0_i32 = arith.constant 0 : i32
    %0 = arith.cmpi eq, %arg2, %c0_i32 : i32
    %1 = arith.extui %0 : i1 to i32
    %c0_i32_0 = arith.constant 0 : i32
    %2 = arith.cmpi ne, %1, %c0_i32_0 : i32
    scf.if %2 {
      %cst_9 = arith.constant 0.000000e+00 : f32
      %12 = vector.broadcast %cst_9 : f32 to vector<16x64xf32>
      %c0_10 = arith.constant 0 : index
      %c0_11 = arith.constant 0 : index
      %13 = vector.load %arg7[%c0_10, %c0_11] : memref<16x64xf32, #tpu.memory_space<vmem>>, vector<16x64xf32>
      tpu.vector_store %arg7[%c0_10, %c0_11], %12 {strides = array<i32>} : memref<16x64xf32, #tpu.memory_space<vmem>>, vector<16x64xf32>,
    } else {
    }
    %c0 = arith.constant 0 : index
    %c0_1 = arith.constant 0 : index
    %3 = vector.load %arg7[%c0, %c0_1] : memref<16x64xf32, #tpu.memory_space<vmem>>, vector<16x64xf32>
    %c0_2 = arith.constant 0 : index
    %c0_3 = arith.constant 0 : index
    %4 = vector.load %arg3[%c0_2, %c0_3] : memref<16x512xbf16, #tpu.memory_space<vmem>>, vector<16x512xbf16>
    %c0_4 = arith.constant 0 : index
    %c0_5 = arith.constant 0 : index
    %5 = vector.load %arg4[%c0_4, %c0_5] : memref<512x64xbf16, #tpu.memory_space<vmem>>, vector<512x64xbf16>
    %cst = arith.constant dense<0.000000e+00> : vector<16x64xf32>
    %6 = tpu.matmul %4, %5, %cst {dimension_numbers = #tpu.dot_dimension_numbers<[1], [0], [0], [1], [0, 0, 1, 1], [], []>} : vector<16x512xbf16>, vector<512x64xbf16>, vector<16x64xf32> -> vector<16x64xf32>
    %7 = arith.addf %3, %6 : vector<16x64xf32>
    %c0_6 = arith.constant 0 : index
    %c0_7 = arith.constant 0 : index
    %8 = vector.load %arg7[%c0_6, %c0_7] : memref<16x64xf32, #tpu.memory_space<vmem>>, vector<16x64xf32>
    tpu.vector_store %arg7[%c0_6, %c0_7], %7 {strides = array<i32>} : memref<16x64xf32, #tpu.memory_space<vmem>>, vector<16x64xf32>,
    %c3_i32 = arith.constant 3 : i32
    %9 = arith.cmpi eq, %arg2, %c3_i32 : i32
    %10 = arith.extui %9 : i1 to i32
    %c0_i32_8 = arith.constant 0 : i32
    %11 = arith.cmpi ne, %10, %c0_i32_8 : i32
    scf.if %11 {
      %c0_9 = arith.constant 0 : index
      %c0_10 = arith.constant 0 : index
      %12 = vector.load %arg7[%c0_9, %c0_10] : memref<16x64xf32, #tpu.memory_space<vmem>>, vector<16x64xf32>
      %c0_11 = arith.constant 0 : index
      %c0_12 = arith.constant 0 : index
      %13 = vector.load %arg5[%c0_11, %c0_12] : memref<1x64xf32, #tpu.memory_space<vmem>>, vector<1x64xf32>
      %14 = vector.broadcast %13 : vector<1x64xf32> to vector<16x64xf32>
      %15 = arith.addf %12, %14 : vector<16x64xf32>
      %cst_13 = arith.constant 0.000000e+00 : f32
      %16 = vector.broadcast %cst_13 : f32 to vector<16x64xf32>
      %17 = arith.maximumf %15, %16 : vector<16x64xf32>
      %c0_14 = arith.constant 0 : index
      %c0_15 = arith.constant 0 : index
      %18 = vector.load %arg6[%c0_14, %c0_15] : memref<16x64xf32, #tpu.memory_space<vmem>>, vector<16x64xf32>
      tpu.vector_store %arg6[%c0_14, %c0_15], %17 {strides = array<i32>} : memref<16x64xf32, #tpu.memory_space<vmem>>, vector<16x64xf32>,
    } else {
    }
    return
  }
  func.func @transform_0(%arg0: i32, %arg1: i32, %arg2: i32) -> (i32, i32) {
    %c0_i32 = arith.constant 0 : i32
    return %arg0, %arg2 : i32, i32
  }
  func.func @transform_1(%arg0: i32, %arg1: i32, %arg2: i32) -> (i32, i32) {
    %c0_i32 = arith.constant 0 : i32
    return %arg2, %arg1 : i32, i32
  }
  func.func @transform_2(%arg0: i32, %arg1: i32, %arg2: i32) -> (i32, i32) {
    %c0_i32 = arith.constant 0 : i32
    %c0_i32_0 = arith.constant 0 : i32
    return %c0_i32, %arg1 : i32, i32
  }
  func.func @transform_3(%arg0: i32, %arg1: i32, %arg2: i32) -> (i32, i32) {
    %c0_i32 = arith.constant 0 : i32
    return %arg0, %arg1 : i32, i32
  }
}

module attributes {stable_mosaic.version = 11 : i64} {
  func.func @_mm_bias_kernel(%arg0: i32, %arg1: i32, %arg2: i32, %arg3: memref<16x64xbf16, #tpu.memory_space<vmem>>, %arg4: memref<64x256xbf16, #tpu.memory_space<vmem>>, %arg5: memref<1x256xf32, #tpu.memory_space<vmem>>, %arg6: memref<16x256xf32, #tpu.memory_space<vmem>>, %arg7: memref<16x256xf32, #tpu.memory_space<vmem>>) attributes {dimension_semantics = [#tpu.dimension_semantics<parallel>, #tpu.dimension_semantics<parallel>, #tpu.dimension_semantics<arbitrary>], iteration_bounds = array<i64: 1, 1, 1>, scalar_prefetch = 0 : i64, scratch_operands = 1 : i64, tpu.core_type = #tpu.core_type<tc>, window_params = [{transform_indices = @transform_0, window_bounds = array<i64: 16, 64>}, {transform_indices = @transform_1, window_bounds = array<i64: 64, 256>}, {transform_indices = @transform_2, window_bounds = array<i64: 1, 256>}, {transform_indices = @transform_3, window_bounds = array<i64: 16, 256>}]} {
    %c0_i32 = arith.constant 0 : i32
    %0 = arith.cmpi eq, %arg2, %c0_i32 : i32
    %1 = arith.extui %0 : i1 to i32
    %c0_i32_0 = arith.constant 0 : i32
    %2 = arith.cmpi ne, %1, %c0_i32_0 : i32
    scf.if %2 {
      %cst_10 = arith.constant 0.000000e+00 : f32
      %12 = vector.broadcast %cst_10 : f32 to vector<16x256xf32>
      %c0_11 = arith.constant 0 : index
      %c0_12 = arith.constant 0 : index
      %13 = vector.load %arg7[%c0_11, %c0_12] : memref<16x256xf32, #tpu.memory_space<vmem>>, vector<16x256xf32>
      tpu.vector_store %arg7[%c0_11, %c0_12], %12 {strides = array<i32>} : memref<16x256xf32, #tpu.memory_space<vmem>>, vector<16x256xf32>,
    } else {
    }
    %c0 = arith.constant 0 : index
    %c0_1 = arith.constant 0 : index
    %3 = vector.load %arg7[%c0, %c0_1] : memref<16x256xf32, #tpu.memory_space<vmem>>, vector<16x256xf32>
    %c0_2 = arith.constant 0 : index
    %c0_3 = arith.constant 0 : index
    %4 = vector.load %arg3[%c0_2, %c0_3] : memref<16x64xbf16, #tpu.memory_space<vmem>>, vector<16x64xbf16>
    %c0_4 = arith.constant 0 : index
    %c0_5 = arith.constant 0 : index
    %5 = vector.load %arg4[%c0_4, %c0_5] : memref<64x256xbf16, #tpu.memory_space<vmem>>, vector<64x256xbf16>
    %cst = arith.constant dense<0.000000e+00> : vector<16x256xf32>
    %6 = tpu.matmul %4, %5, %cst {dimension_numbers = #tpu.dot_dimension_numbers<[1], [0], [0], [1], [0, 0, 1, 1], [], []>} : vector<16x64xbf16>, vector<64x256xbf16>, vector<16x256xf32> -> vector<16x256xf32>
    %7 = arith.addf %3, %6 : vector<16x256xf32>
    %c0_6 = arith.constant 0 : index
    %c0_7 = arith.constant 0 : index
    %8 = vector.load %arg7[%c0_6, %c0_7] : memref<16x256xf32, #tpu.memory_space<vmem>>, vector<16x256xf32>
    tpu.vector_store %arg7[%c0_6, %c0_7], %7 {strides = array<i32>} : memref<16x256xf32, #tpu.memory_space<vmem>>, vector<16x256xf32>,
    %c0_i32_8 = arith.constant 0 : i32
    %9 = arith.cmpi eq, %arg2, %c0_i32_8 : i32
    %10 = arith.extui %9 : i1 to i32
    %c0_i32_9 = arith.constant 0 : i32
    %11 = arith.cmpi ne, %10, %c0_i32_9 : i32
    scf.if %11 {
      %c0_10 = arith.constant 0 : index
      %c0_11 = arith.constant 0 : index
      %12 = vector.load %arg7[%c0_10, %c0_11] : memref<16x256xf32, #tpu.memory_space<vmem>>, vector<16x256xf32>
      %c0_12 = arith.constant 0 : index
      %c0_13 = arith.constant 0 : index
      %13 = vector.load %arg5[%c0_12, %c0_13] : memref<1x256xf32, #tpu.memory_space<vmem>>, vector<1x256xf32>
      %14 = vector.broadcast %13 : vector<1x256xf32> to vector<16x256xf32>
      %15 = arith.addf %12, %14 : vector<16x256xf32>
      %c0_14 = arith.constant 0 : index
      %c0_15 = arith.constant 0 : index
      %16 = vector.load %arg6[%c0_14, %c0_15] : memref<16x256xf32, #tpu.memory_space<vmem>>, vector<16x256xf32>
      tpu.vector_store %arg6[%c0_14, %c0_15], %15 {strides = array<i32>} : memref<16x256xf32, #tpu.memory_space<vmem>>, vector<16x256xf32>,
    } else {
    }
    return
  }
  func.func @transform_0(%arg0: i32, %arg1: i32, %arg2: i32) -> (i32, i32) {
    %c0_i32 = arith.constant 0 : i32
    return %arg0, %arg2 : i32, i32
  }
  func.func @transform_1(%arg0: i32, %arg1: i32, %arg2: i32) -> (i32, i32) {
    %c0_i32 = arith.constant 0 : i32
    return %arg2, %arg1 : i32, i32
  }
  func.func @transform_2(%arg0: i32, %arg1: i32, %arg2: i32) -> (i32, i32) {
    %c0_i32 = arith.constant 0 : i32
    %c0_i32_0 = arith.constant 0 : i32
    return %c0_i32, %arg1 : i32, i32
  }
  func.func @transform_3(%arg0: i32, %arg1: i32, %arg2: i32) -> (i32, i32) {
    %c0_i32 = arith.constant 0 : i32
    return %arg0, %arg1 : i32, i32
  }
}

module attributes {stable_mosaic.version = 11 : i64} {
  func.func @_mm_bias_res_kernel(%arg0: i32, %arg1: i32, %arg2: i32, %arg3: memref<16x64xbf16, #tpu.memory_space<vmem>>, %arg4: memref<64x256xbf16, #tpu.memory_space<vmem>>, %arg5: memref<1x256xf32, #tpu.memory_space<vmem>>, %arg6: memref<16x256xf32, #tpu.memory_space<vmem>>, %arg7: memref<16x256xf32, #tpu.memory_space<vmem>>, %arg8: memref<16x256xf32, #tpu.memory_space<vmem>>) attributes {dimension_semantics = [#tpu.dimension_semantics<parallel>, #tpu.dimension_semantics<parallel>, #tpu.dimension_semantics<arbitrary>], iteration_bounds = array<i64: 1, 1, 1>, scalar_prefetch = 0 : i64, scratch_operands = 1 : i64, tpu.core_type = #tpu.core_type<tc>, window_params = [{transform_indices = @transform_0, window_bounds = array<i64: 16, 64>}, {transform_indices = @transform_1, window_bounds = array<i64: 64, 256>}, {transform_indices = @transform_2, window_bounds = array<i64: 1, 256>}, {transform_indices = @transform_3, window_bounds = array<i64: 16, 256>}, {transform_indices = @transform_4, window_bounds = array<i64: 16, 256>}]} {
    %c0_i32 = arith.constant 0 : i32
    %0 = arith.cmpi eq, %arg2, %c0_i32 : i32
    %1 = arith.extui %0 : i1 to i32
    %c0_i32_0 = arith.constant 0 : i32
    %2 = arith.cmpi ne, %1, %c0_i32_0 : i32
    scf.if %2 {
      %cst_10 = arith.constant 0.000000e+00 : f32
      %12 = vector.broadcast %cst_10 : f32 to vector<16x256xf32>
      %c0_11 = arith.constant 0 : index
      %c0_12 = arith.constant 0 : index
      %13 = vector.load %arg8[%c0_11, %c0_12] : memref<16x256xf32, #tpu.memory_space<vmem>>, vector<16x256xf32>
      tpu.vector_store %arg8[%c0_11, %c0_12], %12 {strides = array<i32>} : memref<16x256xf32, #tpu.memory_space<vmem>>, vector<16x256xf32>,
    } else {
    }
    %c0 = arith.constant 0 : index
    %c0_1 = arith.constant 0 : index
    %3 = vector.load %arg8[%c0, %c0_1] : memref<16x256xf32, #tpu.memory_space<vmem>>, vector<16x256xf32>
    %c0_2 = arith.constant 0 : index
    %c0_3 = arith.constant 0 : index
    %4 = vector.load %arg3[%c0_2, %c0_3] : memref<16x64xbf16, #tpu.memory_space<vmem>>, vector<16x64xbf16>
    %c0_4 = arith.constant 0 : index
    %c0_5 = arith.constant 0 : index
    %5 = vector.load %arg4[%c0_4, %c0_5] : memref<64x256xbf16, #tpu.memory_space<vmem>>, vector<64x256xbf16>
    %cst = arith.constant dense<0.000000e+00> : vector<16x256xf32>
    %6 = tpu.matmul %4, %5, %cst {dimension_numbers = #tpu.dot_dimension_numbers<[1], [0], [0], [1], [0, 0, 1, 1], [], []>} : vector<16x64xbf16>, vector<64x256xbf16>, vector<16x256xf32> -> vector<16x256xf32>
    %7 = arith.addf %3, %6 : vector<16x256xf32>
    %c0_6 = arith.constant 0 : index
    %c0_7 = arith.constant 0 : index
    %8 = vector.load %arg8[%c0_6, %c0_7] : memref<16x256xf32, #tpu.memory_space<vmem>>, vector<16x256xf32>
    tpu.vector_store %arg8[%c0_6, %c0_7], %7 {strides = array<i32>} : memref<16x256xf32, #tpu.memory_space<vmem>>, vector<16x256xf32>,
    %c0_i32_8 = arith.constant 0 : i32
    %9 = arith.cmpi eq, %arg2, %c0_i32_8 : i32
    %10 = arith.extui %9 : i1 to i32
    %c0_i32_9 = arith.constant 0 : i32
    %11 = arith.cmpi ne, %10, %c0_i32_9 : i32
    scf.if %11 {
      %c0_10 = arith.constant 0 : index
      %c0_11 = arith.constant 0 : index
      %12 = vector.load %arg8[%c0_10, %c0_11] : memref<16x256xf32, #tpu.memory_space<vmem>>, vector<16x256xf32>
      %c0_12 = arith.constant 0 : index
      %c0_13 = arith.constant 0 : index
      %13 = vector.load %arg5[%c0_12, %c0_13] : memref<1x256xf32, #tpu.memory_space<vmem>>, vector<1x256xf32>
      %14 = vector.broadcast %13 : vector<1x256xf32> to vector<16x256xf32>
      %15 = arith.addf %12, %14 : vector<16x256xf32>
      %c0_14 = arith.constant 0 : index
      %c0_15 = arith.constant 0 : index
      %16 = vector.load %arg6[%c0_14, %c0_15] : memref<16x256xf32, #tpu.memory_space<vmem>>, vector<16x256xf32>
      %17 = arith.addf %15, %16 : vector<16x256xf32>
      %cst_16 = arith.constant 0.000000e+00 : f32
      %18 = vector.broadcast %cst_16 : f32 to vector<16x256xf32>
      %19 = arith.maximumf %17, %18 : vector<16x256xf32>
      %c0_17 = arith.constant 0 : index
      %c0_18 = arith.constant 0 : index
      %20 = vector.load %arg7[%c0_17, %c0_18] : memref<16x256xf32, #tpu.memory_space<vmem>>, vector<16x256xf32>
      tpu.vector_store %arg7[%c0_17, %c0_18], %19 {strides = array<i32>} : memref<16x256xf32, #tpu.memory_space<vmem>>, vector<16x256xf32>,
    } else {
    }
    return
  }
  func.func @transform_0(%arg0: i32, %arg1: i32, %arg2: i32) -> (i32, i32) {
    %c0_i32 = arith.constant 0 : i32
    return %arg0, %arg2 : i32, i32
  }
  func.func @transform_1(%arg0: i32, %arg1: i32, %arg2: i32) -> (i32, i32) {
    %c0_i32 = arith.constant 0 : i32
    return %arg2, %arg1 : i32, i32
  }
  func.func @transform_2(%arg0: i32, %arg1: i32, %arg2: i32) -> (i32, i32) {
    %c0_i32 = arith.constant 0 : i32
    %c0_i32_0 = arith.constant 0 : i32
    return %c0_i32, %arg1 : i32, i32
  }
  func.func @transform_3(%arg0: i32, %arg1: i32, %arg2: i32) -> (i32, i32) {
    %c0_i32 = arith.constant 0 : i32
    return %arg0, %arg1 : i32, i32
  }
  func.func @transform_4(%arg0: i32, %arg1: i32, %arg2: i32) -> (i32, i32) {
    %c0_i32 = arith.constant 0 : i32
    return %arg0, %arg1 : i32, i32
  }
}

module attributes {stable_mosaic.version = 11 : i64} {
  func.func @_mm_bias_kernel(%arg0: i32, %arg1: i32, %arg2: i32, %arg3: memref<16x256xbf16, #tpu.memory_space<vmem>>, %arg4: memref<256x64xbf16, #tpu.memory_space<vmem>>, %arg5: memref<1x64xf32, #tpu.memory_space<vmem>>, %arg6: memref<16x64xf32, #tpu.memory_space<vmem>>, %arg7: memref<16x64xf32, #tpu.memory_space<vmem>>) attributes {dimension_semantics = [#tpu.dimension_semantics<parallel>, #tpu.dimension_semantics<parallel>, #tpu.dimension_semantics<arbitrary>], iteration_bounds = array<i64: 1, 1, 1>, scalar_prefetch = 0 : i64, scratch_operands = 1 : i64, tpu.core_type = #tpu.core_type<tc>, window_params = [{transform_indices = @transform_0, window_bounds = array<i64: 16, 256>}, {transform_indices = @transform_1, window_bounds = array<i64: 256, 64>}, {transform_indices = @transform_2, window_bounds = array<i64: 1, 64>}, {transform_indices = @transform_3, window_bounds = array<i64: 16, 64>}]} {
    %c0_i32 = arith.constant 0 : i32
    %0 = arith.cmpi eq, %arg2, %c0_i32 : i32
    %1 = arith.extui %0 : i1 to i32
    %c0_i32_0 = arith.constant 0 : i32
    %2 = arith.cmpi ne, %1, %c0_i32_0 : i32
    scf.if %2 {
      %cst_10 = arith.constant 0.000000e+00 : f32
      %12 = vector.broadcast %cst_10 : f32 to vector<16x64xf32>
      %c0_11 = arith.constant 0 : index
      %c0_12 = arith.constant 0 : index
      %13 = vector.load %arg7[%c0_11, %c0_12] : memref<16x64xf32, #tpu.memory_space<vmem>>, vector<16x64xf32>
      tpu.vector_store %arg7[%c0_11, %c0_12], %12 {strides = array<i32>} : memref<16x64xf32, #tpu.memory_space<vmem>>, vector<16x64xf32>,
    } else {
    }
    %c0 = arith.constant 0 : index
    %c0_1 = arith.constant 0 : index
    %3 = vector.load %arg7[%c0, %c0_1] : memref<16x64xf32, #tpu.memory_space<vmem>>, vector<16x64xf32>
    %c0_2 = arith.constant 0 : index
    %c0_3 = arith.constant 0 : index
    %4 = vector.load %arg3[%c0_2, %c0_3] : memref<16x256xbf16, #tpu.memory_space<vmem>>, vector<16x256xbf16>
    %c0_4 = arith.constant 0 : index
    %c0_5 = arith.constant 0 : index
    %5 = vector.load %arg4[%c0_4, %c0_5] : memref<256x64xbf16, #tpu.memory_space<vmem>>, vector<256x64xbf16>
    %cst = arith.constant dense<0.000000e+00> : vector<16x64xf32>
    %6 = tpu.matmul %4, %5, %cst {dimension_numbers = #tpu.dot_dimension_numbers<[1], [0], [0], [1], [0, 0, 1, 1], [], []>} : vector<16x256xbf16>, vector<256x64xbf16>, vector<16x64xf32> -> vector<16x64xf32>
    %7 = arith.addf %3, %6 : vector<16x64xf32>
    %c0_6 = arith.constant 0 : index
    %c0_7 = arith.constant 0 : index
    %8 = vector.load %arg7[%c0_6, %c0_7] : memref<16x64xf32, #tpu.memory_space<vmem>>, vector<16x64xf32>
    tpu.vector_store %arg7[%c0_6, %c0_7], %7 {strides = array<i32>} : memref<16x64xf32, #tpu.memory_space<vmem>>, vector<16x64xf32>,
    %c0_i32_8 = arith.constant 0 : i32
    %9 = arith.cmpi eq, %arg2, %c0_i32_8 : i32
    %10 = arith.extui %9 : i1 to i32
    %c0_i32_9 = arith.constant 0 : i32
    %11 = arith.cmpi ne, %10, %c0_i32_9 : i32
    scf.if %11 {
      %c0_10 = arith.constant 0 : index
      %c0_11 = arith.constant 0 : index
      %12 = vector.load %arg7[%c0_10, %c0_11] : memref<16x64xf32, #tpu.memory_space<vmem>>, vector<16x64xf32>
      %c0_12 = arith.constant 0 : index
      %c0_13 = arith.constant 0 : index
      %13 = vector.load %arg5[%c0_12, %c0_13] : memref<1x64xf32, #tpu.memory_space<vmem>>, vector<1x64xf32>
      %14 = vector.broadcast %13 : vector<1x64xf32> to vector<16x64xf32>
      %15 = arith.addf %12, %14 : vector<16x64xf32>
      %cst_14 = arith.constant 0.000000e+00 : f32
      %16 = vector.broadcast %cst_14 : f32 to vector<16x64xf32>
      %17 = arith.maximumf %15, %16 : vector<16x64xf32>
      %c0_15 = arith.constant 0 : index
      %c0_16 = arith.constant 0 : index
      %18 = vector.load %arg6[%c0_15, %c0_16] : memref<16x64xf32, #tpu.memory_space<vmem>>, vector<16x64xf32>
      tpu.vector_store %arg6[%c0_15, %c0_16], %17 {strides = array<i32>} : memref<16x64xf32, #tpu.memory_space<vmem>>, vector<16x64xf32>,
    } else {
    }
    return
  }
  func.func @transform_0(%arg0: i32, %arg1: i32, %arg2: i32) -> (i32, i32) {
    %c0_i32 = arith.constant 0 : i32
    return %arg0, %arg2 : i32, i32
  }
  func.func @transform_1(%arg0: i32, %arg1: i32, %arg2: i32) -> (i32, i32) {
    %c0_i32 = arith.constant 0 : i32
    return %arg2, %arg1 : i32, i32
  }
  func.func @transform_2(%arg0: i32, %arg1: i32, %arg2: i32) -> (i32, i32) {
    %c0_i32 = arith.constant 0 : i32
    %c0_i32_0 = arith.constant 0 : i32
    return %c0_i32, %arg1 : i32, i32
  }
  func.func @transform_3(%arg0: i32, %arg1: i32, %arg2: i32) -> (i32, i32) {
    %c0_i32 = arith.constant 0 : i32
    return %arg0, %arg1 : i32, i32
  }
}

module attributes {stable_mosaic.version = 11 : i64} {
  func.func @_mm_bias_kernel(%arg0: i32, %arg1: i32, %arg2: i32, %arg3: memref<16x256xbf16, #tpu.memory_space<vmem>>, %arg4: memref<256x128xbf16, #tpu.memory_space<vmem>>, %arg5: memref<1x128xf32, #tpu.memory_space<vmem>>, %arg6: memref<16x128xf32, #tpu.memory_space<vmem>>, %arg7: memref<16x128xf32, #tpu.memory_space<vmem>>) attributes {dimension_semantics = [#tpu.dimension_semantics<parallel>, #tpu.dimension_semantics<parallel>, #tpu.dimension_semantics<arbitrary>], iteration_bounds = array<i64: 1, 1, 1>, scalar_prefetch = 0 : i64, scratch_operands = 1 : i64, tpu.core_type = #tpu.core_type<tc>, window_params = [{transform_indices = @transform_0, window_bounds = array<i64: 16, 256>}, {transform_indices = @transform_1, window_bounds = array<i64: 256, 128>}, {transform_indices = @transform_2, window_bounds = array<i64: 1, 128>}, {transform_indices = @transform_3, window_bounds = array<i64: 16, 128>}]} {
    %c0_i32 = arith.constant 0 : i32
    %0 = arith.cmpi eq, %arg2, %c0_i32 : i32
    %1 = arith.extui %0 : i1 to i32
    %c0_i32_0 = arith.constant 0 : i32
    %2 = arith.cmpi ne, %1, %c0_i32_0 : i32
    scf.if %2 {
      %cst_10 = arith.constant 0.000000e+00 : f32
      %12 = vector.broadcast %cst_10 : f32 to vector<16x128xf32>
      %c0_11 = arith.constant 0 : index
      %c0_12 = arith.constant 0 : index
      %13 = vector.load %arg7[%c0_11, %c0_12] : memref<16x128xf32, #tpu.memory_space<vmem>>, vector<16x128xf32>
      tpu.vector_store %arg7[%c0_11, %c0_12], %12 {strides = array<i32>} : memref<16x128xf32, #tpu.memory_space<vmem>>, vector<16x128xf32>,
    } else {
    }
    %c0 = arith.constant 0 : index
    %c0_1 = arith.constant 0 : index
    %3 = vector.load %arg7[%c0, %c0_1] : memref<16x128xf32, #tpu.memory_space<vmem>>, vector<16x128xf32>
    %c0_2 = arith.constant 0 : index
    %c0_3 = arith.constant 0 : index
    %4 = vector.load %arg3[%c0_2, %c0_3] : memref<16x256xbf16, #tpu.memory_space<vmem>>, vector<16x256xbf16>
    %c0_4 = arith.constant 0 : index
    %c0_5 = arith.constant 0 : index
    %5 = vector.load %arg4[%c0_4, %c0_5] : memref<256x128xbf16, #tpu.memory_space<vmem>>, vector<256x128xbf16>
    %cst = arith.constant dense<0.000000e+00> : vector<16x128xf32>
    %6 = tpu.matmul %4, %5, %cst {dimension_numbers = #tpu.dot_dimension_numbers<[1], [0], [0], [1], [0, 0, 1, 1], [], []>} : vector<16x256xbf16>, vector<256x128xbf16>, vector<16x128xf32> -> vector<16x128xf32>
    %7 = arith.addf %3, %6 : vector<16x128xf32>
    %c0_6 = arith.constant 0 : index
    %c0_7 = arith.constant 0 : index
    %8 = vector.load %arg7[%c0_6, %c0_7] : memref<16x128xf32, #tpu.memory_space<vmem>>, vector<16x128xf32>
    tpu.vector_store %arg7[%c0_6, %c0_7], %7 {strides = array<i32>} : memref<16x128xf32, #tpu.memory_space<vmem>>, vector<16x128xf32>,
    %c0_i32_8 = arith.constant 0 : i32
    %9 = arith.cmpi eq, %arg2, %c0_i32_8 : i32
    %10 = arith.extui %9 : i1 to i32
    %c0_i32_9 = arith.constant 0 : i32
    %11 = arith.cmpi ne, %10, %c0_i32_9 : i32
    scf.if %11 {
      %c0_10 = arith.constant 0 : index
      %c0_11 = arith.constant 0 : index
      %12 = vector.load %arg7[%c0_10, %c0_11] : memref<16x128xf32, #tpu.memory_space<vmem>>, vector<16x128xf32>
      %c0_12 = arith.constant 0 : index
      %c0_13 = arith.constant 0 : index
      %13 = vector.load %arg5[%c0_12, %c0_13] : memref<1x128xf32, #tpu.memory_space<vmem>>, vector<1x128xf32>
      %14 = vector.broadcast %13 : vector<1x128xf32> to vector<16x128xf32>
      %15 = arith.addf %12, %14 : vector<16x128xf32>
      %cst_14 = arith.constant 0.000000e+00 : f32
      %16 = vector.broadcast %cst_14 : f32 to vector<16x128xf32>
      %17 = arith.maximumf %15, %16 : vector<16x128xf32>
      %c0_15 = arith.constant 0 : index
      %c0_16 = arith.constant 0 : index
      %18 = vector.load %arg6[%c0_15, %c0_16] : memref<16x128xf32, #tpu.memory_space<vmem>>, vector<16x128xf32>
      tpu.vector_store %arg6[%c0_15, %c0_16], %17 {strides = array<i32>} : memref<16x128xf32, #tpu.memory_space<vmem>>, vector<16x128xf32>,
    } else {
    }
    return
  }
  func.func @transform_0(%arg0: i32, %arg1: i32, %arg2: i32) -> (i32, i32) {
    %c0_i32 = arith.constant 0 : i32
    return %arg0, %arg2 : i32, i32
  }
  func.func @transform_1(%arg0: i32, %arg1: i32, %arg2: i32) -> (i32, i32) {
    %c0_i32 = arith.constant 0 : i32
    return %arg2, %arg1 : i32, i32
  }
  func.func @transform_2(%arg0: i32, %arg1: i32, %arg2: i32) -> (i32, i32) {
    %c0_i32 = arith.constant 0 : i32
    %c0_i32_0 = arith.constant 0 : i32
    return %c0_i32, %arg1 : i32, i32
  }
  func.func @transform_3(%arg0: i32, %arg1: i32, %arg2: i32) -> (i32, i32) {
    %c0_i32 = arith.constant 0 : i32
    return %arg0, %arg1 : i32, i32
  }
}

module attributes {stable_mosaic.version = 11 : i64} {
  func.func @_mm_bias_kernel(%arg0: i32, %arg1: i32, %arg2: i32, %arg3: memref<8x512xbf16, #tpu.memory_space<vmem>>, %arg4: memref<512x128xbf16, #tpu.memory_space<vmem>>, %arg5: memref<1x128xf32, #tpu.memory_space<vmem>>, %arg6: memref<8x128xf32, #tpu.memory_space<vmem>>, %arg7: memref<8x128xf32, #tpu.memory_space<vmem>>) attributes {dimension_semantics = [#tpu.dimension_semantics<parallel>, #tpu.dimension_semantics<parallel>, #tpu.dimension_semantics<arbitrary>], iteration_bounds = array<i64: 1, 1, 7>, scalar_prefetch = 0 : i64, scratch_operands = 1 : i64, tpu.core_type = #tpu.core_type<tc>, window_params = [{transform_indices = @transform_0, window_bounds = array<i64: 8, 512>}, {transform_indices = @transform_1, window_bounds = array<i64: 512, 128>}, {transform_indices = @transform_2, window_bounds = array<i64: 1, 128>}, {transform_indices = @transform_3, window_bounds = array<i64: 8, 128>}]} {
    %c0_i32 = arith.constant 0 : i32
    %0 = arith.cmpi eq, %arg2, %c0_i32 : i32
    %1 = arith.extui %0 : i1 to i32
    %c0_i32_0 = arith.constant 0 : i32
    %2 = arith.cmpi ne, %1, %c0_i32_0 : i32
    scf.if %2 {
      %cst_9 = arith.constant 0.000000e+00 : f32
      %12 = vector.broadcast %cst_9 : f32 to vector<8x128xf32>
      %c0_10 = arith.constant 0 : index
      %c0_11 = arith.constant 0 : index
      %13 = vector.load %arg7[%c0_10, %c0_11] : memref<8x128xf32, #tpu.memory_space<vmem>>, vector<8x128xf32>
      tpu.vector_store %arg7[%c0_10, %c0_11], %12 {strides = array<i32>} : memref<8x128xf32, #tpu.memory_space<vmem>>, vector<8x128xf32>,
    } else {
    }
    %c0 = arith.constant 0 : index
    %c0_1 = arith.constant 0 : index
    %3 = vector.load %arg7[%c0, %c0_1] : memref<8x128xf32, #tpu.memory_space<vmem>>, vector<8x128xf32>
    %c0_2 = arith.constant 0 : index
    %c0_3 = arith.constant 0 : index
    %4 = vector.load %arg3[%c0_2, %c0_3] : memref<8x512xbf16, #tpu.memory_space<vmem>>, vector<8x512xbf16>
    %c0_4 = arith.constant 0 : index
    %c0_5 = arith.constant 0 : index
    %5 = vector.load %arg4[%c0_4, %c0_5] : memref<512x128xbf16, #tpu.memory_space<vmem>>, vector<512x128xbf16>
    %cst = arith.constant dense<0.000000e+00> : vector<8x128xf32>
    %6 = tpu.matmul %4, %5, %cst {dimension_numbers = #tpu.dot_dimension_numbers<[1], [0], [0], [1], [0, 0, 1, 1], [], []>} : vector<8x512xbf16>, vector<512x128xbf16>, vector<8x128xf32> -> vector<8x128xf32>
    %7 = arith.addf %3, %6 : vector<8x128xf32>
    %c0_6 = arith.constant 0 : index
    %c0_7 = arith.constant 0 : index
    %8 = vector.load %arg7[%c0_6, %c0_7] : memref<8x128xf32, #tpu.memory_space<vmem>>, vector<8x128xf32>
    tpu.vector_store %arg7[%c0_6, %c0_7], %7 {strides = array<i32>} : memref<8x128xf32, #tpu.memory_space<vmem>>, vector<8x128xf32>,
    %c6_i32 = arith.constant 6 : i32
    %9 = arith.cmpi eq, %arg2, %c6_i32 : i32
    %10 = arith.extui %9 : i1 to i32
    %c0_i32_8 = arith.constant 0 : i32
    %11 = arith.cmpi ne, %10, %c0_i32_8 : i32
    scf.if %11 {
      %c0_9 = arith.constant 0 : index
      %c0_10 = arith.constant 0 : index
      %12 = vector.load %arg7[%c0_9, %c0_10] : memref<8x128xf32, #tpu.memory_space<vmem>>, vector<8x128xf32>
      %c0_11 = arith.constant 0 : index
      %c0_12 = arith.constant 0 : index
      %13 = vector.load %arg5[%c0_11, %c0_12] : memref<1x128xf32, #tpu.memory_space<vmem>>, vector<1x128xf32>
      %14 = vector.broadcast %13 : vector<1x128xf32> to vector<8x128xf32>
      %15 = arith.addf %12, %14 : vector<8x128xf32>
      %cst_13 = arith.constant 0.000000e+00 : f32
      %16 = vector.broadcast %cst_13 : f32 to vector<8x128xf32>
      %17 = arith.maximumf %15, %16 : vector<8x128xf32>
      %c0_14 = arith.constant 0 : index
      %c0_15 = arith.constant 0 : index
      %18 = vector.load %arg6[%c0_14, %c0_15] : memref<8x128xf32, #tpu.memory_space<vmem>>, vector<8x128xf32>
      tpu.vector_store %arg6[%c0_14, %c0_15], %17 {strides = array<i32>} : memref<8x128xf32, #tpu.memory_space<vmem>>, vector<8x128xf32>,
    } else {
    }
    return
  }
  func.func @transform_0(%arg0: i32, %arg1: i32, %arg2: i32) -> (i32, i32) {
    %c0_i32 = arith.constant 0 : i32
    return %arg0, %arg2 : i32, i32
  }
  func.func @transform_1(%arg0: i32, %arg1: i32, %arg2: i32) -> (i32, i32) {
    %c0_i32 = arith.constant 0 : i32
    return %arg2, %arg1 : i32, i32
  }
  func.func @transform_2(%arg0: i32, %arg1: i32, %arg2: i32) -> (i32, i32) {
    %c0_i32 = arith.constant 0 : i32
    %c0_i32_0 = arith.constant 0 : i32
    return %c0_i32, %arg1 : i32, i32
  }
  func.func @transform_3(%arg0: i32, %arg1: i32, %arg2: i32) -> (i32, i32) {
    %c0_i32 = arith.constant 0 : i32
    return %arg0, %arg1 : i32, i32
  }
}

module attributes {stable_mosaic.version = 11 : i64} {
  func.func @_mm_bias_kernel(%arg0: i32, %arg1: i32, %arg2: i32, %arg3: memref<8x256xbf16, #tpu.memory_space<vmem>>, %arg4: memref<256x256xbf16, #tpu.memory_space<vmem>>, %arg5: memref<1x256xf32, #tpu.memory_space<vmem>>, %arg6: memref<8x256xf32, #tpu.memory_space<vmem>>, %arg7: memref<8x256xf32, #tpu.memory_space<vmem>>) attributes {dimension_semantics = [#tpu.dimension_semantics<parallel>, #tpu.dimension_semantics<parallel>, #tpu.dimension_semantics<arbitrary>], iteration_bounds = array<i64: 1, 2, 1>, scalar_prefetch = 0 : i64, scratch_operands = 1 : i64, tpu.core_type = #tpu.core_type<tc>, window_params = [{transform_indices = @transform_0, window_bounds = array<i64: 8, 256>}, {transform_indices = @transform_1, window_bounds = array<i64: 256, 256>}, {transform_indices = @transform_2, window_bounds = array<i64: 1, 256>}, {transform_indices = @transform_3, window_bounds = array<i64: 8, 256>}]} {
    %c0_i32 = arith.constant 0 : i32
    %0 = arith.cmpi eq, %arg2, %c0_i32 : i32
    %1 = arith.extui %0 : i1 to i32
    %c0_i32_0 = arith.constant 0 : i32
    %2 = arith.cmpi ne, %1, %c0_i32_0 : i32
    scf.if %2 {
      %cst_10 = arith.constant 0.000000e+00 : f32
      %12 = vector.broadcast %cst_10 : f32 to vector<8x256xf32>
      %c0_11 = arith.constant 0 : index
      %c0_12 = arith.constant 0 : index
      %13 = vector.load %arg7[%c0_11, %c0_12] : memref<8x256xf32, #tpu.memory_space<vmem>>, vector<8x256xf32>
      tpu.vector_store %arg7[%c0_11, %c0_12], %12 {strides = array<i32>} : memref<8x256xf32, #tpu.memory_space<vmem>>, vector<8x256xf32>,
    } else {
    }
    %c0 = arith.constant 0 : index
    %c0_1 = arith.constant 0 : index
    %3 = vector.load %arg7[%c0, %c0_1] : memref<8x256xf32, #tpu.memory_space<vmem>>, vector<8x256xf32>
    %c0_2 = arith.constant 0 : index
    %c0_3 = arith.constant 0 : index
    %4 = vector.load %arg3[%c0_2, %c0_3] : memref<8x256xbf16, #tpu.memory_space<vmem>>, vector<8x256xbf16>
    %c0_4 = arith.constant 0 : index
    %c0_5 = arith.constant 0 : index
    %5 = vector.load %arg4[%c0_4, %c0_5] : memref<256x256xbf16, #tpu.memory_space<vmem>>, vector<256x256xbf16>
    %cst = arith.constant dense<0.000000e+00> : vector<8x256xf32>
    %6 = tpu.matmul %4, %5, %cst {dimension_numbers = #tpu.dot_dimension_numbers<[1], [0], [0], [1], [0, 0, 1, 1], [], []>} : vector<8x256xbf16>, vector<256x256xbf16>, vector<8x256xf32> -> vector<8x256xf32>
    %7 = arith.addf %3, %6 : vector<8x256xf32>
    %c0_6 = arith.constant 0 : index
    %c0_7 = arith.constant 0 : index
    %8 = vector.load %arg7[%c0_6, %c0_7] : memref<8x256xf32, #tpu.memory_space<vmem>>, vector<8x256xf32>
    tpu.vector_store %arg7[%c0_6, %c0_7], %7 {strides = array<i32>} : memref<8x256xf32, #tpu.memory_space<vmem>>, vector<8x256xf32>,
    %c0_i32_8 = arith.constant 0 : i32
    %9 = arith.cmpi eq, %arg2, %c0_i32_8 : i32
    %10 = arith.extui %9 : i1 to i32
    %c0_i32_9 = arith.constant 0 : i32
    %11 = arith.cmpi ne, %10, %c0_i32_9 : i32
    scf.if %11 {
      %c0_10 = arith.constant 0 : index
      %c0_11 = arith.constant 0 : index
      %12 = vector.load %arg7[%c0_10, %c0_11] : memref<8x256xf32, #tpu.memory_space<vmem>>, vector<8x256xf32>
      %c0_12 = arith.constant 0 : index
      %c0_13 = arith.constant 0 : index
      %13 = vector.load %arg5[%c0_12, %c0_13] : memref<1x256xf32, #tpu.memory_space<vmem>>, vector<1x256xf32>
      %14 = vector.broadcast %13 : vector<1x256xf32> to vector<8x256xf32>
      %15 = arith.addf %12, %14 : vector<8x256xf32>
      %c0_14 = arith.constant 0 : index
      %c0_15 = arith.constant 0 : index
      %16 = vector.load %arg6[%c0_14, %c0_15] : memref<8x256xf32, #tpu.memory_space<vmem>>, vector<8x256xf32>
      tpu.vector_store %arg6[%c0_14, %c0_15], %15 {strides = array<i32>} : memref<8x256xf32, #tpu.memory_space<vmem>>, vector<8x256xf32>,
    } else {
    }
    return
  }
  func.func @transform_0(%arg0: i32, %arg1: i32, %arg2: i32) -> (i32, i32) {
    %c0_i32 = arith.constant 0 : i32
    return %arg0, %arg2 : i32, i32
  }
  func.func @transform_1(%arg0: i32, %arg1: i32, %arg2: i32) -> (i32, i32) {
    %c0_i32 = arith.constant 0 : i32
    return %arg2, %arg1 : i32, i32
  }
  func.func @transform_2(%arg0: i32, %arg1: i32, %arg2: i32) -> (i32, i32) {
    %c0_i32 = arith.constant 0 : i32
    %c0_i32_0 = arith.constant 0 : i32
    return %c0_i32, %arg1 : i32, i32
  }
  func.func @transform_3(%arg0: i32, %arg1: i32, %arg2: i32) -> (i32, i32) {
    %c0_i32 = arith.constant 0 : i32
    return %arg0, %arg1 : i32, i32
  }
}

module attributes {stable_mosaic.version = 11 : i64} {
  func.func @_mm_bias_res_kernel(%arg0: i32, %arg1: i32, %arg2: i32, %arg3: memref<8x128xbf16, #tpu.memory_space<vmem>>, %arg4: memref<128x256xbf16, #tpu.memory_space<vmem>>, %arg5: memref<1x256xf32, #tpu.memory_space<vmem>>, %arg6: memref<8x256xf32, #tpu.memory_space<vmem>>, %arg7: memref<8x256xf32, #tpu.memory_space<vmem>>, %arg8: memref<8x256xf32, #tpu.memory_space<vmem>>) attributes {dimension_semantics = [#tpu.dimension_semantics<parallel>, #tpu.dimension_semantics<parallel>, #tpu.dimension_semantics<arbitrary>], iteration_bounds = array<i64: 1, 2, 1>, scalar_prefetch = 0 : i64, scratch_operands = 1 : i64, tpu.core_type = #tpu.core_type<tc>, window_params = [{transform_indices = @transform_0, window_bounds = array<i64: 8, 128>}, {transform_indices = @transform_1, window_bounds = array<i64: 128, 256>}, {transform_indices = @transform_2, window_bounds = array<i64: 1, 256>}, {transform_indices = @transform_3, window_bounds = array<i64: 8, 256>}, {transform_indices = @transform_4, window_bounds = array<i64: 8, 256>}]} {
    %c0_i32 = arith.constant 0 : i32
    %0 = arith.cmpi eq, %arg2, %c0_i32 : i32
    %1 = arith.extui %0 : i1 to i32
    %c0_i32_0 = arith.constant 0 : i32
    %2 = arith.cmpi ne, %1, %c0_i32_0 : i32
    scf.if %2 {
      %cst_10 = arith.constant 0.000000e+00 : f32
      %12 = vector.broadcast %cst_10 : f32 to vector<8x256xf32>
      %c0_11 = arith.constant 0 : index
      %c0_12 = arith.constant 0 : index
      %13 = vector.load %arg8[%c0_11, %c0_12] : memref<8x256xf32, #tpu.memory_space<vmem>>, vector<8x256xf32>
      tpu.vector_store %arg8[%c0_11, %c0_12], %12 {strides = array<i32>} : memref<8x256xf32, #tpu.memory_space<vmem>>, vector<8x256xf32>,
    } else {
    }
    %c0 = arith.constant 0 : index
    %c0_1 = arith.constant 0 : index
    %3 = vector.load %arg8[%c0, %c0_1] : memref<8x256xf32, #tpu.memory_space<vmem>>, vector<8x256xf32>
    %c0_2 = arith.constant 0 : index
    %c0_3 = arith.constant 0 : index
    %4 = vector.load %arg3[%c0_2, %c0_3] : memref<8x128xbf16, #tpu.memory_space<vmem>>, vector<8x128xbf16>
    %c0_4 = arith.constant 0 : index
    %c0_5 = arith.constant 0 : index
    %5 = vector.load %arg4[%c0_4, %c0_5] : memref<128x256xbf16, #tpu.memory_space<vmem>>, vector<128x256xbf16>
    %cst = arith.constant dense<0.000000e+00> : vector<8x256xf32>
    %6 = tpu.matmul %4, %5, %cst {dimension_numbers = #tpu.dot_dimension_numbers<[1], [0], [0], [1], [0, 0, 1, 1], [], []>} : vector<8x128xbf16>, vector<128x256xbf16>, vector<8x256xf32> -> vector<8x256xf32>
    %7 = arith.addf %3, %6 : vector<8x256xf32>
    %c0_6 = arith.constant 0 : index
    %c0_7 = arith.constant 0 : index
    %8 = vector.load %arg8[%c0_6, %c0_7] : memref<8x256xf32, #tpu.memory_space<vmem>>, vector<8x256xf32>
    tpu.vector_store %arg8[%c0_6, %c0_7], %7 {strides = array<i32>} : memref<8x256xf32, #tpu.memory_space<vmem>>, vector<8x256xf32>,
    %c0_i32_8 = arith.constant 0 : i32
    %9 = arith.cmpi eq, %arg2, %c0_i32_8 : i32
    %10 = arith.extui %9 : i1 to i32
    %c0_i32_9 = arith.constant 0 : i32
    %11 = arith.cmpi ne, %10, %c0_i32_9 : i32
    scf.if %11 {
      %c0_10 = arith.constant 0 : index
      %c0_11 = arith.constant 0 : index
      %12 = vector.load %arg8[%c0_10, %c0_11] : memref<8x256xf32, #tpu.memory_space<vmem>>, vector<8x256xf32>
      %c0_12 = arith.constant 0 : index
      %c0_13 = arith.constant 0 : index
      %13 = vector.load %arg5[%c0_12, %c0_13] : memref<1x256xf32, #tpu.memory_space<vmem>>, vector<1x256xf32>
      %14 = vector.broadcast %13 : vector<1x256xf32> to vector<8x256xf32>
      %15 = arith.addf %12, %14 : vector<8x256xf32>
      %c0_14 = arith.constant 0 : index
      %c0_15 = arith.constant 0 : index
      %16 = vector.load %arg6[%c0_14, %c0_15] : memref<8x256xf32, #tpu.memory_space<vmem>>, vector<8x256xf32>
      %17 = arith.addf %15, %16 : vector<8x256xf32>
      %cst_16 = arith.constant 0.000000e+00 : f32
      %18 = vector.broadcast %cst_16 : f32 to vector<8x256xf32>
      %19 = arith.maximumf %17, %18 : vector<8x256xf32>
      %c0_17 = arith.constant 0 : index
      %c0_18 = arith.constant 0 : index
      %20 = vector.load %arg7[%c0_17, %c0_18] : memref<8x256xf32, #tpu.memory_space<vmem>>, vector<8x256xf32>
      tpu.vector_store %arg7[%c0_17, %c0_18], %19 {strides = array<i32>} : memref<8x256xf32, #tpu.memory_space<vmem>>, vector<8x256xf32>,
    } else {
    }
    return
  }
  func.func @transform_0(%arg0: i32, %arg1: i32, %arg2: i32) -> (i32, i32) {
    %c0_i32 = arith.constant 0 : i32
    return %arg0, %arg2 : i32, i32
  }
  func.func @transform_1(%arg0: i32, %arg1: i32, %arg2: i32) -> (i32, i32) {
    %c0_i32 = arith.constant 0 : i32
    return %arg2, %arg1 : i32, i32
  }
  func.func @transform_2(%arg0: i32, %arg1: i32, %arg2: i32) -> (i32, i32) {
    %c0_i32 = arith.constant 0 : i32
    %c0_i32_0 = arith.constant 0 : i32
    return %c0_i32, %arg1 : i32, i32
  }
  func.func @transform_3(%arg0: i32, %arg1: i32, %arg2: i32) -> (i32, i32) {
    %c0_i32 = arith.constant 0 : i32
    return %arg0, %arg1 : i32, i32
  }
  func.func @transform_4(%arg0: i32, %arg1: i32, %arg2: i32) -> (i32, i32) {
    %c0_i32 = arith.constant 0 : i32
    return %arg0, %arg1 : i32, i32
  }
}

module attributes {stable_mosaic.version = 11 : i64} {
  func.func @_mm_bias_kernel(%arg0: i32, %arg1: i32, %arg2: i32, %arg3: memref<8x512xbf16, #tpu.memory_space<vmem>>, %arg4: memref<512x256xbf16, #tpu.memory_space<vmem>>, %arg5: memref<1x256xf32, #tpu.memory_space<vmem>>, %arg6: memref<8x256xf32, #tpu.memory_space<vmem>>, %arg7: memref<8x256xf32, #tpu.memory_space<vmem>>) attributes {dimension_semantics = [#tpu.dimension_semantics<parallel>, #tpu.dimension_semantics<parallel>, #tpu.dimension_semantics<arbitrary>], iteration_bounds = array<i64: 1, 1, 1>, scalar_prefetch = 0 : i64, scratch_operands = 1 : i64, tpu.core_type = #tpu.core_type<tc>, window_params = [{transform_indices = @transform_0, window_bounds = array<i64: 8, 512>}, {transform_indices = @transform_1, window_bounds = array<i64: 512, 256>}, {transform_indices = @transform_2, window_bounds = array<i64: 1, 256>}, {transform_indices = @transform_3, window_bounds = array<i64: 8, 256>}]} {
    %c0_i32 = arith.constant 0 : i32
    %0 = arith.cmpi eq, %arg2, %c0_i32 : i32
    %1 = arith.extui %0 : i1 to i32
    %c0_i32_0 = arith.constant 0 : i32
    %2 = arith.cmpi ne, %1, %c0_i32_0 : i32
    scf.if %2 {
      %cst_10 = arith.constant 0.000000e+00 : f32
      %12 = vector.broadcast %cst_10 : f32 to vector<8x256xf32>
      %c0_11 = arith.constant 0 : index
      %c0_12 = arith.constant 0 : index
      %13 = vector.load %arg7[%c0_11, %c0_12] : memref<8x256xf32, #tpu.memory_space<vmem>>, vector<8x256xf32>
      tpu.vector_store %arg7[%c0_11, %c0_12], %12 {strides = array<i32>} : memref<8x256xf32, #tpu.memory_space<vmem>>, vector<8x256xf32>,
    } else {
    }
    %c0 = arith.constant 0 : index
    %c0_1 = arith.constant 0 : index
    %3 = vector.load %arg7[%c0, %c0_1] : memref<8x256xf32, #tpu.memory_space<vmem>>, vector<8x256xf32>
    %c0_2 = arith.constant 0 : index
    %c0_3 = arith.constant 0 : index
    %4 = vector.load %arg3[%c0_2, %c0_3] : memref<8x512xbf16, #tpu.memory_space<vmem>>, vector<8x512xbf16>
    %c0_4 = arith.constant 0 : index
    %c0_5 = arith.constant 0 : index
    %5 = vector.load %arg4[%c0_4, %c0_5] : memref<512x256xbf16, #tpu.memory_space<vmem>>, vector<512x256xbf16>
    %cst = arith.constant dense<0.000000e+00> : vector<8x256xf32>
    %6 = tpu.matmul %4, %5, %cst {dimension_numbers = #tpu.dot_dimension_numbers<[1], [0], [0], [1], [0, 0, 1, 1], [], []>} : vector<8x512xbf16>, vector<512x256xbf16>, vector<8x256xf32> -> vector<8x256xf32>
    %7 = arith.addf %3, %6 : vector<8x256xf32>
    %c0_6 = arith.constant 0 : index
    %c0_7 = arith.constant 0 : index
    %8 = vector.load %arg7[%c0_6, %c0_7] : memref<8x256xf32, #tpu.memory_space<vmem>>, vector<8x256xf32>
    tpu.vector_store %arg7[%c0_6, %c0_7], %7 {strides = array<i32>} : memref<8x256xf32, #tpu.memory_space<vmem>>, vector<8x256xf32>,
    %c0_i32_8 = arith.constant 0 : i32
    %9 = arith.cmpi eq, %arg2, %c0_i32_8 : i32
    %10 = arith.extui %9 : i1 to i32
    %c0_i32_9 = arith.constant 0 : i32
    %11 = arith.cmpi ne, %10, %c0_i32_9 : i32
    scf.if %11 {
      %c0_10 = arith.constant 0 : index
      %c0_11 = arith.constant 0 : index
      %12 = vector.load %arg7[%c0_10, %c0_11] : memref<8x256xf32, #tpu.memory_space<vmem>>, vector<8x256xf32>
      %c0_12 = arith.constant 0 : index
      %c0_13 = arith.constant 0 : index
      %13 = vector.load %arg5[%c0_12, %c0_13] : memref<1x256xf32, #tpu.memory_space<vmem>>, vector<1x256xf32>
      %14 = vector.broadcast %13 : vector<1x256xf32> to vector<8x256xf32>
      %15 = arith.addf %12, %14 : vector<8x256xf32>
      %cst_14 = arith.constant 0.000000e+00 : f32
      %16 = vector.broadcast %cst_14 : f32 to vector<8x256xf32>
      %17 = arith.maximumf %15, %16 : vector<8x256xf32>
      %c0_15 = arith.constant 0 : index
      %c0_16 = arith.constant 0 : index
      %18 = vector.load %arg6[%c0_15, %c0_16] : memref<8x256xf32, #tpu.memory_space<vmem>>, vector<8x256xf32>
      tpu.vector_store %arg6[%c0_15, %c0_16], %17 {strides = array<i32>} : memref<8x256xf32, #tpu.memory_space<vmem>>, vector<8x256xf32>,
    } else {
    }
    return
  }
  func.func @transform_0(%arg0: i32, %arg1: i32, %arg2: i32) -> (i32, i32) {
    %c0_i32 = arith.constant 0 : i32
    return %arg0, %arg2 : i32, i32
  }
  func.func @transform_1(%arg0: i32, %arg1: i32, %arg2: i32) -> (i32, i32) {
    %c0_i32 = arith.constant 0 : i32
    return %arg2, %arg1 : i32, i32
  }
  func.func @transform_2(%arg0: i32, %arg1: i32, %arg2: i32) -> (i32, i32) {
    %c0_i32 = arith.constant 0 : i32
    %c0_i32_0 = arith.constant 0 : i32
    return %c0_i32, %arg1 : i32, i32
  }
  func.func @transform_3(%arg0: i32, %arg1: i32, %arg2: i32) -> (i32, i32) {
    %c0_i32 = arith.constant 0 : i32
    return %arg0, %arg1 : i32, i32
  }
}

module attributes {stable_mosaic.version = 11 : i64} {
  func.func @_mm_bias_kernel(%arg0: i32, %arg1: i32, %arg2: i32, %arg3: memref<8x512xbf16, #tpu.memory_space<vmem>>, %arg4: memref<512x256xbf16, #tpu.memory_space<vmem>>, %arg5: memref<1x256xf32, #tpu.memory_space<vmem>>, %arg6: memref<8x256xf32, #tpu.memory_space<vmem>>, %arg7: memref<8x256xf32, #tpu.memory_space<vmem>>) attributes {dimension_semantics = [#tpu.dimension_semantics<parallel>, #tpu.dimension_semantics<parallel>, #tpu.dimension_semantics<arbitrary>], iteration_bounds = array<i64: 1, 1, 14>, scalar_prefetch = 0 : i64, scratch_operands = 1 : i64, tpu.core_type = #tpu.core_type<tc>, window_params = [{transform_indices = @transform_0, window_bounds = array<i64: 8, 512>}, {transform_indices = @transform_1, window_bounds = array<i64: 512, 256>}, {transform_indices = @transform_2, window_bounds = array<i64: 1, 256>}, {transform_indices = @transform_3, window_bounds = array<i64: 8, 256>}]} {
    %c0_i32 = arith.constant 0 : i32
    %0 = arith.cmpi eq, %arg2, %c0_i32 : i32
    %1 = arith.extui %0 : i1 to i32
    %c0_i32_0 = arith.constant 0 : i32
    %2 = arith.cmpi ne, %1, %c0_i32_0 : i32
    scf.if %2 {
      %cst_9 = arith.constant 0.000000e+00 : f32
      %12 = vector.broadcast %cst_9 : f32 to vector<8x256xf32>
      %c0_10 = arith.constant 0 : index
      %c0_11 = arith.constant 0 : index
      %13 = vector.load %arg7[%c0_10, %c0_11] : memref<8x256xf32, #tpu.memory_space<vmem>>, vector<8x256xf32>
      tpu.vector_store %arg7[%c0_10, %c0_11], %12 {strides = array<i32>} : memref<8x256xf32, #tpu.memory_space<vmem>>, vector<8x256xf32>,
    } else {
    }
    %c0 = arith.constant 0 : index
    %c0_1 = arith.constant 0 : index
    %3 = vector.load %arg7[%c0, %c0_1] : memref<8x256xf32, #tpu.memory_space<vmem>>, vector<8x256xf32>
    %c0_2 = arith.constant 0 : index
    %c0_3 = arith.constant 0 : index
    %4 = vector.load %arg3[%c0_2, %c0_3] : memref<8x512xbf16, #tpu.memory_space<vmem>>, vector<8x512xbf16>
    %c0_4 = arith.constant 0 : index
    %c0_5 = arith.constant 0 : index
    %5 = vector.load %arg4[%c0_4, %c0_5] : memref<512x256xbf16, #tpu.memory_space<vmem>>, vector<512x256xbf16>
    %cst = arith.constant dense<0.000000e+00> : vector<8x256xf32>
    %6 = tpu.matmul %4, %5, %cst {dimension_numbers = #tpu.dot_dimension_numbers<[1], [0], [0], [1], [0, 0, 1, 1], [], []>} : vector<8x512xbf16>, vector<512x256xbf16>, vector<8x256xf32> -> vector<8x256xf32>
    %7 = arith.addf %3, %6 : vector<8x256xf32>
    %c0_6 = arith.constant 0 : index
    %c0_7 = arith.constant 0 : index
    %8 = vector.load %arg7[%c0_6, %c0_7] : memref<8x256xf32, #tpu.memory_space<vmem>>, vector<8x256xf32>
    tpu.vector_store %arg7[%c0_6, %c0_7], %7 {strides = array<i32>} : memref<8x256xf32, #tpu.memory_space<vmem>>, vector<8x256xf32>,
    %c13_i32 = arith.constant 13 : i32
    %9 = arith.cmpi eq, %arg2, %c13_i32 : i32
    %10 = arith.extui %9 : i1 to i32
    %c0_i32_8 = arith.constant 0 : i32
    %11 = arith.cmpi ne, %10, %c0_i32_8 : i32
    scf.if %11 {
      %c0_9 = arith.constant 0 : index
      %c0_10 = arith.constant 0 : index
      %12 = vector.load %arg7[%c0_9, %c0_10] : memref<8x256xf32, #tpu.memory_space<vmem>>, vector<8x256xf32>
      %c0_11 = arith.constant 0 : index
      %c0_12 = arith.constant 0 : index
      %13 = vector.load %arg5[%c0_11, %c0_12] : memref<1x256xf32, #tpu.memory_space<vmem>>, vector<1x256xf32>
      %14 = vector.broadcast %13 : vector<1x256xf32> to vector<8x256xf32>
      %15 = arith.addf %12, %14 : vector<8x256xf32>
      %cst_13 = arith.constant 0.000000e+00 : f32
      %16 = vector.broadcast %cst_13 : f32 to vector<8x256xf32>
      %17 = arith.maximumf %15, %16 : vector<8x256xf32>
      %c0_14 = arith.constant 0 : index
      %c0_15 = arith.constant 0 : index
      %18 = vector.load %arg6[%c0_14, %c0_15] : memref<8x256xf32, #tpu.memory_space<vmem>>, vector<8x256xf32>
      tpu.vector_store %arg6[%c0_14, %c0_15], %17 {strides = array<i32>} : memref<8x256xf32, #tpu.memory_space<vmem>>, vector<8x256xf32>,
    } else {
    }
    return
  }
  func.func @transform_0(%arg0: i32, %arg1: i32, %arg2: i32) -> (i32, i32) {
    %c0_i32 = arith.constant 0 : i32
    return %arg0, %arg2 : i32, i32
  }
  func.func @transform_1(%arg0: i32, %arg1: i32, %arg2: i32) -> (i32, i32) {
    %c0_i32 = arith.constant 0 : i32
    return %arg2, %arg1 : i32, i32
  }
  func.func @transform_2(%arg0: i32, %arg1: i32, %arg2: i32) -> (i32, i32) {
    %c0_i32 = arith.constant 0 : i32
    %c0_i32_0 = arith.constant 0 : i32
    return %c0_i32, %arg1 : i32, i32
  }
  func.func @transform_3(%arg0: i32, %arg1: i32, %arg2: i32) -> (i32, i32) {
    %c0_i32 = arith.constant 0 : i32
    return %arg0, %arg1 : i32, i32
  }
}

module attributes {stable_mosaic.version = 11 : i64} {
  func.func @_mm_bias_kernel(%arg0: i32, %arg1: i32, %arg2: i32, %arg3: memref<8x512xbf16, #tpu.memory_space<vmem>>, %arg4: memref<512x256xbf16, #tpu.memory_space<vmem>>, %arg5: memref<1x256xf32, #tpu.memory_space<vmem>>, %arg6: memref<8x256xf32, #tpu.memory_space<vmem>>, %arg7: memref<8x256xf32, #tpu.memory_space<vmem>>) attributes {dimension_semantics = [#tpu.dimension_semantics<parallel>, #tpu.dimension_semantics<parallel>, #tpu.dimension_semantics<arbitrary>], iteration_bounds = array<i64: 1, 4, 1>, scalar_prefetch = 0 : i64, scratch_operands = 1 : i64, tpu.core_type = #tpu.core_type<tc>, window_params = [{transform_indices = @transform_0, window_bounds = array<i64: 8, 512>}, {transform_indices = @transform_1, window_bounds = array<i64: 512, 256>}, {transform_indices = @transform_2, window_bounds = array<i64: 1, 256>}, {transform_indices = @transform_3, window_bounds = array<i64: 8, 256>}]} {
    %c0_i32 = arith.constant 0 : i32
    %0 = arith.cmpi eq, %arg2, %c0_i32 : i32
    %1 = arith.extui %0 : i1 to i32
    %c0_i32_0 = arith.constant 0 : i32
    %2 = arith.cmpi ne, %1, %c0_i32_0 : i32
    scf.if %2 {
      %cst_10 = arith.constant 0.000000e+00 : f32
      %12 = vector.broadcast %cst_10 : f32 to vector<8x256xf32>
      %c0_11 = arith.constant 0 : index
      %c0_12 = arith.constant 0 : index
      %13 = vector.load %arg7[%c0_11, %c0_12] : memref<8x256xf32, #tpu.memory_space<vmem>>, vector<8x256xf32>
      tpu.vector_store %arg7[%c0_11, %c0_12], %12 {strides = array<i32>} : memref<8x256xf32, #tpu.memory_space<vmem>>, vector<8x256xf32>,
    } else {
    }
    %c0 = arith.constant 0 : index
    %c0_1 = arith.constant 0 : index
    %3 = vector.load %arg7[%c0, %c0_1] : memref<8x256xf32, #tpu.memory_space<vmem>>, vector<8x256xf32>
    %c0_2 = arith.constant 0 : index
    %c0_3 = arith.constant 0 : index
    %4 = vector.load %arg3[%c0_2, %c0_3] : memref<8x512xbf16, #tpu.memory_space<vmem>>, vector<8x512xbf16>
    %c0_4 = arith.constant 0 : index
    %c0_5 = arith.constant 0 : index
    %5 = vector.load %arg4[%c0_4, %c0_5] : memref<512x256xbf16, #tpu.memory_space<vmem>>, vector<512x256xbf16>
    %cst = arith.constant dense<0.000000e+00> : vector<8x256xf32>
    %6 = tpu.matmul %4, %5, %cst {dimension_numbers = #tpu.dot_dimension_numbers<[1], [0], [0], [1], [0, 0, 1, 1], [], []>} : vector<8x512xbf16>, vector<512x256xbf16>, vector<8x256xf32> -> vector<8x256xf32>
    %7 = arith.addf %3, %6 : vector<8x256xf32>
    %c0_6 = arith.constant 0 : index
    %c0_7 = arith.constant 0 : index
    %8 = vector.load %arg7[%c0_6, %c0_7] : memref<8x256xf32, #tpu.memory_space<vmem>>, vector<8x256xf32>
    tpu.vector_store %arg7[%c0_6, %c0_7], %7 {strides = array<i32>} : memref<8x256xf32, #tpu.memory_space<vmem>>, vector<8x256xf32>,
    %c0_i32_8 = arith.constant 0 : i32
    %9 = arith.cmpi eq, %arg2, %c0_i32_8 : i32
    %10 = arith.extui %9 : i1 to i32
    %c0_i32_9 = arith.constant 0 : i32
    %11 = arith.cmpi ne, %10, %c0_i32_9 : i32
    scf.if %11 {
      %c0_10 = arith.constant 0 : index
      %c0_11 = arith.constant 0 : index
      %12 = vector.load %arg7[%c0_10, %c0_11] : memref<8x256xf32, #tpu.memory_space<vmem>>, vector<8x256xf32>
      %c0_12 = arith.constant 0 : index
      %c0_13 = arith.constant 0 : index
      %13 = vector.load %arg5[%c0_12, %c0_13] : memref<1x256xf32, #tpu.memory_space<vmem>>, vector<1x256xf32>
      %14 = vector.broadcast %13 : vector<1x256xf32> to vector<8x256xf32>
      %15 = arith.addf %12, %14 : vector<8x256xf32>
      %c0_14 = arith.constant 0 : index
      %c0_15 = arith.constant 0 : index
      %16 = vector.load %arg6[%c0_14, %c0_15] : memref<8x256xf32, #tpu.memory_space<vmem>>, vector<8x256xf32>
      tpu.vector_store %arg6[%c0_14, %c0_15], %15 {strides = array<i32>} : memref<8x256xf32, #tpu.memory_space<vmem>>, vector<8x256xf32>,
    } else {
    }
    return
  }
  func.func @transform_0(%arg0: i32, %arg1: i32, %arg2: i32) -> (i32, i32) {
    %c0_i32 = arith.constant 0 : i32
    return %arg0, %arg2 : i32, i32
  }
  func.func @transform_1(%arg0: i32, %arg1: i32, %arg2: i32) -> (i32, i32) {
    %c0_i32 = arith.constant 0 : i32
    return %arg2, %arg1 : i32, i32
  }
  func.func @transform_2(%arg0: i32, %arg1: i32, %arg2: i32) -> (i32, i32) {
    %c0_i32 = arith.constant 0 : i32
    %c0_i32_0 = arith.constant 0 : i32
    return %c0_i32, %arg1 : i32, i32
  }
  func.func @transform_3(%arg0: i32, %arg1: i32, %arg2: i32) -> (i32, i32) {
    %c0_i32 = arith.constant 0 : i32
    return %arg0, %arg1 : i32, i32
  }
}

module attributes {stable_mosaic.version = 11 : i64} {
  func.func @_mm_bias_res_kernel(%arg0: i32, %arg1: i32, %arg2: i32, %arg3: memref<8x256xbf16, #tpu.memory_space<vmem>>, %arg4: memref<256x256xbf16, #tpu.memory_space<vmem>>, %arg5: memref<1x256xf32, #tpu.memory_space<vmem>>, %arg6: memref<8x256xf32, #tpu.memory_space<vmem>>, %arg7: memref<8x256xf32, #tpu.memory_space<vmem>>, %arg8: memref<8x256xf32, #tpu.memory_space<vmem>>) attributes {dimension_semantics = [#tpu.dimension_semantics<parallel>, #tpu.dimension_semantics<parallel>, #tpu.dimension_semantics<arbitrary>], iteration_bounds = array<i64: 1, 4, 1>, scalar_prefetch = 0 : i64, scratch_operands = 1 : i64, tpu.core_type = #tpu.core_type<tc>, window_params = [{transform_indices = @transform_0, window_bounds = array<i64: 8, 256>}, {transform_indices = @transform_1, window_bounds = array<i64: 256, 256>}, {transform_indices = @transform_2, window_bounds = array<i64: 1, 256>}, {transform_indices = @transform_3, window_bounds = array<i64: 8, 256>}, {transform_indices = @transform_4, window_bounds = array<i64: 8, 256>}]} {
    %c0_i32 = arith.constant 0 : i32
    %0 = arith.cmpi eq, %arg2, %c0_i32 : i32
    %1 = arith.extui %0 : i1 to i32
    %c0_i32_0 = arith.constant 0 : i32
    %2 = arith.cmpi ne, %1, %c0_i32_0 : i32
    scf.if %2 {
      %cst_10 = arith.constant 0.000000e+00 : f32
      %12 = vector.broadcast %cst_10 : f32 to vector<8x256xf32>
      %c0_11 = arith.constant 0 : index
      %c0_12 = arith.constant 0 : index
      %13 = vector.load %arg8[%c0_11, %c0_12] : memref<8x256xf32, #tpu.memory_space<vmem>>, vector<8x256xf32>
      tpu.vector_store %arg8[%c0_11, %c0_12], %12 {strides = array<i32>} : memref<8x256xf32, #tpu.memory_space<vmem>>, vector<8x256xf32>,
    } else {
    }
    %c0 = arith.constant 0 : index
    %c0_1 = arith.constant 0 : index
    %3 = vector.load %arg8[%c0, %c0_1] : memref<8x256xf32, #tpu.memory_space<vmem>>, vector<8x256xf32>
    %c0_2 = arith.constant 0 : index
    %c0_3 = arith.constant 0 : index
    %4 = vector.load %arg3[%c0_2, %c0_3] : memref<8x256xbf16, #tpu.memory_space<vmem>>, vector<8x256xbf16>
    %c0_4 = arith.constant 0 : index
    %c0_5 = arith.constant 0 : index
    %5 = vector.load %arg4[%c0_4, %c0_5] : memref<256x256xbf16, #tpu.memory_space<vmem>>, vector<256x256xbf16>
    %cst = arith.constant dense<0.000000e+00> : vector<8x256xf32>
    %6 = tpu.matmul %4, %5, %cst {dimension_numbers = #tpu.dot_dimension_numbers<[1], [0], [0], [1], [0, 0, 1, 1], [], []>} : vector<8x256xbf16>, vector<256x256xbf16>, vector<8x256xf32> -> vector<8x256xf32>
    %7 = arith.addf %3, %6 : vector<8x256xf32>
    %c0_6 = arith.constant 0 : index
    %c0_7 = arith.constant 0 : index
    %8 = vector.load %arg8[%c0_6, %c0_7] : memref<8x256xf32, #tpu.memory_space<vmem>>, vector<8x256xf32>
    tpu.vector_store %arg8[%c0_6, %c0_7], %7 {strides = array<i32>} : memref<8x256xf32, #tpu.memory_space<vmem>>, vector<8x256xf32>,
    %c0_i32_8 = arith.constant 0 : i32
    %9 = arith.cmpi eq, %arg2, %c0_i32_8 : i32
    %10 = arith.extui %9 : i1 to i32
    %c0_i32_9 = arith.constant 0 : i32
    %11 = arith.cmpi ne, %10, %c0_i32_9 : i32
    scf.if %11 {
      %c0_10 = arith.constant 0 : index
      %c0_11 = arith.constant 0 : index
      %12 = vector.load %arg8[%c0_10, %c0_11] : memref<8x256xf32, #tpu.memory_space<vmem>>, vector<8x256xf32>
      %c0_12 = arith.constant 0 : index
      %c0_13 = arith.constant 0 : index
      %13 = vector.load %arg5[%c0_12, %c0_13] : memref<1x256xf32, #tpu.memory_space<vmem>>, vector<1x256xf32>
      %14 = vector.broadcast %13 : vector<1x256xf32> to vector<8x256xf32>
      %15 = arith.addf %12, %14 : vector<8x256xf32>
      %c0_14 = arith.constant 0 : index
      %c0_15 = arith.constant 0 : index
      %16 = vector.load %arg6[%c0_14, %c0_15] : memref<8x256xf32, #tpu.memory_space<vmem>>, vector<8x256xf32>
      %17 = arith.addf %15, %16 : vector<8x256xf32>
      %cst_16 = arith.constant 0.000000e+00 : f32
      %18 = vector.broadcast %cst_16 : f32 to vector<8x256xf32>
      %19 = arith.maximumf %17, %18 : vector<8x256xf32>
      %c0_17 = arith.constant 0 : index
      %c0_18 = arith.constant 0 : index
      %20 = vector.load %arg7[%c0_17, %c0_18] : memref<8x256xf32, #tpu.memory_space<vmem>>, vector<8x256xf32>
      tpu.vector_store %arg7[%c0_17, %c0_18], %19 {strides = array<i32>} : memref<8x256xf32, #tpu.memory_space<vmem>>, vector<8x256xf32>,
    } else {
    }
    return
  }
  func.func @transform_0(%arg0: i32, %arg1: i32, %arg2: i32) -> (i32, i32) {
    %c0_i32 = arith.constant 0 : i32
    return %arg0, %arg2 : i32, i32
  }
  func.func @transform_1(%arg0: i32, %arg1: i32, %arg2: i32) -> (i32, i32) {
    %c0_i32 = arith.constant 0 : i32
    return %arg2, %arg1 : i32, i32
  }
  func.func @transform_2(%arg0: i32, %arg1: i32, %arg2: i32) -> (i32, i32) {
    %c0_i32 = arith.constant 0 : i32
    %c0_i32_0 = arith.constant 0 : i32
    return %c0_i32, %arg1 : i32, i32
  }
  func.func @transform_3(%arg0: i32, %arg1: i32, %arg2: i32) -> (i32, i32) {
    %c0_i32 = arith.constant 0 : i32
    return %arg0, %arg1 : i32, i32
  }
  func.func @transform_4(%arg0: i32, %arg1: i32, %arg2: i32) -> (i32, i32) {
    %c0_i32 = arith.constant 0 : i32
    return %arg0, %arg1 : i32, i32
  }
}

</mosaic_0001>

<bundles_post_ra>
// kernel: _lambda_.20
= control target key start
LH: loop header
LB: loop body
LE: loop exit
PB: predicated region body
PF: predicated region fallthrough
CT: control target
= control target key end

     0   :  { %8 = vsyncpa [#allocation4], 0  ;;  %s1862_s12 = smov 0   ;;  %s1864_s13 = smov 0   ;;  %s2392_s0 = inlined_call_operand.vmem [shape: bf16[1024,27], index: 0, kind: input, shape index: {}]   ;;  %s2393_s1 = inlined_call_operand.hbm [shape: bf16[27,32], index: 1, kind: input, shape index: {}]   ;;  %s2394_s2 = inlined_call_operand.vmem [shape: f32[1,32], index: 2, kind: input, shape index: {}]   ;;  %s2395_s3 = inlined_call_operand.vmem [shape: f32[1024,32], index: 3, kind: output, shape index: {}]  }
   0x1   :  { %s1866_s14 = smov 0  }
   0x2 LB: > { %s1523_s15 = sadd.s32 4294967295, %s1835_s14   ;;  %s33_s16 = sadd.s32 1, %s1831_s13  ;;  %s1835_s14 = sphi %s1866_s14, %s14_s14   ;;  %s1831_s13 = sphi %s1864_s13, %s2400_s13   ;;  %s1827_s12 = sphi %s1862_s12, %s2399_s12  }
   0x3   : > { %p35_p0 = scmp.ge.s32.totalorder %s33_s16, 2  ;;  %p1525_p1 = scmp.ge.s32.totalorder %s1835_s14, 1 }
   0x4   : > { %p148_p2 = scmp.lt.s32.totalorder %s1835_s14, 3  ;;  %p1887_p4 = scmp.eq.s32.totalorder %s1523_s15, 0 }
   0x5   : > { %s2402_s16 = smov (%p35_p0, %s33_s16), 0  ;;  %s1837_s19 = smov [#allocation3]  }
   0x6   : > { %p1883_p3 = pnand %p1525_p1, %p148_p2  ;;  %s164_s20 = sshll.u32 %s1837_s19, 4  ;;  %s165_s20 = int_to_ptr.vmem [resolvable:$true] %s164_s20 }
   0x7   : > { %s1794_s21 = scalar_lea.vmem %s165_s20, 256  ;;  %p1802_p11 = scmp.lt.s32.totalorder %s165_s20, %s165_s20 }
   0x8   : > { %p1714_p5 = pneg %p1883_p3  ;;  %p1795_p8 = scmp.ne.s32.totalorder %s165_s20, %s1794_s21 }
   0x9   : > { %p1803_p12 = scmp.lt.s32.totalorder %s1794_s21, %s1794_s21 }
   0xa   : > { %p1715_p6 = pnand %p1887_p4, %p1714_p5 }
   0xb   : > { %p1804_p13 = por %p1803_p12, %p1802_p11 }
   0xc   : > { %p1785_p7 = pneg %p1715_p6 }
   0xe   : > { %p1797_p9 = pnand %p1795_p8, %p1785_p7 }
  0x10   : > { %p1798_p10 = pneg %p1797_p9 }
  0x12   : > { %p1805_p0 = pnand %p1804_p13, %p1798_p10 }
  0x14   : > { %1808 = shalt.err (!%p1805_p0)
}
  0x15   : > { %s1838_s22 = smov 64   ;;  %s1839_s23 = smov 4  }
  0x16   : > { %1717 = dma.hbm_to_vmem [thread:$0]  (!%p1715_p6), %s2393_s1, 256, %s165_s20, [#allocation4], %s1838_s22, %s1838_s22, %s1839_s23  }
  0x17   : > { %198 = sbr.rel (%p1883_p3) target bundleno = 314 (0x13a), region = 32 }
  0x1c   : > { %1822 = dma.done.wait (%p1887_p4), [#allocation4], 256  }
  0x1d   : > { %1824 = vsyncadd (%p1887_p4), [#allocation4], 4294967040  ;;  %vm723_vm0 = vcmask 1044480   ;;  %s1531_s26 = sshll.u32 %s1827_s12, 6  ;;  %vm258_vm1 = vcmask 261120   ;;  %v1840_v0 = vmov 0.0  }
  0x1e   : > { %p1907_p1 = scmp.lt.s32.totalorder %s1531_s26, 127  ;;  %261 = vst.msk [vmem:[#allocation2 + $0x10] sm:$0xff] %vm258_vm1, %v1840_v0  ;;  %259 = vst.msk [vmem:[#allocation2] sm:$0xff] %vm258_vm1, %v1840_v0  ;;  %vm724_vm2 = vcmask 1045504   ;;  %v1841_v1 = vmov 65535   ;;  %v1750_v5 = vld [vmem:[#allocation3] sm:$0xff]  }
  0x1f   : > { %260 = vst.msk [vmem:[#allocation2 + $0x8] sm:$0xff] %vm258_vm1, %v1840_v0  ;;  %262 = vst.msk [vmem:[#allocation2 + $0x18] sm:$0xff] %vm258_vm1, %v1840_v0  ;;  %v725_v2 = vsel %vm723_vm0, 4294967295, %v1841_v1  ;;  %v1749_v4 = vld [vmem:[#allocation3 + $0x8] sm:$0x3f]   ;;  %vm626_vm3 = vcmask 220160  }
  0x20   : > { %263 = vst.msk [vmem:[#allocation2 + $0x20] sm:$0xff] %vm258_vm1, %v1840_v0  ;;  %264 = vst.msk [vmem:[#allocation2 + $0x28] sm:$0xff] %vm258_vm1, %v1840_v0  ;;  %s2404_s26 = smov (!%p1907_p1, %s1531_s26), 127  ;;  %v726_v3 = vsel %vm724_vm2, %v725_v2, 0  ;;  %v2125_v1 = vld [vmem:[%s2394_s2] ss:$0 sm:$0xff] }
  0x21   : > { %265 = vst.msk [vmem:[#allocation2 + $0x30] sm:$0xff] %vm258_vm1, %v1840_v0  ;;  %266 = vst.msk [vmem:[#allocation2 + $0x38] sm:$0xff] %vm258_vm1, %v1840_v0  ;;  %s1532_s28 = sshll.u32 %s2404_s26, 2  ;;  %v728_v6 = vand.u32 %v1749_v4, %v726_v3  ;;  %s1534_s7 = sshll.u32 %s2404_s26, 3 }
  0x22   : > { %267 = vst.msk [vmem:[#allocation2 + $0x40] sm:$0xff] %vm258_vm1, %v1840_v0  ;;  %268 = vst.msk [vmem:[#allocation2 + $0x48] sm:$0xff] %vm258_vm1, %v1840_v0  ;;  %s2050_s4 = scalar_lea.vmem %s2392_s0, %s1532_s28  ;;  %s2137_s10 = scalar_lea.vmem %s2395_s3, %s1534_s7 }
  0x23   : > { %269 = vst.msk [vmem:[#allocation2 + $0x50] sm:$0xff] %vm258_vm1, %v1840_v0  ;;  %270 = vst.msk [vmem:[#allocation2 + $0x58] sm:$0xff] %vm258_vm1, %v1840_v0  ;;  %v1751_v7 = vld [vmem:[%s2050_s4] sm:$0xff]   ;;  %1638 = vmatprep.subr.bf16.mxu0 %v728_v6  ;;  %1706 = vmatprep.subr.bf16.mxu1 %v728_v6  ;;  %v1753_v9 = vld [vmem:[%s2050_s4 + $0x8] sm:$0xff]  }
  0x24   : > { %271 = vst.msk [vmem:[#allocation2 + $0x60] sm:$0xff] %vm258_vm1, %v1840_v0  ;;  %272 = vst.msk [vmem:[#allocation2 + $0x68] sm:$0xff] %vm258_vm1, %v1840_v0  ;;  %v1752_v8 = vld [vmem:[%s2050_s4 + $0x80] sm:$0xff]   ;;  %1639 = vmatpush3.bf16.msra.mxu0 %v728_v6  ;;  %1708 = vmatpush3.bf16.msra.mxu1 %v728_v6  ;;  %v1754_v10 = vld [vmem:[%s2050_s4 + $0x88] sm:$0xff]  }
  0x25   : > { %273 = vst.msk [vmem:[#allocation2 + $0x70] sm:$0xff] %vm258_vm1, %v1840_v0  ;;  %274 = vst.msk [vmem:[#allocation2 + $0x78] sm:$0xff] %vm258_vm1, %v1840_v0  ;;  %1640 = vmatprep.subr.bf16.mxu0 %v1750_v5  ;;  %1707 = vmatprep.subr.bf16.mxu1 %v1750_v5  ;;  %v1755_v11 = vld [vmem:[%s2050_s4 + $0x10] sm:$0xff]   ;;  %v1757_v13 = vld [vmem:[%s2050_s4 + $0x18] sm:$0xff]  }
  0x26   : > { %275 = vst.msk [vmem:[#allocation2 + $0x80] sm:$0xff] %vm258_vm1, %v1840_v0  ;;  %276 = vst.msk [vmem:[#allocation2 + $0x88] sm:$0xff] %vm258_vm1, %v1840_v0  ;;  %1642 = vmatprep.mubr.msk.bf16.mxu0 %vm626_vm3, %v1751_v7  ;;  %1674 = vmatprep.mubr.msk.bf16.mxu1 %vm626_vm3, %v1752_v8  ;;  %v1756_v12 = vld [vmem:[%s2050_s4 + $0x90] sm:$0xff]   ;;  %v1758_v14 = vld [vmem:[%s2050_s4 + $0x98] sm:$0xff]  }
  0x27   : > { %277 = vst.msk [vmem:[#allocation2 + $0x90] sm:$0xff] %vm258_vm1, %v1840_v0  ;;  %278 = vst.msk [vmem:[#allocation2 + $0x98] sm:$0xff] %vm258_vm1, %v1840_v0  ;;  %v1759_v15 = vld [vmem:[%s2050_s4 + $0x20] sm:$0xff]   ;;  %v1761_v17 = vld [vmem:[%s2050_s4 + $0x28] sm:$0xff]  }
  0x28   : > { %279 = vst.msk [vmem:[#allocation2 + $0xa0] sm:$0xff] %vm258_vm1, %v1840_v0  ;;  %280 = vst.msk [vmem:[#allocation2 + $0xa8] sm:$0xff] %vm258_vm1, %v1840_v0  ;;  %1641 = vmatpush3.bf16.msra.mxu0 %v1750_v5  ;;  %1709 = vmatpush3.bf16.msra.mxu1 %v1750_v5  ;;  %v1760_v16 = vld [vmem:[%s2050_s4 + $0xa0] sm:$0xff]   ;;  %v1762_v18 = vld [vmem:[%s2050_s4 + $0xa8] sm:$0xff]  }
  0x29   : > { %281 = vst.msk [vmem:[#allocation2 + $0xb0] sm:$0xff] %vm258_vm1, %v1840_v0  ;;  %282 = vst.msk [vmem:[#allocation2 + $0xb8] sm:$0xff] %vm258_vm1, %v1840_v0  ;;  %v1763_v19 = vld [vmem:[%s2050_s4 + $0x30] sm:$0xff]   ;;  %v1765_v21 = vld [vmem:[%s2050_s4 + $0x38] sm:$0xff]  }
  0x2a   : > { %283 = vst.msk [vmem:[#allocation2 + $0xc0] sm:$0xff] %vm258_vm1, %v1840_v0  ;;  %284 = vst.msk [vmem:[#allocation2 + $0xc8] sm:$0xff] %vm258_vm1, %v1840_v0  ;;  %v1764_v20 = vld [vmem:[%s2050_s4 + $0xb0] sm:$0xff]   ;;  %v1766_v22 = vld [vmem:[%s2050_s4 + $0xb8] sm:$0xff]  }
  0x2b   : > { %285 = vst.msk [vmem:[#allocation2 + $0xd0] sm:$0xff] %vm258_vm1, %v1840_v0  ;;  %286 = vst.msk [vmem:[#allocation2 + $0xd8] sm:$0xff] %vm258_vm1, %v1840_v0  ;;  %1643 = vmatmul.mubr.msk.bf16.vlgmr.msra.gmra.mxu0 %vm626_vm3, %v1753_v9  ;;  %1675 = vmatmul.mubr.msk.bf16.vlgmr.msra.gmra.mxu1 %vm626_vm3, %v1754_v10  ;;  %v1767_v23 = vld [vmem:[%s2050_s4 + $0x40] sm:$0xff]   ;;  %v1769_v25 = vld [vmem:[%s2050_s4 + $0x48] sm:$0xff]  }
  0x2c   : > { %287 = vst.msk [vmem:[#allocation2 + $0xe0] sm:$0xff] %vm258_vm1, %v1840_v0  ;;  %288 = vst.msk [vmem:[#allocation2 + $0xe8] sm:$0xff] %vm258_vm1, %v1840_v0  ;;  %1646 = vmatprep.mubr.msk.bf16.mxu0 %vm626_vm3, %v1755_v11  ;;  %1678 = vmatprep.mubr.msk.bf16.mxu1 %vm626_vm3, %v1756_v12  ;;  %v1768_v24 = vld [vmem:[%s2050_s4 + $0xc0] sm:$0xff]   ;;  %v1770_v26 = vld [vmem:[%s2050_s4 + $0xc8] sm:$0xff]  }
  0x2d   : > { %289 = vst.msk [vmem:[#allocation2 + $0xf0] sm:$0xff] %vm258_vm1, %v1840_v0  ;;  %290 = vst.msk [vmem:[#allocation2 + $0xf8] sm:$0xff] %vm258_vm1, %v1840_v0  ;;  %v1771_v27 = vld [vmem:[%s2050_s4 + $0x50] sm:$0xff]   ;;  %v1773_v29 = vld [vmem:[%s2050_s4 + $0x58] sm:$0xff]  }
  0x2e   : > { %291 = vst.msk [vmem:[#allocation2 + $0x100] sm:$0xff] %vm258_vm1, %v1840_v0  ;;  %292 = vst.msk [vmem:[#allocation2 + $0x108] sm:$0xff] %vm258_vm1, %v1840_v0  ;;  %v1772_v28 = vld [vmem:[%s2050_s4 + $0xd0] sm:$0xff]   ;;  %v1774_v30 = vld [vmem:[%s2050_s4 + $0xd8] sm:$0xff]  }
  0x2f   : > { %293 = vst.msk [vmem:[#allocation2 + $0x110] sm:$0xff] %vm258_vm1, %v1840_v0  ;;  %294 = vst.msk [vmem:[#allocation2 + $0x118] sm:$0xff] %vm258_vm1, %v1840_v0  ;;  %v1775_v31 = vld [vmem:[%s2050_s4 + $0x60] sm:$0xff]   ;;  %v1777_v33 = vld [vmem:[%s2050_s4 + $0x68] sm:$0xff]  }
  0x30   : > { %295 = vst.msk [vmem:[#allocation2 + $0x120] sm:$0xff] %vm258_vm1, %v1840_v0  ;;  %296 = vst.msk [vmem:[#allocation2 + $0x128] sm:$0xff] %vm258_vm1, %v1840_v0  ;;  %v1776_v32 = vld [vmem:[%s2050_s4 + $0xe0] sm:$0xff]   ;;  %v1778_v34 = vld [vmem:[%s2050_s4 + $0xe8] sm:$0xff]  }
  0x31   : > { %297 = vst.msk [vmem:[#allocation2 + $0x130] sm:$0xff] %vm258_vm1, %v1840_v0  ;;  %298 = vst.msk [vmem:[#allocation2 + $0x138] sm:$0xff] %vm258_vm1, %v1840_v0  ;;  %v1779_v35 = vld [vmem:[%s2050_s4 + $0x70] sm:$0xff]   ;;  %v1781_v37 = vld [vmem:[%s2050_s4 + $0x78] sm:$0xff]  }
  0x32   : > { %299 = vst.msk [vmem:[#allocation2 + $0x140] sm:$0xff] %vm258_vm1, %v1840_v0  ;;  %300 = vst.msk [vmem:[#allocation2 + $0x148] sm:$0xff] %vm258_vm1, %v1840_v0  ;;  %v1780_v36 = vld [vmem:[%s2050_s4 + $0xf0] sm:$0xff]   ;;  %v1782_v38 = vld [vmem:[%s2050_s4 + $0xf8] sm:$0xff]  }
  0x33   : > { %301 = vst.msk [vmem:[#allocation2 + $0x150] sm:$0xff] %vm258_vm1, %v1840_v0  ;;  %302 = vst.msk [vmem:[#allocation2 + $0x158] sm:$0xff] %vm258_vm1, %v1840_v0  ;;  %1647 = vmatmul.mubr.msk.bf16.gmra.mxu0 %vm626_vm3, %v1757_v13  ;;  %1679 = vmatmul.mubr.msk.bf16.gmra.mxu1 %vm626_vm3, %v1758_v14  ;;  %v325_v39 = vld [vmem:[#allocation2 + $0x10] sm:$0xff]  ;;  %v323_v43 = vld [vmem:[#allocation2] sm:$0xff] }
  0x34   : > { %303 = vst.msk [vmem:[#allocation2 + $0x160] sm:$0xff] %vm258_vm1, %v1840_v0  ;;  %304 = vst.msk [vmem:[#allocation2 + $0x168] sm:$0xff] %vm258_vm1, %v1840_v0  ;;  %1650 = vmatprep.mubr.msk.bf16.mxu0 %vm626_vm3, %v1759_v15  ;;  %1682 = vmatprep.mubr.msk.bf16.mxu1 %vm626_vm3, %v1760_v16  ;;  %v326_v49 = vld [vmem:[#allocation2 + $0x18] sm:$0xff]  ;;  %v324_v55 = vld [vmem:[#allocation2 + $0x8] sm:$0xff] }
  0x35   : > { %305 = vst.msk [vmem:[#allocation2 + $0x170] sm:$0xff] %vm258_vm1, %v1840_v0  ;;  %306 = vst.msk [vmem:[#allocation2 + $0x178] sm:$0xff] %vm258_vm1, %v1840_v0  ;;  %v355_v44 = vld [vmem:[#allocation2 + $0x100] sm:$0xff]  ;;  %v356_v56 = vld [vmem:[#allocation2 + $0x108] sm:$0xff] }
  0x36   : > { %307 = vst.msk [vmem:[#allocation2 + $0x180] sm:$0xff] %vm258_vm1, %v1840_v0  ;;  %308 = vst.msk [vmem:[#allocation2 + $0x188] sm:$0xff] %vm258_vm1, %v1840_v0  ;;  %v357_v40 = vld [vmem:[#allocation2 + $0x110] sm:$0xff]  ;;  %v358_v50 = vld [vmem:[#allocation2 + $0x118] sm:$0xff] }
  0x37   : > { %309 = vst.msk [vmem:[#allocation2 + $0x190] sm:$0xff] %vm258_vm1, %v1840_v0  ;;  %310 = vst.msk [vmem:[#allocation2 + $0x198] sm:$0xff] %vm258_vm1, %v1840_v0  ;;  %v329_v61 = vld [vmem:[#allocation2 + $0x30] sm:$0xff]  ;;  %v327_v4 = vld [vmem:[#allocation2 + $0x20] sm:$0xff] }
  0x38   : > { %311 = vst.msk [vmem:[#allocation2 + $0x1a0] sm:$0xff] %vm258_vm1, %v1840_v0  ;;  %312 = vst.msk [vmem:[#allocation2 + $0x1a8] sm:$0xff] %vm258_vm1, %v1840_v0  ;;  %v361_v62 = vld [vmem:[#allocation2 + $0x130] sm:$0xff]  ;;  %v359_v5 = vld [vmem:[#allocation2 + $0x120] sm:$0xff] }
  0x39   : > { %313 = vst.msk [vmem:[#allocation2 + $0x1b0] sm:$0xff] %vm258_vm1, %v1840_v0  ;;  %314 = vst.msk [vmem:[#allocation2 + $0x1b8] sm:$0xff] %vm258_vm1, %v1840_v0  ;;  %v330_v16 = vld [vmem:[#allocation2 + $0x38] sm:$0xff] }
  0x3a   : > { %315 = vst.msk [vmem:[#allocation2 + $0x1c0] sm:$0xff] %vm258_vm1, %v1840_v0  ;;  %316 = vst.msk [vmem:[#allocation2 + $0x1c8] sm:$0xff] %vm258_vm1, %v1840_v0 }
  0x3b   : > { %317 = vst.msk [vmem:[#allocation2 + $0x1d0] sm:$0xff] %vm258_vm1, %v1840_v0  ;;  %318 = vst.msk [vmem:[#allocation2 + $0x1d8] sm:$0xff] %vm258_vm1, %v1840_v0  ;;  %1651 = vmatmul.mubr.msk.bf16.gmra.mxu0 %vm626_vm3, %v1761_v17  ;;  %1683 = vmatmul.mubr.msk.bf16.gmra.mxu1 %vm626_vm3, %v1762_v18  ;;  %v362_v17 = vld [vmem:[#allocation2 + $0x138] sm:$0xff] }
  0x3c   : > { %319 = vst.msk [vmem:[#allocation2 + $0x1e0] sm:$0xff] %vm258_vm1, %v1840_v0  ;;  %320 = vst.msk [vmem:[#allocation2 + $0x1e8] sm:$0xff] %vm258_vm1, %v1840_v0  ;;  %1654 = vmatprep.mubr.msk.bf16.mxu0 %vm626_vm3, %v1763_v19  ;;  %1686 = vmatprep.mubr.msk.bf16.mxu1 %vm626_vm3, %v1764_v20 }
  0x3d   : > { %321 = vst.msk [vmem:[#allocation2 + $0x1f0] sm:$0xff] %vm258_vm1, %v1840_v0  ;;  %322 = vst.msk [vmem:[#allocation2 + $0x1f8] sm:$0xff] %vm258_vm1, %v1840_v0 }
  0x43   : > { %1655 = vmatmul.mubr.msk.bf16.gmra.mxu0 %vm626_vm3, %v1765_v21  ;;  %1687 = vmatmul.mubr.msk.bf16.gmra.mxu1 %vm626_vm3, %v1766_v22 }
  0x44   : > { %1658 = vmatprep.mubr.msk.bf16.mxu0 %vm626_vm3, %v1767_v23  ;;  %1690 = vmatprep.mubr.msk.bf16.mxu1 %vm626_vm3, %v1768_v24 }
  0x4b   : > { %1659 = vmatmul.mubr.msk.bf16.gmra.mxu0 %vm626_vm3, %v1769_v25  ;;  %1691 = vmatmul.mubr.msk.bf16.gmra.mxu1 %vm626_vm3, %v1770_v26  ;;  %v328_v26 = vld [vmem:[#allocation2 + $0x28] sm:$0xff] }
  0x4c   : > { %1662 = vmatprep.mubr.msk.bf16.mxu0 %vm626_vm3, %v1771_v27  ;;  %1694 = vmatprep.mubr.msk.bf16.mxu1 %vm626_vm3, %v1772_v28  ;;  %v360_v27 = vld [vmem:[#allocation2 + $0x128] sm:$0xff] }
  0x53   : > { %1663 = vmatmul.mubr.msk.bf16.gmra.mxu0 %vm626_vm3, %v1773_v29  ;;  %1695 = vmatmul.mubr.msk.bf16.gmra.mxu1 %vm626_vm3, %v1774_v30 }
  0x54   : > { %1666 = vmatprep.mubr.msk.bf16.mxu0 %vm626_vm3, %v1775_v31  ;;  %1698 = vmatprep.mubr.msk.bf16.mxu1 %vm626_vm3, %v1776_v32 }
  0x5b   : > { %1667 = vmatmul.mubr.msk.bf16.gmra.mxu0 %vm626_vm3, %v1777_v33  ;;  %1699 = vmatmul.mubr.msk.bf16.gmra.mxu1 %vm626_vm3, %v1778_v34 }
  0x5c   : > { %1670 = vmatprep.mubr.msk.bf16.mxu0 %vm626_vm3, %v1779_v35  ;;  %1702 = vmatprep.mubr.msk.bf16.mxu1 %vm626_vm3, %v1780_v36 }
  0x63   : > { %1671 = vmatmul.mubr.msk.bf16.gmra.mxu0 %vm626_vm3, %v1781_v37  ;;  %1703 = vmatmul.mubr.msk.bf16.gmra.mxu1 %vm626_vm3, %v1782_v38  ;;  %v333_v38 = vld [vmem:[#allocation2 + $0x50] sm:$0xff] }
  0xeb   : > { %v1644_v41 = vpop.f32.mrf.mxu0  ;;  %v1676_v42 = vpop.f32.mrf.mxu1 }
  0xec   : > { %v1021_v45 = vadd.f32 %v1644_v41, %v325_v39  ;;  %v1053_v46 = vadd.f32 %v1676_v42, %v357_v40  ;;  %v365_v39 = vld [vmem:[#allocation2 + $0x150] sm:$0xff] }
  0xed   : > { %v764_v47 = vpop.f32.mrf.mxu0  ;;  %v892_v48 = vpop.f32.mrf.mxu1 }
  0xee   : > { %1086 = vst.msk [vmem:[#allocation2 + $0x10] sm:$0xff] %vm258_vm1, %v1021_v45  ;;  %1118 = vst.msk [vmem:[#allocation2 + $0x110] sm:$0xff] %vm258_vm1, %v1053_v46  ;;  %v1019_v51 = vadd.f32 %v764_v47, %v323_v43  ;;  %v1051_v52 = vadd.f32 %v892_v48, %v355_v44 }
  0xef   : > { %v1645_v53 = vpop.f32.mrf.mxu0  ;;  %v1677_v54 = vpop.f32.mrf.mxu1 }
  0xf0   : > { %1084 = vst.msk [vmem:[#allocation2] sm:$0xff] %vm258_vm1, %v1019_v51  ;;  %1116 = vst.msk [vmem:[#allocation2 + $0x100] sm:$0xff] %vm258_vm1, %v1051_v52  ;;  %v1022_v57 = vadd.f32 %v1645_v53, %v326_v49  ;;  %v1054_v58 = vadd.f32 %v1677_v54, %v358_v50  ;;  %v331_v50 = vld [vmem:[#allocation2 + $0x40] sm:$0xff] }
  0xf1   : > { %v767_v59 = vpop.f32.mrf.mxu0  ;;  %v895_v60 = vpop.f32.mrf.mxu1  ;;  %v363_v51 = vld [vmem:[#allocation2 + $0x140] sm:$0xff] }
  0xf2   : > { %1087 = vst.msk [vmem:[#allocation2 + $0x18] sm:$0xff] %vm258_vm1, %v1022_v57  ;;  %1119 = vst.msk [vmem:[#allocation2 + $0x118] sm:$0xff] %vm258_vm1, %v1054_v58  ;;  %v1020_v63 = vadd.f32 %v767_v59, %v324_v55  ;;  %v1052_v0 = vadd.f32 %v895_v60, %v356_v56 }
  0xf3   : > { %v1648_v2 = vpop.f32.mrf.mxu0  ;;  %v1680_v3 = vpop.f32.mrf.mxu1 }
  0xf4   : > { %1085 = vst.msk [vmem:[#allocation2 + $0x8] sm:$0xff] %vm258_vm1, %v1020_v63  ;;  %1117 = vst.msk [vmem:[#allocation2 + $0x108] sm:$0xff] %vm258_vm1, %v1052_v0  ;;  %v1025_v6 = vadd.f32 %v1648_v2, %v329_v61  ;;  %v1057_v7 = vadd.f32 %v1680_v3, %v361_v62  ;;  %v334_v62 = vld [vmem:[#allocation2 + $0x58] sm:$0xff]  ;;  %v332_v0 = vld [vmem:[#allocation2 + $0x48] sm:$0xff] }
  0xf5   : > { %v1153_v8 = vld [vmem:[#allocation2 + $0x10] sm:$0xff]  ;;  %v780_v10 = vpop.f32.mrf.mxu0  ;;  %v908_v11 = vpop.f32.mrf.mxu1  ;;  %v366_v63 = vld [vmem:[#allocation2 + $0x158] sm:$0xff] }
  0xf6   : > { %v1185_v9 = vld [vmem:[#allocation2 + $0x110] sm:$0xff]  ;;  %v1224_v12 = vadd.f32 %v2125_v1, %v1153_v8  ;;  %1090 = vst.msk [vmem:[#allocation2 + $0x30] sm:$0xff] %vm258_vm1, %v1025_v6  ;;  %1122 = vst.msk [vmem:[#allocation2 + $0x130] sm:$0xff] %vm258_vm1, %v1057_v7  ;;  %v1023_v14 = vadd.f32 %v780_v10, %v327_v4  ;;  %v1055_v15 = vadd.f32 %v908_v11, %v359_v5  ;;  %v364_v8 = vld [vmem:[#allocation2 + $0x148] sm:$0xff] }
  0xf7   : > { %v1256_v13 = vadd.f32 %v2125_v1, %v1185_v9  ;;  %v1151_v18 = vld [vmem:[#allocation2] sm:$0xff]  ;;  %v1649_v20 = vpop.f32.mrf.mxu0  ;;  %v1681_v21 = vpop.f32.mrf.mxu1 }
  0xf8   : > { %v1183_v19 = vld [vmem:[#allocation2 + $0x100] sm:$0xff]  ;;  %v1288_v22 = vmax.f32 %v1224_v12, 0.0  ;;  %v1222_v24 = vadd.f32 %v2125_v1, %v1151_v18  ;;  %1088 = vst.msk [vmem:[#allocation2 + $0x20] sm:$0xff] %vm258_vm1, %v1023_v14  ;;  %1120 = vst.msk [vmem:[#allocation2 + $0x120] sm:$0xff] %vm258_vm1, %v1055_v15  ;;  %v1026_v30 = vadd.f32 %v1649_v20, %v330_v16  ;;  %v1058_v31 = vadd.f32 %v1681_v21, %v362_v17  ;;  %v337_v17 = vld [vmem:[#allocation2 + $0x70] sm:$0xff] }
  0xf9   : > { %v1320_v23 = vmax.f32 %v1256_v13, 0.0  ;;  %v1254_v25 = vadd.f32 %v2125_v1, %v1183_v19  ;;  %v1154_v28 = vld [vmem:[#allocation2 + $0x18] sm:$0xff]  ;;  %v783_v32 = vpop.f32.mrf.mxu0  ;;  %v911_v33 = vpop.f32.mrf.mxu1  ;;  %v369_v18 = vld [vmem:[#allocation2 + $0x170] sm:$0xff] }
  0xfa   : > { %v1186_v29 = vld [vmem:[#allocation2 + $0x118] sm:$0xff]  ;;  %1352 = vst.msk [vmem:[%s2137_s10 + $0x10] sm:$0xff] %vm258_vm1, %v1288_v22  ;;  %v1286_v34 = vmax.f32 %v1222_v24, 0.0  ;;  %v1225_v36 = vadd.f32 %v2125_v1, %v1154_v28  ;;  %1091 = vst.msk [vmem:[#allocation2 + $0x38] sm:$0xff] %vm258_vm1, %v1026_v30  ;;  %v1024_v42 = vadd.f32 %v783_v32, %v328_v26  ;;  %v1056_v43 = vadd.f32 %v911_v33, %v360_v27  ;;  %v367_v30 = vld [vmem:[#allocation2 + $0x160] sm:$0xff] }
  0xfb   : > { %1384 = vst.msk [vmem:[%s2137_s10 + $0x110] sm:$0xff] %vm258_vm1, %v1320_v23  ;;  %v1318_v35 = vmax.f32 %v1254_v25, 0.0  ;;  %v1257_v37 = vadd.f32 %v2125_v1, %v1186_v29  ;;  %v1152_v40 = vld [vmem:[#allocation2 + $0x8] sm:$0xff]  ;;  %1123 = vst.msk [vmem:[#allocation2 + $0x138] sm:$0xff] %vm258_vm1, %v1058_v31  ;;  %v1652_v44 = vpop.f32.mrf.mxu0  ;;  %v1684_v45 = vpop.f32.mrf.mxu1  ;;  %v335_v29 = vld [vmem:[#allocation2 + $0x60] sm:$0xff] }
  0xfc   : > { %v1184_v41 = vld [vmem:[#allocation2 + $0x108] sm:$0xff]  ;;  %1350 = vst.msk [vmem:[%s2137_s10] sm:$0xff] %vm258_vm1, %v1286_v34  ;;  %v1289_v46 = vmax.f32 %v1225_v36, 0.0  ;;  %v1223_v48 = vadd.f32 %v2125_v1, %v1152_v40  ;;  %1089 = vst.msk [vmem:[#allocation2 + $0x28] sm:$0xff] %vm258_vm1, %v1024_v42  ;;  %v1029_v54 = vadd.f32 %v1652_v44, %v333_v38  ;;  %v1061_v55 = vadd.f32 %v1684_v45, %v365_v39  ;;  %v370_v42 = vld [vmem:[#allocation2 + $0x178] sm:$0xff] }
  0xfd   : > { %1382 = vst.msk [vmem:[%s2137_s10 + $0x100] sm:$0xff] %vm258_vm1, %v1318_v35  ;;  %v1321_v47 = vmax.f32 %v1257_v37, 0.0  ;;  %v1255_v49 = vadd.f32 %v2125_v1, %v1184_v41  ;;  %v1157_v52 = vld [vmem:[#allocation2 + $0x30] sm:$0xff]  ;;  %1121 = vst.msk [vmem:[#allocation2 + $0x128] sm:$0xff] %vm258_vm1, %v1056_v43  ;;  %v796_v56 = vpop.f32.mrf.mxu0  ;;  %v924_v57 = vpop.f32.mrf.mxu1  ;;  %v338_v41 = vld [vmem:[#allocation2 + $0x78] sm:$0xff] }
  0xfe   : > { %v1189_v53 = vld [vmem:[#allocation2 + $0x130] sm:$0xff]  ;;  %1353 = vst.msk [vmem:[%s2137_s10 + $0x18] sm:$0xff] %vm258_vm1, %v1289_v46  ;;  %v1287_v58 = vmax.f32 %v1223_v48, 0.0  ;;  %v1228_v60 = vadd.f32 %v2125_v1, %v1157_v52  ;;  %1094 = vst.msk [vmem:[#allocation2 + $0x50] sm:$0xff] %vm258_vm1, %v1029_v54  ;;  %v1027_v4 = vadd.f32 %v796_v56, %v331_v50  ;;  %v1059_v5 = vadd.f32 %v924_v57, %v363_v51  ;;  %v368_v54 = vld [vmem:[#allocation2 + $0x168] sm:$0xff] }
  0xff   : > { %1385 = vst.msk [vmem:[%s2137_s10 + $0x118] sm:$0xff] %vm258_vm1, %v1321_v47  ;;  %v1319_v59 = vmax.f32 %v1255_v49, 0.0  ;;  %v1260_v61 = vadd.f32 %v2125_v1, %v1189_v53  ;;  %v1155_v2 = vld [vmem:[#allocation2 + $0x20] sm:$0xff]  ;;  %1126 = vst.msk [vmem:[#allocation2 + $0x150] sm:$0xff] %vm258_vm1, %v1061_v55  ;;  %v1653_v6 = vpop.f32.mrf.mxu0  ;;  %v1685_v7 = vpop.f32.mrf.mxu1  ;;  %v336_v53 = vld [vmem:[#allocation2 + $0x68] sm:$0xff] }
 0x100   : > { %v1187_v3 = vld [vmem:[#allocation2 + $0x120] sm:$0xff]  ;;  %1351 = vst.msk [vmem:[%s2137_s10 + $0x8] sm:$0xff] %vm258_vm1, %v1287_v58  ;;  %v1292_v9 = vmax.f32 %v1228_v60, 0.0  ;;  %v1226_v11 = vadd.f32 %v2125_v1, %v1155_v2  ;;  %1092 = vst.msk [vmem:[#allocation2 + $0x40] sm:$0xff] %vm258_vm1, %v1027_v4  ;;  %v1030_v13 = vadd.f32 %v1653_v6, %v334_v62  ;;  %v1062_v14 = vadd.f32 %v1685_v7, %v366_v63  ;;  %v341_v2 = vld [vmem:[#allocation2 + $0x90] sm:$0xff] }
 0x101   : > { %1383 = vst.msk [vmem:[%s2137_s10 + $0x108] sm:$0xff] %vm258_vm1, %v1319_v59  ;;  %v1324_v10 = vmax.f32 %v1260_v61, 0.0  ;;  %v1258_v12 = vadd.f32 %v2125_v1, %v1187_v3  ;;  %1124 = vst.msk [vmem:[#allocation2 + $0x140] sm:$0xff] %vm258_vm1, %v1059_v5  ;;  %v799_v15 = vpop.f32.mrf.mxu0  ;;  %v927_v16 = vpop.f32.mrf.mxu1  ;;  %v1158_v21 = vld [vmem:[#allocation2 + $0x38] sm:$0xff]  ;;  %v373_v3 = vld [vmem:[#allocation2 + $0x190] sm:$0xff] }
 0x102   : > { %1356 = vst.msk [vmem:[%s2137_s10 + $0x30] sm:$0xff] %vm258_vm1, %v1292_v9  ;;  %v1290_v19 = vmax.f32 %v1226_v11, 0.0  ;;  %v1190_v22 = vld [vmem:[#allocation2 + $0x138] sm:$0xff]  ;;  %v1028_v23 = vadd.f32 %v799_v15, %v332_v0  ;;  %v1060_v24 = vadd.f32 %v927_v16, %v364_v8  ;;  %v1229_v25 = vadd.f32 %v2125_v1, %v1158_v21  ;;  %1095 = vst.msk [vmem:[#allocation2 + $0x58] sm:$0xff] %vm258_vm1, %v1030_v13  ;;  %v371_v21 = vld [vmem:[#allocation2 + $0x180] sm:$0xff] }
 0x103   : > { %1388 = vst.msk [vmem:[%s2137_s10 + $0x130] sm:$0xff] %vm258_vm1, %v1324_v10  ;;  %v1322_v20 = vmax.f32 %v1258_v12, 0.0  ;;  %v1261_v26 = vadd.f32 %v2125_v1, %v1190_v22  ;;  %1127 = vst.msk [vmem:[#allocation2 + $0x158] sm:$0xff] %vm258_vm1, %v1062_v14  ;;  %v1656_v27 = vpop.f32.mrf.mxu0  ;;  %v1688_v28 = vpop.f32.mrf.mxu1  ;;  %v1156_v31 = vld [vmem:[#allocation2 + $0x28] sm:$0xff] }
 0x104   : > { %1354 = vst.msk [vmem:[%s2137_s10 + $0x20] sm:$0xff] %vm258_vm1, %v1290_v19  ;;  %v1188_v32 = vld [vmem:[#allocation2 + $0x128] sm:$0xff]  ;;  %1093 = vst.msk [vmem:[#allocation2 + $0x48] sm:$0xff] %vm258_vm1, %v1028_v23  ;;  %v1033_v33 = vadd.f32 %v1656_v27, %v337_v17  ;;  %v1065_v34 = vadd.f32 %v1688_v28, %v369_v18  ;;  %v1293_v35 = vmax.f32 %v1229_v25, 0.0  ;;  %v1227_v37 = vadd.f32 %v2125_v1, %v1156_v31 }
 0x105   : > { %1386 = vst.msk [vmem:[%s2137_s10 + $0x120] sm:$0xff] %vm258_vm1, %v1322_v20  ;;  %1125 = vst.msk [vmem:[#allocation2 + $0x148] sm:$0xff] %vm258_vm1, %v1060_v24  ;;  %v1325_v36 = vmax.f32 %v1261_v26, 0.0  ;;  %v1259_v38 = vadd.f32 %v2125_v1, %v1188_v32  ;;  %v812_v39 = vpop.f32.mrf.mxu0  ;;  %v940_v40 = vpop.f32.mrf.mxu1  ;;  %v1161_v43 = vld [vmem:[#allocation2 + $0x50] sm:$0xff]  ;;  %v339_v20 = vld [vmem:[#allocation2 + $0x80] sm:$0xff] }
 0x106   : > { %v1193_v44 = vld [vmem:[#allocation2 + $0x150] sm:$0xff]  ;;  %1098 = vst.msk [vmem:[#allocation2 + $0x70] sm:$0xff] %vm258_vm1, %v1033_v33  ;;  %1130 = vst.msk [vmem:[#allocation2 + $0x170] sm:$0xff] %vm258_vm1, %v1065_v34  ;;  %v1031_v45 = vadd.f32 %v812_v39, %v335_v29  ;;  %v1063_v46 = vadd.f32 %v940_v40, %v367_v30  ;;  %v1291_v47 = vmax.f32 %v1227_v37, 0.0  ;;  %v1232_v49 = vadd.f32 %v2125_v1, %v1161_v43  ;;  %v342_v32 = vld [vmem:[#allocation2 + $0x98] sm:$0xff] }
 0x107   : > { %1357 = vst.msk [vmem:[%s2137_s10 + $0x38] sm:$0xff] %vm258_vm1, %v1293_v35  ;;  %1389 = vst.msk [vmem:[%s2137_s10 + $0x138] sm:$0xff] %vm258_vm1, %v1325_v36  ;;  %v1323_v48 = vmax.f32 %v1259_v38, 0.0  ;;  %v1264_v50 = vadd.f32 %v2125_v1, %v1193_v44  ;;  %v1657_v51 = vpop.f32.mrf.mxu0  ;;  %v1689_v52 = vpop.f32.mrf.mxu1  ;;  %v1159_v55 = vld [vmem:[#allocation2 + $0x40] sm:$0xff]  ;;  %v374_v33 = vld [vmem:[#allocation2 + $0x198] sm:$0xff] }
 0x108   : > { %v1191_v56 = vld [vmem:[#allocation2 + $0x140] sm:$0xff]  ;;  %1096 = vst.msk [vmem:[#allocation2 + $0x60] sm:$0xff] %vm258_vm1, %v1031_v45  ;;  %1128 = vst.msk [vmem:[#allocation2 + $0x160] sm:$0xff] %vm258_vm1, %v1063_v46  ;;  %v1034_v57 = vadd.f32 %v1657_v51, %v338_v41  ;;  %v1066_v58 = vadd.f32 %v1689_v52, %v370_v42  ;;  %v1296_v59 = vmax.f32 %v1232_v49, 0.0  ;;  %v1230_v61 = vadd.f32 %v2125_v1, %v1159_v55  ;;  %v340_v44 = vld [vmem:[#allocation2 + $0x88] sm:$0xff] }
 0x109   : > { %1355 = vst.msk [vmem:[%s2137_s10 + $0x28] sm:$0xff] %vm258_vm1, %v1291_v47  ;;  %1387 = vst.msk [vmem:[%s2137_s10 + $0x128] sm:$0xff] %vm258_vm1, %v1323_v48  ;;  %v1328_v60 = vmax.f32 %v1264_v50, 0.0  ;;  %v1262_v62 = vadd.f32 %v2125_v1, %v1191_v56  ;;  %v815_v63 = vpop.f32.mrf.mxu0  ;;  %v943_v0 = vpop.f32.mrf.mxu1  ;;  %v1162_v4 = vld [vmem:[#allocation2 + $0x58] sm:$0xff]  ;;  %v372_v45 = vld [vmem:[#allocation2 + $0x188] sm:$0xff] }
 0x10a   : > { %v1194_v5 = vld [vmem:[#allocation2 + $0x158] sm:$0xff]  ;;  %1099 = vst.msk [vmem:[#allocation2 + $0x78] sm:$0xff] %vm258_vm1, %v1034_v57  ;;  %1131 = vst.msk [vmem:[#allocation2 + $0x178] sm:$0xff] %vm258_vm1, %v1066_v58  ;;  %v1032_v6 = vadd.f32 %v815_v63, %v336_v53  ;;  %v1064_v7 = vadd.f32 %v943_v0, %v368_v54  ;;  %v1294_v8 = vmax.f32 %v1230_v61, 0.0  ;;  %v1233_v10 = vadd.f32 %v2125_v1, %v1162_v4  ;;  %v345_v56 = vld [vmem:[#allocation2 + $0xb0] sm:$0xff] }
 0x10b   : > { %1360 = vst.msk [vmem:[%s2137_s10 + $0x50] sm:$0xff] %vm258_vm1, %v1296_v59  ;;  %1392 = vst.msk [vmem:[%s2137_s10 + $0x150] sm:$0xff] %vm258_vm1, %v1328_v60  ;;  %v1326_v9 = vmax.f32 %v1262_v62, 0.0  ;;  %v1265_v11 = vadd.f32 %v2125_v1, %v1194_v5  ;;  %v1160_v12 = vld [vmem:[#allocation2 + $0x48] sm:$0xff]  ;;  %v1660_v14 = vpop.f32.mrf.mxu0  ;;  %v1692_v15 = vpop.f32.mrf.mxu1  ;;  %v377_v57 = vld [vmem:[#allocation2 + $0x1b0] sm:$0xff] }
 0x10c   : > { %v1192_v13 = vld [vmem:[#allocation2 + $0x148] sm:$0xff]  ;;  %v1231_v16 = vadd.f32 %v2125_v1, %v1160_v12  ;;  %1097 = vst.msk [vmem:[#allocation2 + $0x68] sm:$0xff] %vm258_vm1, %v1032_v6  ;;  %1129 = vst.msk [vmem:[#allocation2 + $0x168] sm:$0xff] %vm258_vm1, %v1064_v7  ;;  %v1037_v18 = vadd.f32 %v1660_v14, %v341_v2  ;;  %v1069_v19 = vadd.f32 %v1692_v15, %v373_v3  ;;  %v1297_v22 = vmax.f32 %v1233_v10, 0.0  ;;  %v343_v5 = vld [vmem:[#allocation2 + $0xa0] sm:$0xff] }
 0x10d   : > { %v1263_v17 = vadd.f32 %v2125_v1, %v1192_v13  ;;  %1358 = vst.msk [vmem:[%s2137_s10 + $0x40] sm:$0xff] %vm258_vm1, %v1294_v8  ;;  %1390 = vst.msk [vmem:[%s2137_s10 + $0x140] sm:$0xff] %vm258_vm1, %v1326_v9  ;;  %v1329_v23 = vmax.f32 %v1265_v11, 0.0  ;;  %v1165_v24 = vld [vmem:[#allocation2 + $0x70] sm:$0xff]  ;;  %v828_v26 = vpop.f32.mrf.mxu0  ;;  %v956_v27 = vpop.f32.mrf.mxu1  ;;  %v375_v6 = vld [vmem:[#allocation2 + $0x1a0] sm:$0xff] }
 0x10e   : > { %v1197_v25 = vld [vmem:[#allocation2 + $0x170] sm:$0xff]  ;;  %v1295_v28 = vmax.f32 %v1231_v16, 0.0  ;;  %v1236_v30 = vadd.f32 %v2125_v1, %v1165_v24  ;;  %1102 = vst.msk [vmem:[#allocation2 + $0x90] sm:$0xff] %vm258_vm1, %v1037_v18  ;;  %1134 = vst.msk [vmem:[#allocation2 + $0x190] sm:$0xff] %vm258_vm1, %v1069_v19  ;;  %v1035_v36 = vadd.f32 %v828_v26, %v339_v20  ;;  %v1067_v37 = vadd.f32 %v956_v27, %v371_v21  ;;  %v346_v7 = vld [vmem:[#allocation2 + $0xb8] sm:$0xff] }
 0x10f   : > { %v1327_v29 = vmax.f32 %v1263_v17, 0.0  ;;  %v1268_v31 = vadd.f32 %v2125_v1, %v1197_v25  ;;  %1361 = vst.msk [vmem:[%s2137_s10 + $0x58] sm:$0xff] %vm258_vm1, %v1297_v22  ;;  %1393 = vst.msk [vmem:[%s2137_s10 + $0x158] sm:$0xff] %vm258_vm1, %v1329_v23  ;;  %v1163_v34 = vld [vmem:[#allocation2 + $0x60] sm:$0xff]  ;;  %v1661_v38 = vpop.f32.mrf.mxu0  ;;  %v1693_v39 = vpop.f32.mrf.mxu1  ;;  %v378_v14 = vld [vmem:[#allocation2 + $0x1b8] sm:$0xff] }
 0x110   : > { %v1195_v35 = vld [vmem:[#allocation2 + $0x160] sm:$0xff]  ;;  %1359 = vst.msk [vmem:[%s2137_s10 + $0x48] sm:$0xff] %vm258_vm1, %v1295_v28  ;;  %v1300_v40 = vmax.f32 %v1236_v30, 0.0  ;;  %v1234_v42 = vadd.f32 %v2125_v1, %v1163_v34  ;;  %1100 = vst.msk [vmem:[#allocation2 + $0x80] sm:$0xff] %vm258_vm1, %v1035_v36  ;;  %v1038_v48 = vadd.f32 %v1661_v38, %v342_v32  ;;  %v1070_v49 = vadd.f32 %v1693_v39, %v374_v33  ;;  %v344_v23 = vld [vmem:[#allocation2 + $0xa8] sm:$0xff] }
 0x111   : > { %1391 = vst.msk [vmem:[%s2137_s10 + $0x148] sm:$0xff] %vm258_vm1, %v1327_v29  ;;  %v1332_v41 = vmax.f32 %v1268_v31, 0.0  ;;  %v1266_v43 = vadd.f32 %v2125_v1, %v1195_v35  ;;  %v1166_v46 = vld [vmem:[#allocation2 + $0x78] sm:$0xff]  ;;  %1132 = vst.msk [vmem:[#allocation2 + $0x180] sm:$0xff] %vm258_vm1, %v1067_v37  ;;  %v831_v50 = vpop.f32.mrf.mxu0  ;;  %v959_v51 = vpop.f32.mrf.mxu1  ;;  %v376_v24 = vld [vmem:[#allocation2 + $0x1a8] sm:$0xff] }
 0x112   : > { %v1198_v47 = vld [vmem:[#allocation2 + $0x178] sm:$0xff]  ;;  %1364 = vst.msk [vmem:[%s2137_s10 + $0x70] sm:$0xff] %vm258_vm1, %v1300_v40  ;;  %v1298_v52 = vmax.f32 %v1234_v42, 0.0  ;;  %v1237_v54 = vadd.f32 %v2125_v1, %v1166_v46  ;;  %1103 = vst.msk [vmem:[#allocation2 + $0x98] sm:$0xff] %vm258_vm1, %v1038_v48  ;;  %v1036_v60 = vadd.f32 %v831_v50, %v340_v44  ;;  %v1068_v61 = vadd.f32 %v959_v51, %v372_v45  ;;  %v349_v35 = vld [vmem:[#allocation2 + $0xd0] sm:$0xff] }
 0x113   : > { %1396 = vst.msk [vmem:[%s2137_s10 + $0x170] sm:$0xff] %vm258_vm1, %v1332_v41  ;;  %v1330_v53 = vmax.f32 %v1266_v43, 0.0  ;;  %v1269_v55 = vadd.f32 %v2125_v1, %v1198_v47  ;;  %v1164_v58 = vld [vmem:[#allocation2 + $0x68] sm:$0xff]  ;;  %1135 = vst.msk [vmem:[#allocation2 + $0x198] sm:$0xff] %vm258_vm1, %v1070_v49  ;;  %v1664_v62 = vpop.f32.mrf.mxu0  ;;  %v1696_v63 = vpop.f32.mrf.mxu1  ;;  %v381_v36 = vld [vmem:[#allocation2 + $0x1d0] sm:$0xff] }
 0x114   : > { %v1196_v59 = vld [vmem:[#allocation2 + $0x168] sm:$0xff]  ;;  %1362 = vst.msk [vmem:[%s2137_s10 + $0x60] sm:$0xff] %vm258_vm1, %v1298_v52  ;;  %v1301_v0 = vmax.f32 %v1237_v54, 0.0  ;;  %v1235_v3 = vadd.f32 %v2125_v1, %v1164_v58  ;;  %1101 = vst.msk [vmem:[#allocation2 + $0x88] sm:$0xff] %vm258_vm1, %v1036_v60  ;;  %v1041_v10 = vadd.f32 %v1664_v62, %v345_v56  ;;  %v1073_v11 = vadd.f32 %v1696_v63, %v377_v57  ;;  %v347_v47 = vld [vmem:[#allocation2 + $0xc0] sm:$0xff] }
 0x115   : > { %1394 = vst.msk [vmem:[%s2137_s10 + $0x160] sm:$0xff] %vm258_vm1, %v1330_v53  ;;  %v1333_v2 = vmax.f32 %v1269_v55, 0.0  ;;  %v1267_v4 = vadd.f32 %v2125_v1, %v1196_v59  ;;  %v1169_v8 = vld [vmem:[#allocation2 + $0x90] sm:$0xff]  ;;  %1133 = vst.msk [vmem:[#allocation2 + $0x188] sm:$0xff] %vm258_vm1, %v1068_v61  ;;  %v844_v12 = vpop.f32.mrf.mxu0  ;;  %v972_v13 = vpop.f32.mrf.mxu1  ;;  %v379_v48 = vld [vmem:[#allocation2 + $0x1c0] sm:$0xff] }
 0x116   : > { %v1201_v9 = vld [vmem:[#allocation2 + $0x190] sm:$0xff]  ;;  %1365 = vst.msk [vmem:[%s2137_s10 + $0x78] sm:$0xff] %vm258_vm1, %v1301_v0  ;;  %v1299_v15 = vmax.f32 %v1235_v3, 0.0  ;;  %v1240_v17 = vadd.f32 %v2125_v1, %v1169_v8  ;;  %1106 = vst.msk [vmem:[#allocation2 + $0xb0] sm:$0xff] %vm258_vm1, %v1041_v10  ;;  %v1039_v19 = vadd.f32 %v844_v12, %v343_v5  ;;  %v1071_v20 = vadd.f32 %v972_v13, %v375_v6  ;;  %v350_v59 = vld [vmem:[#allocation2 + $0xd8] sm:$0xff] }
 0x117   : > { %1397 = vst.msk [vmem:[%s2137_s10 + $0x178] sm:$0xff] %vm258_vm1, %v1333_v2  ;;  %v1331_v16 = vmax.f32 %v1267_v4, 0.0  ;;  %v1272_v18 = vadd.f32 %v2125_v1, %v1201_v9  ;;  %1138 = vst.msk [vmem:[#allocation2 + $0x1b0] sm:$0xff] %vm258_vm1, %v1073_v11  ;;  %v1665_v21 = vpop.f32.mrf.mxu0  ;;  %v1697_v22 = vpop.f32.mrf.mxu1  ;;  %v1167_v27 = vld [vmem:[#allocation2 + $0x80] sm:$0xff]  ;;  %v382_v60 = vld [vmem:[#allocation2 + $0x1d8] sm:$0xff] }
 0x118   : > { %1363 = vst.msk [vmem:[%s2137_s10 + $0x68] sm:$0xff] %vm258_vm1, %v1299_v15  ;;  %v1304_v25 = vmax.f32 %v1240_v17, 0.0  ;;  %v1199_v28 = vld [vmem:[#allocation2 + $0x180] sm:$0xff]  ;;  %v1042_v29 = vadd.f32 %v1665_v21, %v346_v7  ;;  %v1074_v30 = vadd.f32 %v1697_v22, %v378_v14  ;;  %v1238_v31 = vadd.f32 %v2125_v1, %v1167_v27  ;;  %1104 = vst.msk [vmem:[#allocation2 + $0xa0] sm:$0xff] %vm258_vm1, %v1039_v19  ;;  %v348_v8 = vld [vmem:[#allocation2 + $0xc8] sm:$0xff] }
 0x119   : > { %1395 = vst.msk [vmem:[%s2137_s10 + $0x168] sm:$0xff] %vm258_vm1, %v1331_v16  ;;  %v1336_v26 = vmax.f32 %v1272_v18, 0.0  ;;  %v1270_v32 = vadd.f32 %v2125_v1, %v1199_v28  ;;  %1136 = vst.msk [vmem:[#allocation2 + $0x1a0] sm:$0xff] %vm258_vm1, %v1071_v20  ;;  %v847_v33 = vpop.f32.mrf.mxu0  ;;  %v975_v34 = vpop.f32.mrf.mxu1  ;;  %v1170_v37 = vld [vmem:[#allocation2 + $0x98] sm:$0xff]  ;;  %v380_v9 = vld [vmem:[#allocation2 + $0x1c8] sm:$0xff] }
 0x11a   : > { %1368 = vst.msk [vmem:[%s2137_s10 + $0x90] sm:$0xff] %vm258_vm1, %v1304_v25  ;;  %v1202_v38 = vld [vmem:[#allocation2 + $0x198] sm:$0xff]  ;;  %1107 = vst.msk [vmem:[#allocation2 + $0xb8] sm:$0xff] %vm258_vm1, %v1042_v29  ;;  %v1040_v39 = vadd.f32 %v847_v33, %v344_v23  ;;  %v1072_v40 = vadd.f32 %v975_v34, %v376_v24  ;;  %v1302_v41 = vmax.f32 %v1238_v31, 0.0  ;;  %v1241_v43 = vadd.f32 %v2125_v1, %v1170_v37  ;;  %v385_v27 = vld [vmem:[#allocation2 + $0x1f0] sm:$0xff] }
 0x11b   : > { %1400 = vst.msk [vmem:[%s2137_s10 + $0x190] sm:$0xff] %vm258_vm1, %v1336_v26  ;;  %1139 = vst.msk [vmem:[#allocation2 + $0x1b8] sm:$0xff] %vm258_vm1, %v1074_v30  ;;  %v1334_v42 = vmax.f32 %v1270_v32, 0.0  ;;  %v1273_v44 = vadd.f32 %v2125_v1, %v1202_v38  ;;  %v1668_v45 = vpop.f32.mrf.mxu0  ;;  %v1700_v46 = vpop.f32.mrf.mxu1  ;;  %v1168_v49 = vld [vmem:[#allocation2 + $0x88] sm:$0xff]  ;;  %v353_v26 = vld [vmem:[#allocation2 + $0xf0] sm:$0xff] }
 0x11c   : > { %v1200_v50 = vld [vmem:[#allocation2 + $0x188] sm:$0xff]  ;;  %1105 = vst.msk [vmem:[#allocation2 + $0xa8] sm:$0xff] %vm258_vm1, %v1040_v39  ;;  %1137 = vst.msk [vmem:[#allocation2 + $0x1a8] sm:$0xff] %vm258_vm1, %v1072_v40  ;;  %v1045_v51 = vadd.f32 %v1668_v45, %v349_v35  ;;  %v1077_v52 = vadd.f32 %v1700_v46, %v381_v36  ;;  %v1305_v53 = vmax.f32 %v1241_v43, 0.0  ;;  %v1239_v55 = vadd.f32 %v2125_v1, %v1168_v49  ;;  %v351_v38 = vld [vmem:[#allocation2 + $0xe0] sm:$0xff] }
 0x11d   : > { %1366 = vst.msk [vmem:[%s2137_s10 + $0x80] sm:$0xff] %vm258_vm1, %v1302_v41  ;;  %1398 = vst.msk [vmem:[%s2137_s10 + $0x180] sm:$0xff] %vm258_vm1, %v1334_v42  ;;  %v1337_v54 = vmax.f32 %v1273_v44, 0.0  ;;  %v1271_v56 = vadd.f32 %v2125_v1, %v1200_v50  ;;  %v860_v57 = vpop.f32.mrf.mxu0  ;;  %v988_v58 = vpop.f32.mrf.mxu1  ;;  %v1173_v61 = vld [vmem:[#allocation2 + $0xb0] sm:$0xff]  ;;  %v383_v39 = vld [vmem:[#allocation2 + $0x1e0] sm:$0xff] }
 0x11e   : > { %v1205_v62 = vld [vmem:[#allocation2 + $0x1b0] sm:$0xff]  ;;  %1110 = vst.msk [vmem:[#allocation2 + $0xd0] sm:$0xff] %vm258_vm1, %v1045_v51  ;;  %1142 = vst.msk [vmem:[#allocation2 + $0x1d0] sm:$0xff] %vm258_vm1, %v1077_v52  ;;  %v1043_v63 = vadd.f32 %v860_v57, %v347_v47  ;;  %v1075_v0 = vadd.f32 %v988_v58, %v379_v48  ;;  %v1303_v2 = vmax.f32 %v1239_v55, 0.0  ;;  %v1244_v4 = vadd.f32 %v2125_v1, %v1173_v61  ;;  %v354_v50 = vld [vmem:[#allocation2 + $0xf8] sm:$0xff] }
 0x11f   : > { %1369 = vst.msk [vmem:[%s2137_s10 + $0x98] sm:$0xff] %vm258_vm1, %v1305_v53  ;;  %1401 = vst.msk [vmem:[%s2137_s10 + $0x198] sm:$0xff] %vm258_vm1, %v1337_v54  ;;  %v1335_v3 = vmax.f32 %v1271_v56, 0.0  ;;  %v1276_v5 = vadd.f32 %v2125_v1, %v1205_v62  ;;  %v1669_v6 = vpop.f32.mrf.mxu0  ;;  %v1701_v7 = vpop.f32.mrf.mxu1  ;;  %v1171_v10 = vld [vmem:[#allocation2 + $0xa0] sm:$0xff]  ;;  %v386_v51 = vld [vmem:[#allocation2 + $0x1f8] sm:$0xff] }
 0x120   : > { %v1203_v11 = vld [vmem:[#allocation2 + $0x1a0] sm:$0xff]  ;;  %1108 = vst.msk [vmem:[#allocation2 + $0xc0] sm:$0xff] %vm258_vm1, %v1043_v63  ;;  %1140 = vst.msk [vmem:[#allocation2 + $0x1c0] sm:$0xff] %vm258_vm1, %v1075_v0  ;;  %v1046_v12 = vadd.f32 %v1669_v6, %v350_v59  ;;  %v1078_v13 = vadd.f32 %v1701_v7, %v382_v60  ;;  %v1308_v14 = vmax.f32 %v1244_v4, 0.0  ;;  %v1242_v16 = vadd.f32 %v2125_v1, %v1171_v10  ;;  %v352_v62 = vld [vmem:[#allocation2 + $0xe8] sm:$0xff] }
 0x121   : > { %1367 = vst.msk [vmem:[%s2137_s10 + $0x88] sm:$0xff] %vm258_vm1, %v1303_v2  ;;  %1399 = vst.msk [vmem:[%s2137_s10 + $0x188] sm:$0xff] %vm258_vm1, %v1335_v3  ;;  %v1340_v15 = vmax.f32 %v1276_v5, 0.0  ;;  %v1274_v17 = vadd.f32 %v2125_v1, %v1203_v11  ;;  %v1174_v18 = vld [vmem:[#allocation2 + $0xb8] sm:$0xff]  ;;  %v863_v20 = vpop.f32.mrf.mxu0  ;;  %v991_v21 = vpop.f32.mrf.mxu1  ;;  %v384_v63 = vld [vmem:[#allocation2 + $0x1e8] sm:$0xff] }
 0x122   : > { %v1206_v19 = vld [vmem:[#allocation2 + $0x1b8] sm:$0xff]  ;;  %v1245_v22 = vadd.f32 %v2125_v1, %v1174_v18  ;;  %1111 = vst.msk [vmem:[#allocation2 + $0xd8] sm:$0xff] %vm258_vm1, %v1046_v12  ;;  %1143 = vst.msk [vmem:[#allocation2 + $0x1d8] sm:$0xff] %vm258_vm1, %v1078_v13  ;;  %v1044_v24 = vadd.f32 %v863_v20, %v348_v8  ;;  %v1076_v25 = vadd.f32 %v991_v21, %v380_v9  ;;  %v1306_v28 = vmax.f32 %v1242_v16, 0.0 }
 0x123   : > { %v1277_v23 = vadd.f32 %v2125_v1, %v1206_v19  ;;  %1372 = vst.msk [vmem:[%s2137_s10 + $0xb0] sm:$0xff] %vm258_vm1, %v1308_v14  ;;  %1404 = vst.msk [vmem:[%s2137_s10 + $0x1b0] sm:$0xff] %vm258_vm1, %v1340_v15  ;;  %v1338_v29 = vmax.f32 %v1274_v17, 0.0  ;;  %v1172_v30 = vld [vmem:[#allocation2 + $0xa8] sm:$0xff]  ;;  %v1672_v32 = vpop.f32.mrf.mxu0  ;;  %v1704_v33 = vpop.f32.mrf.mxu1 }
 0x124   : > { %v1204_v31 = vld [vmem:[#allocation2 + $0x1a8] sm:$0xff]  ;;  %v1309_v34 = vmax.f32 %v1245_v22, 0.0  ;;  %v1243_v36 = vadd.f32 %v2125_v1, %v1172_v30  ;;  %1109 = vst.msk [vmem:[#allocation2 + $0xc8] sm:$0xff] %vm258_vm1, %v1044_v24  ;;  %1141 = vst.msk [vmem:[#allocation2 + $0x1c8] sm:$0xff] %vm258_vm1, %v1076_v25  ;;  %v1049_v42 = vadd.f32 %v1672_v32, %v353_v26  ;;  %v1081_v43 = vadd.f32 %v1704_v33, %v385_v27 }
 0x125   : > { %v1341_v35 = vmax.f32 %v1277_v23, 0.0  ;;  %v1275_v37 = vadd.f32 %v2125_v1, %v1204_v31  ;;  %1370 = vst.msk [vmem:[%s2137_s10 + $0xa0] sm:$0xff] %vm258_vm1, %v1306_v28  ;;  %1402 = vst.msk [vmem:[%s2137_s10 + $0x1a0] sm:$0xff] %vm258_vm1, %v1338_v29  ;;  %v1177_v40 = vld [vmem:[#allocation2 + $0xd0] sm:$0xff]  ;;  %v876_v44 = vpop.f32.mrf.mxu0  ;;  %v1004_v45 = vpop.f32.mrf.mxu1 }
 0x126   : > { %v1209_v41 = vld [vmem:[#allocation2 + $0x1d0] sm:$0xff]  ;;  %1373 = vst.msk [vmem:[%s2137_s10 + $0xb8] sm:$0xff] %vm258_vm1, %v1309_v34  ;;  %v1307_v46 = vmax.f32 %v1243_v36, 0.0  ;;  %v1248_v48 = vadd.f32 %v2125_v1, %v1177_v40  ;;  %1114 = vst.msk [vmem:[#allocation2 + $0xf0] sm:$0xff] %vm258_vm1, %v1049_v42  ;;  %v1047_v54 = vadd.f32 %v876_v44, %v351_v38  ;;  %v1079_v55 = vadd.f32 %v1004_v45, %v383_v39 }
 0x127   : > { %1405 = vst.msk [vmem:[%s2137_s10 + $0x1b8] sm:$0xff] %vm258_vm1, %v1341_v35  ;;  %v1339_v47 = vmax.f32 %v1275_v37, 0.0  ;;  %v1280_v49 = vadd.f32 %v2125_v1, %v1209_v41  ;;  %v1175_v52 = vld [vmem:[#allocation2 + $0xc0] sm:$0xff]  ;;  %1146 = vst.msk [vmem:[#allocation2 + $0x1f0] sm:$0xff] %vm258_vm1, %v1081_v43  ;;  %v1673_v56 = vpop.f32.mrf.mxu0  ;;  %v1705_v57 = vpop.f32.mrf.mxu1 }
 0x128   : > { %v1207_v53 = vld [vmem:[#allocation2 + $0x1c0] sm:$0xff]  ;;  %1371 = vst.msk [vmem:[%s2137_s10 + $0xa8] sm:$0xff] %vm258_vm1, %v1307_v46  ;;  %v1312_v58 = vmax.f32 %v1248_v48, 0.0  ;;  %v1246_v60 = vadd.f32 %v2125_v1, %v1175_v52  ;;  %1112 = vst.msk [vmem:[#allocation2 + $0xe0] sm:$0xff] %vm258_vm1, %v1047_v54  ;;  %v1050_v3 = vadd.f32 %v1673_v56, %v354_v50  ;;  %v1082_v4 = vadd.f32 %v1705_v57, %v386_v51 }
 0x129   : > { %1403 = vst.msk [vmem:[%s2137_s10 + $0x1a8] sm:$0xff] %vm258_vm1, %v1339_v47  ;;  %v1344_v59 = vmax.f32 %v1280_v49, 0.0  ;;  %v1278_v61 = vadd.f32 %v2125_v1, %v1207_v53  ;;  %v1178_v0 = vld [vmem:[#allocation2 + $0xd8] sm:$0xff]  ;;  %1144 = vst.msk [vmem:[#allocation2 + $0x1e0] sm:$0xff] %vm258_vm1, %v1079_v55  ;;  %v879_v5 = vpop.f32.mrf.mxu0  ;;  %v1007_v6 = vpop.f32.mrf.mxu1 }
 0x12a   : > { %v1210_v2 = vld [vmem:[#allocation2 + $0x1d8] sm:$0xff]  ;;  %1376 = vst.msk [vmem:[%s2137_s10 + $0xd0] sm:$0xff] %vm258_vm1, %v1312_v58  ;;  %v1310_v7 = vmax.f32 %v1246_v60, 0.0  ;;  %v1249_v9 = vadd.f32 %v2125_v1, %v1178_v0  ;;  %1115 = vst.msk [vmem:[#allocation2 + $0xf8] sm:$0xff] %vm258_vm1, %v1050_v3  ;;  %v1048_v13 = vadd.f32 %v879_v5, %v352_v62  ;;  %v1080_v14 = vadd.f32 %v1007_v6, %v384_v63 }
 0x12b   : > { %1408 = vst.msk [vmem:[%s2137_s10 + $0x1d0] sm:$0xff] %vm258_vm1, %v1344_v59  ;;  %v1342_v8 = vmax.f32 %v1278_v61, 0.0  ;;  %v1281_v10 = vadd.f32 %v2125_v1, %v1210_v2  ;;  %v1176_v11 = vld [vmem:[#allocation2 + $0xc8] sm:$0xff]  ;;  %1147 = vst.msk [vmem:[#allocation2 + $0x1f8] sm:$0xff] %vm258_vm1, %v1082_v4 }
 0x12c   : > { %v1208_v12 = vld [vmem:[#allocation2 + $0x1c8] sm:$0xff]  ;;  %1374 = vst.msk [vmem:[%s2137_s10 + $0xc0] sm:$0xff] %vm258_vm1, %v1310_v7  ;;  %v1313_v15 = vmax.f32 %v1249_v9, 0.0  ;;  %v1247_v17 = vadd.f32 %v2125_v1, %v1176_v11  ;;  %1113 = vst.msk [vmem:[#allocation2 + $0xe8] sm:$0xff] %vm258_vm1, %v1048_v13 }
 0x12d   : > { %1406 = vst.msk [vmem:[%s2137_s10 + $0x1c0] sm:$0xff] %vm258_vm1, %v1342_v8  ;;  %v1345_v16 = vmax.f32 %v1281_v10, 0.0  ;;  %v1279_v18 = vadd.f32 %v2125_v1, %v1208_v12  ;;  %1145 = vst.msk [vmem:[#allocation2 + $0x1e8] sm:$0xff] %vm258_vm1, %v1080_v14  ;;  %v1181_v21 = vld [vmem:[#allocation2 + $0xf0] sm:$0xff] }
 0x12e   : > { %1377 = vst.msk [vmem:[%s2137_s10 + $0xd8] sm:$0xff] %vm258_vm1, %v1313_v15  ;;  %v1311_v19 = vmax.f32 %v1247_v17, 0.0  ;;  %v1213_v22 = vld [vmem:[#allocation2 + $0x1f0] sm:$0xff]  ;;  %v1252_v23 = vadd.f32 %v2125_v1, %v1181_v21 }
 0x12f   : > { %1409 = vst.msk [vmem:[%s2137_s10 + $0x1d8] sm:$0xff] %vm258_vm1, %v1345_v16  ;;  %v1343_v20 = vmax.f32 %v1279_v18, 0.0  ;;  %v1284_v24 = vadd.f32 %v2125_v1, %v1213_v22  ;;  %v1179_v25 = vld [vmem:[#allocation2 + $0xe0] sm:$0xff] }
 0x130   : > { %1375 = vst.msk [vmem:[%s2137_s10 + $0xc8] sm:$0xff] %vm258_vm1, %v1311_v19  ;;  %v1211_v26 = vld [vmem:[#allocation2 + $0x1e0] sm:$0xff]  ;;  %v1316_v27 = vmax.f32 %v1252_v23, 0.0  ;;  %v1250_v29 = vadd.f32 %v2125_v1, %v1179_v25 }
 0x131   : > { %1407 = vst.msk [vmem:[%s2137_s10 + $0x1c8] sm:$0xff] %vm258_vm1, %v1343_v20  ;;  %v1348_v28 = vmax.f32 %v1284_v24, 0.0  ;;  %v1282_v30 = vadd.f32 %v2125_v1, %v1211_v26  ;;  %v1182_v31 = vld [vmem:[#allocation2 + $0xf8] sm:$0xff] }
 0x132   : > { %v1214_v32 = vld [vmem:[#allocation2 + $0x1f8] sm:$0xff]  ;;  %1380 = vst.msk [vmem:[%s2137_s10 + $0xf0] sm:$0xff] %vm258_vm1, %v1316_v27  ;;  %v1314_v33 = vmax.f32 %v1250_v29, 0.0  ;;  %v1253_v35 = vadd.f32 %v2125_v1, %v1182_v31 }
 0x133   : > { %1412 = vst.msk [vmem:[%s2137_s10 + $0x1f0] sm:$0xff] %vm258_vm1, %v1348_v28  ;;  %v1346_v34 = vmax.f32 %v1282_v30, 0.0  ;;  %v1285_v36 = vadd.f32 %v2125_v1, %v1214_v32  ;;  %v1180_v37 = vld [vmem:[#allocation2 + $0xe8] sm:$0xff] }
 0x134   : > { %v1212_v38 = vld [vmem:[#allocation2 + $0x1e8] sm:$0xff]  ;;  %1378 = vst.msk [vmem:[%s2137_s10 + $0xe0] sm:$0xff] %vm258_vm1, %v1314_v33  ;;  %v1317_v39 = vmax.f32 %v1253_v35, 0.0  ;;  %v1251_v41 = vadd.f32 %v2125_v1, %v1180_v37 }
 0x135   : > { %1410 = vst.msk [vmem:[%s2137_s10 + $0x1e0] sm:$0xff] %vm258_vm1, %v1346_v34  ;;  %v1349_v40 = vmax.f32 %v1285_v36, 0.0  ;;  %v1283_v42 = vadd.f32 %v2125_v1, %v1212_v38 }
 0x136   : > { %1381 = vst.msk [vmem:[%s2137_s10 + $0xf8] sm:$0xff] %vm258_vm1, %v1317_v39  ;;  %v1315_v43 = vmax.f32 %v1251_v41, 0.0 }
 0x137   : > { %1413 = vst.msk [vmem:[%s2137_s10 + $0x1f8] sm:$0xff] %vm258_vm1, %v1349_v40  ;;  %v1347_v44 = vmax.f32 %v1283_v42, 0.0 }
 0x138   : > { %1379 = vst.msk [vmem:[%s2137_s10 + $0xe8] sm:$0xff] %vm258_vm1, %v1315_v43 }
 0x139   : > { %1411 = vst.msk [vmem:[%s2137_s10 + $0x1e8] sm:$0xff] %vm258_vm1, %v1347_v44 }
 0x13a PF: > { %s14_s14 = sadd.s32 1, %s1835_s14   ;;  %s2399_s12 = smov %s1831_s13 }
 0x13b   : > { %p11_p2 = scmp.ge.s32.totalorder %s14_s14, 4   ;;  %s2400_s13 = smov %s2402_s16 }
 0x13d   :  { %13 = sbr.rel (!%p11_p2) target bundleno = 2 (0x2), region = 79 }
 0x142   :  { %1442 = vsyncpa [#allocation4], 1 }
 0x143   :  { %1444 = vsyncpa [#allocation4 + $0x1], 1 }

// kernel: _lambda_.21
= control target key start
LH: loop header
LB: loop body
LE: loop exit
PB: predicated region body
PF: predicated region fallthrough
CT: control target
= control target key end

     0   :  { %s1627_s12 = smov 0   ;;  %s1629_s13 = smov 0   ;;  %s1929_s0 = inlined_call_operand.vmem [shape: bf16[128,11264], index: 0, kind: input, shape index: {}]   ;;  %s1930_s1 = inlined_call_operand.vmem [shape: bf16[11264,64], index: 1, kind: input, shape index: {}]   ;;  %s1931_s2 = inlined_call_operand.vmem [shape: f32[1,64], index: 2, kind: input, shape index: {}]   ;;  %s1932_s3 = inlined_call_operand.vmem [shape: f32[128,64], index: 3, kind: output, shape index: {}]  }
   0x1   :  { %s1631_s14 = smov 0   ;;  %s1633_s15 = smov 0  }
   0x2   :  { %s1635_s16 = smov 0  }
   0x3 LB: > { %s25_s17 = sadd.s32 1, %s1600_s15  ;;  %p48_p1 = scmp.ne.s32.totalorder %s1592_s13, %s1588_s12  ;;  %s1604_s16 = sphi %s1635_s16, %s13_s16   ;;  %s1600_s15 = sphi %s1633_s15, %s1936_s15   ;;  %s1596_s14 = sphi %s1631_s14, %s1935_s14   ;;  %s1592_s13 = sphi %s1629_s13, %s1934_s13   ;;  %s1588_s12 = sphi %s1627_s12, %s1933_s12  }
   0x4   : > { %p26_p0 = scmp.ge.s32.totalorder %s25_s17, 22  ;;  %p49_p2 = scmp.eq.s32.totalorder %s1604_s16, 0 }
   0x5   : > { %s41_s19 = sadd.s32 1, %s1592_s13  ;;  %p1237_p5 = scmp.ge.s32.totalorder %s1604_s16, 22 }
   0x6   : > { %s1938_s17 = smov (%p26_p0, %s25_s17), 0  ;;  %p50_p3 = por %p49_p2, %p48_p1 }
   0x7   : > { %s37_s18 = ssub.s32 %s1600_s15, %s1938_s17  ;;  %162 = sbr.rel (%p1237_p5) target bundleno = 32 (0x20), region = 20 }
   0x8   : > { %p39_p4 = scmp.eq.s32.totalorder %s37_s18, 0 }
   0xa   : > { %s1662_s20 = scalar_select %p39_p4, %s1592_s13, %s41_s19  }
   0xc   : > { %165 = sbr.rel (!%p50_p3) target bundleno = 32 (0x20), region = 24  ;;  %s167_s21 = sand.u32 (%p50_p3), 1, %s1592_s13  }
   0xd   : > { %s1316_s22 = sshll.u32 (%p50_p3), %s1600_s15, 4  ;;  %s1238_s23 = sshll.u32 (%p50_p3), %s167_s21, 8 }
   0xe   : > { %s1670_s26 = scalar_lea.vmem (%p50_p3), %s1929_s0, %s1316_s22  ;;  %s1675_s27 = scalar_lea.vmem (%p50_p3), [#allocation3], %s1238_s23 }
   0xf   : > { %v188_v0 = vld [vmem:[%s1670_s26] sm:$0xff] (%p50_p3)  ;;  %v190_v1 = vld [vmem:[%s1670_s26 + $0x8] sm:$0xff] (%p50_p3) }
  0x10   : > { %v192_v2 = vld [vmem:[%s1670_s26 + $0x160] sm:$0xff] (%p50_p3)  ;;  %189 = vst [vmem:[%s1675_s27] sm:$0xff] (%p50_p3), %v188_v0  ;;  %191 = vst [vmem:[%s1675_s27 + $0x8] sm:$0xff] (%p50_p3), %v190_v1  ;;  %v194_v3 = vld [vmem:[%s1670_s26 + $0x168] sm:$0xff] (%p50_p3) }
  0x11   : > { %193 = vst [vmem:[%s1675_s27 + $0x10] sm:$0xff] %v192_v2  ;;  %v196_v4 = vld [vmem:[%s1670_s26 + $0x2c0] sm:$0xff]  ;;  %v198_v5 = vld [vmem:[%s1670_s26 + $0x2c8] sm:$0xff]  ;;  %195 = vst [vmem:[%s1675_s27 + $0x18] sm:$0xff] %v194_v3 }
  0x12   : > { %197 = vst [vmem:[%s1675_s27 + $0x20] sm:$0xff] %v196_v4  ;;  %199 = vst [vmem:[%s1675_s27 + $0x28] sm:$0xff] %v198_v5  ;;  %v200_v6 = vld [vmem:[%s1670_s26 + $0x420] sm:$0xff]  ;;  %v202_v7 = vld [vmem:[%s1670_s26 + $0x428] sm:$0xff] }
  0x13   : > { %v204_v8 = vld [vmem:[%s1670_s26 + $0x580] sm:$0xff]  ;;  %201 = vst [vmem:[%s1675_s27 + $0x30] sm:$0xff] %v200_v6  ;;  %203 = vst [vmem:[%s1675_s27 + $0x38] sm:$0xff] %v202_v7  ;;  %v206_v9 = vld [vmem:[%s1670_s26 + $0x588] sm:$0xff] }
  0x14   : > { %205 = vst [vmem:[%s1675_s27 + $0x40] sm:$0xff] %v204_v8  ;;  %v208_v10 = vld [vmem:[%s1670_s26 + $0x6e0] sm:$0xff]  ;;  %v210_v11 = vld [vmem:[%s1670_s26 + $0x6e8] sm:$0xff]  ;;  %207 = vst [vmem:[%s1675_s27 + $0x48] sm:$0xff] %v206_v9 }
  0x15   : > { %209 = vst [vmem:[%s1675_s27 + $0x50] sm:$0xff] %v208_v10  ;;  %211 = vst [vmem:[%s1675_s27 + $0x58] sm:$0xff] %v210_v11  ;;  %v212_v12 = vld [vmem:[%s1670_s26 + $0x840] sm:$0xff]  ;;  %v214_v13 = vld [vmem:[%s1670_s26 + $0x848] sm:$0xff] }
  0x16   : > { %v216_v14 = vld [vmem:[%s1670_s26 + $0x9a0] sm:$0xff]  ;;  %213 = vst [vmem:[%s1675_s27 + $0x60] sm:$0xff] %v212_v12  ;;  %215 = vst [vmem:[%s1675_s27 + $0x68] sm:$0xff] %v214_v13  ;;  %v218_v15 = vld [vmem:[%s1670_s26 + $0x9a8] sm:$0xff] }
  0x17   : > { %217 = vst [vmem:[%s1675_s27 + $0x70] sm:$0xff] %v216_v14  ;;  %v220_v16 = vld [vmem:[%s1670_s26 + $0xb00] sm:$0xff]  ;;  %v222_v17 = vld [vmem:[%s1670_s26 + $0xb08] sm:$0xff]  ;;  %219 = vst [vmem:[%s1675_s27 + $0x78] sm:$0xff] %v218_v15 }
  0x18   : > { %221 = vst [vmem:[%s1675_s27 + $0x80] sm:$0xff] %v220_v16  ;;  %223 = vst [vmem:[%s1675_s27 + $0x88] sm:$0xff] %v222_v17  ;;  %v224_v18 = vld [vmem:[%s1670_s26 + $0xc60] sm:$0xff]  ;;  %v226_v19 = vld [vmem:[%s1670_s26 + $0xc68] sm:$0xff] }
  0x19   : > { %v228_v20 = vld [vmem:[%s1670_s26 + $0xdc0] sm:$0xff]  ;;  %225 = vst [vmem:[%s1675_s27 + $0x90] sm:$0xff] %v224_v18  ;;  %227 = vst [vmem:[%s1675_s27 + $0x98] sm:$0xff] %v226_v19  ;;  %v230_v21 = vld [vmem:[%s1670_s26 + $0xdc8] sm:$0xff] }
  0x1a   : > { %229 = vst [vmem:[%s1675_s27 + $0xa0] sm:$0xff] %v228_v20  ;;  %v232_v22 = vld [vmem:[%s1670_s26 + $0xf20] sm:$0xff]  ;;  %v234_v23 = vld [vmem:[%s1670_s26 + $0xf28] sm:$0xff]  ;;  %231 = vst [vmem:[%s1675_s27 + $0xa8] sm:$0xff] %v230_v21 }
  0x1b   : > { %233 = vst [vmem:[%s1675_s27 + $0xb0] sm:$0xff] %v232_v22  ;;  %235 = vst [vmem:[%s1675_s27 + $0xb8] sm:$0xff] %v234_v23  ;;  %v236_v24 = vld [vmem:[%s1670_s26 + $0x1080] sm:$0xff]  ;;  %v238_v25 = vld [vmem:[%s1670_s26 + $0x1088] sm:$0xff] }
  0x1c   : > { %v240_v26 = vld [vmem:[%s1670_s26 + $0x11e0] sm:$0xff]  ;;  %237 = vst [vmem:[%s1675_s27 + $0xc0] sm:$0xff] %v236_v24  ;;  %239 = vst [vmem:[%s1675_s27 + $0xc8] sm:$0xff] %v238_v25  ;;  %v242_v27 = vld [vmem:[%s1670_s26 + $0x11e8] sm:$0xff] }
  0x1d   : > { %241 = vst [vmem:[%s1675_s27 + $0xd0] sm:$0xff] %v240_v26  ;;  %v244_v28 = vld [vmem:[%s1670_s26 + $0x1340] sm:$0xff]  ;;  %v246_v29 = vld [vmem:[%s1670_s26 + $0x1348] sm:$0xff]  ;;  %243 = vst [vmem:[%s1675_s27 + $0xd8] sm:$0xff] %v242_v27 }
  0x1e   : > { %245 = vst [vmem:[%s1675_s27 + $0xe0] sm:$0xff] %v244_v28  ;;  %247 = vst [vmem:[%s1675_s27 + $0xe8] sm:$0xff] %v246_v29  ;;  %v248_v30 = vld [vmem:[%s1670_s26 + $0x14a0] sm:$0xff]  ;;  %v250_v31 = vld [vmem:[%s1670_s26 + $0x14a8] sm:$0xff] }
  0x1f   : > { %249 = vst [vmem:[%s1675_s27 + $0xf0] sm:$0xff] %v248_v30  ;;  %251 = vst [vmem:[%s1675_s27 + $0xf8] sm:$0xff] %v250_v31 }
  0x20 PF: > { %p1241_p6 = scmp.ge.s32.totalorder %s1604_s16, 1  ;;  %p268_p7 = scmp.lt.s32.totalorder %s1604_s16, 23 }
  0x22   : > { %p269_p8 = pnand %p1241_p6, %p268_p7 }
  0x23   : > { %s275_s28 = sand.u32 (!%p269_p8), 1, %s1588_s12   ;;  %s1243_s29 = sshll.u32 (!%p269_p8), %s1596_s14, 6 }
  0x24   : > { %272 = sbr.rel (%p269_p8) target bundleno = 366 (0x16e), region = 51  ;;  %s1242_s30 = sshll.u32 (!%p269_p8), %s275_s28, 8 }
  0x25   : > { %p315_p9 = scmp.lt.s32.totalorder (!%p269_p8), %s1243_s29, 1407  ;;  %s1747_s8 = scalar_lea.vmem (!%p269_p8), [#allocation3], %s1242_s30 }
  0x26   : > { %p1245_p10 = scmp.ne.s32.totalorder (!%p269_p8), %s1596_s14, 0 }
  0x29   : > { %s1940_s29 = smov (!%p315_p9, %s1243_s29), 1407  ;;  %339 = sbr.rel (%p1245_p10) target bundleno = 55 (0x37), region = 59 }
  0x2a   : > { %s1244_s4 = sshll.u32 %s1940_s29, 2 }
  0x2b   : > { %s1745_s7 = scalar_lea.vmem %s1930_s1, %s1244_s4 }
  0x2e   : > { %vm340_vm0 = vcmask 523264   ;;  %v1606_v32 = vmov 0.0  }
  0x2f   : > { %341 = vst.msk [vmem:[#allocation2] sm:$0xff] %vm340_vm0, %v1606_v32  ;;  %342 = vst.msk [vmem:[#allocation2 + $0x8] sm:$0xff] %vm340_vm0, %v1606_v32 }
  0x30   : > { %343 = vst.msk [vmem:[#allocation2 + $0x10] sm:$0xff] %vm340_vm0, %v1606_v32  ;;  %344 = vst.msk [vmem:[#allocation2 + $0x18] sm:$0xff] %vm340_vm0, %v1606_v32 }
  0x31   : > { %345 = vst.msk [vmem:[#allocation2 + $0x20] sm:$0xff] %vm340_vm0, %v1606_v32  ;;  %346 = vst.msk [vmem:[#allocation2 + $0x28] sm:$0xff] %vm340_vm0, %v1606_v32 }
  0x32   : > { %347 = vst.msk [vmem:[#allocation2 + $0x30] sm:$0xff] %vm340_vm0, %v1606_v32  ;;  %348 = vst.msk [vmem:[#allocation2 + $0x38] sm:$0xff] %vm340_vm0, %v1606_v32 }
  0x33   : > { %349 = vst.msk [vmem:[#allocation2 + $0x40] sm:$0xff] %vm340_vm0, %v1606_v32  ;;  %350 = vst.msk [vmem:[#allocation2 + $0x48] sm:$0xff] %vm340_vm0, %v1606_v32 }
  0x34   : > { %351 = vst.msk [vmem:[#allocation2 + $0x50] sm:$0xff] %vm340_vm0, %v1606_v32  ;;  %352 = vst.msk [vmem:[#allocation2 + $0x58] sm:$0xff] %vm340_vm0, %v1606_v32 }
  0x35   : > { %353 = vst.msk [vmem:[#allocation2 + $0x60] sm:$0xff] %vm340_vm0, %v1606_v32  ;;  %354 = vst.msk [vmem:[#allocation2 + $0x68] sm:$0xff] %vm340_vm0, %v1606_v32 }
  0x36   : > { %355 = vst.msk [vmem:[#allocation2 + $0x70] sm:$0xff] %vm340_vm0, %v1606_v32  ;;  %356 = vst.msk [vmem:[#allocation2 + $0x78] sm:$0xff] %vm340_vm0, %v1606_v32 }
  0x37 PF: > { %v1486_v33 = vld [vmem:[%s1745_s7 + $0x78] sm:$0xff]   ;;  %v1490_v37 = vld [vmem:[%s1745_s7 + $0x70] sm:$0xff]   ;;  %v1494_v41 = vld [vmem:[%s1745_s7 + $0x68] sm:$0xff]   ;;  %vm1031_vm1 = vcmask 523264   ;;  %p1310_p11 = scmp.ne.s32.totalorder %s1596_s14, 21 }
  0x38   : > { %v1487_v34 = vld [vmem:[%s1745_s7 + $0xf8] sm:$0xff]   ;;  %1317 = vmatprep.subr.bf16.mxu0 %v1486_v33  ;;  %v1491_v38 = vld [vmem:[%s1745_s7 + $0xf0] sm:$0xff]   ;;  %v1495_v42 = vld [vmem:[%s1745_s7 + $0xe8] sm:$0xff]  }
  0x39   : > { %v1488_v35 = vld [vmem:[%s1745_s7 + $0x38] sm:$0xff]   ;;  %1381 = vmatprep.subr.bf16.mxu1 %v1487_v34  ;;  %v1492_v39 = vld [vmem:[%s1745_s7 + $0x30] sm:$0xff]   ;;  %v1496_v43 = vld [vmem:[%s1745_s7 + $0x28] sm:$0xff]  }
  0x3a   : > { %v1489_v36 = vld [vmem:[%s1745_s7 + $0xb8] sm:$0xff]   ;;  %1318 = vmatpush3.bf16.msra.mxu0 %v1488_v35  ;;  %v1493_v40 = vld [vmem:[%s1745_s7 + $0xb0] sm:$0xff]   ;;  %v1497_v44 = vld [vmem:[%s1745_s7 + $0xa8] sm:$0xff]  }
  0x3b   : > { %1382 = vmatpush3.bf16.msra.mxu1 %v1489_v36  ;;  %1319 = vmatprep.subr.bf16.mxu0 %v1490_v37  ;;  %v1498_v45 = vld [vmem:[%s1745_s7 + $0x60] sm:$0xff]   ;;  %v1502_v49 = vld [vmem:[%s1745_s7 + $0x58] sm:$0xff]   ;;  %v1506_v53 = vld [vmem:[%s1745_s7 + $0x50] sm:$0xff]  }
  0x3c   : > { %1383 = vmatprep.subr.bf16.mxu1 %v1491_v38  ;;  %v1499_v46 = vld [vmem:[%s1745_s7 + $0xe0] sm:$0xff]   ;;  %v1503_v50 = vld [vmem:[%s1745_s7 + $0xd8] sm:$0xff]   ;;  %v1507_v54 = vld [vmem:[%s1745_s7 + $0xd0] sm:$0xff]  }
  0x3d   : > { %v1500_v47 = vld [vmem:[%s1745_s7 + $0x20] sm:$0xff]   ;;  %v1504_v51 = vld [vmem:[%s1745_s7 + $0x18] sm:$0xff]   ;;  %v1508_v55 = vld [vmem:[%s1745_s7 + $0x10] sm:$0xff]  }
  0x3e   : > { %1320 = vmatpush3.bf16.msra.mxu0 %v1492_v39  ;;  %v1501_v48 = vld [vmem:[%s1745_s7 + $0xa0] sm:$0xff]   ;;  %v1505_v52 = vld [vmem:[%s1745_s7 + $0x98] sm:$0xff]   ;;  %v1509_v56 = vld [vmem:[%s1745_s7 + $0x90] sm:$0xff]  }
  0x3f   : > { %1384 = vmatpush3.bf16.msra.mxu1 %v1493_v40  ;;  %1321 = vmatprep.subr.bf16.mxu0 %v1494_v41  ;;  %v1510_v57 = vld [vmem:[%s1745_s7 + $0x48] sm:$0xff]   ;;  %v1514_v61 = vld [vmem:[%s1745_s7 + $0x40] sm:$0xff]  }
  0x40   : > { %1385 = vmatprep.subr.bf16.mxu1 %v1495_v42  ;;  %v1511_v58 = vld [vmem:[%s1745_s7 + $0xc8] sm:$0xff]   ;;  %v1515_v62 = vld [vmem:[%s1745_s7 + $0xc0] sm:$0xff]  }
  0x41   : > { %v1512_v59 = vld [vmem:[%s1745_s7 + $0x8] sm:$0xff]   ;;  %v1516_v63 = vld [vmem:[%s1745_s7] sm:$0xff]  }
  0x42   : > { %1322 = vmatpush3.bf16.msra.mxu0 %v1496_v43  ;;  %v1513_v60 = vld [vmem:[%s1745_s7 + $0x88] sm:$0xff]   ;;  %v1517_v0 = vld [vmem:[%s1745_s7 + $0x80] sm:$0xff]  }
  0x43   : > { %1386 = vmatpush3.bf16.msra.mxu1 %v1497_v44  ;;  %1323 = vmatprep.subr.bf16.mxu0 %v1498_v45  ;;  %v1518_v1 = vld [vmem:[%s1747_s8] ss:$16 sps:$4 sm:$0xff]   ;;  %v1520_v2 = vld [vmem:[%s1747_s8 + $0x4] ss:$16 sps:$4 sm:$0xff]   ;;  %v1521_v3 = vld [vmem:[%s1747_s8 + $0x8] ss:$16 sps:$4 sm:$0xff]  }
  0x44   : > { %1387 = vmatprep.subr.bf16.mxu1 %v1499_v46  ;;  %v1523_v4 = vld [vmem:[%s1747_s8 + $0xc] ss:$16 sps:$4 sm:$0xff]   ;;  %853 = vmatprep.mubr.bf16.mxu0 %v1520_v2  ;;  %v1524_v5 = vld [vmem:[%s1747_s8 + $0x24] ss:$16 sps:$4 sm:$0xff]   ;;  %v1528_v7 = vld [vmem:[%s1747_s8 + $0x20] ss:$16 sps:$4 sm:$0xff]  }
  0x45   : > { %950 = vmatprep.mubr.bf16.mxu1 %v1523_v4  ;;  %v1526_v6 = vld [vmem:[%s1747_s8 + $0x2c] ss:$16 sps:$4 sm:$0xff]   ;;  %v1529_v8 = vld [vmem:[%s1747_s8 + $0x28] ss:$16 sps:$4 sm:$0xff]   ;;  %v1530_v9 = vld [vmem:[%s1747_s8 + $0x44] ss:$16 sps:$4 sm:$0xff]  }
  0x46   : > { %1324 = vmatpush3.bf16.msra.mxu0 %v1500_v47  ;;  %v1532_v10 = vld [vmem:[%s1747_s8 + $0x4c] ss:$16 sps:$4 sm:$0xff]   ;;  %v1534_v11 = vld [vmem:[%s1747_s8 + $0x40] ss:$16 sps:$4 sm:$0xff]   ;;  %v1535_v12 = vld [vmem:[%s1747_s8 + $0x48] ss:$16 sps:$4 sm:$0xff]  }
  0x47   : > { %1388 = vmatpush3.bf16.msra.mxu1 %v1501_v48  ;;  %1325 = vmatprep.subr.bf16.mxu0 %v1502_v49  ;;  %v1536_v13 = vld [vmem:[%s1747_s8 + $0x64] ss:$16 sps:$4 sm:$0xff]   ;;  %v1538_v14 = vld [vmem:[%s1747_s8 + $0x6c] ss:$16 sps:$4 sm:$0xff]   ;;  %v1540_v15 = vld [vmem:[%s1747_s8 + $0x60] ss:$16 sps:$4 sm:$0xff]  }
  0x48   : > { %1389 = vmatprep.subr.bf16.mxu1 %v1503_v50  ;;  %v1541_v16 = vld [vmem:[%s1747_s8 + $0x68] ss:$16 sps:$4 sm:$0xff]   ;;  %v1542_v17 = vld [vmem:[%s1747_s8 + $0x84] ss:$16 sps:$4 sm:$0xff]   ;;  %v1544_v18 = vld [vmem:[%s1747_s8 + $0x8c] ss:$16 sps:$4 sm:$0xff]  }
  0x49   : > { %v1546_v19 = vld [vmem:[%s1747_s8 + $0x80] ss:$16 sps:$4 sm:$0xff]   ;;  %v1547_v20 = vld [vmem:[%s1747_s8 + $0x88] ss:$16 sps:$4 sm:$0xff]   ;;  %v1548_v21 = vld [vmem:[%s1747_s8 + $0xa4] ss:$16 sps:$4 sm:$0xff]  }
  0x4a   : > { %1326 = vmatpush3.bf16.msra.mxu0 %v1504_v51  ;;  %v1550_v22 = vld [vmem:[%s1747_s8 + $0xac] ss:$16 sps:$4 sm:$0xff]   ;;  %v1552_v23 = vld [vmem:[%s1747_s8 + $0xa0] ss:$16 sps:$4 sm:$0xff]   ;;  %v1553_v24 = vld [vmem:[%s1747_s8 + $0xa8] ss:$16 sps:$4 sm:$0xff]  }
  0x4b   : > { %1390 = vmatpush3.bf16.msra.mxu1 %v1505_v52  ;;  %1327 = vmatprep.subr.bf16.mxu0 %v1506_v53  ;;  %v1554_v25 = vld [vmem:[%s1747_s8 + $0xc4] ss:$16 sps:$4 sm:$0xff]   ;;  %v1556_v26 = vld [vmem:[%s1747_s8 + $0xcc] ss:$16 sps:$4 sm:$0xff]   ;;  %v1558_v27 = vld [vmem:[%s1747_s8 + $0xc0] ss:$16 sps:$4 sm:$0xff]  }
  0x4c   : > { %1391 = vmatprep.subr.bf16.mxu1 %v1507_v54  ;;  %v1559_v28 = vld [vmem:[%s1747_s8 + $0xc8] ss:$16 sps:$4 sm:$0xff]   ;;  %v1560_v29 = vld [vmem:[%s1747_s8 + $0xe4] ss:$16 sps:$4 sm:$0xff]   ;;  %v1562_v30 = vld [vmem:[%s1747_s8 + $0xec] ss:$16 sps:$4 sm:$0xff]  }
  0x4d   : > { %v1564_v31 = vld [vmem:[%s1747_s8 + $0xe0] ss:$16 sps:$4 sm:$0xff]   ;;  %v1565_v32 = vld [vmem:[%s1747_s8 + $0xe8] ss:$16 sps:$4 sm:$0xff]  }
  0x4e   : > { %1328 = vmatpush3.bf16.msra.mxu0 %v1508_v55  ;;  %v357_v40 = vld [vmem:[#allocation2] sm:$0xff]  ;;  %v358_v49 = vld [vmem:[#allocation2 + $0x8] sm:$0xff] }
  0x4f   : > { %1392 = vmatpush3.bf16.msra.mxu1 %v1509_v56  ;;  %1329 = vmatprep.subr.bf16.mxu0 %v1510_v57 }
  0x50   : > { %1393 = vmatprep.subr.bf16.mxu1 %v1511_v58  ;;  %v359_v58 = vld [vmem:[#allocation2 + $0x10] sm:$0xff] }
  0x52   : > { %1330 = vmatpush3.bf16.msra.mxu0 %v1512_v59 }
  0x53   : > { %1394 = vmatpush3.bf16.msra.mxu1 %v1513_v60  ;;  %1331 = vmatprep.subr.bf16.mxu0 %v1514_v61 }
  0x54   : > { %1395 = vmatprep.subr.bf16.mxu1 %v1515_v62 }
  0x56   : > { %1332 = vmatpush3.bf16.msra.mxu0 %v1516_v63 }
  0x57   : > { %1396 = vmatpush3.bf16.msra.mxu1 %v1517_v0 }
  0x59   : > { %854 = vmatmul.mubr.bf16.vlgmr.msra.gmra.mxu0 %v1518_v1 }
  0x5a   : > { %951 = vmatmul.mubr.bf16.vlgmr.msra.gmra.mxu1 %v1521_v3  ;;  %861 = vmatprep.mubr.bf16.mxu0 %v1524_v5  ;;  %v360_v3 = vld [vmem:[#allocation2 + $0x18] sm:$0xff] }
  0x5b   : > { %958 = vmatprep.mubr.bf16.mxu1 %v1526_v6 }
  0x61   : > { %862 = vmatmul.mubr.bf16.gmra.mxu0 %v1528_v7 }
  0x62   : > { %959 = vmatmul.mubr.bf16.gmra.mxu1 %v1529_v8  ;;  %869 = vmatprep.mubr.bf16.mxu0 %v1530_v9 }
  0x63   : > { %966 = vmatprep.mubr.bf16.mxu1 %v1532_v10 }
  0x69   : > { %870 = vmatmul.mubr.bf16.gmra.mxu0 %v1534_v11 }
  0x6a   : > { %967 = vmatmul.mubr.bf16.gmra.mxu1 %v1535_v12  ;;  %877 = vmatprep.mubr.bf16.mxu0 %v1536_v13  ;;  %v361_v12 = vld [vmem:[#allocation2 + $0x20] sm:$0xff] }
  0x6b   : > { %974 = vmatprep.mubr.bf16.mxu1 %v1538_v14 }
  0x71   : > { %878 = vmatmul.mubr.bf16.gmra.mxu0 %v1540_v15 }
  0x72   : > { %975 = vmatmul.mubr.bf16.gmra.mxu1 %v1541_v16  ;;  %885 = vmatprep.mubr.bf16.mxu0 %v1542_v17 }
  0x73   : > { %982 = vmatprep.mubr.bf16.mxu1 %v1544_v18 }
  0x79   : > { %886 = vmatmul.mubr.bf16.gmra.mxu0 %v1546_v19 }
  0x7a   : > { %983 = vmatmul.mubr.bf16.gmra.mxu1 %v1547_v20  ;;  %893 = vmatprep.mubr.bf16.mxu0 %v1548_v21  ;;  %v362_v21 = vld [vmem:[#allocation2 + $0x28] sm:$0xff] }
  0x7b   : > { %990 = vmatprep.mubr.bf16.mxu1 %v1550_v22 }
  0x81   : > { %894 = vmatmul.mubr.bf16.gmra.mxu0 %v1552_v23 }
  0x82   : > { %991 = vmatmul.mubr.bf16.gmra.mxu1 %v1553_v24  ;;  %901 = vmatprep.mubr.bf16.mxu0 %v1554_v25 }
  0x83   : > { %998 = vmatprep.mubr.bf16.mxu1 %v1556_v26 }
  0x89   : > { %902 = vmatmul.mubr.bf16.gmra.mxu0 %v1558_v27 }
  0x8a   : > { %999 = vmatmul.mubr.bf16.gmra.mxu1 %v1559_v28  ;;  %909 = vmatprep.mubr.bf16.mxu0 %v1560_v29 }
  0x8b   : > { %1006 = vmatprep.mubr.bf16.mxu1 %v1562_v30  ;;  %v363_v30 = vld [vmem:[#allocation2 + $0x30] sm:$0xff] }
  0x91   : > { %910 = vmatmul.mubr.bf16.gmra.mxu0 %v1564_v31 }
  0x92   : > { %1007 = vmatmul.mubr.bf16.gmra.mxu1 %v1565_v32 }
 0x119   : > { %v1333_v33 = vpop.f32.mrf.mxu0 }
 0x11a   : > { %v1397_v34 = vpop.f32.mrf.mxu1 }
 0x11b   : > { %v1334_v35 = vpop.f32.mrf.mxu0 }
 0x11c   : > { %v1335_v36 = vadd.f32 %v1334_v35, %v1333_v33  ;;  %v1398_v37 = vpop.f32.mrf.mxu1 }
 0x11d   : > { %v1399_v38 = vadd.f32 %v1398_v37, %v1397_v34  ;;  %v1336_v39 = vpop.f32.mrf.mxu0 }
 0x11e   : > { %v1400_v41 = vpop.f32.mrf.mxu1 }
 0x11f   : > { %v953_v42 = vadd.f32 %v1399_v38, %v1335_v36  ;;  %v1337_v43 = vpop.f32.mrf.mxu0 }
 0x120   : > { %v1338_v44 = vadd.f32 %v1337_v43, %v1336_v39  ;;  %v1401_v45 = vpop.f32.mrf.mxu1  ;;  %v364_v39 = vld [vmem:[#allocation2 + $0x38] sm:$0xff] }
 0x121   : > { %v1015_v46 = vadd.f32 %v953_v42, %v357_v40  ;;  %v1402_v47 = vadd.f32 %v1401_v45, %v1400_v41  ;;  %v1339_v48 = vpop.f32.mrf.mxu0 }
 0x122   : > { %v1403_v50 = vpop.f32.mrf.mxu1 }
 0x123   : > { %1032 = vst.msk [vmem:[#allocation2] sm:$0xff] %vm1031_vm1, %v1015_v46  ;;  %v956_v51 = vadd.f32 %v1402_v47, %v1338_v44  ;;  %v1340_v52 = vpop.f32.mrf.mxu0 }
 0x124   : > { %v1341_v53 = vadd.f32 %v1340_v52, %v1339_v48  ;;  %v1404_v54 = vpop.f32.mrf.mxu1  ;;  %v365_v48 = vld [vmem:[#allocation2 + $0x40] sm:$0xff] }
 0x125   : > { %v1016_v55 = vadd.f32 %v956_v51, %v358_v49  ;;  %v1405_v56 = vadd.f32 %v1404_v54, %v1403_v50  ;;  %v1342_v57 = vpop.f32.mrf.mxu0 }
 0x126   : > { %v1406_v59 = vpop.f32.mrf.mxu1 }
 0x127   : > { %1033 = vst.msk [vmem:[#allocation2 + $0x8] sm:$0xff] %vm1031_vm1, %v1016_v55  ;;  %v961_v60 = vadd.f32 %v1405_v56, %v1341_v53  ;;  %v1343_v61 = vpop.f32.mrf.mxu0 }
 0x128   : > { %v1344_v62 = vadd.f32 %v1343_v61, %v1342_v57  ;;  %v1407_v63 = vpop.f32.mrf.mxu1  ;;  %v366_v57 = vld [vmem:[#allocation2 + $0x48] sm:$0xff] }
 0x129   : > { %v1017_v0 = vadd.f32 %v961_v60, %v359_v58  ;;  %v1408_v1 = vadd.f32 %v1407_v63, %v1406_v59  ;;  %v1345_v2 = vpop.f32.mrf.mxu0 }
 0x12a   : > { %v1409_v4 = vpop.f32.mrf.mxu1 }
 0x12b   : > { %1034 = vst.msk [vmem:[#allocation2 + $0x10] sm:$0xff] %vm1031_vm1, %v1017_v0  ;;  %v964_v5 = vadd.f32 %v1408_v1, %v1344_v62  ;;  %v1346_v6 = vpop.f32.mrf.mxu0 }
 0x12c   : > { %v1347_v7 = vadd.f32 %v1346_v6, %v1345_v2  ;;  %v1410_v8 = vpop.f32.mrf.mxu1  ;;  %v367_v2 = vld [vmem:[#allocation2 + $0x50] sm:$0xff] }
 0x12d   : > { %v1018_v9 = vadd.f32 %v964_v5, %v360_v3  ;;  %v1411_v10 = vadd.f32 %v1410_v8, %v1409_v4  ;;  %v1348_v11 = vpop.f32.mrf.mxu0 }
 0x12e   : > { %v1412_v13 = vpop.f32.mrf.mxu1 }
 0x12f   : > { %1035 = vst.msk [vmem:[#allocation2 + $0x18] sm:$0xff] %vm1031_vm1, %v1018_v9  ;;  %v969_v14 = vadd.f32 %v1411_v10, %v1347_v7  ;;  %v1349_v15 = vpop.f32.mrf.mxu0 }
 0x130   : > { %v1350_v16 = vadd.f32 %v1349_v15, %v1348_v11  ;;  %v1413_v17 = vpop.f32.mrf.mxu1  ;;  %v368_v11 = vld [vmem:[#allocation2 + $0x58] sm:$0xff] }
 0x131   : > { %v1019_v18 = vadd.f32 %v969_v14, %v361_v12  ;;  %v1414_v19 = vadd.f32 %v1413_v17, %v1412_v13  ;;  %v1351_v20 = vpop.f32.mrf.mxu0 }
 0x132   : > { %v1415_v22 = vpop.f32.mrf.mxu1 }
 0x133   : > { %1036 = vst.msk [vmem:[#allocation2 + $0x20] sm:$0xff] %vm1031_vm1, %v1019_v18  ;;  %v972_v23 = vadd.f32 %v1414_v19, %v1350_v16  ;;  %v1352_v24 = vpop.f32.mrf.mxu0 }
 0x134   : > { %v1353_v25 = vadd.f32 %v1352_v24, %v1351_v20  ;;  %v1416_v26 = vpop.f32.mrf.mxu1  ;;  %v369_v20 = vld [vmem:[#allocation2 + $0x60] sm:$0xff] }
 0x135   : > { %v1020_v27 = vadd.f32 %v972_v23, %v362_v21  ;;  %v1417_v28 = vadd.f32 %v1416_v26, %v1415_v22  ;;  %v1354_v29 = vpop.f32.mrf.mxu0 }
 0x136   : > { %v1418_v31 = vpop.f32.mrf.mxu1 }
 0x137   : > { %1037 = vst.msk [vmem:[#allocation2 + $0x28] sm:$0xff] %vm1031_vm1, %v1020_v27  ;;  %v977_v32 = vadd.f32 %v1417_v28, %v1353_v25  ;;  %v1355_v33 = vpop.f32.mrf.mxu0 }
 0x138   : > { %v1356_v34 = vadd.f32 %v1355_v33, %v1354_v29  ;;  %v1419_v35 = vpop.f32.mrf.mxu1  ;;  %v370_v29 = vld [vmem:[#allocation2 + $0x68] sm:$0xff] }
 0x139   : > { %v1021_v36 = vadd.f32 %v977_v32, %v363_v30  ;;  %v1420_v37 = vadd.f32 %v1419_v35, %v1418_v31  ;;  %v1357_v38 = vpop.f32.mrf.mxu0 }
 0x13a   : > { %v1421_v40 = vpop.f32.mrf.mxu1 }
 0x13b   : > { %1038 = vst.msk [vmem:[#allocation2 + $0x30] sm:$0xff] %vm1031_vm1, %v1021_v36  ;;  %v980_v41 = vadd.f32 %v1420_v37, %v1356_v34  ;;  %v1358_v42 = vpop.f32.mrf.mxu0 }
 0x13c   : > { %v1359_v43 = vadd.f32 %v1358_v42, %v1357_v38  ;;  %v1422_v44 = vpop.f32.mrf.mxu1  ;;  %v371_v38 = vld [vmem:[#allocation2 + $0x70] sm:$0xff] }
 0x13d   : > { %v1022_v45 = vadd.f32 %v980_v41, %v364_v39  ;;  %v1423_v46 = vadd.f32 %v1422_v44, %v1421_v40  ;;  %v1360_v47 = vpop.f32.mrf.mxu0 }
 0x13e   : > { %v1424_v49 = vpop.f32.mrf.mxu1 }
 0x13f   : > { %1039 = vst.msk [vmem:[#allocation2 + $0x38] sm:$0xff] %vm1031_vm1, %v1022_v45  ;;  %v985_v50 = vadd.f32 %v1423_v46, %v1359_v43  ;;  %v1361_v51 = vpop.f32.mrf.mxu0  ;;  %v372_v46 = vld [vmem:[#allocation2 + $0x78] sm:$0xff] }
 0x140   : > { %v1362_v52 = vadd.f32 %v1361_v51, %v1360_v47  ;;  %v1425_v53 = vpop.f32.mrf.mxu1 }
 0x141   : > { %v1023_v54 = vadd.f32 %v985_v50, %v365_v48  ;;  %v1426_v55 = vadd.f32 %v1425_v53, %v1424_v49  ;;  %v1363_v56 = vpop.f32.mrf.mxu0 }
 0x142   : > { %v1427_v58 = vpop.f32.mrf.mxu1 }
 0x143   : > { %1040 = vst.msk [vmem:[#allocation2 + $0x40] sm:$0xff] %vm1031_vm1, %v1023_v54  ;;  %v988_v59 = vadd.f32 %v1426_v55, %v1362_v52  ;;  %v1364_v60 = vpop.f32.mrf.mxu0 }
 0x144   : > { %v1365_v61 = vadd.f32 %v1364_v60, %v1363_v56  ;;  %v1428_v62 = vpop.f32.mrf.mxu1 }
 0x145   : > { %v1024_v63 = vadd.f32 %v988_v59, %v366_v57  ;;  %v1429_v0 = vadd.f32 %v1428_v62, %v1427_v58  ;;  %v1366_v1 = vpop.f32.mrf.mxu0 }
 0x146   : > { %v1430_v3 = vpop.f32.mrf.mxu1 }
 0x147   : > { %1041 = vst.msk [vmem:[#allocation2 + $0x48] sm:$0xff] %vm1031_vm1, %v1024_v63  ;;  %v993_v4 = vadd.f32 %v1429_v0, %v1365_v61  ;;  %v1367_v5 = vpop.f32.mrf.mxu0 }
 0x148   : > { %v1368_v6 = vadd.f32 %v1367_v5, %v1366_v1  ;;  %v1431_v7 = vpop.f32.mrf.mxu1 }
 0x149   : > { %v1025_v8 = vadd.f32 %v993_v4, %v367_v2  ;;  %v1432_v9 = vadd.f32 %v1431_v7, %v1430_v3  ;;  %v1369_v10 = vpop.f32.mrf.mxu0 }
 0x14a   : > { %v1433_v12 = vpop.f32.mrf.mxu1 }
 0x14b   : > { %1042 = vst.msk [vmem:[#allocation2 + $0x50] sm:$0xff] %vm1031_vm1, %v1025_v8  ;;  %v996_v13 = vadd.f32 %v1432_v9, %v1368_v6  ;;  %v1370_v14 = vpop.f32.mrf.mxu0 }
 0x14c   : > { %v1371_v15 = vadd.f32 %v1370_v14, %v1369_v10  ;;  %v1434_v16 = vpop.f32.mrf.mxu1 }
 0x14d   : > { %v1026_v17 = vadd.f32 %v996_v13, %v368_v11  ;;  %v1435_v18 = vadd.f32 %v1434_v16, %v1433_v12  ;;  %v1372_v19 = vpop.f32.mrf.mxu0 }
 0x14e   : > { %v1436_v21 = vpop.f32.mrf.mxu1 }
 0x14f   : > { %1043 = vst.msk [vmem:[#allocation2 + $0x58] sm:$0xff] %vm1031_vm1, %v1026_v17  ;;  %v1001_v22 = vadd.f32 %v1435_v18, %v1371_v15  ;;  %v1373_v23 = vpop.f32.mrf.mxu0 }
 0x150   : > { %v1374_v24 = vadd.f32 %v1373_v23, %v1372_v19  ;;  %v1437_v25 = vpop.f32.mrf.mxu1 }
 0x151   : > { %v1027_v26 = vadd.f32 %v1001_v22, %v369_v20  ;;  %v1438_v27 = vadd.f32 %v1437_v25, %v1436_v21  ;;  %v1375_v28 = vpop.f32.mrf.mxu0 }
 0x152   : > { %v1439_v30 = vpop.f32.mrf.mxu1 }
 0x153   : > { %1044 = vst.msk [vmem:[#allocation2 + $0x60] sm:$0xff] %vm1031_vm1, %v1027_v26  ;;  %v1004_v31 = vadd.f32 %v1438_v27, %v1374_v24  ;;  %v1376_v32 = vpop.f32.mrf.mxu0 }
 0x154   : > { %v1377_v33 = vadd.f32 %v1376_v32, %v1375_v28  ;;  %v1440_v34 = vpop.f32.mrf.mxu1 }
 0x155   : > { %v1028_v35 = vadd.f32 %v1004_v31, %v370_v29  ;;  %v1441_v36 = vadd.f32 %v1440_v34, %v1439_v30  ;;  %v1378_v37 = vpop.f32.mrf.mxu0 }
 0x156   : > { %v1442_v39 = vpop.f32.mrf.mxu1 }
 0x157   : > { %1045 = vst.msk [vmem:[#allocation2 + $0x68] sm:$0xff] %vm1031_vm1, %v1028_v35  ;;  %v1009_v40 = vadd.f32 %v1441_v36, %v1377_v33  ;;  %v1379_v41 = vpop.f32.mrf.mxu0 }
 0x158   : > { %v1380_v42 = vadd.f32 %v1379_v41, %v1378_v37  ;;  %v1443_v43 = vpop.f32.mrf.mxu1 }
 0x159   : > { %v1029_v44 = vadd.f32 %v1009_v40, %v371_v38  ;;  %v1444_v45 = vadd.f32 %v1443_v43, %v1442_v39 }
 0x15b   : > { %1046 = vst.msk [vmem:[#allocation2 + $0x70] sm:$0xff] %vm1031_vm1, %v1029_v44  ;;  %v1012_v47 = vadd.f32 %v1444_v45, %v1380_v42  ;;  %1051 = sbr.rel (%p1310_p11) target bundleno = 366 (0x16e), region = 63 }
 0x15d   : > { %v1030_v48 = vadd.f32 %v1012_v47, %v372_v46 }
 0x15f   : > { %1047 = vst.msk [vmem:[#allocation2 + $0x78] sm:$0xff] %vm1031_vm1, %v1030_v48 }
 0x160   : > { %v1052_v49 = vld [vmem:[#allocation2] sm:$0xff]  ;;  %v1053_v51 = vld [vmem:[#allocation2 + $0x8] sm:$0xff]  ;;  %v1054_v54 = vld [vmem:[#allocation2 + $0x10] sm:$0xff] }
 0x161   : > { %v1311_v50 = vld [vmem:[%s1931_s2] ss:$0 sm:$0xff]  ;;  %v1055_v55 = vld [vmem:[#allocation2 + $0x18] sm:$0xff]  ;;  %v1057_v60 = vld [vmem:[#allocation2 + $0x28] sm:$0xff] }
 0x162   : > { %v1075_v52 = vadd.f32 %v1311_v50, %v1052_v49  ;;  %v1076_v53 = vadd.f32 %v1311_v50, %v1053_v51  ;;  %v1056_v56 = vld [vmem:[#allocation2 + $0x20] sm:$0xff]  ;;  %v1077_v57 = vadd.f32 %v1311_v50, %v1054_v54  ;;  %v1078_v58 = vadd.f32 %v1311_v50, %v1055_v55  ;;  %v1058_v61 = vld [vmem:[#allocation2 + $0x30] sm:$0xff]  ;;  %v1059_v62 = vld [vmem:[#allocation2 + $0x38] sm:$0xff] }
 0x163   : > { %v1079_v59 = vadd.f32 %v1311_v50, %v1056_v56  ;;  %v1080_v1 = vadd.f32 %v1311_v50, %v1057_v60  ;;  %v1081_v2 = vadd.f32 %v1311_v50, %v1058_v61  ;;  %v1060_v3 = vld [vmem:[#allocation2 + $0x40] sm:$0xff]  ;;  %v1061_v4 = vld [vmem:[#allocation2 + $0x48] sm:$0xff]  ;;  %v1062_v5 = vld [vmem:[#allocation2 + $0x50] sm:$0xff]  ;;  %v1082_v9 = vadd.f32 %v1311_v50, %v1059_v62 }
 0x164   : > { %v1091_v63 = vmax.f32 %v1075_v52, 0.0  ;;  %v1092_v0 = vmax.f32 %v1076_v53, 0.0  ;;  %v1093_v6 = vmax.f32 %v1077_v57, 0.0  ;;  %v1094_v7 = vmax.f32 %v1078_v58, 0.0  ;;  %v1063_v10 = vld [vmem:[#allocation2 + $0x58] sm:$0xff]  ;;  %v1064_v11 = vld [vmem:[#allocation2 + $0x60] sm:$0xff] }
 0x165   : > { %v1095_v8 = vmax.f32 %v1079_v59, 0.0  ;;  %v1065_v12 = vld [vmem:[#allocation2 + $0x68] sm:$0xff]  ;;  %v1096_v13 = vmax.f32 %v1080_v1, 0.0  ;;  %v1097_v14 = vmax.f32 %v1081_v2, 0.0  ;;  %v1083_v15 = vadd.f32 %v1311_v50, %v1060_v3  ;;  %v1066_v17 = vld [vmem:[#allocation2 + $0x70] sm:$0xff] }
 0x166   : > { %1107 = vst.msk [vmem:[%s1932_s3] sm:$0xff] %vm1031_vm1, %v1091_v63  ;;  %1108 = vst.msk [vmem:[%s1932_s3 + $0x8] sm:$0xff] %vm1031_vm1, %v1092_v0  ;;  %v1084_v16 = vadd.f32 %v1311_v50, %v1061_v4  ;;  %v1067_v18 = vld [vmem:[#allocation2 + $0x78] sm:$0xff]  ;;  %v1098_v19 = vmax.f32 %v1082_v9, 0.0  ;;  %v1085_v20 = vadd.f32 %v1311_v50, %v1062_v5  ;;  %v1086_v21 = vadd.f32 %v1311_v50, %v1063_v10 }
 0x167   : > { %1109 = vst.msk [vmem:[%s1932_s3 + $0x10] sm:$0xff] %vm1031_vm1, %v1093_v6  ;;  %1110 = vst.msk [vmem:[%s1932_s3 + $0x18] sm:$0xff] %vm1031_vm1, %v1094_v7  ;;  %v1087_v22 = vadd.f32 %v1311_v50, %v1064_v11  ;;  %v1099_v23 = vmax.f32 %v1083_v15, 0.0  ;;  %v1088_v25 = vadd.f32 %v1311_v50, %v1065_v12  ;;  %v1089_v26 = vadd.f32 %v1311_v50, %v1066_v17 }
 0x168   : > { %1111 = vst.msk [vmem:[%s1932_s3 + $0x20] sm:$0xff] %vm1031_vm1, %v1095_v8  ;;  %1112 = vst.msk [vmem:[%s1932_s3 + $0x28] sm:$0xff] %vm1031_vm1, %v1096_v13  ;;  %v1100_v24 = vmax.f32 %v1084_v16, 0.0  ;;  %v1101_v27 = vmax.f32 %v1085_v20, 0.0  ;;  %v1102_v28 = vmax.f32 %v1086_v21, 0.0  ;;  %v1090_v30 = vadd.f32 %v1311_v50, %v1067_v18 }
 0x169   : > { %1113 = vst.msk [vmem:[%s1932_s3 + $0x30] sm:$0xff] %vm1031_vm1, %v1097_v14  ;;  %1114 = vst.msk [vmem:[%s1932_s3 + $0x38] sm:$0xff] %vm1031_vm1, %v1098_v19  ;;  %v1103_v29 = vmax.f32 %v1087_v22, 0.0  ;;  %v1104_v31 = vmax.f32 %v1088_v25, 0.0  ;;  %v1105_v32 = vmax.f32 %v1089_v26, 0.0 }
 0x16a   : > { %1115 = vst.msk [vmem:[%s1932_s3 + $0x40] sm:$0xff] %vm1031_vm1, %v1099_v23  ;;  %1116 = vst.msk [vmem:[%s1932_s3 + $0x48] sm:$0xff] %vm1031_vm1, %v1100_v24  ;;  %v1106_v33 = vmax.f32 %v1090_v30, 0.0 }
 0x16b   : > { %1117 = vst.msk [vmem:[%s1932_s3 + $0x50] sm:$0xff] %vm1031_vm1, %v1101_v27  ;;  %1118 = vst.msk [vmem:[%s1932_s3 + $0x58] sm:$0xff] %vm1031_vm1, %v1102_v28 }
 0x16c   : > { %1119 = vst.msk [vmem:[%s1932_s3 + $0x60] sm:$0xff] %vm1031_vm1, %v1103_v29  ;;  %1120 = vst.msk [vmem:[%s1932_s3 + $0x68] sm:$0xff] %vm1031_vm1, %v1104_v31 }
 0x16d   : > { %1121 = vst.msk [vmem:[%s1932_s3 + $0x70] sm:$0xff] %vm1031_vm1, %v1105_v32  ;;  %1122 = vst.msk [vmem:[%s1932_s3 + $0x78] sm:$0xff] %vm1031_vm1, %v1106_v33 }
 0x16e PF: > { %s13_s16 = sadd.s32 1, %s1604_s16   ;;  %s1933_s12 = smov %s1592_s13 }
 0x16f   : > { %p10_p12 = scmp.ge.s32.totalorder %s13_s16, 24   ;;  %s1934_s13 = smov %s1662_s20 }
 0x170   : > { %s1935_s14 = smov %s1600_s15  ;;  %s1936_s15 = smov %s1938_s17 }
 0x171   :  { %12 = sbr.rel (!%p10_p12) target bundleno = 3 (0x3), region = 104 }

// kernel: _lambda_.22
= control target key start
LH: loop header
LB: loop body
LE: loop exit
PB: predicated region body
PF: predicated region fallthrough
CT: control target
= control target key end

     0   :  { %vm48_vm0 = vcmask 523264   ;;  %s175_s0 = inlined_call_operand.vmem [shape: f32[3,64,64], index: 0, kind: input, shape index: {}]   ;;  %s176_s1 = inlined_call_operand.vmem [shape: f32[64,64], index: 1, kind: output, shape index: {}]  }
   0x1   :  { %v8_v0 = vld [vmem:[%s175_s0] sm:$0xff]  ;;  %v9_v4 = vld [vmem:[%s175_s0 + $0x8] sm:$0xff]  ;;  %v10_v8 = vld [vmem:[%s175_s0 + $0x10] sm:$0xff] }
   0x2   :  { %v16_v1 = vld [vmem:[%s175_s0 + $0x40] sm:$0xff]  ;;  %v17_v5 = vld [vmem:[%s175_s0 + $0x48] sm:$0xff]  ;;  %v18_v9 = vld [vmem:[%s175_s0 + $0x50] sm:$0xff] }
   0x3   :  { %v24_v2 = vld [vmem:[%s175_s0 + $0x80] sm:$0xff]  ;;  %v32_v3 = vmax.f32 %v8_v0, %v16_v1  ;;  %v25_v6 = vld [vmem:[%s175_s0 + $0x88] sm:$0xff]  ;;  %v33_v7 = vmax.f32 %v9_v4, %v17_v5  ;;  %v26_v10 = vld [vmem:[%s175_s0 + $0x90] sm:$0xff]  ;;  %v34_v12 = vmax.f32 %v10_v8, %v18_v9 }
   0x4   :  { %v11_v13 = vld [vmem:[%s175_s0 + $0x18] sm:$0xff]  ;;  %v12_v18 = vld [vmem:[%s175_s0 + $0x20] sm:$0xff]  ;;  %v13_v23 = vld [vmem:[%s175_s0 + $0x28] sm:$0xff] }
   0x5   :  { %v40_v11 = vmax.f32 %v32_v3, %v24_v2  ;;  %v19_v14 = vld [vmem:[%s175_s0 + $0x58] sm:$0xff]  ;;  %v41_v16 = vmax.f32 %v33_v7, %v25_v6  ;;  %v20_v19 = vld [vmem:[%s175_s0 + $0x60] sm:$0xff]  ;;  %v42_v21 = vmax.f32 %v34_v12, %v26_v10  ;;  %v21_v24 = vld [vmem:[%s175_s0 + $0x68] sm:$0xff] }
   0x6   :  { %v27_v15 = vld [vmem:[%s175_s0 + $0x98] sm:$0xff]  ;;  %v35_v17 = vmax.f32 %v11_v13, %v19_v14  ;;  %v28_v20 = vld [vmem:[%s175_s0 + $0xa0] sm:$0xff]  ;;  %v36_v22 = vmax.f32 %v12_v18, %v20_v19  ;;  %v29_v25 = vld [vmem:[%s175_s0 + $0xa8] sm:$0xff]  ;;  %v37_v27 = vmax.f32 %v13_v23, %v21_v24 }
   0x7   :  { %49 = vst.msk [vmem:[%s176_s1] sm:$0xff] %vm48_vm0, %v40_v11  ;;  %50 = vst.msk [vmem:[%s176_s1 + $0x8] sm:$0xff] %vm48_vm0, %v41_v16  ;;  %v14_v28 = vld [vmem:[%s175_s0 + $0x30] sm:$0xff]  ;;  %v15_v33 = vld [vmem:[%s175_s0 + $0x38] sm:$0xff] }
   0x8   :  { %v43_v26 = vmax.f32 %v35_v17, %v27_v15  ;;  %v22_v29 = vld [vmem:[%s175_s0 + $0x70] sm:$0xff]  ;;  %51 = vst.msk [vmem:[%s176_s1 + $0x10] sm:$0xff] %vm48_vm0, %v42_v21  ;;  %v44_v31 = vmax.f32 %v36_v22, %v28_v20  ;;  %v23_v34 = vld [vmem:[%s175_s0 + $0x78] sm:$0xff]  ;;  %v45_v36 = vmax.f32 %v37_v27, %v29_v25 }
   0x9   :  { %v30_v30 = vld [vmem:[%s175_s0 + $0xb0] sm:$0xff]  ;;  %v38_v32 = vmax.f32 %v14_v28, %v22_v29  ;;  %v31_v35 = vld [vmem:[%s175_s0 + $0xb8] sm:$0xff]  ;;  %v39_v37 = vmax.f32 %v15_v33, %v23_v34 }
   0xa   :  { %52 = vst.msk [vmem:[%s176_s1 + $0x18] sm:$0xff] %vm48_vm0, %v43_v26  ;;  %53 = vst.msk [vmem:[%s176_s1 + $0x20] sm:$0xff] %vm48_vm0, %v44_v31 }
   0xb   :  { %v46_v38 = vmax.f32 %v38_v32, %v30_v30  ;;  %54 = vst.msk [vmem:[%s176_s1 + $0x28] sm:$0xff] %vm48_vm0, %v45_v36  ;;  %v47_v39 = vmax.f32 %v39_v37, %v31_v35 }
   0xd   :  { %55 = vst.msk [vmem:[%s176_s1 + $0x30] sm:$0xff] %vm48_vm0, %v46_v38  ;;  %56 = vst.msk [vmem:[%s176_s1 + $0x38] sm:$0xff] %vm48_vm0, %v47_v39 }

// kernel: _lambda_.23
= control target key start
LH: loop header
LB: loop body
LE: loop exit
PB: predicated region body
PF: predicated region fallthrough
CT: control target
= control target key end

     0   :  { %vm28_vm0 = vcmask 523264   ;;  %s99_s0 = inlined_call_operand.vmem [shape: f32[3,32,64], index: 0, kind: input, shape index: {}]   ;;  %s100_s1 = inlined_call_operand.vmem [shape: f32[32,64], index: 1, kind: output, shape index: {}]  }
   0x1   :  { %v8_v0 = vld [vmem:[%s99_s0] sm:$0xff]  ;;  %v9_v4 = vld [vmem:[%s99_s0 + $0x8] sm:$0xff]  ;;  %v10_v8 = vld [vmem:[%s99_s0 + $0x10] sm:$0xff] }
   0x2   :  { %v12_v1 = vld [vmem:[%s99_s0 + $0x20] sm:$0xff]  ;;  %v13_v5 = vld [vmem:[%s99_s0 + $0x28] sm:$0xff]  ;;  %v14_v9 = vld [vmem:[%s99_s0 + $0x30] sm:$0xff] }
   0x3   :  { %v16_v2 = vld [vmem:[%s99_s0 + $0x40] sm:$0xff]  ;;  %v20_v3 = vmax.f32 %v8_v0, %v12_v1  ;;  %v17_v6 = vld [vmem:[%s99_s0 + $0x48] sm:$0xff]  ;;  %v21_v7 = vmax.f32 %v9_v4, %v13_v5  ;;  %v18_v10 = vld [vmem:[%s99_s0 + $0x50] sm:$0xff]  ;;  %v22_v12 = vmax.f32 %v10_v8, %v14_v9 }
   0x4   :  { %v11_v13 = vld [vmem:[%s99_s0 + $0x18] sm:$0xff] }
   0x5   :  { %v24_v11 = vmax.f32 %v20_v3, %v16_v2  ;;  %v15_v14 = vld [vmem:[%s99_s0 + $0x38] sm:$0xff]  ;;  %v25_v16 = vmax.f32 %v21_v7, %v17_v6  ;;  %v26_v18 = vmax.f32 %v22_v12, %v18_v10 }
   0x6   :  { %v19_v15 = vld [vmem:[%s99_s0 + $0x58] sm:$0xff]  ;;  %v23_v17 = vmax.f32 %v11_v13, %v15_v14 }
   0x7   :  { %29 = vst.msk [vmem:[%s100_s1] sm:$0xff] %vm28_vm0, %v24_v11  ;;  %30 = vst.msk [vmem:[%s100_s1 + $0x8] sm:$0xff] %vm28_vm0, %v25_v16 }
   0x8   :  { %v27_v19 = vmax.f32 %v23_v17, %v19_v15  ;;  %31 = vst.msk [vmem:[%s100_s1 + $0x10] sm:$0xff] %vm28_vm0, %v26_v18 }
   0xa   :  { %32 = vst.msk [vmem:[%s100_s1 + $0x18] sm:$0xff] %vm28_vm0, %v27_v19 }

// kernel: _lambda_.24
= control target key start
LH: loop header
LB: loop body
LE: loop exit
PB: predicated region body
PF: predicated region fallthrough
CT: control target
= control target key end

     0   :  { %vm18_vm0 = vcmask 523264   ;;  %s59_s0 = inlined_call_operand.vmem [shape: f32[3,16,64], index: 0, kind: input, shape index: {}]   ;;  %s60_s1 = inlined_call_operand.vmem [shape: f32[16,64], index: 1, kind: output, shape index: {}]  }
   0x1   :  { %v8_v0 = vld [vmem:[%s59_s0] sm:$0xff]  ;;  %v10_v1 = vld [vmem:[%s59_s0 + $0x10] sm:$0xff]  ;;  %v9_v4 = vld [vmem:[%s59_s0 + $0x8] sm:$0xff] }
   0x2   :  { %v12_v2 = vld [vmem:[%s59_s0 + $0x20] sm:$0xff]  ;;  %v14_v3 = vmax.f32 %v8_v0, %v10_v1  ;;  %v11_v5 = vld [vmem:[%s59_s0 + $0x18] sm:$0xff]  ;;  %v13_v6 = vld [vmem:[%s59_s0 + $0x28] sm:$0xff] }
   0x3   :  { %v15_v7 = vmax.f32 %v9_v4, %v11_v5 }
   0x4   :  { %v16_v8 = vmax.f32 %v14_v3, %v12_v2 }
   0x5   :  { %v17_v9 = vmax.f32 %v15_v7, %v13_v6 }
   0x6   :  { %19 = vst.msk [vmem:[%s60_s1] sm:$0xff] %vm18_vm0, %v16_v8 }
   0x7   :  { %20 = vst.msk [vmem:[%s60_s1 + $0x8] sm:$0xff] %vm18_vm0, %v17_v9 }

// kernel: _lambda_.25
= control target key start
LH: loop header
LB: loop body
LE: loop exit
PB: predicated region body
PF: predicated region fallthrough
CT: control target
= control target key end

     0   :  { %vm19_vm0 = vcmask 523264   ;;  %v165_v0 = vmov 0.0   ;;  %vm166_vm1 = vmmov 0   ;;  %s218_s1 = inlined_call_operand.vmem [shape: bf16[64,64], index: 1, kind: input, shape index: {}]   ;;  %s219_s0 = inlined_call_operand.vmem [shape: bf16[16,64], index: 0, kind: input, shape index: {}]   ;;  %s220_s2 = inlined_call_operand.vmem [shape: f32[1,64], index: 2, kind: input, shape index: {}]   ;;  %s221_s3 = inlined_call_operand.vmem [shape: f32[16,64], index: 3, kind: output, shape index: {}]  }
   0x1   :  { %146 = vmatprep.subr.bf16.mxu0 %v165_v0  ;;  %v160_v1 = vld [vmem:[%s218_s1 + $0x18] sm:$0xff]   ;;  %154 = vmatprep.mubr.msk.bf16.mxu0 %vm166_vm1, %v165_v0  ;;  %20 = vst.msk [vmem:[#allocation2] sm:$0xff] %vm19_vm0, %v165_v0  ;;  %21 = vst.msk [vmem:[#allocation2 + $0x8] sm:$0xff] %vm19_vm0, %v165_v0  ;;  %v161_v2 = vld [vmem:[%s218_s1 + $0x10] sm:$0xff]  }
   0x2   :  { %147 = vmatpush3.bf16.msra.mxu0 %v160_v1  ;;  %v162_v3 = vld [vmem:[%s218_s1 + $0x8] sm:$0xff]   ;;  %v163_v4 = vld [vmem:[%s218_s1] sm:$0xff]  }
   0x3   :  { %148 = vmatprep.subr.bf16.mxu0 %v165_v0  ;;  %v164_v5 = vld [vmem:[%s219_s0] sm:$0xff]  }
   0x4   :  { %v140_v14 = vld [vmem:[%s220_s2] ss:$0 sm:$0xff] }
   0x6   :  { %149 = vmatpush3.bf16.msra.mxu0 %v161_v2 }
   0x7   :  { %150 = vmatprep.subr.bf16.mxu0 %v165_v0 }
   0x8   :  { %v22_v6 = vld [vmem:[#allocation2] sm:$0xff]  ;;  %v23_v10 = vld [vmem:[#allocation2 + $0x8] sm:$0xff] }
   0xa   :  { %151 = vmatpush3.bf16.msra.mxu0 %v162_v3 }
   0xb   :  { %152 = vmatprep.subr.bf16.mxu0 %v165_v0 }
   0xe   :  { %153 = vmatpush3.bf16.msra.mxu0 %v163_v4 }
  0x11   :  { %155 = vmatmul.mubr.msk.bf16.vlgmr.msra.gmra.mxu0 %vm19_vm0, %v164_v5 }
  0xd1   :  { %v101_v7 = vpop.f32.mrf.mxu0 }
  0xd2   :  { %v108_v8 = vadd.f32 %v101_v7, %v22_v6 }
  0xd3   :  { %v156_v9 = vpop.f32.mrf.mxu0 }
  0xd4   :  { %110 = vst.msk [vmem:[#allocation2] sm:$0xff] %vm19_vm0, %v108_v8 }
  0xd5   :  { %v104_v11 = vpop.f32.mrf.mxu0 }
  0xd6   :  { %v109_v12 = vadd.f32 %v104_v11, %v23_v10 }
  0xd7   :  { %v157_v13 = vpop.f32.mrf.mxu0 }
  0xd8   :  { %111 = vst.msk [vmem:[#allocation2 + $0x8] sm:$0xff] %vm19_vm0, %v109_v12 }
  0xdb   :  { %v115_v15 = vld [vmem:[#allocation2] sm:$0xff] }
  0xdc   :  { %v124_v16 = vadd.f32 %v140_v14, %v115_v15 }
  0xde   :  { %v126_v17 = vmax.f32 %v124_v16, 0.0 }
  0xdf   :  { %v116_v18 = vld [vmem:[#allocation2 + $0x8] sm:$0xff] }
  0xe0   :  { %128 = vst.msk [vmem:[%s221_s3] sm:$0xff] %vm19_vm0, %v126_v17  ;;  %v125_v19 = vadd.f32 %v140_v14, %v116_v18 }
  0xe2   :  { %v127_v20 = vmax.f32 %v125_v19, 0.0 }
  0xe4   :  { %129 = vst.msk [vmem:[%s221_s3 + $0x8] sm:$0xff] %vm19_vm0, %v127_v20 }

// kernel: _lambda_.26
= control target key start
LH: loop header
LB: loop body
LE: loop exit
PB: predicated region body
PF: predicated region fallthrough
CT: control target
= control target key end

     0   :  { %s1025_s12 = smov 0   ;;  %s1027_s13 = smov 0   ;;  %s1145_s0 = inlined_call_operand.vmem [shape: bf16[16,2048], index: 0, kind: input, shape index: {}]   ;;  %s1146_s1 = inlined_call_operand.vmem [shape: bf16[2048,64], index: 1, kind: input, shape index: {}]   ;;  %s1147_s2 = inlined_call_operand.vmem [shape: f32[1,64], index: 2, kind: input, shape index: {}]   ;;  %s1148_s3 = inlined_call_operand.vmem [shape: f32[16,64], index: 3, kind: output, shape index: {}]  }
   0x1   :  { %s1029_s14 = smov 0   ;;  %s1031_s15 = smov 0  }
   0x2   :  { %s1033_s16 = smov 0  }
   0x3 LB: > { %s25_s17 = sadd.s32 1, %s998_s15  ;;  %p48_p1 = scmp.ne.s32.totalorder %s990_s13, %s986_s12  ;;  %s1002_s16 = sphi %s1033_s16, %s13_s16   ;;  %s998_s15 = sphi %s1031_s15, %s1152_s15   ;;  %s994_s14 = sphi %s1029_s14, %s1151_s14   ;;  %s990_s13 = sphi %s1027_s13, %s1150_s13   ;;  %s986_s12 = sphi %s1025_s12, %s1149_s12  }
   0x4   : > { %p26_p0 = scmp.ge.s32.totalorder %s25_s17, 4  ;;  %p49_p2 = scmp.eq.s32.totalorder %s1002_s16, 0 }
   0x5   : > { %s41_s19 = sadd.s32 1, %s990_s13  ;;  %p789_p5 = scmp.ge.s32.totalorder %s1002_s16, 4 }
   0x6   : > { %s1154_s17 = smov (%p26_p0, %s25_s17), 0  ;;  %p50_p3 = por %p49_p2, %p48_p1 }
   0x7   : > { %s37_s18 = ssub.s32 %s998_s15, %s1154_s17  ;;  %162 = sbr.rel (%p789_p5) target bundleno = 18 (0x12), region = 20 }
   0x8   : > { %p39_p4 = scmp.eq.s32.totalorder %s37_s18, 0 }
   0xa   : > { %s1060_s20 = scalar_select %p39_p4, %s990_s13, %s41_s19  }
   0xc   : > { %165 = sbr.rel (!%p50_p3) target bundleno = 18 (0x12), region = 24  ;;  %s167_s21 = sand.u32 (%p50_p3), 1, %s990_s13  }
   0xd   : > { %s840_s22 = sshll.u32 (%p50_p3), %s998_s15, 4  ;;  %s790_s23 = sshll.u32 (%p50_p3), %s167_s21, 5 }
   0xe   : > { %s175_s26 = scalar_lea.vmem (%p50_p3), %s1145_s0, %s840_s22  ;;  %s169_s27 = scalar_lea.vmem (%p50_p3), [#allocation3], %s790_s23 }
   0xf   : > { %v188_v0 = vld [vmem:[%s175_s26] sm:$0xff] (%p50_p3)  ;;  %v190_v1 = vld [vmem:[%s175_s26 + $0x8] sm:$0xff] (%p50_p3) }
  0x10   : > { %v192_v2 = vld [vmem:[%s175_s26 + $0x40] sm:$0xff] (%p50_p3)  ;;  %189 = vst [vmem:[%s169_s27] sm:$0xff] (%p50_p3), %v188_v0  ;;  %191 = vst [vmem:[%s169_s27 + $0x8] sm:$0xff] (%p50_p3), %v190_v1  ;;  %v194_v3 = vld [vmem:[%s175_s26 + $0x48] sm:$0xff] (%p50_p3) }
  0x11   : > { %193 = vst [vmem:[%s169_s27 + $0x10] sm:$0xff] %v192_v2  ;;  %195 = vst [vmem:[%s169_s27 + $0x18] sm:$0xff] %v194_v3 }
  0x12 PF: > { %p793_p6 = scmp.ge.s32.totalorder %s1002_s16, 1  ;;  %p212_p7 = scmp.lt.s32.totalorder %s1002_s16, 5 }
  0x14   : > { %p213_p8 = pnand %p793_p6, %p212_p7 }
  0x15   : > { %s219_s28 = sand.u32 (!%p213_p8), 1, %s986_s12   ;;  %s795_s29 = sshll.u32 (!%p213_p8), %s994_s14, 6 }
  0x16   : > { %216 = sbr.rel (%p213_p8) target bundleno = 287 (0x11f), region = 51  ;;  %s794_s30 = sshll.u32 (!%p213_p8), %s219_s28, 5 }
  0x17   : > { %p259_p9 = scmp.lt.s32.totalorder (!%p213_p8), %s795_s29, 255  ;;  %s1077_s8 = scalar_lea.vmem (!%p213_p8), [#allocation3], %s794_s30 }
  0x18   : > { %p797_p10 = scmp.ne.s32.totalorder (!%p213_p8), %s994_s14, 0 }
  0x1b   : > { %s1156_s29 = smov (!%p259_p9, %s795_s29), 255  ;;  %283 = sbr.rel (%p797_p10) target bundleno = 34 (0x22), region = 59 }
  0x1c   : > { %s796_s4 = sshll.u32 %s1156_s29, 2 }
  0x1d   : > { %s1075_s7 = scalar_lea.vmem %s1146_s1, %s796_s4 }
  0x20   : > { %vm284_vm0 = vcmask 523264   ;;  %v1004_v4 = vmov 0.0  }
  0x21   : > { %285 = vst.msk [vmem:[#allocation2] sm:$0xff] %vm284_vm0, %v1004_v4  ;;  %286 = vst.msk [vmem:[#allocation2 + $0x8] sm:$0xff] %vm284_vm0, %v1004_v4 }
  0x22 PF: > { %v926_v5 = vld [vmem:[%s1075_s7 + $0x78] sm:$0xff]   ;;  %v930_v9 = vld [vmem:[%s1075_s7 + $0x70] sm:$0xff]   ;;  %v934_v13 = vld [vmem:[%s1075_s7 + $0x68] sm:$0xff]   ;;  %vm653_vm1 = vcmask 523264   ;;  %p834_p11 = scmp.ne.s32.totalorder %s994_s14, 3 }
  0x23   : > { %v927_v6 = vld [vmem:[%s1075_s7 + $0xf8] sm:$0xff]   ;;  %841 = vmatprep.subr.bf16.mxu0 %v926_v5  ;;  %v931_v10 = vld [vmem:[%s1075_s7 + $0xf0] sm:$0xff]   ;;  %v935_v14 = vld [vmem:[%s1075_s7 + $0xe8] sm:$0xff]  }
  0x24   : > { %v928_v7 = vld [vmem:[%s1075_s7 + $0x38] sm:$0xff]   ;;  %863 = vmatprep.subr.bf16.mxu1 %v927_v6  ;;  %v932_v11 = vld [vmem:[%s1075_s7 + $0x30] sm:$0xff]   ;;  %v936_v15 = vld [vmem:[%s1075_s7 + $0x28] sm:$0xff]  }
  0x25   : > { %v929_v8 = vld [vmem:[%s1075_s7 + $0xb8] sm:$0xff]   ;;  %842 = vmatpush3.bf16.msra.mxu0 %v928_v7  ;;  %v933_v12 = vld [vmem:[%s1075_s7 + $0xb0] sm:$0xff]   ;;  %v937_v16 = vld [vmem:[%s1075_s7 + $0xa8] sm:$0xff]  }
  0x26   : > { %864 = vmatpush3.bf16.msra.mxu1 %v929_v8  ;;  %843 = vmatprep.subr.bf16.mxu0 %v930_v9  ;;  %v938_v17 = vld [vmem:[%s1075_s7 + $0x60] sm:$0xff]   ;;  %v942_v21 = vld [vmem:[%s1075_s7 + $0x58] sm:$0xff]   ;;  %v946_v25 = vld [vmem:[%s1075_s7 + $0x50] sm:$0xff]  }
  0x27   : > { %865 = vmatprep.subr.bf16.mxu1 %v931_v10  ;;  %v939_v18 = vld [vmem:[%s1075_s7 + $0xe0] sm:$0xff]   ;;  %v943_v22 = vld [vmem:[%s1075_s7 + $0xd8] sm:$0xff]   ;;  %v947_v26 = vld [vmem:[%s1075_s7 + $0xd0] sm:$0xff]  }
  0x28   : > { %v940_v19 = vld [vmem:[%s1075_s7 + $0x20] sm:$0xff]   ;;  %v944_v23 = vld [vmem:[%s1075_s7 + $0x18] sm:$0xff]   ;;  %v948_v27 = vld [vmem:[%s1075_s7 + $0x10] sm:$0xff]  }
  0x29   : > { %844 = vmatpush3.bf16.msra.mxu0 %v932_v11  ;;  %v941_v20 = vld [vmem:[%s1075_s7 + $0xa0] sm:$0xff]   ;;  %v945_v24 = vld [vmem:[%s1075_s7 + $0x98] sm:$0xff]   ;;  %v949_v28 = vld [vmem:[%s1075_s7 + $0x90] sm:$0xff]  }
  0x2a   : > { %866 = vmatpush3.bf16.msra.mxu1 %v933_v12  ;;  %845 = vmatprep.subr.bf16.mxu0 %v934_v13  ;;  %v950_v29 = vld [vmem:[%s1075_s7 + $0x48] sm:$0xff]   ;;  %v954_v33 = vld [vmem:[%s1075_s7 + $0x40] sm:$0xff]  }
  0x2b   : > { %867 = vmatprep.subr.bf16.mxu1 %v935_v14  ;;  %v951_v30 = vld [vmem:[%s1075_s7 + $0xc8] sm:$0xff]   ;;  %v955_v34 = vld [vmem:[%s1075_s7 + $0xc0] sm:$0xff]  }
  0x2c   : > { %v952_v31 = vld [vmem:[%s1075_s7 + $0x8] sm:$0xff]   ;;  %v956_v35 = vld [vmem:[%s1075_s7] sm:$0xff]  }
  0x2d   : > { %846 = vmatpush3.bf16.msra.mxu0 %v936_v15  ;;  %v953_v32 = vld [vmem:[%s1075_s7 + $0x88] sm:$0xff]   ;;  %v957_v36 = vld [vmem:[%s1075_s7 + $0x80] sm:$0xff]  }
  0x2e   : > { %868 = vmatpush3.bf16.msra.mxu1 %v937_v16  ;;  %847 = vmatprep.subr.bf16.mxu0 %v938_v17  ;;  %v958_v37 = vld [vmem:[%s1077_s8] ss:$16 sps:$4 sm:$0xff]   ;;  %v960_v38 = vld [vmem:[%s1077_s8 + $0x4] ss:$16 sps:$4 sm:$0xff]   ;;  %v961_v39 = vld [vmem:[%s1077_s8 + $0x8] ss:$16 sps:$4 sm:$0xff]  }
  0x2f   : > { %869 = vmatprep.subr.bf16.mxu1 %v939_v18  ;;  %v963_v40 = vld [vmem:[%s1077_s8 + $0xc] ss:$16 sps:$4 sm:$0xff]   ;;  %601 = vmatprep.mubr.bf16.mxu0 %v960_v38  ;;  %v287_v48 = vld [vmem:[#allocation2] sm:$0xff] }
  0x30   : > { %642 = vmatprep.mubr.bf16.mxu1 %v963_v40  ;;  %v288_v56 = vld [vmem:[#allocation2 + $0x8] sm:$0xff] }
  0x31   : > { %848 = vmatpush3.bf16.msra.mxu0 %v940_v19 }
  0x32   : > { %870 = vmatpush3.bf16.msra.mxu1 %v941_v20  ;;  %849 = vmatprep.subr.bf16.mxu0 %v942_v21 }
  0x33   : > { %871 = vmatprep.subr.bf16.mxu1 %v943_v22 }
  0x35   : > { %850 = vmatpush3.bf16.msra.mxu0 %v944_v23 }
  0x36   : > { %872 = vmatpush3.bf16.msra.mxu1 %v945_v24  ;;  %851 = vmatprep.subr.bf16.mxu0 %v946_v25 }
  0x37   : > { %873 = vmatprep.subr.bf16.mxu1 %v947_v26 }
  0x39   : > { %852 = vmatpush3.bf16.msra.mxu0 %v948_v27 }
  0x3a   : > { %874 = vmatpush3.bf16.msra.mxu1 %v949_v28  ;;  %853 = vmatprep.subr.bf16.mxu0 %v950_v29 }
  0x3b   : > { %875 = vmatprep.subr.bf16.mxu1 %v951_v30 }
  0x3d   : > { %854 = vmatpush3.bf16.msra.mxu0 %v952_v31 }
  0x3e   : > { %876 = vmatpush3.bf16.msra.mxu1 %v953_v32  ;;  %855 = vmatprep.subr.bf16.mxu0 %v954_v33 }
  0x3f   : > { %877 = vmatprep.subr.bf16.mxu1 %v955_v34 }
  0x41   : > { %856 = vmatpush3.bf16.msra.mxu0 %v956_v35 }
  0x42   : > { %878 = vmatpush3.bf16.msra.mxu1 %v957_v36 }
  0x44   : > { %602 = vmatmul.mubr.bf16.vlgmr.msra.gmra.mxu0 %v958_v37 }
  0x45   : > { %643 = vmatmul.mubr.bf16.vlgmr.msra.gmra.mxu1 %v961_v39 }
 0x104   : > { %v857_v41 = vpop.f32.mrf.mxu0 }
 0x105   : > { %v879_v42 = vpop.f32.mrf.mxu1 }
 0x106   : > { %v858_v43 = vpop.f32.mrf.mxu0 }
 0x107   : > { %v859_v44 = vadd.f32 %v858_v43, %v857_v41  ;;  %v880_v45 = vpop.f32.mrf.mxu1 }
 0x108   : > { %v881_v46 = vadd.f32 %v880_v45, %v879_v42  ;;  %v860_v47 = vpop.f32.mrf.mxu0 }
 0x109   : > { %v882_v49 = vpop.f32.mrf.mxu1 }
 0x10a   : > { %v645_v50 = vadd.f32 %v881_v46, %v859_v44  ;;  %v861_v51 = vpop.f32.mrf.mxu0 }
 0x10b   : > { %v862_v52 = vadd.f32 %v861_v51, %v860_v47  ;;  %v883_v53 = vpop.f32.mrf.mxu1 }
 0x10c   : > { %v651_v54 = vadd.f32 %v645_v50, %v287_v48  ;;  %v884_v55 = vadd.f32 %v883_v53, %v882_v49 }
 0x10e   : > { %654 = vst.msk [vmem:[#allocation2] sm:$0xff] %vm653_vm1, %v651_v54  ;;  %v648_v57 = vadd.f32 %v884_v55, %v862_v52  ;;  %659 = sbr.rel (%p834_p11) target bundleno = 287 (0x11f), region = 63 }
 0x110   : > { %v652_v58 = vadd.f32 %v648_v57, %v288_v56 }
 0x112   : > { %655 = vst.msk [vmem:[#allocation2 + $0x8] sm:$0xff] %vm653_vm1, %v652_v58 }
 0x113   : > { %v835_v60 = vld [vmem:[%s1147_s2] ss:$0 sm:$0xff] }
 0x115   : > { %v660_v59 = vld [vmem:[#allocation2] sm:$0xff] }
 0x116   : > { %v669_v62 = vadd.f32 %v835_v60, %v660_v59 }
 0x118   : > { %v671_v0 = vmax.f32 %v669_v62, 0.0 }
 0x119   : > { %v661_v61 = vld [vmem:[#allocation2 + $0x8] sm:$0xff] }
 0x11a   : > { %v670_v63 = vadd.f32 %v835_v60, %v661_v61  ;;  %673 = vst.msk [vmem:[%s1148_s3] sm:$0xff] %vm653_vm1, %v671_v0 }
 0x11c   : > { %v672_v1 = vmax.f32 %v670_v63, 0.0 }
 0x11e   : > { %674 = vst.msk [vmem:[%s1148_s3 + $0x8] sm:$0xff] %vm653_vm1, %v672_v1 }
 0x11f PF: > { %s13_s16 = sadd.s32 1, %s1002_s16   ;;  %s1149_s12 = smov %s990_s13 }
 0x120   : > { %p10_p12 = scmp.ge.s32.totalorder %s13_s16, 6   ;;  %s1150_s13 = smov %s1060_s20 }
 0x121   : > { %s1151_s14 = smov %s998_s15  ;;  %s1152_s15 = smov %s1154_s17 }
 0x122   :  { %12 = sbr.rel (!%p10_p12) target bundleno = 3 (0x3), region = 104 }

// kernel: _lambda_.27
= control target key start
LH: loop header
LB: loop body
LE: loop exit
PB: predicated region body
PF: predicated region fallthrough
CT: control target
= control target key end

     0   :  { %v192_v1 = vmov 0   ;;  %vm82_vm0 = vcmask 523264   ;;  %v146_v10 = vlaneseq  ;;  %s255_s1 = inlined_call_operand.vmem [shape: bf16[64,256], index: 1, kind: input, shape index: {}]   ;;  %s256_s0 = inlined_call_operand.vmem [shape: bf16[16,64], index: 0, kind: input, shape index: {}]   ;;  %s257_s2 = inlined_call_operand.vmem [shape: f32[1,256], index: 2, kind: input, shape index: {}]   ;;  %s258_s3 = inlined_call_operand.vmem [shape: f32[16,256], index: 3, kind: output, shape index: {}]  }
   0x1   :  { %v179_v0 = vld [vmem:[%s255_s1 + $0x34] ss:$8 sps:$4 sm:$0xff]   ;;  %118 = vmatprep.mubr.bf16.mxu0 %v192_v1  ;;  %v181_v2 = vld [vmem:[%s255_s1 + $0x30] ss:$8 sps:$4 sm:$0xff]   ;;  %v182_v3 = vld [vmem:[%s255_s1 + $0x24] ss:$8 sps:$4 sm:$0xff]  }
   0x2   :  { %94 = vmatprep.subr.bf16.mxu0 %v179_v0  ;;  %v184_v4 = vld [vmem:[%s255_s1 + $0x20] ss:$8 sps:$4 sm:$0xff]   ;;  %v185_v5 = vld [vmem:[%s255_s1 + $0x14] ss:$8 sps:$4 sm:$0xff]   ;;  %v187_v6 = vld [vmem:[%s255_s1 + $0x10] ss:$8 sps:$4 sm:$0xff]  }
   0x3   :  { %95 = vmatpush1.bf16.msra.mxu0 %v181_v2  ;;  %v188_v7 = vld [vmem:[%s255_s1 + $0x4] ss:$8 sps:$4 sm:$0xff]   ;;  %v190_v8 = vld [vmem:[%s255_s1] ss:$8 sps:$4 sm:$0xff]   ;;  %v147_v11 = vshrl.u32 %v146_v10, 7 }
   0x4   :  { %96 = vmatprep.subr.bf16.mxu0 %v182_v3  ;;  %v191_v9 = vld [vmem:[%s256_s0] sm:$0xff]  }
   0x5   :  { %v148_v12 = vsub.s32 0, %v147_v11  ;;  %v144_v13 = vld [vmem:[%s257_s2] sm:$0x3]  ;;  %v152_v14 = vsub.s32 1, %v147_v11 }
   0x7   :  { %97 = vmatpush1.bf16.msra.mxu0 %v184_v4  ;;  %v149_v15 = vrot.slane %v144_v13, %v148_v12  ;;  %v153_v16 = vrot.slane %v144_v13, %v152_v14 }
   0x8   :  { %98 = vmatprep.subr.bf16.mxu0 %v185_v5 }
   0xb   :  { %99 = vmatpush1.bf16.msra.mxu0 %v187_v6 }
   0xc   :  { %100 = vmatprep.subr.bf16.mxu0 %v188_v7 }
   0xf   :  { %101 = vmatpush1.bf16.msra.mxu0 %v190_v8 }
  0x12   :  { %177 = vmatmul.mubr.msk.bf16.vlgmr.msra.gmra.mxu0 %vm82_vm0, %v191_v9 }
  0xd2   :  { %v120_v17 = vpop.f32.mrf.mxu0 }
  0xd3   :  { %v156_v18 = vadd.f32 %v149_v15, %v120_v17 }
  0xd4   :  { %v122_v19 = vpop.f32.mrf.mxu0 }
  0xd5   :  { %160 = vst [vmem:[%s258_s3] sm:$0xff] %v156_v18  ;;  %v157_v20 = vadd.f32 %v153_v16, %v122_v19 }
  0xd6   :  { %v124_v21 = vpop.f32.mrf.mxu0 }
  0xd7   :  { %161 = vst [vmem:[%s258_s3 + $0x8] sm:$0xff] %v157_v20  ;;  %v158_v22 = vadd.f32 %v149_v15, %v124_v21 }
  0xd8   :  { %v126_v23 = vpop.f32.mrf.mxu0 }
  0xd9   :  { %162 = vst [vmem:[%s258_s3 + $0x10] sm:$0xff] %v158_v22  ;;  %v159_v24 = vadd.f32 %v153_v16, %v126_v23 }
  0xdb   :  { %163 = vst [vmem:[%s258_s3 + $0x18] sm:$0xff] %v159_v24 }

// kernel: _lambda_.28
= control target key start
LH: loop header
LB: loop body
LE: loop exit
PB: predicated region body
PF: predicated region fallthrough
CT: control target
= control target key end

     0   :  { %v207_v1 = vmov 0   ;;  %vm85_vm0 = vcmask 523264   ;;  %v149_v10 = vlaneseq  ;;  %s287_s1 = inlined_call_operand.vmem [shape: bf16[64,256], index: 1, kind: input, shape index: {}]   ;;  %s288_s0 = inlined_call_operand.vmem [shape: bf16[16,64], index: 0, kind: input, shape index: {}]   ;;  %s289_s2 = inlined_call_operand.vmem [shape: f32[1,256], index: 2, kind: input, shape index: {}]   ;;  %s290_s3 = inlined_call_operand.vmem [shape: f32[16,256], index: 3, kind: input, shape index: {}]   ;;  %s291_s4 = inlined_call_operand.vmem [shape: f32[16,256], index: 4, kind: output, shape index: {}]  }
   0x1   :  { %v194_v0 = vld [vmem:[%s287_s1 + $0x34] ss:$8 sps:$4 sm:$0xff]   ;;  %121 = vmatprep.mubr.bf16.mxu0 %v207_v1  ;;  %v196_v2 = vld [vmem:[%s287_s1 + $0x30] ss:$8 sps:$4 sm:$0xff]   ;;  %v197_v3 = vld [vmem:[%s287_s1 + $0x24] ss:$8 sps:$4 sm:$0xff]  }
   0x2   :  { %97 = vmatprep.subr.bf16.mxu0 %v194_v0  ;;  %v199_v4 = vld [vmem:[%s287_s1 + $0x20] ss:$8 sps:$4 sm:$0xff]   ;;  %v200_v5 = vld [vmem:[%s287_s1 + $0x14] ss:$8 sps:$4 sm:$0xff]   ;;  %v202_v6 = vld [vmem:[%s287_s1 + $0x10] ss:$8 sps:$4 sm:$0xff]  }
   0x3   :  { %98 = vmatpush1.bf16.msra.mxu0 %v196_v2  ;;  %v203_v7 = vld [vmem:[%s287_s1 + $0x4] ss:$8 sps:$4 sm:$0xff]   ;;  %v205_v8 = vld [vmem:[%s287_s1] ss:$8 sps:$4 sm:$0xff]   ;;  %v150_v11 = vshrl.u32 %v149_v10, 7  ;;  %v165_v25 = vld [vmem:[%s290_s3 + $0x10] sm:$0xff] }
   0x4   :  { %99 = vmatprep.subr.bf16.mxu0 %v197_v3  ;;  %v206_v9 = vld [vmem:[%s288_s0] sm:$0xff]   ;;  %v164_v21 = vld [vmem:[%s290_s3 + $0x8] sm:$0xff]  ;;  %v166_v30 = vld [vmem:[%s290_s3 + $0x18] sm:$0xff] }
   0x5   :  { %v151_v12 = vsub.s32 0, %v150_v11  ;;  %v147_v13 = vld [vmem:[%s289_s2] sm:$0x3]  ;;  %v155_v14 = vsub.s32 1, %v150_v11 }
   0x6   :  { %v163_v18 = vld [vmem:[%s290_s3] sm:$0xff] }
   0x7   :  { %100 = vmatpush1.bf16.msra.mxu0 %v199_v4  ;;  %v152_v15 = vrot.slane %v147_v13, %v151_v12  ;;  %v156_v16 = vrot.slane %v147_v13, %v155_v14 }
   0x8   :  { %101 = vmatprep.subr.bf16.mxu0 %v200_v5 }
   0xb   :  { %102 = vmatpush1.bf16.msra.mxu0 %v202_v6 }
   0xc   :  { %103 = vmatprep.subr.bf16.mxu0 %v203_v7 }
   0xf   :  { %104 = vmatpush1.bf16.msra.mxu0 %v205_v8 }
  0x12   :  { %192 = vmatmul.mubr.msk.bf16.vlgmr.msra.gmra.mxu0 %vm85_vm0, %v206_v9 }
  0xd2   :  { %v123_v17 = vpop.f32.mrf.mxu0 }
  0xd3   :  { %v159_v19 = vadd.f32 %v152_v15, %v123_v17 }
  0xd4   :  { %v125_v20 = vpop.f32.mrf.mxu0 }
  0xd5   :  { %v167_v22 = vadd.f32 %v163_v18, %v159_v19  ;;  %v160_v23 = vadd.f32 %v156_v16, %v125_v20 }
  0xd6   :  { %v127_v24 = vpop.f32.mrf.mxu0 }
  0xd7   :  { %v171_v26 = vmax.f32 %v167_v22, 0.0  ;;  %v168_v27 = vadd.f32 %v164_v21, %v160_v23  ;;  %v161_v28 = vadd.f32 %v152_v15, %v127_v24 }
  0xd8   :  { %v129_v29 = vpop.f32.mrf.mxu0 }
  0xd9   :  { %175 = vst [vmem:[%s291_s4] sm:$0xff] %v171_v26  ;;  %v172_v31 = vmax.f32 %v168_v27, 0.0  ;;  %v169_v32 = vadd.f32 %v165_v25, %v161_v28  ;;  %v162_v33 = vadd.f32 %v156_v16, %v129_v29 }
  0xdb   :  { %176 = vst [vmem:[%s291_s4 + $0x8] sm:$0xff] %v172_v31  ;;  %v173_v34 = vmax.f32 %v169_v32, 0.0  ;;  %v170_v35 = vadd.f32 %v166_v30, %v162_v33 }
  0xdd   :  { %177 = vst [vmem:[%s291_s4 + $0x10] sm:$0xff] %v173_v34  ;;  %v174_v36 = vmax.f32 %v170_v35, 0.0 }
  0xdf   :  { %178 = vst [vmem:[%s291_s4 + $0x18] sm:$0xff] %v174_v36 }

// kernel: _lambda_.29
= control target key start
LH: loop header
LB: loop body
LE: loop exit
PB: predicated region body
PF: predicated region fallthrough
CT: control target
= control target key end

     0   :  { %vm19_vm0 = vcmask 523264   ;;  %v293_v18 = vmov 0.0   ;;  %s383_s1 = inlined_call_operand.vmem [shape: bf16[256,64], index: 1, kind: input, shape index: {}]   ;;  %s384_s0 = inlined_call_operand.vmem [shape: bf16[16,256], index: 0, kind: input, shape index: {}]   ;;  %s385_s2 = inlined_call_operand.vmem [shape: f32[1,64], index: 2, kind: input, shape index: {}]   ;;  %s386_s3 = inlined_call_operand.vmem [shape: f32[16,64], index: 3, kind: output, shape index: {}]  }
   0x1   :  { %v274_v0 = vld [vmem:[%s383_s1 + $0x78] sm:$0xff]   ;;  %v276_v2 = vld [vmem:[%s383_s1 + $0x70] sm:$0xff]   ;;  %v278_v4 = vld [vmem:[%s383_s1 + $0x68] sm:$0xff]   ;;  %20 = vst.msk [vmem:[#allocation2] sm:$0xff] %vm19_vm0, %v293_v18 }
   0x2   :  { %v275_v1 = vld [vmem:[%s383_s1 + $0x38] sm:$0xff]   ;;  %251 = vmatprep.subr.bf16.mxu0 %v274_v0  ;;  %v277_v3 = vld [vmem:[%s383_s1 + $0x30] sm:$0xff]   ;;  %v279_v5 = vld [vmem:[%s383_s1 + $0x28] sm:$0xff]   ;;  %21 = vst.msk [vmem:[#allocation2 + $0x8] sm:$0xff] %vm19_vm0, %v293_v18 }
   0x3   :  { %252 = vmatpush3.bf16.msra.mxu0 %v275_v1  ;;  %v280_v6 = vld [vmem:[%s383_s1 + $0x60] sm:$0xff]   ;;  %v282_v8 = vld [vmem:[%s383_s1 + $0x58] sm:$0xff]   ;;  %v284_v10 = vld [vmem:[%s383_s1 + $0x50] sm:$0xff]  }
   0x4   :  { %253 = vmatprep.subr.bf16.mxu0 %v276_v2  ;;  %v281_v7 = vld [vmem:[%s383_s1 + $0x20] sm:$0xff]   ;;  %v283_v9 = vld [vmem:[%s383_s1 + $0x18] sm:$0xff]   ;;  %v285_v12 = vld [vmem:[%s383_s1 + $0x10] sm:$0xff]  }
   0x5   :  { %v292_v11 = vld [vmem:[%s384_s0 + $0x4] ss:$8 sps:$4 sm:$0xff]   ;;  %v290_v17 = vld [vmem:[%s384_s0] ss:$8 sps:$4 sm:$0xff]  }
   0x6   :  { %196 = vmatprep.mubr.bf16.mxu0 %v292_v11  ;;  %v286_v13 = vld [vmem:[%s383_s1 + $0x48] sm:$0xff]   ;;  %v288_v15 = vld [vmem:[%s383_s1 + $0x40] sm:$0xff]  }
   0x7   :  { %254 = vmatpush3.bf16.msra.mxu0 %v277_v3  ;;  %v287_v14 = vld [vmem:[%s383_s1 + $0x8] sm:$0xff]   ;;  %v289_v16 = vld [vmem:[%s383_s1] sm:$0xff]  }
   0x8   :  { %255 = vmatprep.subr.bf16.mxu0 %v278_v4  ;;  %v22_v20 = vld [vmem:[#allocation2] sm:$0xff] }
   0x9   :  { %v23_v25 = vld [vmem:[#allocation2 + $0x8] sm:$0xff]  ;;  %v250_v29 = vld [vmem:[%s385_s2] ss:$0 sm:$0xff] }
   0xb   :  { %256 = vmatpush3.bf16.msra.mxu0 %v279_v5 }
   0xc   :  { %257 = vmatprep.subr.bf16.mxu0 %v280_v6 }
   0xf   :  { %258 = vmatpush3.bf16.msra.mxu0 %v281_v7 }
  0x10   :  { %259 = vmatprep.subr.bf16.mxu0 %v282_v8 }
  0x13   :  { %260 = vmatpush3.bf16.msra.mxu0 %v283_v9 }
  0x14   :  { %261 = vmatprep.subr.bf16.mxu0 %v284_v10 }
  0x17   :  { %262 = vmatpush3.bf16.msra.mxu0 %v285_v12 }
  0x18   :  { %263 = vmatprep.subr.bf16.mxu0 %v286_v13 }
  0x1b   :  { %264 = vmatpush3.bf16.msra.mxu0 %v287_v14 }
  0x1c   :  { %265 = vmatprep.subr.bf16.mxu0 %v288_v15 }
  0x1f   :  { %266 = vmatpush3.bf16.msra.mxu0 %v289_v16 }
  0x22   :  { %197 = vmatmul.mubr.bf16.vlgmr.msra.gmra.mxu0 %v290_v17 }
  0xe2   :  { %v267_v19 = vpop.f32.mrf.mxu0 }
  0xe4   :  { %v268_v21 = vpop.f32.mrf.mxu0 }
  0xe5   :  { %v269_v22 = vadd.f32 %v268_v21, %v267_v19 }
  0xe6   :  { %v270_v23 = vpop.f32.mrf.mxu0 }
  0xe7   :  { %v205_v24 = vadd.f32 %v269_v22, %v22_v20 }
  0xe8   :  { %v271_v26 = vpop.f32.mrf.mxu0 }
  0xe9   :  { %208 = vst.msk [vmem:[#allocation2] sm:$0xff] %vm19_vm0, %v205_v24  ;;  %v272_v27 = vadd.f32 %v271_v26, %v270_v23 }
  0xeb   :  { %v206_v28 = vadd.f32 %v272_v27, %v23_v25 }
  0xed   :  { %209 = vst.msk [vmem:[#allocation2 + $0x8] sm:$0xff] %vm19_vm0, %v206_v28 }
  0xf0   :  { %v213_v30 = vld [vmem:[#allocation2] sm:$0xff] }
  0xf1   :  { %v222_v31 = vadd.f32 %v250_v29, %v213_v30 }
  0xf3   :  { %v224_v32 = vmax.f32 %v222_v31, 0.0 }
  0xf4   :  { %v214_v33 = vld [vmem:[#allocation2 + $0x8] sm:$0xff] }
  0xf5   :  { %226 = vst.msk [vmem:[%s386_s3] sm:$0xff] %vm19_vm0, %v224_v32  ;;  %v223_v34 = vadd.f32 %v250_v29, %v214_v33 }
  0xf7   :  { %v225_v35 = vmax.f32 %v223_v34, 0.0 }
  0xf9   :  { %227 = vst.msk [vmem:[%s386_s3 + $0x8] sm:$0xff] %vm19_vm0, %v225_v35 }

// kernel: _lambda_.32
= control target key start
LH: loop header
LB: loop body
LE: loop exit
PB: predicated region body
PF: predicated region fallthrough
CT: control target
= control target key end

     0   :  { %s373_s1 = inlined_call_operand.vmem [shape: bf16[256,128], index: 1, kind: input, shape index: {}]   ;;  %s374_s0 = inlined_call_operand.vmem [shape: bf16[16,256], index: 0, kind: input, shape index: {}]   ;;  %s375_s2 = inlined_call_operand.vmem [shape: f32[1,128], index: 2, kind: input, shape index: {}]   ;;  %s376_s3 = inlined_call_operand.vmem [shape: f32[16,128], index: 3, kind: output, shape index: {}]  }
   0x1   :  { %v271_v0 = vld [vmem:[%s373_s1 + $0x78] sm:$0xff]   ;;  %v273_v2 = vld [vmem:[%s373_s1 + $0x70] sm:$0xff]   ;;  %v275_v4 = vld [vmem:[%s373_s1 + $0x68] sm:$0xff]  }
   0x2   :  { %v272_v1 = vld [vmem:[%s373_s1 + $0x38] sm:$0xff]   ;;  %249 = vmatprep.subr.bf16.mxu0 %v271_v0  ;;  %v274_v3 = vld [vmem:[%s373_s1 + $0x30] sm:$0xff]   ;;  %v276_v5 = vld [vmem:[%s373_s1 + $0x28] sm:$0xff]  }
   0x3   :  { %250 = vmatpush3.bf16.msra.mxu0 %v272_v1  ;;  %v277_v6 = vld [vmem:[%s373_s1 + $0x60] sm:$0xff]   ;;  %v279_v8 = vld [vmem:[%s373_s1 + $0x58] sm:$0xff]   ;;  %v281_v10 = vld [vmem:[%s373_s1 + $0x50] sm:$0xff]  }
   0x4   :  { %251 = vmatprep.subr.bf16.mxu0 %v273_v2  ;;  %v278_v7 = vld [vmem:[%s373_s1 + $0x20] sm:$0xff]   ;;  %v280_v9 = vld [vmem:[%s373_s1 + $0x18] sm:$0xff]   ;;  %v282_v12 = vld [vmem:[%s373_s1 + $0x10] sm:$0xff]  }
   0x5   :  { %v289_v11 = vld [vmem:[%s374_s0 + $0x4] ss:$8 sps:$4 sm:$0xff]   ;;  %v287_v17 = vld [vmem:[%s374_s0] ss:$8 sps:$4 sm:$0xff]  }
   0x6   :  { %195 = vmatprep.mubr.bf16.mxu0 %v289_v11  ;;  %v283_v13 = vld [vmem:[%s373_s1 + $0x48] sm:$0xff]   ;;  %v285_v15 = vld [vmem:[%s373_s1 + $0x40] sm:$0xff]  }
   0x7   :  { %252 = vmatpush3.bf16.msra.mxu0 %v274_v3  ;;  %v284_v14 = vld [vmem:[%s373_s1 + $0x8] sm:$0xff]   ;;  %v286_v16 = vld [vmem:[%s373_s1] sm:$0xff]  }
   0x8   :  { %253 = vmatprep.subr.bf16.mxu0 %v275_v4  ;;  %v248_v20 = vld [vmem:[%s375_s2] ss:$0 sm:$0xff] }
   0xb   :  { %254 = vmatpush3.bf16.msra.mxu0 %v276_v5 }
   0xc   :  { %255 = vmatprep.subr.bf16.mxu0 %v277_v6 }
   0xf   :  { %256 = vmatpush3.bf16.msra.mxu0 %v278_v7 }
  0x10   :  { %257 = vmatprep.subr.bf16.mxu0 %v279_v8 }
  0x13   :  { %258 = vmatpush3.bf16.msra.mxu0 %v280_v9 }
  0x14   :  { %259 = vmatprep.subr.bf16.mxu0 %v281_v10 }
  0x17   :  { %260 = vmatpush3.bf16.msra.mxu0 %v282_v12 }
  0x18   :  { %261 = vmatprep.subr.bf16.mxu0 %v283_v13 }
  0x1b   :  { %262 = vmatpush3.bf16.msra.mxu0 %v284_v14 }
  0x1c   :  { %263 = vmatprep.subr.bf16.mxu0 %v285_v15 }
  0x1f   :  { %264 = vmatpush3.bf16.msra.mxu0 %v286_v16 }
  0x22   :  { %196 = vmatmul.mubr.bf16.vlgmr.msra.gmra.mxu0 %v287_v17 }
  0xe2   :  { %v265_v18 = vpop.f32.mrf.mxu0 }
  0xe4   :  { %v266_v19 = vpop.f32.mrf.mxu0 }
  0xe5   :  { %v267_v21 = vadd.f32 %v266_v19, %v265_v18 }
  0xe6   :  { %v268_v22 = vpop.f32.mrf.mxu0 }
  0xe7   :  { %v220_v23 = vadd.f32 %v267_v21, %v248_v20 }
  0xe8   :  { %v269_v24 = vpop.f32.mrf.mxu0 }
  0xe9   :  { %v222_v25 = vmax.f32 %v220_v23, 0.0  ;;  %v270_v26 = vadd.f32 %v269_v24, %v268_v22 }
  0xeb   :  { %224 = vst [vmem:[%s376_s3] sm:$0xff] %v222_v25  ;;  %v221_v27 = vadd.f32 %v270_v26, %v248_v20 }
  0xed   :  { %v223_v28 = vmax.f32 %v221_v27, 0.0 }
  0xef   :  { %225 = vst [vmem:[%s376_s3 + $0x8] sm:$0xff] %v223_v28 }

// kernel: _lambda_.34
= control target key start
LH: loop header
LB: loop body
LE: loop exit
PB: predicated region body
PF: predicated region fallthrough
CT: control target
= control target key end

     0   :  { %s1020_s12 = smov 0   ;;  %s1022_s13 = smov 0   ;;  %s1199_s0 = inlined_call_operand.vmem [shape: bf16[8,256], index: 0, kind: input, shape index: {}]   ;;  %s1200_s1 = inlined_call_operand.vmem [shape: bf16[256,512], index: 1, kind: input, shape index: {}]   ;;  %s1201_s2 = inlined_call_operand.vmem [shape: f32[1,512], index: 2, kind: input, shape index: {}]   ;;  %s1202_s3 = inlined_call_operand.vmem [shape: f32[8,512], index: 3, kind: output, shape index: {}]  }
   0x1   :  { %s1024_s14 = smov 0   ;;  %s1026_s15 = smov 0  }
   0x2   :  { %s1028_s16 = smov 0  }
   0x3 LB: > { %s28_s17 = sadd.s32 1, %s994_s15  ;;  %p76_p1 = scmp.ne.s32.totalorder %s986_s13, %s982_s12  ;;  %s998_s16 = sphi %s1028_s16, %s13_s16   ;;  %s994_s15 = sphi %s1026_s15, %s1206_s15   ;;  %s990_s14 = sphi %s1024_s14, %s1205_s14   ;;  %s986_s13 = sphi %s1022_s13, %s1204_s13   ;;  %s982_s12 = sphi %s1020_s12, %s1203_s12  }
   0x4   : > { %p30_p0 = scmp.ge.s32.totalorder %s28_s17, 2  ;;  %p77_p2 = scmp.eq.s32.totalorder %s998_s16, 0 }
   0x5   : > { %s69_s19 = sadd.s32 1, %s986_s13  ;;  %p824_p5 = scmp.ge.s32.totalorder %s998_s16, 2 }
   0x6   : > { %s1208_s17 = smov (%p30_p0, %s28_s17), 0  ;;  %p78_p3 = por %p77_p2, %p76_p1 }
   0x7   : > { %s65_s18 = ssub.s32 %s994_s15, %s1208_s17  ;;  %169 = sbr.rel (%p824_p5) target bundleno = 32 (0x20), region = 20 }
   0x8   : > { %p67_p4 = scmp.eq.s32.totalorder %s65_s18, 0 }
   0xa   : > { %s1055_s20 = scalar_select %p67_p4, %s986_s13, %s69_s19  }
   0xc   : > { %172 = sbr.rel (!%p78_p3) target bundleno = 32 (0x20), region = 24  ;;  %s174_s21 = sand.u32 (%p78_p3), 1, %s986_s13  }
   0xd   : > { %s869_s22 = sshll.u32 (%p78_p3), %s994_s15, 3  ;;  %s825_s23 = sshll.u32 (%p78_p3), %s174_s21, 8 }
   0xe   : > { %s1063_s26 = scalar_lea.vmem (%p78_p3), %s1200_s1, %s869_s22  ;;  %s1068_s27 = scalar_lea.vmem (%p78_p3), [#allocation3], %s825_s23 }
   0xf   : > { %v273_v0 = vld [vmem:[%s1063_s26] sm:$0xff] (%p78_p3)  ;;  %v275_v1 = vld [vmem:[%s1063_s26 + $0x10] sm:$0xff] (%p78_p3) }
  0x10   : > { %v277_v2 = vld [vmem:[%s1063_s26 + $0x20] sm:$0xff] (%p78_p3)  ;;  %274 = vst [vmem:[%s1068_s27] sm:$0xff] (%p78_p3), %v273_v0  ;;  %276 = vst [vmem:[%s1068_s27 + $0x8] sm:$0xff] (%p78_p3), %v275_v1  ;;  %v279_v3 = vld [vmem:[%s1063_s26 + $0x30] sm:$0xff] (%p78_p3) }
  0x11   : > { %278 = vst [vmem:[%s1068_s27 + $0x10] sm:$0xff] %v277_v2  ;;  %v281_v4 = vld [vmem:[%s1063_s26 + $0x40] sm:$0xff]  ;;  %v283_v5 = vld [vmem:[%s1063_s26 + $0x50] sm:$0xff]  ;;  %280 = vst [vmem:[%s1068_s27 + $0x18] sm:$0xff] %v279_v3 }
  0x12   : > { %282 = vst [vmem:[%s1068_s27 + $0x20] sm:$0xff] %v281_v4  ;;  %284 = vst [vmem:[%s1068_s27 + $0x28] sm:$0xff] %v283_v5  ;;  %v285_v6 = vld [vmem:[%s1063_s26 + $0x60] sm:$0xff]  ;;  %v287_v7 = vld [vmem:[%s1063_s26 + $0x70] sm:$0xff] }
  0x13   : > { %v289_v8 = vld [vmem:[%s1063_s26 + $0x80] sm:$0xff]  ;;  %286 = vst [vmem:[%s1068_s27 + $0x30] sm:$0xff] %v285_v6  ;;  %288 = vst [vmem:[%s1068_s27 + $0x38] sm:$0xff] %v287_v7  ;;  %v291_v9 = vld [vmem:[%s1063_s26 + $0x90] sm:$0xff] }
  0x14   : > { %290 = vst [vmem:[%s1068_s27 + $0x40] sm:$0xff] %v289_v8  ;;  %v293_v10 = vld [vmem:[%s1063_s26 + $0xa0] sm:$0xff]  ;;  %v295_v11 = vld [vmem:[%s1063_s26 + $0xb0] sm:$0xff]  ;;  %292 = vst [vmem:[%s1068_s27 + $0x48] sm:$0xff] %v291_v9 }
  0x15   : > { %294 = vst [vmem:[%s1068_s27 + $0x50] sm:$0xff] %v293_v10  ;;  %296 = vst [vmem:[%s1068_s27 + $0x58] sm:$0xff] %v295_v11  ;;  %v297_v12 = vld [vmem:[%s1063_s26 + $0xc0] sm:$0xff]  ;;  %v299_v13 = vld [vmem:[%s1063_s26 + $0xd0] sm:$0xff] }
  0x16   : > { %v301_v14 = vld [vmem:[%s1063_s26 + $0xe0] sm:$0xff]  ;;  %298 = vst [vmem:[%s1068_s27 + $0x60] sm:$0xff] %v297_v12  ;;  %300 = vst [vmem:[%s1068_s27 + $0x68] sm:$0xff] %v299_v13  ;;  %v303_v15 = vld [vmem:[%s1063_s26 + $0xf0] sm:$0xff] }
  0x17   : > { %302 = vst [vmem:[%s1068_s27 + $0x70] sm:$0xff] %v301_v14  ;;  %v305_v16 = vld [vmem:[%s1063_s26 + $0x100] sm:$0xff]  ;;  %v307_v17 = vld [vmem:[%s1063_s26 + $0x110] sm:$0xff]  ;;  %304 = vst [vmem:[%s1068_s27 + $0x78] sm:$0xff] %v303_v15 }
  0x18   : > { %306 = vst [vmem:[%s1068_s27 + $0x80] sm:$0xff] %v305_v16  ;;  %308 = vst [vmem:[%s1068_s27 + $0x88] sm:$0xff] %v307_v17  ;;  %v309_v18 = vld [vmem:[%s1063_s26 + $0x120] sm:$0xff]  ;;  %v311_v19 = vld [vmem:[%s1063_s26 + $0x130] sm:$0xff] }
  0x19   : > { %v313_v20 = vld [vmem:[%s1063_s26 + $0x140] sm:$0xff]  ;;  %310 = vst [vmem:[%s1068_s27 + $0x90] sm:$0xff] %v309_v18  ;;  %312 = vst [vmem:[%s1068_s27 + $0x98] sm:$0xff] %v311_v19  ;;  %v315_v21 = vld [vmem:[%s1063_s26 + $0x150] sm:$0xff] }
  0x1a   : > { %314 = vst [vmem:[%s1068_s27 + $0xa0] sm:$0xff] %v313_v20  ;;  %v317_v22 = vld [vmem:[%s1063_s26 + $0x160] sm:$0xff]  ;;  %v319_v23 = vld [vmem:[%s1063_s26 + $0x170] sm:$0xff]  ;;  %316 = vst [vmem:[%s1068_s27 + $0xa8] sm:$0xff] %v315_v21 }
  0x1b   : > { %318 = vst [vmem:[%s1068_s27 + $0xb0] sm:$0xff] %v317_v22  ;;  %320 = vst [vmem:[%s1068_s27 + $0xb8] sm:$0xff] %v319_v23  ;;  %v321_v24 = vld [vmem:[%s1063_s26 + $0x180] sm:$0xff]  ;;  %v323_v25 = vld [vmem:[%s1063_s26 + $0x190] sm:$0xff] }
  0x1c   : > { %v325_v26 = vld [vmem:[%s1063_s26 + $0x1a0] sm:$0xff]  ;;  %322 = vst [vmem:[%s1068_s27 + $0xc0] sm:$0xff] %v321_v24  ;;  %324 = vst [vmem:[%s1068_s27 + $0xc8] sm:$0xff] %v323_v25  ;;  %v327_v27 = vld [vmem:[%s1063_s26 + $0x1b0] sm:$0xff] }
  0x1d   : > { %326 = vst [vmem:[%s1068_s27 + $0xd0] sm:$0xff] %v325_v26  ;;  %v329_v28 = vld [vmem:[%s1063_s26 + $0x1c0] sm:$0xff]  ;;  %v331_v29 = vld [vmem:[%s1063_s26 + $0x1d0] sm:$0xff]  ;;  %328 = vst [vmem:[%s1068_s27 + $0xd8] sm:$0xff] %v327_v27 }
  0x1e   : > { %330 = vst [vmem:[%s1068_s27 + $0xe0] sm:$0xff] %v329_v28  ;;  %332 = vst [vmem:[%s1068_s27 + $0xe8] sm:$0xff] %v331_v29  ;;  %v333_v30 = vld [vmem:[%s1063_s26 + $0x1e0] sm:$0xff]  ;;  %v335_v31 = vld [vmem:[%s1063_s26 + $0x1f0] sm:$0xff] }
  0x1f   : > { %334 = vst [vmem:[%s1068_s27 + $0xf0] sm:$0xff] %v333_v30  ;;  %336 = vst [vmem:[%s1068_s27 + $0xf8] sm:$0xff] %v335_v31 }
  0x20 PF: > { %p828_p6 = scmp.ge.s32.totalorder %s998_s16, 1  ;;  %p349_p7 = scmp.lt.s32.totalorder %s998_s16, 3 }
  0x22   : > { %p350_p8 = pnand %p828_p6, %p349_p7 }
  0x23   : > { %s356_s28 = sand.u32 (!%p350_p8), 1, %s982_s12   ;;  %s830_s6 = sshll.u32 (!%p350_p8), %s990_s14, 1 }
  0x24   : > { %353 = sbr.rel (%p350_p8) target bundleno = 305 (0x131), region = 66  ;;  %s829_s4 = sshll.u32 (!%p350_p8), %s356_s28, 8 }
  0x25   : > { %s1141_s5 = scalar_lea.vmem (!%p350_p8), [#allocation3], %s829_s4  ;;  %p409_p9 = scmp.lt.s32.totalorder (!%p350_p8), %s830_s6, 3 }
  0x29   : > { %v1137_v32 = vld [vmem:[%s1199_s0] sm:$0xff]  ;;  %v910_v34 = vld [vmem:[%s1141_s5 + $0x74] ss:$8 sps:$4 sm:$0xff]   ;;  %v912_v35 = vld [vmem:[%s1141_s5 + $0x70] ss:$8 sps:$4 sm:$0xff]   ;;  %v683_v3 = vlaneseq  ;;  %s1210_s6 = smov (!%p409_p9, %s830_s6), 3 }
  0x2a   : > { %v834_v33 = vcombine.high %v1137_v32, %v1137_v32  ;;  %631 = vmatprep.subr.bf16.mxu0 %v910_v34  ;;  %v913_v36 = vld [vmem:[%s1141_s5 + $0x64] ss:$8 sps:$4 sm:$0xff]   ;;  %v915_v37 = vld [vmem:[%s1141_s5 + $0x60] ss:$8 sps:$4 sm:$0xff]   ;;  %v916_v38 = vld [vmem:[%s1141_s5 + $0x54] ss:$8 sps:$4 sm:$0xff]   ;;  %v833_v2 = vcombine.low %v1137_v32, %v1137_v32  ;;  %s411_s9 = scalar_lea.vmem %s1201_s2, %s1210_s6 }
  0x2b   : > { %632 = vmatpush1.bf16.msra.mxu0 %v912_v35  ;;  %v918_v39 = vld [vmem:[%s1141_s5 + $0x50] ss:$8 sps:$4 sm:$0xff]   ;;  %v919_v40 = vld [vmem:[%s1141_s5 + $0x44] ss:$8 sps:$4 sm:$0xff]   ;;  %v921_v41 = vld [vmem:[%s1141_s5 + $0x40] ss:$8 sps:$4 sm:$0xff]  }
  0x2c   : > { %663 = vmatprep.mubr.bf16.mxu0 %v834_v33  ;;  %633 = vmatprep.subr.bf16.mxu0 %v913_v36  ;;  %v922_v42 = vld [vmem:[%s1141_s5 + $0x34] ss:$8 sps:$4 sm:$0xff]   ;;  %v924_v43 = vld [vmem:[%s1141_s5 + $0x30] ss:$8 sps:$4 sm:$0xff]   ;;  %v925_v44 = vld [vmem:[%s1141_s5 + $0x24] ss:$8 sps:$4 sm:$0xff]  }
  0x2d   : > { %v927_v45 = vld [vmem:[%s1141_s5 + $0x20] ss:$8 sps:$4 sm:$0xff]   ;;  %v928_v46 = vld [vmem:[%s1141_s5 + $0x14] ss:$8 sps:$4 sm:$0xff]   ;;  %v930_v47 = vld [vmem:[%s1141_s5 + $0x10] ss:$8 sps:$4 sm:$0xff]  }
  0x2e   : > { %v931_v48 = vld [vmem:[%s1141_s5 + $0x4] ss:$8 sps:$4 sm:$0xff]   ;;  %v933_v49 = vld [vmem:[%s1141_s5] ss:$8 sps:$4 sm:$0xff]   ;;  %v934_v50 = vld [vmem:[%s1141_s5 + $0xf4] ss:$8 sps:$4 sm:$0xff]  }
  0x2f   : > { %634 = vmatpush1.bf16.msra.mxu0 %v915_v37  ;;  %v936_v51 = vld [vmem:[%s1141_s5 + $0xf0] ss:$8 sps:$4 sm:$0xff]   ;;  %v937_v52 = vld [vmem:[%s1141_s5 + $0xe4] ss:$8 sps:$4 sm:$0xff]   ;;  %v939_v53 = vld [vmem:[%s1141_s5 + $0xe0] ss:$8 sps:$4 sm:$0xff]  }
  0x30   : > { %635 = vmatprep.subr.bf16.mxu0 %v916_v38  ;;  %v940_v54 = vld [vmem:[%s1141_s5 + $0xd4] ss:$8 sps:$4 sm:$0xff]   ;;  %v942_v55 = vld [vmem:[%s1141_s5 + $0xd0] ss:$8 sps:$4 sm:$0xff]   ;;  %v943_v56 = vld [vmem:[%s1141_s5 + $0xc4] ss:$8 sps:$4 sm:$0xff]  }
  0x31   : > { %v945_v57 = vld [vmem:[%s1141_s5 + $0xc0] ss:$8 sps:$4 sm:$0xff]   ;;  %v946_v58 = vld [vmem:[%s1141_s5 + $0xb4] ss:$8 sps:$4 sm:$0xff]   ;;  %v948_v59 = vld [vmem:[%s1141_s5 + $0xb0] ss:$8 sps:$4 sm:$0xff]  }
  0x32   : > { %v949_v60 = vld [vmem:[%s1141_s5 + $0xa4] ss:$8 sps:$4 sm:$0xff]   ;;  %v951_v61 = vld [vmem:[%s1141_s5 + $0xa0] ss:$8 sps:$4 sm:$0xff]   ;;  %v952_v62 = vld [vmem:[%s1141_s5 + $0x94] ss:$8 sps:$4 sm:$0xff]  }
  0x33   : > { %636 = vmatpush1.bf16.msra.mxu0 %v918_v39  ;;  %v954_v63 = vld [vmem:[%s1141_s5 + $0x90] ss:$8 sps:$4 sm:$0xff]   ;;  %v955_v0 = vld [vmem:[%s1141_s5 + $0x84] ss:$8 sps:$4 sm:$0xff]   ;;  %v957_v1 = vld [vmem:[%s1141_s5 + $0x80] ss:$8 sps:$4 sm:$0xff]  }
  0x34   : > { %637 = vmatprep.subr.bf16.mxu0 %v919_v40  ;;  %v684_v4 = vshrl.u32 %v683_v3, 7  ;;  %v681_v6 = vld [vmem:[%s411_s9] sm:$0x3]  ;;  %s832_s10 = sshll.u32 %s1210_s6, 3 }
  0x35   : > { %s421_s18 = scalar_lea.vmem %s1202_s3, %s832_s10 }
  0x36   : > { %v685_v5 = vsub.s32 0, %v684_v4  ;;  %v689_v7 = vsub.s32 1, %v684_v4 }
  0x37   : > { %638 = vmatpush1.bf16.msra.mxu0 %v921_v41 }
  0x38   : > { %639 = vmatprep.subr.bf16.mxu0 %v922_v42  ;;  %v686_v8 = vrot.slane %v681_v6, %v685_v5  ;;  %v690_v9 = vrot.slane %v681_v6, %v689_v7 }
  0x3b   : > { %640 = vmatpush1.bf16.msra.mxu0 %v924_v43 }
  0x3c   : > { %641 = vmatprep.subr.bf16.mxu0 %v925_v44 }
  0x3f   : > { %642 = vmatpush1.bf16.msra.mxu0 %v927_v45 }
  0x40   : > { %643 = vmatprep.subr.bf16.mxu0 %v928_v46 }
  0x43   : > { %644 = vmatpush1.bf16.msra.mxu0 %v930_v47 }
  0x44   : > { %645 = vmatprep.subr.bf16.mxu0 %v931_v48 }
  0x47   : > { %646 = vmatpush1.bf16.msra.mxu0 %v933_v49 }
  0x48   : > { %647 = vmatprep.subr.bf16.mxu0 %v934_v50 }
  0x4b   : > { %648 = vmatpush2.bf16.msra.mxu0 %v936_v51 }
  0x4c   : > { %649 = vmatprep.subr.bf16.mxu0 %v937_v52 }
  0x4f   : > { %650 = vmatpush2.bf16.msra.mxu0 %v939_v53 }
  0x50   : > { %651 = vmatprep.subr.bf16.mxu0 %v940_v54 }
  0x53   : > { %652 = vmatpush2.bf16.msra.mxu0 %v942_v55 }
  0x54   : > { %653 = vmatprep.subr.bf16.mxu0 %v943_v56 }
  0x57   : > { %654 = vmatpush2.bf16.msra.mxu0 %v945_v57 }
  0x58   : > { %655 = vmatprep.subr.bf16.mxu0 %v946_v58 }
  0x5b   : > { %656 = vmatpush2.bf16.msra.mxu0 %v948_v59 }
  0x5c   : > { %657 = vmatprep.subr.bf16.mxu0 %v949_v60 }
  0x5f   : > { %658 = vmatpush2.bf16.msra.mxu0 %v951_v61 }
  0x60   : > { %659 = vmatprep.subr.bf16.mxu0 %v952_v62 }
  0x63   : > { %660 = vmatpush2.bf16.msra.mxu0 %v954_v63 }
  0x64   : > { %661 = vmatprep.subr.bf16.mxu0 %v955_v0 }
  0x67   : > { %662 = vmatpush2.bf16.msra.mxu0 %v957_v1 }
  0x6a   : > { %664 = vmatmul.mubr.bf16.vlgmr.msra.gmra.mxu0 %v833_v2 }
 0x12a   : > { %v665_v10 = vpop.f32.mrf.mxu0 }
 0x12b   : > { %v693_v11 = vadd.f32 %v686_v8, %v665_v10 }
 0x12c   : > { %v667_v12 = vpop.f32.mrf.mxu0 }
 0x12d   : > { %695 = vst [vmem:[%s421_s18] sm:$0xff] %v693_v11  ;;  %v694_v13 = vadd.f32 %v690_v9, %v667_v12 }
 0x12e   : > { %v669_v14 = vpop.f32.mrf.mxu0 }
 0x12f   : > { %696 = vst [vmem:[%s421_s18 + $0x8] sm:$0xff] %v694_v13 }
 0x130   : > { %v670_v15 = vpop.f32.mrf.mxu0 }
 0x131 PF: > { %s13_s16 = sadd.s32 1, %s998_s16   ;;  %s1203_s12 = smov %s986_s13 }
 0x132   : > { %p10_p10 = scmp.ge.s32.totalorder %s13_s16, 4   ;;  %s1204_s13 = smov %s1055_s20 }
 0x133   : > { %s1205_s14 = smov %s994_s15  ;;  %s1206_s15 = smov %s1208_s17 }
 0x134   :  { %12 = sbr.rel (!%p10_p10) target bundleno = 3 (0x3), region = 119 }

// kernel: _lambda_.33
= control target key start
LH: loop header
LB: loop body
LE: loop exit
PB: predicated region body
PF: predicated region fallthrough
CT: control target
= control target key end

     0   :  { %s941_s12 = smov 0   ;;  %s943_s13 = smov 0   ;;  %s1024_s0 = inlined_call_operand.vmem [shape: bf16[8,3584], index: 0, kind: input, shape index: {}]   ;;  %s1025_s1 = inlined_call_operand.vmem [shape: bf16[3584,128], index: 1, kind: input, shape index: {}]   ;;  %s1026_s2 = inlined_call_operand.vmem [shape: f32[1,128], index: 2, kind: input, shape index: {}]   ;;  %s1027_s3 = inlined_call_operand.vmem [shape: f32[8,128], index: 3, kind: output, shape index: {}]  }
   0x1   :  { %s945_s14 = smov 0  }
   0x2 LB: > { %s25_s15 = sadd.s32 1, %s914_s13  ;;  %p744_p0 = scmp.ge.s32.totalorder %s918_s14, 1  ;;  %s918_s14 = sphi %s945_s14, %s13_s14   ;;  %s914_s13 = sphi %s943_s13, %s1029_s13   ;;  %s910_s12 = sphi %s941_s12, %s1028_s12  }
   0x3   : > { %p26_p1 = scmp.ge.s32.totalorder %s25_s15, 7  ;;  %p189_p2 = scmp.lt.s32.totalorder %s918_s14, 8 }
   0x5   : > { %s1031_s15 = smov (%p26_p1, %s25_s15), 0  ;;  %p190_p3 = pnand %p744_p0, %p189_p2 }
   0x6   : > { %s745_s16 = sshll.u32 (!%p190_p3), %s910_s12, 2  ;;  %s747_s17 = sshll.u32 (!%p190_p3), %s910_s12, 6 }
   0x7   : > { %193 = sbr.rel (%p190_p3) target bundleno = 271 (0x10f), region = 32  ;;  %p233_p4 = scmp.lt.s32.totalorder (!%p190_p3), %s745_s16, 27 }
   0x8   : > { %p241_p5 = scmp.lt.s32.totalorder (!%p190_p3), %s747_s17, 447  ;;  %p749_p6 = scmp.ne.s32.totalorder (!%p190_p3), %s910_s12, 0 }
   0xc   : > { %s1033_s16 = smov (!%p233_p4, %s745_s16), 27  ;;  %s1035_s17 = smov (!%p241_p5, %s747_s17), 447 }
   0xd   : > { %s746_s18 = sshll.u32 %s1033_s16, 2  ;;  %s748_s22 = sshll.u32 %s1035_s17, 2 }
   0xe   : > { %s966_s21 = scalar_lea.vmem %s1024_s0, %s746_s18  ;;  %s971_s25 = scalar_lea.vmem %s1025_s1, %s748_s22 }
   0xf   : > { %263 = sbr.rel (%p749_p6) target bundleno = 22 (0x16), region = 36 }
  0x14   : > { %v920_v0 = vmov 0.0  }
  0x15   : > { %264 = vst [vmem:[#allocation2] sm:$0xff] %v920_v0 }
  0x16 PF: > { %v860_v1 = vld [vmem:[%s971_s25 + $0x78] sm:$0xff]   ;;  %v864_v5 = vld [vmem:[%s971_s25 + $0x70] sm:$0xff]   ;;  %v868_v9 = vld [vmem:[%s971_s25 + $0x68] sm:$0xff]   ;;  %p786_p7 = scmp.ne.s32.totalorder %s910_s12, 6 }
  0x17   : > { %v861_v2 = vld [vmem:[%s971_s25 + $0xf8] sm:$0xff]   ;;  %791 = vmatprep.subr.bf16.mxu0 %v860_v1  ;;  %v865_v6 = vld [vmem:[%s971_s25 + $0xf0] sm:$0xff]   ;;  %v869_v10 = vld [vmem:[%s971_s25 + $0xe8] sm:$0xff]  }
  0x18   : > { %v862_v3 = vld [vmem:[%s971_s25 + $0x38] sm:$0xff]   ;;  %813 = vmatprep.subr.bf16.mxu1 %v861_v2  ;;  %v866_v7 = vld [vmem:[%s971_s25 + $0x30] sm:$0xff]   ;;  %v870_v11 = vld [vmem:[%s971_s25 + $0x28] sm:$0xff]  }
  0x19   : > { %v863_v4 = vld [vmem:[%s971_s25 + $0xb8] sm:$0xff]   ;;  %792 = vmatpush3.bf16.msra.mxu0 %v862_v3  ;;  %v867_v8 = vld [vmem:[%s971_s25 + $0xb0] sm:$0xff]   ;;  %v871_v12 = vld [vmem:[%s971_s25 + $0xa8] sm:$0xff]  }
  0x1a   : > { %814 = vmatpush3.bf16.msra.mxu1 %v863_v4  ;;  %793 = vmatprep.subr.bf16.mxu0 %v864_v5  ;;  %v872_v13 = vld [vmem:[%s971_s25 + $0x60] sm:$0xff]   ;;  %v876_v17 = vld [vmem:[%s971_s25 + $0x58] sm:$0xff]   ;;  %v880_v21 = vld [vmem:[%s971_s25 + $0x50] sm:$0xff]  }
  0x1b   : > { %815 = vmatprep.subr.bf16.mxu1 %v865_v6  ;;  %v873_v14 = vld [vmem:[%s971_s25 + $0xe0] sm:$0xff]   ;;  %v877_v18 = vld [vmem:[%s971_s25 + $0xd8] sm:$0xff]   ;;  %v881_v22 = vld [vmem:[%s971_s25 + $0xd0] sm:$0xff]  }
  0x1c   : > { %v874_v15 = vld [vmem:[%s971_s25 + $0x20] sm:$0xff]   ;;  %v878_v19 = vld [vmem:[%s971_s25 + $0x18] sm:$0xff]   ;;  %v882_v23 = vld [vmem:[%s971_s25 + $0x10] sm:$0xff]  }
  0x1d   : > { %794 = vmatpush3.bf16.msra.mxu0 %v866_v7  ;;  %v875_v16 = vld [vmem:[%s971_s25 + $0xa0] sm:$0xff]   ;;  %v879_v20 = vld [vmem:[%s971_s25 + $0x98] sm:$0xff]   ;;  %v883_v24 = vld [vmem:[%s971_s25 + $0x90] sm:$0xff]  }
  0x1e   : > { %816 = vmatpush3.bf16.msra.mxu1 %v867_v8  ;;  %795 = vmatprep.subr.bf16.mxu0 %v868_v9  ;;  %v884_v25 = vld [vmem:[%s971_s25 + $0x48] sm:$0xff]   ;;  %v888_v29 = vld [vmem:[%s971_s25 + $0x40] sm:$0xff]  }
  0x1f   : > { %817 = vmatprep.subr.bf16.mxu1 %v869_v10  ;;  %v885_v26 = vld [vmem:[%s971_s25 + $0xc8] sm:$0xff]   ;;  %v889_v30 = vld [vmem:[%s971_s25 + $0xc0] sm:$0xff]  }
  0x20   : > { %v886_v27 = vld [vmem:[%s971_s25 + $0x8] sm:$0xff]   ;;  %v890_v31 = vld [vmem:[%s971_s25] sm:$0xff]  }
  0x21   : > { %796 = vmatpush3.bf16.msra.mxu0 %v870_v11  ;;  %v887_v28 = vld [vmem:[%s971_s25 + $0x88] sm:$0xff]   ;;  %v891_v32 = vld [vmem:[%s971_s25 + $0x80] sm:$0xff]  }
  0x22   : > { %818 = vmatpush3.bf16.msra.mxu1 %v871_v12  ;;  %797 = vmatprep.subr.bf16.mxu0 %v872_v13  ;;  %v266_v33 = vld [vmem:[%s966_s21] sm:$0xff]  ;;  %v267_v34 = vld [vmem:[%s966_s21 + $0x8] sm:$0xff] }
  0x23   : > { %819 = vmatprep.subr.bf16.mxu1 %v873_v14  ;;  %v750_v35 = vcombine.low %v266_v33, %v266_v33  ;;  %v751_v36 = vcombine.high %v266_v33, %v266_v33  ;;  %v752_v37 = vcombine.low %v267_v34, %v267_v34  ;;  %v753_v38 = vcombine.high %v267_v34, %v267_v34  ;;  %v265_v45 = vld [vmem:[#allocation2] sm:$0xff] }
  0x25   : > { %798 = vmatpush3.bf16.msra.mxu0 %v874_v15  ;;  %570 = vmatprep.mubr.bf16.mxu0 %v751_v36 }
  0x26   : > { %820 = vmatpush3.bf16.msra.mxu1 %v875_v16  ;;  %799 = vmatprep.subr.bf16.mxu0 %v876_v17 }
  0x27   : > { %821 = vmatprep.subr.bf16.mxu1 %v877_v18  ;;  %610 = vmatprep.mubr.bf16.mxu1 %v753_v38 }
  0x29   : > { %800 = vmatpush3.bf16.msra.mxu0 %v878_v19 }
  0x2a   : > { %822 = vmatpush3.bf16.msra.mxu1 %v879_v20  ;;  %801 = vmatprep.subr.bf16.mxu0 %v880_v21 }
  0x2b   : > { %823 = vmatprep.subr.bf16.mxu1 %v881_v22 }
  0x2d   : > { %802 = vmatpush3.bf16.msra.mxu0 %v882_v23 }
  0x2e   : > { %824 = vmatpush3.bf16.msra.mxu1 %v883_v24  ;;  %803 = vmatprep.subr.bf16.mxu0 %v884_v25 }
  0x2f   : > { %825 = vmatprep.subr.bf16.mxu1 %v885_v26 }
  0x31   : > { %804 = vmatpush3.bf16.msra.mxu0 %v886_v27 }
  0x32   : > { %826 = vmatpush3.bf16.msra.mxu1 %v887_v28  ;;  %805 = vmatprep.subr.bf16.mxu0 %v888_v29 }
  0x33   : > { %827 = vmatprep.subr.bf16.mxu1 %v889_v30 }
  0x35   : > { %806 = vmatpush3.bf16.msra.mxu0 %v890_v31 }
  0x36   : > { %828 = vmatpush3.bf16.msra.mxu1 %v891_v32 }
  0x38   : > { %571 = vmatmul.mubr.bf16.vlgmr.msra.gmra.mxu0 %v750_v35 }
  0x39   : > { %611 = vmatmul.mubr.bf16.vlgmr.msra.gmra.mxu1 %v752_v37 }
  0xf8   : > { %v807_v39 = vpop.f32.mrf.mxu0 }
  0xf9   : > { %v829_v40 = vpop.f32.mrf.mxu1 }
  0xfa   : > { %v808_v41 = vpop.f32.mrf.mxu0 }
  0xfb   : > { %v830_v42 = vpop.f32.mrf.mxu1  ;;  %v809_v43 = vadd.f32 %v808_v41, %v807_v39 }
  0xfc   : > { %v831_v44 = vadd.f32 %v830_v42, %v829_v40  ;;  %v810_v46 = vpop.f32.mrf.mxu0 }
  0xfd   : > { %v832_v47 = vpop.f32.mrf.mxu1 }
  0xfe   : > { %v613_v48 = vadd.f32 %v831_v44, %v809_v43  ;;  %v811_v49 = vpop.f32.mrf.mxu0  ;;  %623 = sbr.rel (%p786_p7) target bundleno = 271 (0x10f), region = 40 }
  0xff   : > { %v833_v50 = vpop.f32.mrf.mxu1 }
 0x100   : > { %v618_v51 = vadd.f32 %v613_v48, %v265_v45 }
 0x102   : > { %619 = vst [vmem:[#allocation2] sm:$0xff] %v618_v51 }
 0x103   : > { %v787_v53 = vld [vmem:[%s1026_s2] ss:$0 sm:$0xff] }
 0x109   : > { %v624_v52 = vld [vmem:[#allocation2] sm:$0xff] }
 0x10a   : > { %v632_v54 = vadd.f32 %v787_v53, %v624_v52 }
 0x10c   : > { %v633_v55 = vmax.f32 %v632_v54, 0.0 }
 0x10e   : > { %634 = vst [vmem:[%s1027_s3] sm:$0xff] %v633_v55 }
 0x10f PF: > { %s13_s14 = sadd.s32 1, %s918_s14   ;;  %s1028_s12 = smov %s914_s13 }
 0x110   : > { %p10_p8 = scmp.ge.s32.totalorder %s13_s14, 9   ;;  %s1029_s13 = smov %s1031_s15 }
 0x112   :  { %12 = sbr.rel (!%p10_p8) target bundleno = 2 (0x2), region = 76 }

// kernel: _lambda_.35
= control target key start
LH: loop header
LB: loop body
LE: loop exit
PB: predicated region body
PF: predicated region fallthrough
CT: control target
= control target key end

     0   :  { %s895_s15 = smov 0   ;;  %s897_s16 = smov 0   ;;  %s987_s0 = inlined_call_operand.vmem [shape: bf16[8,128], index: 0, kind: input, shape index: {}]   ;;  %s988_s1 = inlined_call_operand.vmem [shape: bf16[128,512], index: 1, kind: input, shape index: {}]   ;;  %s989_s2 = inlined_call_operand.vmem [shape: f32[1,512], index: 2, kind: input, shape index: {}]   ;;  %s990_s3 = inlined_call_operand.vmem [shape: f32[8,512], index: 3, kind: input, shape index: {}]   ;;  %s991_s4 = inlined_call_operand.vmem [shape: f32[8,512], index: 4, kind: output, shape index: {}]  }
   0x1   :  { %s899_s17 = smov 0   ;;  %s901_s18 = smov 0  }
   0x2   :  { %s903_s19 = smov 0  }
   0x3 LB: > { %s29_s20 = sadd.s32 1, %s863_s18  ;;  %p77_p1 = scmp.ne.s32.totalorder %s855_s16, %s851_s15  ;;  %s867_s19 = sphi %s903_s19, %s14_s19   ;;  %s863_s18 = sphi %s901_s18, %s995_s18   ;;  %s859_s17 = sphi %s899_s17, %s994_s17   ;;  %s855_s16 = sphi %s897_s16, %s993_s16   ;;  %s851_s15 = sphi %s895_s15, %s992_s15  }
   0x4   : > { %p31_p0 = scmp.ge.s32.totalorder %s29_s20, 2  ;;  %p78_p2 = scmp.eq.s32.totalorder %s867_s19, 0 }
   0x5   : > { %s70_s22 = sadd.s32 1, %s855_s16  ;;  %p734_p5 = scmp.ge.s32.totalorder %s867_s19, 2 }
   0x6   : > { %s997_s20 = smov (%p31_p0, %s29_s20), 0  ;;  %p79_p3 = por %p78_p2, %p77_p1 }
   0x7   : > { %s66_s21 = ssub.s32 %s863_s18, %s997_s20  ;;  %195 = sbr.rel (%p734_p5) target bundleno = 24 (0x18), region = 20 }
   0x8   : > { %p68_p4 = scmp.eq.s32.totalorder %s66_s21, 0 }
   0xa   : > { %s930_s23 = scalar_select %p68_p4, %s855_s16, %s70_s22  }
   0xc   : > { %198 = sbr.rel (!%p79_p3) target bundleno = 24 (0x18), region = 24  ;;  %s200_s24 = sand.u32 (%p79_p3), 1, %s855_s16  }
   0xd   : > { %s763_s25 = sshll.u32 (%p79_p3), %s863_s18, 3  ;;  %s735_s26 = sshll.u32 (%p79_p3), %s200_s24, 7 }
   0xe   : > { %s938_s29 = scalar_lea.vmem (%p79_p3), %s988_s1, %s763_s25  ;;  %s202_s30 = scalar_lea.vmem (%p79_p3), [#allocation3], %s735_s26 }
   0xf   : > { %v267_v0 = vld [vmem:[%s938_s29] sm:$0xff] (%p79_p3)  ;;  %v269_v1 = vld [vmem:[%s938_s29 + $0x10] sm:$0xff] (%p79_p3) }
  0x10   : > { %v271_v2 = vld [vmem:[%s938_s29 + $0x20] sm:$0xff] (%p79_p3)  ;;  %268 = vst [vmem:[%s202_s30] sm:$0xff] (%p79_p3), %v267_v0  ;;  %270 = vst [vmem:[%s202_s30 + $0x8] sm:$0xff] (%p79_p3), %v269_v1  ;;  %v273_v3 = vld [vmem:[%s938_s29 + $0x30] sm:$0xff] (%p79_p3) }
  0x11   : > { %272 = vst [vmem:[%s202_s30 + $0x10] sm:$0xff] %v271_v2  ;;  %v275_v4 = vld [vmem:[%s938_s29 + $0x40] sm:$0xff]  ;;  %v277_v5 = vld [vmem:[%s938_s29 + $0x50] sm:$0xff]  ;;  %274 = vst [vmem:[%s202_s30 + $0x18] sm:$0xff] %v273_v3 }
  0x12   : > { %276 = vst [vmem:[%s202_s30 + $0x20] sm:$0xff] %v275_v4  ;;  %278 = vst [vmem:[%s202_s30 + $0x28] sm:$0xff] %v277_v5  ;;  %v279_v6 = vld [vmem:[%s938_s29 + $0x60] sm:$0xff]  ;;  %v281_v7 = vld [vmem:[%s938_s29 + $0x70] sm:$0xff] }
  0x13   : > { %v283_v8 = vld [vmem:[%s938_s29 + $0x80] sm:$0xff]  ;;  %280 = vst [vmem:[%s202_s30 + $0x30] sm:$0xff] %v279_v6  ;;  %282 = vst [vmem:[%s202_s30 + $0x38] sm:$0xff] %v281_v7  ;;  %v285_v9 = vld [vmem:[%s938_s29 + $0x90] sm:$0xff] }
  0x14   : > { %284 = vst [vmem:[%s202_s30 + $0x40] sm:$0xff] %v283_v8  ;;  %v287_v10 = vld [vmem:[%s938_s29 + $0xa0] sm:$0xff]  ;;  %v289_v11 = vld [vmem:[%s938_s29 + $0xb0] sm:$0xff]  ;;  %286 = vst [vmem:[%s202_s30 + $0x48] sm:$0xff] %v285_v9 }
  0x15   : > { %288 = vst [vmem:[%s202_s30 + $0x50] sm:$0xff] %v287_v10  ;;  %290 = vst [vmem:[%s202_s30 + $0x58] sm:$0xff] %v289_v11  ;;  %v291_v12 = vld [vmem:[%s938_s29 + $0xc0] sm:$0xff]  ;;  %v293_v13 = vld [vmem:[%s938_s29 + $0xd0] sm:$0xff] }
  0x16   : > { %v295_v14 = vld [vmem:[%s938_s29 + $0xe0] sm:$0xff]  ;;  %292 = vst [vmem:[%s202_s30 + $0x60] sm:$0xff] %v291_v12  ;;  %294 = vst [vmem:[%s202_s30 + $0x68] sm:$0xff] %v293_v13  ;;  %v297_v15 = vld [vmem:[%s938_s29 + $0xf0] sm:$0xff] }
  0x17   : > { %296 = vst [vmem:[%s202_s30 + $0x70] sm:$0xff] %v295_v14  ;;  %298 = vst [vmem:[%s202_s30 + $0x78] sm:$0xff] %v297_v15 }
  0x18 PF: > { %p738_p6 = scmp.ge.s32.totalorder %s867_s19, 1  ;;  %p324_p7 = scmp.lt.s32.totalorder %s867_s19, 3 }
  0x1a   : > { %p325_p8 = pnand %p738_p6, %p324_p7 }
  0x1b   : > { %s331_s5 = sand.u32 (!%p325_p8), 1, %s851_s15   ;;  %s740_s10 = sshll.u32 (!%p325_p8), %s859_s17, 1 }
  0x1c   : > { %328 = sbr.rel (%p325_p8) target bundleno = 268 (0x10c), region = 70  ;;  %s739_s6 = sshll.u32 (!%p325_p8), %s331_s5, 7 }
  0x1d   : > { %s333_s7 = scalar_lea.vmem (!%p325_p8), [#allocation3], %s739_s6  ;;  %p390_p9 = scmp.lt.s32.totalorder (!%p325_p8), %s740_s10, 3 }
  0x21   : > { %v869_v16 = vmov 0   ;;  %v805_v17 = vld [vmem:[%s333_s7 + $0x74] ss:$8 sps:$4 sm:$0xff]   ;;  %v807_v18 = vld [vmem:[%s333_s7 + $0x70] ss:$8 sps:$4 sm:$0xff]   ;;  %v572_v34 = vlaneseq  ;;  %s999_s10 = smov (!%p390_p9, %s740_s10), 3 }
  0x22   : > { %552 = vmatprep.mubr.bf16.mxu0 %v869_v16  ;;  %520 = vmatprep.subr.bf16.mxu0 %v805_v17  ;;  %v808_v19 = vld [vmem:[%s333_s7 + $0x64] ss:$8 sps:$4 sm:$0xff]   ;;  %v810_v20 = vld [vmem:[%s333_s7 + $0x60] ss:$8 sps:$4 sm:$0xff]   ;;  %v811_v21 = vld [vmem:[%s333_s7 + $0x54] ss:$8 sps:$4 sm:$0xff]   ;;  %s392_s13 = scalar_lea.vmem %s989_s2, %s999_s10 }
  0x23   : > { %521 = vmatpush1.bf16.msra.mxu0 %v807_v18  ;;  %v813_v22 = vld [vmem:[%s333_s7 + $0x50] ss:$8 sps:$4 sm:$0xff]   ;;  %v814_v23 = vld [vmem:[%s333_s7 + $0x44] ss:$8 sps:$4 sm:$0xff]   ;;  %v816_v24 = vld [vmem:[%s333_s7 + $0x40] ss:$8 sps:$4 sm:$0xff]  }
  0x24   : > { %522 = vmatprep.subr.bf16.mxu0 %v808_v19  ;;  %v817_v25 = vld [vmem:[%s333_s7 + $0x34] ss:$8 sps:$4 sm:$0xff]   ;;  %v819_v26 = vld [vmem:[%s333_s7 + $0x30] ss:$8 sps:$4 sm:$0xff]   ;;  %v820_v27 = vld [vmem:[%s333_s7 + $0x24] ss:$8 sps:$4 sm:$0xff]  }
  0x25   : > { %v822_v28 = vld [vmem:[%s333_s7 + $0x20] ss:$8 sps:$4 sm:$0xff]   ;;  %v823_v29 = vld [vmem:[%s333_s7 + $0x14] ss:$8 sps:$4 sm:$0xff]   ;;  %v825_v30 = vld [vmem:[%s333_s7 + $0x10] ss:$8 sps:$4 sm:$0xff]  }
  0x26   : > { %v826_v31 = vld [vmem:[%s333_s7 + $0x4] ss:$8 sps:$4 sm:$0xff]   ;;  %v828_v32 = vld [vmem:[%s333_s7] ss:$8 sps:$4 sm:$0xff]   ;;  %v573_v35 = vshrl.u32 %v572_v34, 7  ;;  %s742_s14 = sshll.u32 %s999_s10, 3 }
  0x27   : > { %523 = vmatpush1.bf16.msra.mxu0 %v810_v20  ;;  %v423_v33 = vld [vmem:[%s987_s0] sm:$0xf]  ;;  %s402_s22 = scalar_lea.vmem %s990_s3, %s742_s14  ;;  %s412_s25 = scalar_lea.vmem %s991_s4, %s742_s14 }
  0x28   : > { %524 = vmatprep.subr.bf16.mxu0 %v811_v21  ;;  %v574_v36 = vsub.s32 0, %v573_v35  ;;  %v570_v37 = vld [vmem:[%s392_s13] sm:$0x3]  ;;  %v578_v38 = vsub.s32 1, %v573_v35  ;;  %v585_v45 = vld [vmem:[%s402_s22 + $0x8] sm:$0xff] }
  0x29   : > { %v584_v42 = vld [vmem:[%s402_s22] sm:$0xff] }
  0x2a   : > { %v575_v39 = vrot.slane %v570_v37, %v574_v36  ;;  %v579_v40 = vrot.slane %v570_v37, %v578_v38 }
  0x2b   : > { %525 = vmatpush1.bf16.msra.mxu0 %v813_v22 }
  0x2c   : > { %526 = vmatprep.subr.bf16.mxu0 %v814_v23 }
  0x2f   : > { %527 = vmatpush1.bf16.msra.mxu0 %v816_v24 }
  0x30   : > { %528 = vmatprep.subr.bf16.mxu0 %v817_v25 }
  0x33   : > { %529 = vmatpush1.bf16.msra.mxu0 %v819_v26 }
  0x34   : > { %530 = vmatprep.subr.bf16.mxu0 %v820_v27 }
  0x37   : > { %531 = vmatpush1.bf16.msra.mxu0 %v822_v28 }
  0x38   : > { %532 = vmatprep.subr.bf16.mxu0 %v823_v29 }
  0x3b   : > { %533 = vmatpush1.bf16.msra.mxu0 %v825_v30 }
  0x3c   : > { %534 = vmatprep.subr.bf16.mxu0 %v826_v31 }
  0x3f   : > { %535 = vmatpush1.bf16.msra.mxu0 %v828_v32 }
  0x42   : > { %553 = vmatmul.mubr.bf16.vlgmr.msra.gmra.mxu0 %v423_v33 }
 0x102   : > { %v554_v41 = vpop.f32.mrf.mxu0 }
 0x103   : > { %v582_v43 = vadd.f32 %v575_v39, %v554_v41 }
 0x104   : > { %v556_v44 = vpop.f32.mrf.mxu0 }
 0x105   : > { %v586_v46 = vadd.f32 %v584_v42, %v582_v43  ;;  %v583_v47 = vadd.f32 %v579_v40, %v556_v44 }
 0x106   : > { %v558_v48 = vpop.f32.mrf.mxu0 }
 0x107   : > { %v588_v49 = vmax.f32 %v586_v46, 0.0  ;;  %v587_v50 = vadd.f32 %v585_v45, %v583_v47 }
 0x108   : > { %v559_v51 = vpop.f32.mrf.mxu0 }
 0x109   : > { %590 = vst [vmem:[%s412_s25] sm:$0xff] %v588_v49  ;;  %v589_v52 = vmax.f32 %v587_v50, 0.0 }
 0x10b   : > { %591 = vst [vmem:[%s412_s25 + $0x8] sm:$0xff] %v589_v52 }
 0x10c PF: > { %s14_s19 = sadd.s32 1, %s867_s19   ;;  %s992_s15 = smov %s855_s16 }
 0x10d   : > { %p11_p10 = scmp.ge.s32.totalorder %s14_s19, 4   ;;  %s993_s16 = smov %s930_s23 }
 0x10e   : > { %s994_s17 = smov %s863_s18  ;;  %s995_s18 = smov %s997_s20 }
 0x10f   :  { %13 = sbr.rel (!%p11_p10) target bundleno = 3 (0x3), region = 126 }

// kernel: _lambda_.36
= control target key start
LH: loop header
LB: loop body
LE: loop exit
PB: predicated region body
PF: predicated region fallthrough
CT: control target
= control target key end

     0   :  { %s930_s1 = inlined_call_operand.vmem [shape: bf16[512,256], index: 1, kind: input, shape index: {}]   ;;  %s931_s0 = inlined_call_operand.vmem [shape: bf16[8,512], index: 0, kind: input, shape index: {}]   ;;  %s932_s2 = inlined_call_operand.vmem [shape: f32[1,256], index: 2, kind: input, shape index: {}]   ;;  %s933_s3 = inlined_call_operand.vmem [shape: f32[8,256], index: 3, kind: output, shape index: {}]  }
   0x1   :  { %v603_v0 = vld [vmem:[%s930_s1 + $0x74] ss:$8 sps:$4 sm:$0xff]   ;;  %v607_v2 = vld [vmem:[%s930_s1 + $0x70] ss:$8 sps:$4 sm:$0xff]   ;;  %v609_v4 = vld [vmem:[%s930_s1 + $0x64] ss:$8 sps:$4 sm:$0xff]  }
   0x2   :  { %v605_v1 = vld [vmem:[%s930_s1 + $0x174] ss:$8 sps:$4 sm:$0xff]   ;;  %422 = vmatprep.subr.bf16.mxu0 %v603_v0  ;;  %v608_v3 = vld [vmem:[%s930_s1 + $0x170] ss:$8 sps:$4 sm:$0xff]   ;;  %v611_v5 = vld [vmem:[%s930_s1 + $0x164] ss:$8 sps:$4 sm:$0xff]  }
   0x3   :  { %463 = vmatprep.subr.bf16.mxu1 %v605_v1  ;;  %423 = vmatpush1.bf16.msra.mxu0 %v607_v2  ;;  %v613_v6 = vld [vmem:[%s930_s1 + $0x60] ss:$8 sps:$4 sm:$0xff]   ;;  %v615_v8 = vld [vmem:[%s930_s1 + $0x54] ss:$8 sps:$4 sm:$0xff]   ;;  %v619_v10 = vld [vmem:[%s930_s1 + $0x50] ss:$8 sps:$4 sm:$0xff]  }
   0x4   :  { %464 = vmatpush1.bf16.msra.mxu1 %v608_v3  ;;  %424 = vmatprep.subr.bf16.mxu0 %v609_v4  ;;  %v614_v7 = vld [vmem:[%s930_s1 + $0x160] ss:$8 sps:$4 sm:$0xff]   ;;  %v617_v9 = vld [vmem:[%s930_s1 + $0x154] ss:$8 sps:$4 sm:$0xff]   ;;  %v620_v11 = vld [vmem:[%s930_s1 + $0x150] ss:$8 sps:$4 sm:$0xff]  }
   0x5   :  { %465 = vmatprep.subr.bf16.mxu1 %v611_v5  ;;  %v621_v12 = vld [vmem:[%s930_s1 + $0x44] ss:$8 sps:$4 sm:$0xff]   ;;  %v625_v14 = vld [vmem:[%s930_s1 + $0x40] ss:$8 sps:$4 sm:$0xff]   ;;  %v627_v16 = vld [vmem:[%s930_s1 + $0x34] ss:$8 sps:$4 sm:$0xff]  }
   0x6   :  { %v623_v13 = vld [vmem:[%s930_s1 + $0x144] ss:$8 sps:$4 sm:$0xff]   ;;  %v626_v15 = vld [vmem:[%s930_s1 + $0x140] ss:$8 sps:$4 sm:$0xff]   ;;  %v629_v17 = vld [vmem:[%s930_s1 + $0x134] ss:$8 sps:$4 sm:$0xff]  }
   0x7   :  { %425 = vmatpush1.bf16.msra.mxu0 %v613_v6  ;;  %v631_v18 = vld [vmem:[%s930_s1 + $0x30] ss:$8 sps:$4 sm:$0xff]   ;;  %v633_v20 = vld [vmem:[%s930_s1 + $0x24] ss:$8 sps:$4 sm:$0xff]   ;;  %v637_v22 = vld [vmem:[%s930_s1 + $0x20] ss:$8 sps:$4 sm:$0xff]   ;;  %v515_v6 = vlaneseq }
   0x8   :  { %466 = vmatpush1.bf16.msra.mxu1 %v614_v7  ;;  %426 = vmatprep.subr.bf16.mxu0 %v615_v8  ;;  %v632_v19 = vld [vmem:[%s930_s1 + $0x130] ss:$8 sps:$4 sm:$0xff]   ;;  %v635_v21 = vld [vmem:[%s930_s1 + $0x124] ss:$8 sps:$4 sm:$0xff]   ;;  %v638_v23 = vld [vmem:[%s930_s1 + $0x120] ss:$8 sps:$4 sm:$0xff]  }
   0x9   :  { %467 = vmatprep.subr.bf16.mxu1 %v617_v9  ;;  %v639_v24 = vld [vmem:[%s930_s1 + $0x14] ss:$8 sps:$4 sm:$0xff]   ;;  %v643_v26 = vld [vmem:[%s930_s1 + $0x10] ss:$8 sps:$4 sm:$0xff]   ;;  %v645_v28 = vld [vmem:[%s930_s1 + $0x4] ss:$8 sps:$4 sm:$0xff]  }
   0xa   :  { %v641_v25 = vld [vmem:[%s930_s1 + $0x114] ss:$8 sps:$4 sm:$0xff]   ;;  %v644_v27 = vld [vmem:[%s930_s1 + $0x110] ss:$8 sps:$4 sm:$0xff]   ;;  %v647_v29 = vld [vmem:[%s930_s1 + $0x104] ss:$8 sps:$4 sm:$0xff]  }
   0xb   :  { %427 = vmatpush1.bf16.msra.mxu0 %v619_v10  ;;  %v649_v30 = vld [vmem:[%s930_s1] ss:$8 sps:$4 sm:$0xff]   ;;  %v651_v32 = vld [vmem:[%s930_s1 + $0xf4] ss:$8 sps:$4 sm:$0xff]   ;;  %v655_v34 = vld [vmem:[%s930_s1 + $0xf0] ss:$8 sps:$4 sm:$0xff]  }
   0xc   :  { %468 = vmatpush1.bf16.msra.mxu1 %v620_v11  ;;  %428 = vmatprep.subr.bf16.mxu0 %v621_v12  ;;  %v650_v31 = vld [vmem:[%s930_s1 + $0x100] ss:$8 sps:$4 sm:$0xff]   ;;  %v653_v33 = vld [vmem:[%s930_s1 + $0x1f4] ss:$8 sps:$4 sm:$0xff]   ;;  %v656_v35 = vld [vmem:[%s930_s1 + $0x1f0] ss:$8 sps:$4 sm:$0xff]  }
   0xd   :  { %469 = vmatprep.subr.bf16.mxu1 %v623_v13  ;;  %v657_v36 = vld [vmem:[%s930_s1 + $0xe4] ss:$8 sps:$4 sm:$0xff]   ;;  %v661_v38 = vld [vmem:[%s930_s1 + $0xe0] ss:$8 sps:$4 sm:$0xff]   ;;  %v663_v40 = vld [vmem:[%s930_s1 + $0xd4] ss:$8 sps:$4 sm:$0xff]  }
   0xe   :  { %v659_v37 = vld [vmem:[%s930_s1 + $0x1e4] ss:$8 sps:$4 sm:$0xff]   ;;  %v662_v39 = vld [vmem:[%s930_s1 + $0x1e0] ss:$8 sps:$4 sm:$0xff]   ;;  %v665_v41 = vld [vmem:[%s930_s1 + $0x1d4] ss:$8 sps:$4 sm:$0xff]  }
   0xf   :  { %429 = vmatpush1.bf16.msra.mxu0 %v625_v14  ;;  %v667_v42 = vld [vmem:[%s930_s1 + $0xd0] ss:$8 sps:$4 sm:$0xff]   ;;  %v669_v44 = vld [vmem:[%s930_s1 + $0xc4] ss:$8 sps:$4 sm:$0xff]   ;;  %v673_v49 = vld [vmem:[%s930_s1 + $0xc0] ss:$8 sps:$4 sm:$0xff]  }
  0x10   :  { %470 = vmatpush1.bf16.msra.mxu1 %v626_v15  ;;  %430 = vmatprep.subr.bf16.mxu0 %v627_v16  ;;  %v668_v43 = vld [vmem:[%s930_s1 + $0x1d0] ss:$8 sps:$4 sm:$0xff]   ;;  %v671_v45 = vld [vmem:[%s930_s1 + $0x1c4] ss:$8 sps:$4 sm:$0xff]   ;;  %v674_v50 = vld [vmem:[%s930_s1 + $0x1c0] ss:$8 sps:$4 sm:$0xff]  }
  0x11   :  { %471 = vmatprep.subr.bf16.mxu1 %v629_v17  ;;  %v22_v46 = vld [vmem:[%s931_s0] sm:$0xff]  ;;  %v23_v48 = vld [vmem:[%s931_s0 + $0x8] sm:$0xff]  ;;  %v675_v52 = vld [vmem:[%s930_s1 + $0xb4] ss:$8 sps:$4 sm:$0xff]   ;;  %v516_v7 = vshrl.u32 %v515_v6, 7 }
  0x12   :  { %v536_v47 = vcombine.high %v22_v46, %v22_v46  ;;  %v538_v51 = vcombine.high %v23_v48, %v23_v48  ;;  %v677_v53 = vld [vmem:[%s930_s1 + $0x1b4] ss:$8 sps:$4 sm:$0xff]   ;;  %v679_v54 = vld [vmem:[%s930_s1 + $0xb0] ss:$8 sps:$4 sm:$0xff]   ;;  %v681_v56 = vld [vmem:[%s930_s1 + $0xa4] ss:$8 sps:$4 sm:$0xff]   ;;  %v535_v4 = vcombine.low %v22_v46, %v22_v46  ;;  %v537_v5 = vcombine.low %v23_v48, %v23_v48 }
  0x13   :  { %431 = vmatpush1.bf16.msra.mxu0 %v631_v18  ;;  %v680_v55 = vld [vmem:[%s930_s1 + $0x1b0] ss:$8 sps:$4 sm:$0xff]   ;;  %v683_v57 = vld [vmem:[%s930_s1 + $0x1a4] ss:$8 sps:$4 sm:$0xff]   ;;  %v685_v58 = vld [vmem:[%s930_s1 + $0xa0] ss:$8 sps:$4 sm:$0xff]  }
  0x14   :  { %472 = vmatpush1.bf16.msra.mxu1 %v632_v19  ;;  %432 = vmatprep.subr.bf16.mxu0 %v633_v20  ;;  %v686_v59 = vld [vmem:[%s930_s1 + $0x1a0] ss:$8 sps:$4 sm:$0xff]   ;;  %v687_v60 = vld [vmem:[%s930_s1 + $0x94] ss:$8 sps:$4 sm:$0xff]   ;;  %v691_v62 = vld [vmem:[%s930_s1 + $0x90] ss:$8 sps:$4 sm:$0xff]  }
  0x15   :  { %473 = vmatprep.subr.bf16.mxu1 %v635_v21  ;;  %454 = vmatprep.mubr.bf16.mxu0 %v536_v47  ;;  %v689_v61 = vld [vmem:[%s930_s1 + $0x194] ss:$8 sps:$4 sm:$0xff]   ;;  %v692_v63 = vld [vmem:[%s930_s1 + $0x190] ss:$8 sps:$4 sm:$0xff]   ;;  %v693_v0 = vld [vmem:[%s930_s1 + $0x84] ss:$8 sps:$4 sm:$0xff]  }
  0x16   :  { %495 = vmatprep.mubr.bf16.mxu1 %v538_v51  ;;  %v695_v1 = vld [vmem:[%s930_s1 + $0x184] ss:$8 sps:$4 sm:$0xff]   ;;  %v697_v2 = vld [vmem:[%s930_s1 + $0x80] ss:$8 sps:$4 sm:$0xff]   ;;  %v517_v8 = vsub.s32 0, %v516_v7  ;;  %v521_v10 = vsub.s32 1, %v516_v7 }
  0x17   :  { %433 = vmatpush1.bf16.msra.mxu0 %v637_v22  ;;  %v698_v3 = vld [vmem:[%s930_s1 + $0x180] ss:$8 sps:$4 sm:$0xff]  }
  0x18   :  { %474 = vmatpush1.bf16.msra.mxu1 %v638_v23  ;;  %434 = vmatprep.subr.bf16.mxu0 %v639_v24  ;;  %v513_v9 = vld [vmem:[%s932_s2] sm:$0x3] }
  0x19   :  { %475 = vmatprep.subr.bf16.mxu1 %v641_v25  ;;  %v518_v11 = vrot.slane %v513_v9, %v517_v8  ;;  %v522_v15 = vrot.slane %v513_v9, %v521_v10 }
  0x1b   :  { %435 = vmatpush1.bf16.msra.mxu0 %v643_v26 }
  0x1c   :  { %476 = vmatpush1.bf16.msra.mxu1 %v644_v27  ;;  %436 = vmatprep.subr.bf16.mxu0 %v645_v28 }
  0x1d   :  { %477 = vmatprep.subr.bf16.mxu1 %v647_v29 }
  0x1f   :  { %437 = vmatpush1.bf16.msra.mxu0 %v649_v30 }
  0x20   :  { %478 = vmatpush1.bf16.msra.mxu1 %v650_v31  ;;  %438 = vmatprep.subr.bf16.mxu0 %v651_v32 }
  0x21   :  { %479 = vmatprep.subr.bf16.mxu1 %v653_v33 }
  0x23   :  { %439 = vmatpush2.bf16.msra.mxu0 %v655_v34 }
  0x24   :  { %480 = vmatpush2.bf16.msra.mxu1 %v656_v35  ;;  %440 = vmatprep.subr.bf16.mxu0 %v657_v36 }
  0x25   :  { %481 = vmatprep.subr.bf16.mxu1 %v659_v37 }
  0x27   :  { %441 = vmatpush2.bf16.msra.mxu0 %v661_v38 }
  0x28   :  { %482 = vmatpush2.bf16.msra.mxu1 %v662_v39  ;;  %442 = vmatprep.subr.bf16.mxu0 %v663_v40 }
  0x29   :  { %483 = vmatprep.subr.bf16.mxu1 %v665_v41 }
  0x2b   :  { %443 = vmatpush2.bf16.msra.mxu0 %v667_v42 }
  0x2c   :  { %484 = vmatpush2.bf16.msra.mxu1 %v668_v43  ;;  %444 = vmatprep.subr.bf16.mxu0 %v669_v44 }
  0x2d   :  { %485 = vmatprep.subr.bf16.mxu1 %v671_v45 }
  0x2f   :  { %445 = vmatpush2.bf16.msra.mxu0 %v673_v49 }
  0x30   :  { %486 = vmatpush2.bf16.msra.mxu1 %v674_v50  ;;  %446 = vmatprep.subr.bf16.mxu0 %v675_v52 }
  0x31   :  { %487 = vmatprep.subr.bf16.mxu1 %v677_v53 }
  0x33   :  { %447 = vmatpush2.bf16.msra.mxu0 %v679_v54 }
  0x34   :  { %488 = vmatpush2.bf16.msra.mxu1 %v680_v55  ;;  %448 = vmatprep.subr.bf16.mxu0 %v681_v56 }
  0x35   :  { %489 = vmatprep.subr.bf16.mxu1 %v683_v57 }
  0x37   :  { %449 = vmatpush2.bf16.msra.mxu0 %v685_v58 }
  0x38   :  { %490 = vmatpush2.bf16.msra.mxu1 %v686_v59  ;;  %450 = vmatprep.subr.bf16.mxu0 %v687_v60 }
  0x39   :  { %491 = vmatprep.subr.bf16.mxu1 %v689_v61 }
  0x3b   :  { %451 = vmatpush2.bf16.msra.mxu0 %v691_v62 }
  0x3c   :  { %492 = vmatpush2.bf16.msra.mxu1 %v692_v63  ;;  %452 = vmatprep.subr.bf16.mxu0 %v693_v0 }
  0x3d   :  { %493 = vmatprep.subr.bf16.mxu1 %v695_v1 }
  0x3f   :  { %453 = vmatpush2.bf16.msra.mxu0 %v697_v2 }
  0x40   :  { %494 = vmatpush2.bf16.msra.mxu1 %v698_v3 }
  0x42   :  { %455 = vmatmul.mubr.bf16.vlgmr.msra.gmra.mxu0 %v535_v4 }
  0x43   :  { %496 = vmatmul.mubr.bf16.vlgmr.msra.gmra.mxu1 %v537_v5 }
 0x102   :  { %v456_v12 = vpop.f32.mrf.mxu0 }
 0x103   :  { %v497_v13 = vpop.f32.mrf.mxu1 }
 0x104   :  { %v498_v14 = vadd.f32 %v497_v13, %v456_v12  ;;  %v458_v16 = vpop.f32.mrf.mxu0 }
 0x105   :  { %v499_v17 = vpop.f32.mrf.mxu1 }
 0x106   :  { %v525_v18 = vadd.f32 %v518_v11, %v498_v14  ;;  %v500_v19 = vadd.f32 %v499_v17, %v458_v16  ;;  %v460_v20 = vpop.f32.mrf.mxu0 }
 0x107   :  { %v501_v21 = vpop.f32.mrf.mxu1 }
 0x108   :  { %v527_v22 = vmax.f32 %v525_v18, 0.0  ;;  %v526_v23 = vadd.f32 %v522_v15, %v500_v19  ;;  %v461_v24 = vpop.f32.mrf.mxu0 }
 0x109   :  { %v502_v25 = vpop.f32.mrf.mxu1 }
 0x10a   :  { %529 = vst [vmem:[%s933_s3] sm:$0xff] %v527_v22  ;;  %v528_v26 = vmax.f32 %v526_v23, 0.0 }
 0x10c   :  { %530 = vst [vmem:[%s933_s3 + $0x8] sm:$0xff] %v528_v26 }

// kernel: _lambda_.37
= control target key start
LH: loop header
LB: loop body
LE: loop exit
PB: predicated region body
PF: predicated region fallthrough
CT: control target
= control target key end

     0   :  { %s1167_s12 = smov 0   ;;  %s1169_s13 = smov 0   ;;  %s1285_s0 = inlined_call_operand.vmem [shape: bf16[8,7168], index: 0, kind: input, shape index: {}]   ;;  %s1286_s1 = inlined_call_operand.vmem [shape: bf16[7168,256], index: 1, kind: input, shape index: {}]   ;;  %s1287_s2 = inlined_call_operand.vmem [shape: f32[1,256], index: 2, kind: input, shape index: {}]   ;;  %s1288_s3 = inlined_call_operand.vmem [shape: f32[8,256], index: 3, kind: output, shape index: {}]  }
   0x1   :  { %s1171_s14 = smov 0  }
   0x2 LB: > { %s25_s15 = sadd.s32 1, %s1140_s13  ;;  %p916_p0 = scmp.ge.s32.totalorder %s1144_s14, 1  ;;  %s1144_s14 = sphi %s1171_s14, %s13_s14   ;;  %s1140_s13 = sphi %s1169_s13, %s1290_s13   ;;  %s1136_s12 = sphi %s1167_s12, %s1289_s12  }
   0x3   : > { %p26_p1 = scmp.ge.s32.totalorder %s25_s15, 14  ;;  %p194_p2 = scmp.lt.s32.totalorder %s1144_s14, 15 }
   0x5   : > { %s1292_s15 = smov (%p26_p1, %s25_s15), 0  ;;  %p195_p3 = pnand %p916_p0, %p194_p2 }
   0x6   : > { %s917_s16 = sshll.u32 (!%p195_p3), %s1136_s12, 2  ;;  %s919_s17 = sshll.u32 (!%p195_p3), %s1136_s12, 6 }
   0x7   : > { %198 = sbr.rel (%p195_p3) target bundleno = 301 (0x12d), region = 32  ;;  %p243_p4 = scmp.lt.s32.totalorder (!%p195_p3), %s917_s16, 55 }
   0x8   : > { %p252_p5 = scmp.lt.s32.totalorder (!%p195_p3), %s919_s17, 895  ;;  %p922_p6 = scmp.ne.s32.totalorder (!%p195_p3), %s1136_s12, 0 }
   0xc   : > { %s1294_s16 = smov (!%p243_p4, %s917_s16), 55  ;;  %s1296_s17 = smov (!%p252_p5, %s919_s17), 895 }
   0xd   : > { %s918_s18 = sshll.u32 %s1294_s16, 2  ;;  %s996_s22 = sshll.u32 %s1296_s17, 3 }
   0xe   : > { %s1192_s21 = scalar_lea.vmem %s1285_s0, %s918_s18  ;;  %s1197_s25 = scalar_lea.vmem %s1286_s1, %s996_s22 }
   0xf   : > { %280 = sbr.rel (%p922_p6) target bundleno = 22 (0x16), region = 36 }
  0x14   : > { %v1146_v0 = vmov 0.0  }
  0x15   : > { %281 = vst [vmem:[#allocation2] sm:$0xff] %v1146_v0  ;;  %282 = vst [vmem:[#allocation2 + $0x8] sm:$0xff] %v1146_v0 }
  0x16 PF: > { %v1022_v1 = vld [vmem:[%s1197_s25 + $0x74] ss:$8 sps:$4 sm:$0xff]   ;;  %v1026_v3 = vld [vmem:[%s1197_s25 + $0x70] ss:$8 sps:$4 sm:$0xff]   ;;  %v1028_v5 = vld [vmem:[%s1197_s25 + $0x64] ss:$8 sps:$4 sm:$0xff]  }
  0x17   : > { %v1024_v2 = vld [vmem:[%s1197_s25 + $0x174] ss:$8 sps:$4 sm:$0xff]   ;;  %685 = vmatprep.subr.bf16.mxu0 %v1022_v1  ;;  %v1027_v4 = vld [vmem:[%s1197_s25 + $0x170] ss:$8 sps:$4 sm:$0xff]   ;;  %v1030_v6 = vld [vmem:[%s1197_s25 + $0x164] ss:$8 sps:$4 sm:$0xff]  }
  0x18   : > { %726 = vmatprep.subr.bf16.mxu1 %v1024_v2  ;;  %686 = vmatpush1.bf16.msra.mxu0 %v1026_v3  ;;  %v1032_v7 = vld [vmem:[%s1197_s25 + $0x60] ss:$8 sps:$4 sm:$0xff]   ;;  %v1034_v9 = vld [vmem:[%s1197_s25 + $0x54] ss:$8 sps:$4 sm:$0xff]   ;;  %v1038_v11 = vld [vmem:[%s1197_s25 + $0x50] ss:$8 sps:$4 sm:$0xff]  }
  0x19   : > { %727 = vmatpush1.bf16.msra.mxu1 %v1027_v4  ;;  %687 = vmatprep.subr.bf16.mxu0 %v1028_v5  ;;  %v1033_v8 = vld [vmem:[%s1197_s25 + $0x160] ss:$8 sps:$4 sm:$0xff]   ;;  %v1036_v10 = vld [vmem:[%s1197_s25 + $0x154] ss:$8 sps:$4 sm:$0xff]   ;;  %v1039_v12 = vld [vmem:[%s1197_s25 + $0x150] ss:$8 sps:$4 sm:$0xff]  }
  0x1a   : > { %728 = vmatprep.subr.bf16.mxu1 %v1030_v6  ;;  %v1040_v13 = vld [vmem:[%s1197_s25 + $0x44] ss:$8 sps:$4 sm:$0xff]   ;;  %v1044_v15 = vld [vmem:[%s1197_s25 + $0x40] ss:$8 sps:$4 sm:$0xff]   ;;  %v1046_v17 = vld [vmem:[%s1197_s25 + $0x34] ss:$8 sps:$4 sm:$0xff]  }
  0x1b   : > { %v1042_v14 = vld [vmem:[%s1197_s25 + $0x144] ss:$8 sps:$4 sm:$0xff]   ;;  %v1045_v16 = vld [vmem:[%s1197_s25 + $0x140] ss:$8 sps:$4 sm:$0xff]   ;;  %v1048_v18 = vld [vmem:[%s1197_s25 + $0x134] ss:$8 sps:$4 sm:$0xff]  }
  0x1c   : > { %688 = vmatpush1.bf16.msra.mxu0 %v1032_v7  ;;  %v1050_v19 = vld [vmem:[%s1197_s25 + $0x30] ss:$8 sps:$4 sm:$0xff]   ;;  %v1052_v21 = vld [vmem:[%s1197_s25 + $0x24] ss:$8 sps:$4 sm:$0xff]   ;;  %v1056_v23 = vld [vmem:[%s1197_s25 + $0x20] ss:$8 sps:$4 sm:$0xff]  }
  0x1d   : > { %729 = vmatpush1.bf16.msra.mxu1 %v1033_v8  ;;  %689 = vmatprep.subr.bf16.mxu0 %v1034_v9  ;;  %v1051_v20 = vld [vmem:[%s1197_s25 + $0x130] ss:$8 sps:$4 sm:$0xff]   ;;  %v1054_v22 = vld [vmem:[%s1197_s25 + $0x124] ss:$8 sps:$4 sm:$0xff]   ;;  %v1057_v24 = vld [vmem:[%s1197_s25 + $0x120] ss:$8 sps:$4 sm:$0xff]  }
  0x1e   : > { %730 = vmatprep.subr.bf16.mxu1 %v1036_v10  ;;  %v1058_v25 = vld [vmem:[%s1197_s25 + $0x14] ss:$8 sps:$4 sm:$0xff]   ;;  %v1062_v27 = vld [vmem:[%s1197_s25 + $0x10] ss:$8 sps:$4 sm:$0xff]   ;;  %v1064_v29 = vld [vmem:[%s1197_s25 + $0x4] ss:$8 sps:$4 sm:$0xff]  }
  0x1f   : > { %v1060_v26 = vld [vmem:[%s1197_s25 + $0x114] ss:$8 sps:$4 sm:$0xff]   ;;  %v1063_v28 = vld [vmem:[%s1197_s25 + $0x110] ss:$8 sps:$4 sm:$0xff]   ;;  %v1066_v30 = vld [vmem:[%s1197_s25 + $0x104] ss:$8 sps:$4 sm:$0xff]  }
  0x20   : > { %690 = vmatpush1.bf16.msra.mxu0 %v1038_v11  ;;  %v1068_v31 = vld [vmem:[%s1197_s25] ss:$8 sps:$4 sm:$0xff]   ;;  %v1070_v33 = vld [vmem:[%s1197_s25 + $0xf4] ss:$8 sps:$4 sm:$0xff]   ;;  %v1074_v35 = vld [vmem:[%s1197_s25 + $0xf0] ss:$8 sps:$4 sm:$0xff]  }
  0x21   : > { %731 = vmatpush1.bf16.msra.mxu1 %v1039_v12  ;;  %691 = vmatprep.subr.bf16.mxu0 %v1040_v13  ;;  %v1069_v32 = vld [vmem:[%s1197_s25 + $0x100] ss:$8 sps:$4 sm:$0xff]   ;;  %v1072_v34 = vld [vmem:[%s1197_s25 + $0x1f4] ss:$8 sps:$4 sm:$0xff]   ;;  %v1075_v36 = vld [vmem:[%s1197_s25 + $0x1f0] ss:$8 sps:$4 sm:$0xff]  }
  0x22   : > { %732 = vmatprep.subr.bf16.mxu1 %v1042_v14  ;;  %v1076_v37 = vld [vmem:[%s1197_s25 + $0xe4] ss:$8 sps:$4 sm:$0xff]   ;;  %v1080_v39 = vld [vmem:[%s1197_s25 + $0xe0] ss:$8 sps:$4 sm:$0xff]   ;;  %v1082_v41 = vld [vmem:[%s1197_s25 + $0xd4] ss:$8 sps:$4 sm:$0xff]  }
  0x23   : > { %v1078_v38 = vld [vmem:[%s1197_s25 + $0x1e4] ss:$8 sps:$4 sm:$0xff]   ;;  %v1081_v40 = vld [vmem:[%s1197_s25 + $0x1e0] ss:$8 sps:$4 sm:$0xff]   ;;  %v1084_v42 = vld [vmem:[%s1197_s25 + $0x1d4] ss:$8 sps:$4 sm:$0xff]  }
  0x24   : > { %692 = vmatpush1.bf16.msra.mxu0 %v1044_v15  ;;  %v1086_v43 = vld [vmem:[%s1197_s25 + $0xd0] ss:$8 sps:$4 sm:$0xff]   ;;  %v1088_v45 = vld [vmem:[%s1197_s25 + $0xc4] ss:$8 sps:$4 sm:$0xff]   ;;  %v1092_v50 = vld [vmem:[%s1197_s25 + $0xc0] ss:$8 sps:$4 sm:$0xff]  }
  0x25   : > { %733 = vmatpush1.bf16.msra.mxu1 %v1045_v16  ;;  %693 = vmatprep.subr.bf16.mxu0 %v1046_v17  ;;  %v1087_v44 = vld [vmem:[%s1197_s25 + $0x1d0] ss:$8 sps:$4 sm:$0xff]   ;;  %v1090_v46 = vld [vmem:[%s1197_s25 + $0x1c4] ss:$8 sps:$4 sm:$0xff]   ;;  %v1093_v51 = vld [vmem:[%s1197_s25 + $0x1c0] ss:$8 sps:$4 sm:$0xff]  }
  0x26   : > { %734 = vmatprep.subr.bf16.mxu1 %v1048_v18  ;;  %v285_v47 = vld [vmem:[%s1192_s21] sm:$0xff]  ;;  %v286_v49 = vld [vmem:[%s1192_s21 + $0x8] sm:$0xff]  ;;  %v1094_v53 = vld [vmem:[%s1197_s25 + $0xb4] ss:$8 sps:$4 sm:$0xff]   ;;  %p991_p7 = scmp.ne.s32.totalorder %s1136_s12, 13 }
  0x27   : > { %v924_v48 = vcombine.high %v285_v47, %v285_v47  ;;  %v926_v52 = vcombine.high %v286_v49, %v286_v49  ;;  %v1096_v54 = vld [vmem:[%s1197_s25 + $0x1b4] ss:$8 sps:$4 sm:$0xff]   ;;  %v1098_v55 = vld [vmem:[%s1197_s25 + $0xb0] ss:$8 sps:$4 sm:$0xff]   ;;  %v1100_v57 = vld [vmem:[%s1197_s25 + $0xa4] ss:$8 sps:$4 sm:$0xff]   ;;  %v923_v5 = vcombine.low %v285_v47, %v285_v47  ;;  %v925_v6 = vcombine.low %v286_v49, %v286_v49 }
  0x28   : > { %694 = vmatpush1.bf16.msra.mxu0 %v1050_v19  ;;  %v1099_v56 = vld [vmem:[%s1197_s25 + $0x1b0] ss:$8 sps:$4 sm:$0xff]   ;;  %v1102_v58 = vld [vmem:[%s1197_s25 + $0x1a4] ss:$8 sps:$4 sm:$0xff]   ;;  %v1104_v59 = vld [vmem:[%s1197_s25 + $0xa0] ss:$8 sps:$4 sm:$0xff]  }
  0x29   : > { %735 = vmatpush1.bf16.msra.mxu1 %v1051_v20  ;;  %695 = vmatprep.subr.bf16.mxu0 %v1052_v21  ;;  %v1105_v60 = vld [vmem:[%s1197_s25 + $0x1a0] ss:$8 sps:$4 sm:$0xff]   ;;  %v1106_v61 = vld [vmem:[%s1197_s25 + $0x94] ss:$8 sps:$4 sm:$0xff]   ;;  %v1110_v63 = vld [vmem:[%s1197_s25 + $0x90] ss:$8 sps:$4 sm:$0xff]  }
  0x2a   : > { %736 = vmatprep.subr.bf16.mxu1 %v1054_v22  ;;  %717 = vmatprep.mubr.bf16.mxu0 %v924_v48  ;;  %v1108_v62 = vld [vmem:[%s1197_s25 + $0x194] ss:$8 sps:$4 sm:$0xff]   ;;  %v1111_v0 = vld [vmem:[%s1197_s25 + $0x190] ss:$8 sps:$4 sm:$0xff]   ;;  %v1112_v1 = vld [vmem:[%s1197_s25 + $0x84] ss:$8 sps:$4 sm:$0xff]  }
  0x2b   : > { %758 = vmatprep.mubr.bf16.mxu1 %v926_v52  ;;  %v1114_v2 = vld [vmem:[%s1197_s25 + $0x184] ss:$8 sps:$4 sm:$0xff]   ;;  %v1116_v3 = vld [vmem:[%s1197_s25 + $0x80] ss:$8 sps:$4 sm:$0xff]  }
  0x2c   : > { %696 = vmatpush1.bf16.msra.mxu0 %v1056_v23  ;;  %v1117_v4 = vld [vmem:[%s1197_s25 + $0x180] ss:$8 sps:$4 sm:$0xff]  }
  0x2d   : > { %737 = vmatpush1.bf16.msra.mxu1 %v1057_v24  ;;  %697 = vmatprep.subr.bf16.mxu0 %v1058_v25  ;;  %v283_v8 = vld [vmem:[#allocation2] sm:$0xff]  ;;  %v284_v12 = vld [vmem:[#allocation2 + $0x8] sm:$0xff] }
  0x2e   : > { %738 = vmatprep.subr.bf16.mxu1 %v1060_v26 }
  0x30   : > { %698 = vmatpush1.bf16.msra.mxu0 %v1062_v27 }
  0x31   : > { %739 = vmatpush1.bf16.msra.mxu1 %v1063_v28  ;;  %699 = vmatprep.subr.bf16.mxu0 %v1064_v29 }
  0x32   : > { %740 = vmatprep.subr.bf16.mxu1 %v1066_v30 }
  0x34   : > { %700 = vmatpush1.bf16.msra.mxu0 %v1068_v31 }
  0x35   : > { %741 = vmatpush1.bf16.msra.mxu1 %v1069_v32  ;;  %701 = vmatprep.subr.bf16.mxu0 %v1070_v33 }
  0x36   : > { %742 = vmatprep.subr.bf16.mxu1 %v1072_v34 }
  0x38   : > { %702 = vmatpush2.bf16.msra.mxu0 %v1074_v35 }
  0x39   : > { %743 = vmatpush2.bf16.msra.mxu1 %v1075_v36  ;;  %703 = vmatprep.subr.bf16.mxu0 %v1076_v37 }
  0x3a   : > { %744 = vmatprep.subr.bf16.mxu1 %v1078_v38 }
  0x3c   : > { %704 = vmatpush2.bf16.msra.mxu0 %v1080_v39 }
  0x3d   : > { %745 = vmatpush2.bf16.msra.mxu1 %v1081_v40  ;;  %705 = vmatprep.subr.bf16.mxu0 %v1082_v41 }
  0x3e   : > { %746 = vmatprep.subr.bf16.mxu1 %v1084_v42 }
  0x40   : > { %706 = vmatpush2.bf16.msra.mxu0 %v1086_v43 }
  0x41   : > { %747 = vmatpush2.bf16.msra.mxu1 %v1087_v44  ;;  %707 = vmatprep.subr.bf16.mxu0 %v1088_v45 }
  0x42   : > { %748 = vmatprep.subr.bf16.mxu1 %v1090_v46 }
  0x44   : > { %708 = vmatpush2.bf16.msra.mxu0 %v1092_v50 }
  0x45   : > { %749 = vmatpush2.bf16.msra.mxu1 %v1093_v51  ;;  %709 = vmatprep.subr.bf16.mxu0 %v1094_v53 }
  0x46   : > { %750 = vmatprep.subr.bf16.mxu1 %v1096_v54 }
  0x48   : > { %710 = vmatpush2.bf16.msra.mxu0 %v1098_v55 }
  0x49   : > { %751 = vmatpush2.bf16.msra.mxu1 %v1099_v56  ;;  %711 = vmatprep.subr.bf16.mxu0 %v1100_v57 }
  0x4a   : > { %752 = vmatprep.subr.bf16.mxu1 %v1102_v58 }
  0x4c   : > { %712 = vmatpush2.bf16.msra.mxu0 %v1104_v59 }
  0x4d   : > { %753 = vmatpush2.bf16.msra.mxu1 %v1105_v60  ;;  %713 = vmatprep.subr.bf16.mxu0 %v1106_v61 }
  0x4e   : > { %754 = vmatprep.subr.bf16.mxu1 %v1108_v62 }
  0x50   : > { %714 = vmatpush2.bf16.msra.mxu0 %v1110_v63 }
  0x51   : > { %755 = vmatpush2.bf16.msra.mxu1 %v1111_v0  ;;  %715 = vmatprep.subr.bf16.mxu0 %v1112_v1 }
  0x52   : > { %756 = vmatprep.subr.bf16.mxu1 %v1114_v2 }
  0x54   : > { %716 = vmatpush2.bf16.msra.mxu0 %v1116_v3 }
  0x55   : > { %757 = vmatpush2.bf16.msra.mxu1 %v1117_v4 }
  0x57   : > { %718 = vmatmul.mubr.bf16.vlgmr.msra.gmra.mxu0 %v923_v5 }
  0x58   : > { %759 = vmatmul.mubr.bf16.vlgmr.msra.gmra.mxu1 %v925_v6 }
 0x117   : > { %v719_v7 = vpop.f32.mrf.mxu0 }
 0x118   : > { %v760_v9 = vpop.f32.mrf.mxu1 }
 0x119   : > { %v761_v10 = vadd.f32 %v760_v9, %v719_v7  ;;  %v721_v11 = vpop.f32.mrf.mxu0 }
 0x11a   : > { %v762_v13 = vpop.f32.mrf.mxu1 }
 0x11b   : > { %v767_v14 = vadd.f32 %v761_v10, %v283_v8  ;;  %v763_v15 = vadd.f32 %v762_v13, %v721_v11  ;;  %v723_v16 = vpop.f32.mrf.mxu0  ;;  %774 = sbr.rel (%p991_p7) target bundleno = 301 (0x12d), region = 40 }
 0x11c   : > { %v764_v17 = vpop.f32.mrf.mxu1 }
 0x11d   : > { %769 = vst [vmem:[#allocation2] sm:$0xff] %v767_v14  ;;  %v768_v18 = vadd.f32 %v763_v15, %v284_v12  ;;  %v724_v19 = vpop.f32.mrf.mxu0 }
 0x11e   : > { %v765_v20 = vpop.f32.mrf.mxu1 }
 0x11f   : > { %770 = vst [vmem:[#allocation2 + $0x8] sm:$0xff] %v768_v18 }
 0x120   : > { %v779_v21 = vlaneseq  ;;  %v777_v23 = vld [vmem:[%s1287_s2] sm:$0x3] }
 0x122   : > { %v780_v22 = vshrl.u32 %v779_v21, 7 }
 0x124   : > { %v781_v24 = vsub.s32 0, %v780_v22  ;;  %v785_v25 = vsub.s32 1, %v780_v22  ;;  %v775_v26 = vld [vmem:[#allocation2] sm:$0xff] }
 0x126   : > { %v776_v27 = vld [vmem:[#allocation2 + $0x8] sm:$0xff]  ;;  %v782_v28 = vrot.slane %v777_v23, %v781_v24  ;;  %v786_v29 = vrot.slane %v777_v23, %v785_v25 }
 0x128   : > { %v789_v30 = vadd.f32 %v782_v28, %v775_v26  ;;  %v790_v31 = vadd.f32 %v786_v29, %v776_v27 }
 0x12a   : > { %v791_v32 = vmax.f32 %v789_v30, 0.0  ;;  %v792_v33 = vmax.f32 %v790_v31, 0.0 }
 0x12c   : > { %793 = vst [vmem:[%s1288_s3] sm:$0xff] %v791_v32  ;;  %794 = vst [vmem:[%s1288_s3 + $0x8] sm:$0xff] %v792_v33 }
 0x12d PF: > { %s13_s14 = sadd.s32 1, %s1144_s14   ;;  %s1289_s12 = smov %s1140_s13 }
 0x12e   : > { %p10_p8 = scmp.ge.s32.totalorder %s13_s14, 16   ;;  %s1290_s13 = smov %s1292_s15 }
 0x130   :  { %12 = sbr.rel (!%p10_p8) target bundleno = 2 (0x2), region = 76 }

// kernel: _lambda_.38
= control target key start
LH: loop header
LB: loop body
LE: loop exit
PB: predicated region body
PF: predicated region fallthrough
CT: control target
= control target key end

     0   :  { %s1473_s12 = smov 0   ;;  %s1475_s13 = smov 0   ;;  %s1757_s0 = inlined_call_operand.vmem [shape: bf16[8,512], index: 0, kind: input, shape index: {}]   ;;  %s1758_s1 = inlined_call_operand.vmem [shape: bf16[512,1024], index: 1, kind: input, shape index: {}]   ;;  %s1759_s2 = inlined_call_operand.vmem [shape: f32[1,1024], index: 2, kind: input, shape index: {}]   ;;  %s1760_s3 = inlined_call_operand.vmem [shape: f32[8,1024], index: 3, kind: output, shape index: {}]  }
   0x1   :  { %s1477_s14 = smov 0   ;;  %s1479_s15 = smov 0  }
   0x2   :  { %s1481_s16 = smov 0  }
   0x3 LB: > { %s28_s17 = sadd.s32 1, %s1447_s15  ;;  %p76_p1 = scmp.ne.s32.totalorder %s1439_s13, %s1435_s12  ;;  %s1451_s16 = sphi %s1481_s16, %s13_s16   ;;  %s1447_s15 = sphi %s1479_s15, %s1764_s15   ;;  %s1443_s14 = sphi %s1477_s14, %s1763_s14   ;;  %s1439_s13 = sphi %s1475_s13, %s1762_s13   ;;  %s1435_s12 = sphi %s1473_s12, %s1761_s12  }
   0x4   : > { %p30_p0 = scmp.ge.s32.totalorder %s28_s17, 4  ;;  %p77_p2 = scmp.eq.s32.totalorder %s1451_s16, 0 }
   0x5   : > { %s69_s19 = sadd.s32 1, %s1439_s13  ;;  %p1193_p5 = scmp.ge.s32.totalorder %s1451_s16, 4 }
   0x6   : > { %s1766_s17 = smov (%p30_p0, %s28_s17), 0  ;;  %p78_p3 = por %p77_p2, %p76_p1 }
   0x7   : > { %s65_s18 = ssub.s32 %s1447_s15, %s1766_s17  ;;  %169 = sbr.rel (%p1193_p5) target bundleno = 80 (0x50), region = 20 }
   0x8   : > { %p67_p4 = scmp.eq.s32.totalorder %s65_s18, 0 }
   0xa   : > { %s1508_s20 = scalar_select %p67_p4, %s1439_s13, %s69_s19  }
   0xc   : > { %172 = sbr.rel (!%p78_p3) target bundleno = 80 (0x50), region = 24  ;;  %s174_s21 = sand.u32 (%p78_p3), 1, %s1439_s13  }
   0xd   : > { %s1272_s22 = sshll.u32 (%p78_p3), %s1447_s15, 3  ;;  %s1194_s23 = sshll.u32 (%p78_p3), %s174_s21, 9 }
   0xe   : > { %s1516_s26 = scalar_lea.vmem (%p78_p3), %s1758_s1, %s1272_s22  ;;  %s1521_s27 = scalar_lea.vmem (%p78_p3), [#allocation3], %s1194_s23 }
   0xf   : > { %v337_v0 = vld [vmem:[%s1516_s26] sm:$0xff] (%p78_p3) }
  0x10   : > { %v339_v1 = vld [vmem:[%s1516_s26 + $0x20] sm:$0xff] (%p78_p3)  ;;  %338 = vst [vmem:[%s1521_s27] sm:$0xff] (%p78_p3), %v337_v0 }
  0x11   : > { %v341_v2 = vld [vmem:[%s1516_s26 + $0x40] sm:$0xff]  ;;  %340 = vst [vmem:[%s1521_s27 + $0x8] sm:$0xff] %v339_v1 }
  0x12   : > { %342 = vst [vmem:[%s1521_s27 + $0x10] sm:$0xff] %v341_v2  ;;  %v343_v3 = vld [vmem:[%s1516_s26 + $0x60] sm:$0xff] }
  0x13   : > { %v345_v4 = vld [vmem:[%s1516_s26 + $0x80] sm:$0xff]  ;;  %344 = vst [vmem:[%s1521_s27 + $0x18] sm:$0xff] %v343_v3 }
  0x14   : > { %v347_v5 = vld [vmem:[%s1516_s26 + $0xa0] sm:$0xff]  ;;  %346 = vst [vmem:[%s1521_s27 + $0x20] sm:$0xff] %v345_v4 }
  0x15   : > { %348 = vst [vmem:[%s1521_s27 + $0x28] sm:$0xff] %v347_v5  ;;  %v349_v6 = vld [vmem:[%s1516_s26 + $0xc0] sm:$0xff] }
  0x16   : > { %v351_v7 = vld [vmem:[%s1516_s26 + $0xe0] sm:$0xff]  ;;  %350 = vst [vmem:[%s1521_s27 + $0x30] sm:$0xff] %v349_v6 }
  0x17   : > { %v353_v8 = vld [vmem:[%s1516_s26 + $0x100] sm:$0xff]  ;;  %352 = vst [vmem:[%s1521_s27 + $0x38] sm:$0xff] %v351_v7 }
  0x18   : > { %354 = vst [vmem:[%s1521_s27 + $0x40] sm:$0xff] %v353_v8  ;;  %v355_v9 = vld [vmem:[%s1516_s26 + $0x120] sm:$0xff] }
  0x19   : > { %v357_v10 = vld [vmem:[%s1516_s26 + $0x140] sm:$0xff]  ;;  %356 = vst [vmem:[%s1521_s27 + $0x48] sm:$0xff] %v355_v9 }
  0x1a   : > { %v359_v11 = vld [vmem:[%s1516_s26 + $0x160] sm:$0xff]  ;;  %358 = vst [vmem:[%s1521_s27 + $0x50] sm:$0xff] %v357_v10 }
  0x1b   : > { %360 = vst [vmem:[%s1521_s27 + $0x58] sm:$0xff] %v359_v11  ;;  %v361_v12 = vld [vmem:[%s1516_s26 + $0x180] sm:$0xff] }
  0x1c   : > { %v363_v13 = vld [vmem:[%s1516_s26 + $0x1a0] sm:$0xff]  ;;  %362 = vst [vmem:[%s1521_s27 + $0x60] sm:$0xff] %v361_v12 }
  0x1d   : > { %v365_v14 = vld [vmem:[%s1516_s26 + $0x1c0] sm:$0xff]  ;;  %364 = vst [vmem:[%s1521_s27 + $0x68] sm:$0xff] %v363_v13 }
  0x1e   : > { %366 = vst [vmem:[%s1521_s27 + $0x70] sm:$0xff] %v365_v14  ;;  %v367_v15 = vld [vmem:[%s1516_s26 + $0x1e0] sm:$0xff] }
  0x1f   : > { %v369_v16 = vld [vmem:[%s1516_s26 + $0x200] sm:$0xff]  ;;  %368 = vst [vmem:[%s1521_s27 + $0x78] sm:$0xff] %v367_v15 }
  0x20   : > { %v371_v17 = vld [vmem:[%s1516_s26 + $0x220] sm:$0xff]  ;;  %370 = vst [vmem:[%s1521_s27 + $0x80] sm:$0xff] %v369_v16 }
  0x21   : > { %372 = vst [vmem:[%s1521_s27 + $0x88] sm:$0xff] %v371_v17  ;;  %v373_v18 = vld [vmem:[%s1516_s26 + $0x240] sm:$0xff] }
  0x22   : > { %v375_v19 = vld [vmem:[%s1516_s26 + $0x260] sm:$0xff]  ;;  %374 = vst [vmem:[%s1521_s27 + $0x90] sm:$0xff] %v373_v18 }
  0x23   : > { %v377_v20 = vld [vmem:[%s1516_s26 + $0x280] sm:$0xff]  ;;  %376 = vst [vmem:[%s1521_s27 + $0x98] sm:$0xff] %v375_v19 }
  0x24   : > { %378 = vst [vmem:[%s1521_s27 + $0xa0] sm:$0xff] %v377_v20  ;;  %v379_v21 = vld [vmem:[%s1516_s26 + $0x2a0] sm:$0xff] }
  0x25   : > { %v381_v22 = vld [vmem:[%s1516_s26 + $0x2c0] sm:$0xff]  ;;  %380 = vst [vmem:[%s1521_s27 + $0xa8] sm:$0xff] %v379_v21 }
  0x26   : > { %v383_v23 = vld [vmem:[%s1516_s26 + $0x2e0] sm:$0xff]  ;;  %382 = vst [vmem:[%s1521_s27 + $0xb0] sm:$0xff] %v381_v22 }
  0x27   : > { %384 = vst [vmem:[%s1521_s27 + $0xb8] sm:$0xff] %v383_v23  ;;  %v385_v24 = vld [vmem:[%s1516_s26 + $0x300] sm:$0xff] }
  0x28   : > { %v387_v25 = vld [vmem:[%s1516_s26 + $0x320] sm:$0xff]  ;;  %386 = vst [vmem:[%s1521_s27 + $0xc0] sm:$0xff] %v385_v24 }
  0x29   : > { %v389_v26 = vld [vmem:[%s1516_s26 + $0x340] sm:$0xff]  ;;  %388 = vst [vmem:[%s1521_s27 + $0xc8] sm:$0xff] %v387_v25 }
  0x2a   : > { %390 = vst [vmem:[%s1521_s27 + $0xd0] sm:$0xff] %v389_v26  ;;  %v391_v27 = vld [vmem:[%s1516_s26 + $0x360] sm:$0xff] }
  0x2b   : > { %v393_v28 = vld [vmem:[%s1516_s26 + $0x380] sm:$0xff]  ;;  %392 = vst [vmem:[%s1521_s27 + $0xd8] sm:$0xff] %v391_v27 }
  0x2c   : > { %v395_v29 = vld [vmem:[%s1516_s26 + $0x3a0] sm:$0xff]  ;;  %394 = vst [vmem:[%s1521_s27 + $0xe0] sm:$0xff] %v393_v28 }
  0x2d   : > { %396 = vst [vmem:[%s1521_s27 + $0xe8] sm:$0xff] %v395_v29  ;;  %v397_v30 = vld [vmem:[%s1516_s26 + $0x3c0] sm:$0xff] }
  0x2e   : > { %v399_v31 = vld [vmem:[%s1516_s26 + $0x3e0] sm:$0xff]  ;;  %398 = vst [vmem:[%s1521_s27 + $0xf0] sm:$0xff] %v397_v30 }
  0x2f   : > { %v401_v32 = vld [vmem:[%s1516_s26 + $0x400] sm:$0xff]  ;;  %400 = vst [vmem:[%s1521_s27 + $0xf8] sm:$0xff] %v399_v31 }
  0x30   : > { %402 = vst [vmem:[%s1521_s27 + $0x100] sm:$0xff] %v401_v32  ;;  %v403_v33 = vld [vmem:[%s1516_s26 + $0x420] sm:$0xff] }
  0x31   : > { %v405_v34 = vld [vmem:[%s1516_s26 + $0x440] sm:$0xff]  ;;  %404 = vst [vmem:[%s1521_s27 + $0x108] sm:$0xff] %v403_v33 }
  0x32   : > { %v407_v35 = vld [vmem:[%s1516_s26 + $0x460] sm:$0xff]  ;;  %406 = vst [vmem:[%s1521_s27 + $0x110] sm:$0xff] %v405_v34 }
  0x33   : > { %408 = vst [vmem:[%s1521_s27 + $0x118] sm:$0xff] %v407_v35  ;;  %v409_v36 = vld [vmem:[%s1516_s26 + $0x480] sm:$0xff] }
  0x34   : > { %v411_v37 = vld [vmem:[%s1516_s26 + $0x4a0] sm:$0xff]  ;;  %410 = vst [vmem:[%s1521_s27 + $0x120] sm:$0xff] %v409_v36 }
  0x35   : > { %v413_v38 = vld [vmem:[%s1516_s26 + $0x4c0] sm:$0xff]  ;;  %412 = vst [vmem:[%s1521_s27 + $0x128] sm:$0xff] %v411_v37 }
  0x36   : > { %414 = vst [vmem:[%s1521_s27 + $0x130] sm:$0xff] %v413_v38  ;;  %v415_v39 = vld [vmem:[%s1516_s26 + $0x4e0] sm:$0xff] }
  0x37   : > { %v417_v40 = vld [vmem:[%s1516_s26 + $0x500] sm:$0xff]  ;;  %416 = vst [vmem:[%s1521_s27 + $0x138] sm:$0xff] %v415_v39 }
  0x38   : > { %v419_v41 = vld [vmem:[%s1516_s26 + $0x520] sm:$0xff]  ;;  %418 = vst [vmem:[%s1521_s27 + $0x140] sm:$0xff] %v417_v40 }
  0x39   : > { %420 = vst [vmem:[%s1521_s27 + $0x148] sm:$0xff] %v419_v41  ;;  %v421_v42 = vld [vmem:[%s1516_s26 + $0x540] sm:$0xff] }
  0x3a   : > { %v423_v43 = vld [vmem:[%s1516_s26 + $0x560] sm:$0xff]  ;;  %422 = vst [vmem:[%s1521_s27 + $0x150] sm:$0xff] %v421_v42 }
  0x3b   : > { %v425_v44 = vld [vmem:[%s1516_s26 + $0x580] sm:$0xff]  ;;  %424 = vst [vmem:[%s1521_s27 + $0x158] sm:$0xff] %v423_v43 }
  0x3c   : > { %426 = vst [vmem:[%s1521_s27 + $0x160] sm:$0xff] %v425_v44  ;;  %v427_v45 = vld [vmem:[%s1516_s26 + $0x5a0] sm:$0xff] }
  0x3d   : > { %v429_v46 = vld [vmem:[%s1516_s26 + $0x5c0] sm:$0xff]  ;;  %428 = vst [vmem:[%s1521_s27 + $0x168] sm:$0xff] %v427_v45 }
  0x3e   : > { %v431_v47 = vld [vmem:[%s1516_s26 + $0x5e0] sm:$0xff]  ;;  %430 = vst [vmem:[%s1521_s27 + $0x170] sm:$0xff] %v429_v46 }
  0x3f   : > { %432 = vst [vmem:[%s1521_s27 + $0x178] sm:$0xff] %v431_v47  ;;  %v433_v48 = vld [vmem:[%s1516_s26 + $0x600] sm:$0xff] }
  0x40   : > { %v435_v49 = vld [vmem:[%s1516_s26 + $0x620] sm:$0xff]  ;;  %434 = vst [vmem:[%s1521_s27 + $0x180] sm:$0xff] %v433_v48 }
  0x41   : > { %v437_v50 = vld [vmem:[%s1516_s26 + $0x640] sm:$0xff]  ;;  %436 = vst [vmem:[%s1521_s27 + $0x188] sm:$0xff] %v435_v49 }
  0x42   : > { %438 = vst [vmem:[%s1521_s27 + $0x190] sm:$0xff] %v437_v50  ;;  %v439_v51 = vld [vmem:[%s1516_s26 + $0x660] sm:$0xff] }
  0x43   : > { %v441_v52 = vld [vmem:[%s1516_s26 + $0x680] sm:$0xff]  ;;  %440 = vst [vmem:[%s1521_s27 + $0x198] sm:$0xff] %v439_v51 }
  0x44   : > { %v443_v53 = vld [vmem:[%s1516_s26 + $0x6a0] sm:$0xff]  ;;  %442 = vst [vmem:[%s1521_s27 + $0x1a0] sm:$0xff] %v441_v52 }
  0x45   : > { %444 = vst [vmem:[%s1521_s27 + $0x1a8] sm:$0xff] %v443_v53  ;;  %v445_v54 = vld [vmem:[%s1516_s26 + $0x6c0] sm:$0xff] }
  0x46   : > { %v447_v55 = vld [vmem:[%s1516_s26 + $0x6e0] sm:$0xff]  ;;  %446 = vst [vmem:[%s1521_s27 + $0x1b0] sm:$0xff] %v445_v54 }
  0x47   : > { %v449_v56 = vld [vmem:[%s1516_s26 + $0x700] sm:$0xff]  ;;  %448 = vst [vmem:[%s1521_s27 + $0x1b8] sm:$0xff] %v447_v55 }
  0x48   : > { %450 = vst [vmem:[%s1521_s27 + $0x1c0] sm:$0xff] %v449_v56  ;;  %v451_v57 = vld [vmem:[%s1516_s26 + $0x720] sm:$0xff] }
  0x49   : > { %v453_v58 = vld [vmem:[%s1516_s26 + $0x740] sm:$0xff]  ;;  %452 = vst [vmem:[%s1521_s27 + $0x1c8] sm:$0xff] %v451_v57 }
  0x4a   : > { %v455_v59 = vld [vmem:[%s1516_s26 + $0x760] sm:$0xff]  ;;  %454 = vst [vmem:[%s1521_s27 + $0x1d0] sm:$0xff] %v453_v58 }
  0x4b   : > { %456 = vst [vmem:[%s1521_s27 + $0x1d8] sm:$0xff] %v455_v59  ;;  %v457_v60 = vld [vmem:[%s1516_s26 + $0x780] sm:$0xff] }
  0x4c   : > { %v459_v61 = vld [vmem:[%s1516_s26 + $0x7a0] sm:$0xff]  ;;  %458 = vst [vmem:[%s1521_s27 + $0x1e0] sm:$0xff] %v457_v60 }
  0x4d   : > { %v461_v62 = vld [vmem:[%s1516_s26 + $0x7c0] sm:$0xff]  ;;  %460 = vst [vmem:[%s1521_s27 + $0x1e8] sm:$0xff] %v459_v61 }
  0x4e   : > { %462 = vst [vmem:[%s1521_s27 + $0x1f0] sm:$0xff] %v461_v62  ;;  %v463_v63 = vld [vmem:[%s1516_s26 + $0x7e0] sm:$0xff] }
  0x4f   : > { %464 = vst [vmem:[%s1521_s27 + $0x1f8] sm:$0xff] %v463_v63 }
  0x50 PF: > { %p1197_p6 = scmp.ge.s32.totalorder %s1451_s16, 1  ;;  %p477_p7 = scmp.lt.s32.totalorder %s1451_s16, 5 }
  0x52   : > { %p478_p8 = pnand %p1197_p6, %p477_p7 }
  0x53   : > { %s484_s28 = sand.u32 (!%p478_p8), 1, %s1435_s12   ;;  %s1199_s8 = sshll.u32 (!%p478_p8), %s1443_s14, 1 }
  0x54   : > { %481 = sbr.rel (%p478_p8) target bundleno = 356 (0x164), region = 66  ;;  %s1198_s6 = sshll.u32 (!%p478_p8), %s484_s28, 9 }
  0x55   : > { %s1665_s7 = scalar_lea.vmem (!%p478_p8), [#allocation3], %s1198_s6  ;;  %p537_p9 = scmp.lt.s32.totalorder (!%p478_p8), %s1199_s8, 7 }
  0x59   : > { %v1654_v0 = vld [vmem:[%s1757_s0] sm:$0xff]  ;;  %v1659_v1 = vld [vmem:[%s1757_s0 + $0x8] sm:$0xff]  ;;  %v1313_v4 = vld [vmem:[%s1665_s7 + $0x74] ss:$8 sps:$4 sm:$0xff]   ;;  %s1768_s8 = smov (!%p537_p9, %s1199_s8), 7 }
  0x5a   : > { %v1203_v2 = vcombine.high %v1654_v0, %v1654_v0  ;;  %v1205_v3 = vcombine.high %v1659_v1, %v1659_v1  ;;  %v1315_v5 = vld [vmem:[%s1665_s7 + $0x174] ss:$8 sps:$4 sm:$0xff]   ;;  %959 = vmatprep.subr.bf16.mxu0 %v1313_v4  ;;  %v1317_v6 = vld [vmem:[%s1665_s7 + $0x70] ss:$8 sps:$4 sm:$0xff]   ;;  %v1319_v8 = vld [vmem:[%s1665_s7 + $0x64] ss:$8 sps:$4 sm:$0xff]   ;;  %s539_s11 = scalar_lea.vmem %s1759_s2, %s1768_s8 }
  0x5b   : > { %v1318_v7 = vld [vmem:[%s1665_s7 + $0x170] ss:$8 sps:$4 sm:$0xff]   ;;  %1000 = vmatprep.subr.bf16.mxu1 %v1315_v5  ;;  %960 = vmatpush1.bf16.msra.mxu0 %v1317_v6  ;;  %v1321_v9 = vld [vmem:[%s1665_s7 + $0x164] ss:$8 sps:$4 sm:$0xff]   ;;  %v1323_v10 = vld [vmem:[%s1665_s7 + $0x60] ss:$8 sps:$4 sm:$0xff]   ;;  %v1202_v6 = vcombine.low %v1654_v0, %v1654_v0 }
  0x5c   : > { %991 = vmatprep.mubr.bf16.mxu0 %v1203_v2  ;;  %1032 = vmatprep.mubr.bf16.mxu1 %v1205_v3  ;;  %v1324_v11 = vld [vmem:[%s1665_s7 + $0x160] ss:$8 sps:$4 sm:$0xff]   ;;  %v1325_v12 = vld [vmem:[%s1665_s7 + $0x54] ss:$8 sps:$4 sm:$0xff]   ;;  %v1329_v14 = vld [vmem:[%s1665_s7 + $0x50] ss:$8 sps:$4 sm:$0xff]  }
  0x5d   : > { %1001 = vmatpush1.bf16.msra.mxu1 %v1318_v7  ;;  %961 = vmatprep.subr.bf16.mxu0 %v1319_v8  ;;  %v1327_v13 = vld [vmem:[%s1665_s7 + $0x154] ss:$8 sps:$4 sm:$0xff]   ;;  %v1330_v15 = vld [vmem:[%s1665_s7 + $0x150] ss:$8 sps:$4 sm:$0xff]   ;;  %v1331_v16 = vld [vmem:[%s1665_s7 + $0x44] ss:$8 sps:$4 sm:$0xff]   ;;  %v1204_v7 = vcombine.low %v1659_v1, %v1659_v1  ;;  %v1052_v8 = vlaneseq }
  0x5e   : > { %1002 = vmatprep.subr.bf16.mxu1 %v1321_v9  ;;  %v1333_v17 = vld [vmem:[%s1665_s7 + $0x144] ss:$8 sps:$4 sm:$0xff]   ;;  %v1335_v18 = vld [vmem:[%s1665_s7 + $0x40] ss:$8 sps:$4 sm:$0xff]   ;;  %v1337_v20 = vld [vmem:[%s1665_s7 + $0x34] ss:$8 sps:$4 sm:$0xff]  }
  0x5f   : > { %962 = vmatpush1.bf16.msra.mxu0 %v1323_v10  ;;  %v1336_v19 = vld [vmem:[%s1665_s7 + $0x140] ss:$8 sps:$4 sm:$0xff]   ;;  %v1339_v21 = vld [vmem:[%s1665_s7 + $0x134] ss:$8 sps:$4 sm:$0xff]   ;;  %v1341_v22 = vld [vmem:[%s1665_s7 + $0x30] ss:$8 sps:$4 sm:$0xff]  }
  0x60   : > { %963 = vmatprep.subr.bf16.mxu0 %v1325_v12  ;;  %v1342_v23 = vld [vmem:[%s1665_s7 + $0x130] ss:$8 sps:$4 sm:$0xff]   ;;  %v1343_v24 = vld [vmem:[%s1665_s7 + $0x24] ss:$8 sps:$4 sm:$0xff]   ;;  %v1347_v26 = vld [vmem:[%s1665_s7 + $0x20] ss:$8 sps:$4 sm:$0xff]  }
  0x61   : > { %1003 = vmatpush1.bf16.msra.mxu1 %v1324_v11  ;;  %v1345_v25 = vld [vmem:[%s1665_s7 + $0x124] ss:$8 sps:$4 sm:$0xff]   ;;  %v1348_v27 = vld [vmem:[%s1665_s7 + $0x120] ss:$8 sps:$4 sm:$0xff]   ;;  %v1349_v28 = vld [vmem:[%s1665_s7 + $0x14] ss:$8 sps:$4 sm:$0xff]  }
  0x62   : > { %1004 = vmatprep.subr.bf16.mxu1 %v1327_v13  ;;  %v1351_v29 = vld [vmem:[%s1665_s7 + $0x114] ss:$8 sps:$4 sm:$0xff]   ;;  %v1353_v30 = vld [vmem:[%s1665_s7 + $0x10] ss:$8 sps:$4 sm:$0xff]   ;;  %v1355_v32 = vld [vmem:[%s1665_s7 + $0x4] ss:$8 sps:$4 sm:$0xff]  }
  0x63   : > { %964 = vmatpush1.bf16.msra.mxu0 %v1329_v14  ;;  %v1354_v31 = vld [vmem:[%s1665_s7 + $0x110] ss:$8 sps:$4 sm:$0xff]   ;;  %v1357_v33 = vld [vmem:[%s1665_s7 + $0x104] ss:$8 sps:$4 sm:$0xff]   ;;  %v1359_v34 = vld [vmem:[%s1665_s7] ss:$8 sps:$4 sm:$0xff]  }
  0x64   : > { %965 = vmatprep.subr.bf16.mxu0 %v1331_v16  ;;  %v1360_v35 = vld [vmem:[%s1665_s7 + $0x100] ss:$8 sps:$4 sm:$0xff]   ;;  %v1361_v36 = vld [vmem:[%s1665_s7 + $0xf4] ss:$8 sps:$4 sm:$0xff]   ;;  %v1365_v38 = vld [vmem:[%s1665_s7 + $0xf0] ss:$8 sps:$4 sm:$0xff]  }
  0x65   : > { %1005 = vmatpush1.bf16.msra.mxu1 %v1330_v15  ;;  %v1363_v37 = vld [vmem:[%s1665_s7 + $0x1f4] ss:$8 sps:$4 sm:$0xff]   ;;  %v1366_v39 = vld [vmem:[%s1665_s7 + $0x1f0] ss:$8 sps:$4 sm:$0xff]   ;;  %v1367_v40 = vld [vmem:[%s1665_s7 + $0xe4] ss:$8 sps:$4 sm:$0xff]  }
  0x66   : > { %1006 = vmatprep.subr.bf16.mxu1 %v1333_v17  ;;  %v1369_v41 = vld [vmem:[%s1665_s7 + $0x1e4] ss:$8 sps:$4 sm:$0xff]   ;;  %v1371_v42 = vld [vmem:[%s1665_s7 + $0xe0] ss:$8 sps:$4 sm:$0xff]   ;;  %v1373_v44 = vld [vmem:[%s1665_s7 + $0xd4] ss:$8 sps:$4 sm:$0xff]  }
  0x67   : > { %966 = vmatpush1.bf16.msra.mxu0 %v1335_v18  ;;  %v1372_v43 = vld [vmem:[%s1665_s7 + $0x1e0] ss:$8 sps:$4 sm:$0xff]   ;;  %v1375_v45 = vld [vmem:[%s1665_s7 + $0x1d4] ss:$8 sps:$4 sm:$0xff]   ;;  %v1377_v46 = vld [vmem:[%s1665_s7 + $0xd0] ss:$8 sps:$4 sm:$0xff]  }
  0x68   : > { %967 = vmatprep.subr.bf16.mxu0 %v1337_v20  ;;  %v1378_v47 = vld [vmem:[%s1665_s7 + $0x1d0] ss:$8 sps:$4 sm:$0xff]   ;;  %v1379_v48 = vld [vmem:[%s1665_s7 + $0xc4] ss:$8 sps:$4 sm:$0xff]   ;;  %v1383_v50 = vld [vmem:[%s1665_s7 + $0xc0] ss:$8 sps:$4 sm:$0xff]  }
  0x69   : > { %1007 = vmatpush1.bf16.msra.mxu1 %v1336_v19  ;;  %v1381_v49 = vld [vmem:[%s1665_s7 + $0x1c4] ss:$8 sps:$4 sm:$0xff]   ;;  %v1384_v51 = vld [vmem:[%s1665_s7 + $0x1c0] ss:$8 sps:$4 sm:$0xff]   ;;  %v1385_v52 = vld [vmem:[%s1665_s7 + $0xb4] ss:$8 sps:$4 sm:$0xff]  }
  0x6a   : > { %1008 = vmatprep.subr.bf16.mxu1 %v1339_v21  ;;  %v1387_v53 = vld [vmem:[%s1665_s7 + $0x1b4] ss:$8 sps:$4 sm:$0xff]   ;;  %v1389_v54 = vld [vmem:[%s1665_s7 + $0xb0] ss:$8 sps:$4 sm:$0xff]   ;;  %v1391_v56 = vld [vmem:[%s1665_s7 + $0xa4] ss:$8 sps:$4 sm:$0xff]  }
  0x6b   : > { %968 = vmatpush1.bf16.msra.mxu0 %v1341_v22  ;;  %v1390_v55 = vld [vmem:[%s1665_s7 + $0x1b0] ss:$8 sps:$4 sm:$0xff]   ;;  %v1393_v57 = vld [vmem:[%s1665_s7 + $0x1a4] ss:$8 sps:$4 sm:$0xff]   ;;  %v1395_v58 = vld [vmem:[%s1665_s7 + $0xa0] ss:$8 sps:$4 sm:$0xff]  }
  0x6c   : > { %969 = vmatprep.subr.bf16.mxu0 %v1343_v24  ;;  %v1396_v59 = vld [vmem:[%s1665_s7 + $0x1a0] ss:$8 sps:$4 sm:$0xff]   ;;  %v1397_v60 = vld [vmem:[%s1665_s7 + $0x94] ss:$8 sps:$4 sm:$0xff]   ;;  %v1401_v62 = vld [vmem:[%s1665_s7 + $0x90] ss:$8 sps:$4 sm:$0xff]  }
  0x6d   : > { %1009 = vmatpush1.bf16.msra.mxu1 %v1342_v23  ;;  %v1399_v61 = vld [vmem:[%s1665_s7 + $0x194] ss:$8 sps:$4 sm:$0xff]   ;;  %v1402_v63 = vld [vmem:[%s1665_s7 + $0x190] ss:$8 sps:$4 sm:$0xff]   ;;  %v1403_v2 = vld [vmem:[%s1665_s7 + $0x84] ss:$8 sps:$4 sm:$0xff]  }
  0x6e   : > { %1010 = vmatprep.subr.bf16.mxu1 %v1345_v25  ;;  %v1405_v3 = vld [vmem:[%s1665_s7 + $0x184] ss:$8 sps:$4 sm:$0xff]   ;;  %v1407_v4 = vld [vmem:[%s1665_s7 + $0x80] ss:$8 sps:$4 sm:$0xff]   ;;  %v1053_v9 = vshrl.u32 %v1052_v8, 7  ;;  %s1201_s12 = sshll.u32 %s1768_s8, 3 }
  0x6f   : > { %970 = vmatpush1.bf16.msra.mxu0 %v1347_v26  ;;  %v1408_v5 = vld [vmem:[%s1665_s7 + $0x180] ss:$8 sps:$4 sm:$0xff]   ;;  %s549_s14 = scalar_lea.vmem %s1760_s3, %s1201_s12 }
  0x70   : > { %971 = vmatprep.subr.bf16.mxu0 %v1349_v28  ;;  %v1054_v10 = vsub.s32 0, %v1053_v9  ;;  %v1050_v11 = vld [vmem:[%s539_s11] sm:$0x3]  ;;  %v1058_v12 = vsub.s32 1, %v1053_v9 }
  0x71   : > { %1011 = vmatpush1.bf16.msra.mxu1 %v1348_v27 }
  0x72   : > { %1012 = vmatprep.subr.bf16.mxu1 %v1351_v29  ;;  %v1055_v0 = vrot.slane %v1050_v11, %v1054_v10  ;;  %v1059_v15 = vrot.slane %v1050_v11, %v1058_v12 }
  0x73   : > { %972 = vmatpush1.bf16.msra.mxu0 %v1353_v30 }
  0x74   : > { %973 = vmatprep.subr.bf16.mxu0 %v1355_v32 }
  0x75   : > { %1013 = vmatpush1.bf16.msra.mxu1 %v1354_v31 }
  0x76   : > { %1014 = vmatprep.subr.bf16.mxu1 %v1357_v33 }
  0x77   : > { %974 = vmatpush1.bf16.msra.mxu0 %v1359_v34 }
  0x78   : > { %975 = vmatprep.subr.bf16.mxu0 %v1361_v36 }
  0x79   : > { %1015 = vmatpush1.bf16.msra.mxu1 %v1360_v35 }
  0x7a   : > { %1016 = vmatprep.subr.bf16.mxu1 %v1363_v37 }
  0x7b   : > { %976 = vmatpush2.bf16.msra.mxu0 %v1365_v38 }
  0x7c   : > { %977 = vmatprep.subr.bf16.mxu0 %v1367_v40 }
  0x7d   : > { %1017 = vmatpush2.bf16.msra.mxu1 %v1366_v39 }
  0x7e   : > { %1018 = vmatprep.subr.bf16.mxu1 %v1369_v41 }
  0x7f   : > { %978 = vmatpush2.bf16.msra.mxu0 %v1371_v42 }
  0x80   : > { %979 = vmatprep.subr.bf16.mxu0 %v1373_v44 }
  0x81   : > { %1019 = vmatpush2.bf16.msra.mxu1 %v1372_v43 }
  0x82   : > { %1020 = vmatprep.subr.bf16.mxu1 %v1375_v45 }
  0x83   : > { %980 = vmatpush2.bf16.msra.mxu0 %v1377_v46 }
  0x84   : > { %981 = vmatprep.subr.bf16.mxu0 %v1379_v48 }
  0x85   : > { %1021 = vmatpush2.bf16.msra.mxu1 %v1378_v47 }
  0x86   : > { %1022 = vmatprep.subr.bf16.mxu1 %v1381_v49 }
  0x87   : > { %982 = vmatpush2.bf16.msra.mxu0 %v1383_v50 }
  0x88   : > { %983 = vmatprep.subr.bf16.mxu0 %v1385_v52 }
  0x89   : > { %1023 = vmatpush2.bf16.msra.mxu1 %v1384_v51 }
  0x8a   : > { %1024 = vmatprep.subr.bf16.mxu1 %v1387_v53 }
  0x8b   : > { %984 = vmatpush2.bf16.msra.mxu0 %v1389_v54 }
  0x8c   : > { %985 = vmatprep.subr.bf16.mxu0 %v1391_v56 }
  0x8d   : > { %1025 = vmatpush2.bf16.msra.mxu1 %v1390_v55 }
  0x8e   : > { %1026 = vmatprep.subr.bf16.mxu1 %v1393_v57 }
  0x8f   : > { %986 = vmatpush2.bf16.msra.mxu0 %v1395_v58 }
  0x90   : > { %987 = vmatprep.subr.bf16.mxu0 %v1397_v60 }
  0x91   : > { %1027 = vmatpush2.bf16.msra.mxu1 %v1396_v59 }
  0x92   : > { %1028 = vmatprep.subr.bf16.mxu1 %v1399_v61 }
  0x93   : > { %988 = vmatpush2.bf16.msra.mxu0 %v1401_v62 }
  0x94   : > { %989 = vmatprep.subr.bf16.mxu0 %v1403_v2 }
  0x95   : > { %1029 = vmatpush2.bf16.msra.mxu1 %v1402_v63 }
  0x96   : > { %1030 = vmatprep.subr.bf16.mxu1 %v1405_v3 }
  0x97   : > { %990 = vmatpush2.bf16.msra.mxu0 %v1407_v4 }
  0x99   : > { %1031 = vmatpush2.bf16.msra.mxu1 %v1408_v5 }
  0x9a   : > { %992 = vmatmul.mubr.bf16.vlgmr.msra.gmra.mxu0 %v1202_v6 }
  0x9c   : > { %1033 = vmatmul.mubr.bf16.vlgmr.msra.gmra.mxu1 %v1204_v7 }
 0x15a   : > { %v993_v13 = vpop.f32.mrf.mxu0 }
 0x15c   : > { %v1034_v1 = vpop.f32.mrf.mxu1  ;;  %v995_v16 = vpop.f32.mrf.mxu0 }
 0x15d   : > { %v1035_v14 = vadd.f32 %v1034_v1, %v993_v13 }
 0x15e   : > { %v1036_v17 = vpop.f32.mrf.mxu1  ;;  %v997_v20 = vpop.f32.mrf.mxu0 }
 0x15f   : > { %v1062_v18 = vadd.f32 %v1055_v0, %v1035_v14  ;;  %v1037_v19 = vadd.f32 %v1036_v17, %v995_v16 }
 0x160   : > { %v1038_v21 = vpop.f32.mrf.mxu1  ;;  %v998_v23 = vpop.f32.mrf.mxu0 }
 0x161   : > { %1064 = vst [vmem:[%s549_s14] sm:$0xff] %v1062_v18  ;;  %v1063_v22 = vadd.f32 %v1059_v15, %v1037_v19 }
 0x162   : > { %v1039_v24 = vpop.f32.mrf.mxu1 }
 0x163   : > { %1065 = vst [vmem:[%s549_s14 + $0x8] sm:$0xff] %v1063_v22 }
 0x164 PF: > { %s13_s16 = sadd.s32 1, %s1451_s16   ;;  %s1761_s12 = smov %s1439_s13 }
 0x165   : > { %p10_p10 = scmp.ge.s32.totalorder %s13_s16, 6   ;;  %s1762_s13 = smov %s1508_s20 }
 0x166   : > { %s1763_s14 = smov %s1447_s15  ;;  %s1764_s15 = smov %s1766_s17 }
 0x167   :  { %12 = sbr.rel (!%p10_p10) target bundleno = 3 (0x3), region = 119 }

// kernel: _lambda_.39
= control target key start
LH: loop header
LB: loop body
LE: loop exit
PB: predicated region body
PF: predicated region fallthrough
CT: control target
= control target key end

     0   :  { %s1114_s15 = smov 0   ;;  %s1116_s16 = smov 0   ;;  %s1296_s0 = inlined_call_operand.vmem [shape: bf16[8,256], index: 0, kind: input, shape index: {}]   ;;  %s1297_s1 = inlined_call_operand.vmem [shape: bf16[256,1024], index: 1, kind: input, shape index: {}]   ;;  %s1298_s2 = inlined_call_operand.vmem [shape: f32[1,1024], index: 2, kind: input, shape index: {}]   ;;  %s1299_s3 = inlined_call_operand.vmem [shape: f32[8,1024], index: 3, kind: input, shape index: {}]   ;;  %s1300_s4 = inlined_call_operand.vmem [shape: f32[8,1024], index: 4, kind: output, shape index: {}]  }
   0x1   :  { %s1118_s17 = smov 0   ;;  %s1120_s18 = smov 0  }
   0x2   :  { %s1122_s19 = smov 0  }
   0x3 LB: > { %s29_s20 = sadd.s32 1, %s1083_s18  ;;  %p77_p1 = scmp.ne.s32.totalorder %s1075_s16, %s1071_s15  ;;  %s1087_s19 = sphi %s1122_s19, %s14_s19   ;;  %s1083_s18 = sphi %s1120_s18, %s1304_s18   ;;  %s1079_s17 = sphi %s1118_s17, %s1303_s17   ;;  %s1075_s16 = sphi %s1116_s16, %s1302_s16   ;;  %s1071_s15 = sphi %s1114_s15, %s1301_s15  }
   0x4   : > { %p31_p0 = scmp.ge.s32.totalorder %s29_s20, 4  ;;  %p78_p2 = scmp.eq.s32.totalorder %s1087_s19, 0 }
   0x5   : > { %s70_s22 = sadd.s32 1, %s1075_s16  ;;  %p911_p5 = scmp.ge.s32.totalorder %s1087_s19, 4 }
   0x6   : > { %s1306_s20 = smov (%p31_p0, %s29_s20), 0  ;;  %p79_p3 = por %p78_p2, %p77_p1 }
   0x7   : > { %s66_s21 = ssub.s32 %s1083_s18, %s1306_s20  ;;  %198 = sbr.rel (%p911_p5) target bundleno = 48 (0x30), region = 20 }
   0x8   : > { %p68_p4 = scmp.eq.s32.totalorder %s66_s21, 0 }
   0xa   : > { %s1149_s23 = scalar_select %p68_p4, %s1075_s16, %s70_s22  }
   0xc   : > { %201 = sbr.rel (!%p79_p3) target bundleno = 48 (0x30), region = 24  ;;  %s203_s24 = sand.u32 (%p79_p3), 1, %s1075_s16  }
   0xd   : > { %s958_s25 = sshll.u32 (%p79_p3), %s1083_s18, 3  ;;  %s912_s26 = sshll.u32 (%p79_p3), %s203_s24, 8 }
   0xe   : > { %s1157_s29 = scalar_lea.vmem (%p79_p3), %s1297_s1, %s958_s25  ;;  %s1162_s30 = scalar_lea.vmem (%p79_p3), [#allocation3], %s912_s26 }
   0xf   : > { %v302_v0 = vld [vmem:[%s1157_s29] sm:$0xff] (%p79_p3) }
  0x10   : > { %v304_v1 = vld [vmem:[%s1157_s29 + $0x20] sm:$0xff] (%p79_p3)  ;;  %303 = vst [vmem:[%s1162_s30] sm:$0xff] (%p79_p3), %v302_v0 }
  0x11   : > { %v306_v2 = vld [vmem:[%s1157_s29 + $0x40] sm:$0xff]  ;;  %305 = vst [vmem:[%s1162_s30 + $0x8] sm:$0xff] %v304_v1 }
  0x12   : > { %307 = vst [vmem:[%s1162_s30 + $0x10] sm:$0xff] %v306_v2  ;;  %v308_v3 = vld [vmem:[%s1157_s29 + $0x60] sm:$0xff] }
  0x13   : > { %v310_v4 = vld [vmem:[%s1157_s29 + $0x80] sm:$0xff]  ;;  %309 = vst [vmem:[%s1162_s30 + $0x18] sm:$0xff] %v308_v3 }
  0x14   : > { %v312_v5 = vld [vmem:[%s1157_s29 + $0xa0] sm:$0xff]  ;;  %311 = vst [vmem:[%s1162_s30 + $0x20] sm:$0xff] %v310_v4 }
  0x15   : > { %313 = vst [vmem:[%s1162_s30 + $0x28] sm:$0xff] %v312_v5  ;;  %v314_v6 = vld [vmem:[%s1157_s29 + $0xc0] sm:$0xff] }
  0x16   : > { %v316_v7 = vld [vmem:[%s1157_s29 + $0xe0] sm:$0xff]  ;;  %315 = vst [vmem:[%s1162_s30 + $0x30] sm:$0xff] %v314_v6 }
  0x17   : > { %v318_v8 = vld [vmem:[%s1157_s29 + $0x100] sm:$0xff]  ;;  %317 = vst [vmem:[%s1162_s30 + $0x38] sm:$0xff] %v316_v7 }
  0x18   : > { %319 = vst [vmem:[%s1162_s30 + $0x40] sm:$0xff] %v318_v8  ;;  %v320_v9 = vld [vmem:[%s1157_s29 + $0x120] sm:$0xff] }
  0x19   : > { %v322_v10 = vld [vmem:[%s1157_s29 + $0x140] sm:$0xff]  ;;  %321 = vst [vmem:[%s1162_s30 + $0x48] sm:$0xff] %v320_v9 }
  0x1a   : > { %v324_v11 = vld [vmem:[%s1157_s29 + $0x160] sm:$0xff]  ;;  %323 = vst [vmem:[%s1162_s30 + $0x50] sm:$0xff] %v322_v10 }
  0x1b   : > { %325 = vst [vmem:[%s1162_s30 + $0x58] sm:$0xff] %v324_v11  ;;  %v326_v12 = vld [vmem:[%s1157_s29 + $0x180] sm:$0xff] }
  0x1c   : > { %v328_v13 = vld [vmem:[%s1157_s29 + $0x1a0] sm:$0xff]  ;;  %327 = vst [vmem:[%s1162_s30 + $0x60] sm:$0xff] %v326_v12 }
  0x1d   : > { %v330_v14 = vld [vmem:[%s1157_s29 + $0x1c0] sm:$0xff]  ;;  %329 = vst [vmem:[%s1162_s30 + $0x68] sm:$0xff] %v328_v13 }
  0x1e   : > { %331 = vst [vmem:[%s1162_s30 + $0x70] sm:$0xff] %v330_v14  ;;  %v332_v15 = vld [vmem:[%s1157_s29 + $0x1e0] sm:$0xff] }
  0x1f   : > { %v334_v16 = vld [vmem:[%s1157_s29 + $0x200] sm:$0xff]  ;;  %333 = vst [vmem:[%s1162_s30 + $0x78] sm:$0xff] %v332_v15 }
  0x20   : > { %v336_v17 = vld [vmem:[%s1157_s29 + $0x220] sm:$0xff]  ;;  %335 = vst [vmem:[%s1162_s30 + $0x80] sm:$0xff] %v334_v16 }
  0x21   : > { %337 = vst [vmem:[%s1162_s30 + $0x88] sm:$0xff] %v336_v17  ;;  %v338_v18 = vld [vmem:[%s1157_s29 + $0x240] sm:$0xff] }
  0x22   : > { %v340_v19 = vld [vmem:[%s1157_s29 + $0x260] sm:$0xff]  ;;  %339 = vst [vmem:[%s1162_s30 + $0x90] sm:$0xff] %v338_v18 }
  0x23   : > { %v342_v20 = vld [vmem:[%s1157_s29 + $0x280] sm:$0xff]  ;;  %341 = vst [vmem:[%s1162_s30 + $0x98] sm:$0xff] %v340_v19 }
  0x24   : > { %343 = vst [vmem:[%s1162_s30 + $0xa0] sm:$0xff] %v342_v20  ;;  %v344_v21 = vld [vmem:[%s1157_s29 + $0x2a0] sm:$0xff] }
  0x25   : > { %v346_v22 = vld [vmem:[%s1157_s29 + $0x2c0] sm:$0xff]  ;;  %345 = vst [vmem:[%s1162_s30 + $0xa8] sm:$0xff] %v344_v21 }
  0x26   : > { %v348_v23 = vld [vmem:[%s1157_s29 + $0x2e0] sm:$0xff]  ;;  %347 = vst [vmem:[%s1162_s30 + $0xb0] sm:$0xff] %v346_v22 }
  0x27   : > { %349 = vst [vmem:[%s1162_s30 + $0xb8] sm:$0xff] %v348_v23  ;;  %v350_v24 = vld [vmem:[%s1157_s29 + $0x300] sm:$0xff] }
  0x28   : > { %v352_v25 = vld [vmem:[%s1157_s29 + $0x320] sm:$0xff]  ;;  %351 = vst [vmem:[%s1162_s30 + $0xc0] sm:$0xff] %v350_v24 }
  0x29   : > { %v354_v26 = vld [vmem:[%s1157_s29 + $0x340] sm:$0xff]  ;;  %353 = vst [vmem:[%s1162_s30 + $0xc8] sm:$0xff] %v352_v25 }
  0x2a   : > { %355 = vst [vmem:[%s1162_s30 + $0xd0] sm:$0xff] %v354_v26  ;;  %v356_v27 = vld [vmem:[%s1157_s29 + $0x360] sm:$0xff] }
  0x2b   : > { %v358_v28 = vld [vmem:[%s1157_s29 + $0x380] sm:$0xff]  ;;  %357 = vst [vmem:[%s1162_s30 + $0xd8] sm:$0xff] %v356_v27 }
  0x2c   : > { %v360_v29 = vld [vmem:[%s1157_s29 + $0x3a0] sm:$0xff]  ;;  %359 = vst [vmem:[%s1162_s30 + $0xe0] sm:$0xff] %v358_v28 }
  0x2d   : > { %361 = vst [vmem:[%s1162_s30 + $0xe8] sm:$0xff] %v360_v29  ;;  %v362_v30 = vld [vmem:[%s1157_s29 + $0x3c0] sm:$0xff] }
  0x2e   : > { %v364_v31 = vld [vmem:[%s1157_s29 + $0x3e0] sm:$0xff]  ;;  %363 = vst [vmem:[%s1162_s30 + $0xf0] sm:$0xff] %v362_v30 }
  0x2f   : > { %365 = vst [vmem:[%s1162_s30 + $0xf8] sm:$0xff] %v364_v31 }
  0x30 PF: > { %p915_p6 = scmp.ge.s32.totalorder %s1087_s19, 1  ;;  %p391_p7 = scmp.lt.s32.totalorder %s1087_s19, 5 }
  0x32   : > { %p392_p8 = pnand %p915_p6, %p391_p7 }
  0x33   : > { %s398_s5 = sand.u32 (!%p392_p8), 1, %s1071_s15   ;;  %s917_s10 = sshll.u32 (!%p392_p8), %s1079_s17, 1 }
  0x34   : > { %395 = sbr.rel (%p392_p8) target bundleno = 324 (0x144), region = 70  ;;  %s916_s8 = sshll.u32 (!%p392_p8), %s398_s5, 8 }
  0x35   : > { %s1235_s9 = scalar_lea.vmem (!%p392_p8), [#allocation3], %s916_s8  ;;  %p462_p9 = scmp.lt.s32.totalorder (!%p392_p8), %s917_s10, 7 }
  0x39   : > { %v1231_v32 = vld [vmem:[%s1296_s0] sm:$0xff]  ;;  %v999_v34 = vld [vmem:[%s1235_s9 + $0x74] ss:$8 sps:$4 sm:$0xff]   ;;  %v1001_v35 = vld [vmem:[%s1235_s9 + $0x70] ss:$8 sps:$4 sm:$0xff]   ;;  %v746_v3 = vlaneseq  ;;  %s1308_s10 = smov (!%p462_p9, %s917_s10), 7 }
  0x3a   : > { %v923_v33 = vcombine.high %v1231_v32, %v1231_v32  ;;  %694 = vmatprep.subr.bf16.mxu0 %v999_v34  ;;  %v1002_v36 = vld [vmem:[%s1235_s9 + $0x64] ss:$8 sps:$4 sm:$0xff]   ;;  %v1004_v37 = vld [vmem:[%s1235_s9 + $0x60] ss:$8 sps:$4 sm:$0xff]   ;;  %v1005_v38 = vld [vmem:[%s1235_s9 + $0x54] ss:$8 sps:$4 sm:$0xff]   ;;  %v922_v2 = vcombine.low %v1231_v32, %v1231_v32  ;;  %s464_s13 = scalar_lea.vmem %s1298_s2, %s1308_s10 }
  0x3b   : > { %695 = vmatpush1.bf16.msra.mxu0 %v1001_v35  ;;  %v1007_v39 = vld [vmem:[%s1235_s9 + $0x50] ss:$8 sps:$4 sm:$0xff]   ;;  %v1008_v40 = vld [vmem:[%s1235_s9 + $0x44] ss:$8 sps:$4 sm:$0xff]   ;;  %v1010_v41 = vld [vmem:[%s1235_s9 + $0x40] ss:$8 sps:$4 sm:$0xff]  }
  0x3c   : > { %726 = vmatprep.mubr.bf16.mxu0 %v923_v33  ;;  %696 = vmatprep.subr.bf16.mxu0 %v1002_v36  ;;  %v1011_v42 = vld [vmem:[%s1235_s9 + $0x34] ss:$8 sps:$4 sm:$0xff]   ;;  %v1013_v43 = vld [vmem:[%s1235_s9 + $0x30] ss:$8 sps:$4 sm:$0xff]   ;;  %v1014_v44 = vld [vmem:[%s1235_s9 + $0x24] ss:$8 sps:$4 sm:$0xff]  }
  0x3d   : > { %v1016_v45 = vld [vmem:[%s1235_s9 + $0x20] ss:$8 sps:$4 sm:$0xff]   ;;  %v1017_v46 = vld [vmem:[%s1235_s9 + $0x14] ss:$8 sps:$4 sm:$0xff]   ;;  %v1019_v47 = vld [vmem:[%s1235_s9 + $0x10] ss:$8 sps:$4 sm:$0xff]  }
  0x3e   : > { %v1020_v48 = vld [vmem:[%s1235_s9 + $0x4] ss:$8 sps:$4 sm:$0xff]   ;;  %v1022_v49 = vld [vmem:[%s1235_s9] ss:$8 sps:$4 sm:$0xff]   ;;  %v1023_v50 = vld [vmem:[%s1235_s9 + $0xf4] ss:$8 sps:$4 sm:$0xff]  }
  0x3f   : > { %697 = vmatpush1.bf16.msra.mxu0 %v1004_v37  ;;  %v1025_v51 = vld [vmem:[%s1235_s9 + $0xf0] ss:$8 sps:$4 sm:$0xff]   ;;  %v1026_v52 = vld [vmem:[%s1235_s9 + $0xe4] ss:$8 sps:$4 sm:$0xff]   ;;  %v1028_v53 = vld [vmem:[%s1235_s9 + $0xe0] ss:$8 sps:$4 sm:$0xff]  }
  0x40   : > { %698 = vmatprep.subr.bf16.mxu0 %v1005_v38  ;;  %v1029_v54 = vld [vmem:[%s1235_s9 + $0xd4] ss:$8 sps:$4 sm:$0xff]   ;;  %v1031_v55 = vld [vmem:[%s1235_s9 + $0xd0] ss:$8 sps:$4 sm:$0xff]   ;;  %v1032_v56 = vld [vmem:[%s1235_s9 + $0xc4] ss:$8 sps:$4 sm:$0xff]  }
  0x41   : > { %v1034_v57 = vld [vmem:[%s1235_s9 + $0xc0] ss:$8 sps:$4 sm:$0xff]   ;;  %v1035_v58 = vld [vmem:[%s1235_s9 + $0xb4] ss:$8 sps:$4 sm:$0xff]   ;;  %v1037_v59 = vld [vmem:[%s1235_s9 + $0xb0] ss:$8 sps:$4 sm:$0xff]  }
  0x42   : > { %v1038_v60 = vld [vmem:[%s1235_s9 + $0xa4] ss:$8 sps:$4 sm:$0xff]   ;;  %v1040_v61 = vld [vmem:[%s1235_s9 + $0xa0] ss:$8 sps:$4 sm:$0xff]   ;;  %v1041_v62 = vld [vmem:[%s1235_s9 + $0x94] ss:$8 sps:$4 sm:$0xff]  }
  0x43   : > { %699 = vmatpush1.bf16.msra.mxu0 %v1007_v39  ;;  %v1043_v63 = vld [vmem:[%s1235_s9 + $0x90] ss:$8 sps:$4 sm:$0xff]   ;;  %v1044_v0 = vld [vmem:[%s1235_s9 + $0x84] ss:$8 sps:$4 sm:$0xff]   ;;  %v1046_v1 = vld [vmem:[%s1235_s9 + $0x80] ss:$8 sps:$4 sm:$0xff]  }
  0x44   : > { %700 = vmatprep.subr.bf16.mxu0 %v1008_v40  ;;  %v747_v4 = vshrl.u32 %v746_v3, 7  ;;  %s919_s14 = sshll.u32 %s1308_s10, 3  ;;  %v744_v6 = vld [vmem:[%s464_s13] sm:$0x3] }
  0x45   : > { %s474_s22 = scalar_lea.vmem %s1299_s3, %s919_s14  ;;  %s484_s25 = scalar_lea.vmem %s1300_s4, %s919_s14 }
  0x46   : > { %v748_v5 = vsub.s32 0, %v747_v4  ;;  %v752_v7 = vsub.s32 1, %v747_v4  ;;  %v758_v11 = vld [vmem:[%s474_s22] sm:$0xff]  ;;  %v759_v14 = vld [vmem:[%s474_s22 + $0x8] sm:$0xff] }
  0x47   : > { %701 = vmatpush1.bf16.msra.mxu0 %v1010_v41 }
  0x48   : > { %702 = vmatprep.subr.bf16.mxu0 %v1011_v42  ;;  %v749_v8 = vrot.slane %v744_v6, %v748_v5  ;;  %v753_v9 = vrot.slane %v744_v6, %v752_v7 }
  0x4b   : > { %703 = vmatpush1.bf16.msra.mxu0 %v1013_v43 }
  0x4c   : > { %704 = vmatprep.subr.bf16.mxu0 %v1014_v44 }
  0x4f   : > { %705 = vmatpush1.bf16.msra.mxu0 %v1016_v45 }
  0x50   : > { %706 = vmatprep.subr.bf16.mxu0 %v1017_v46 }
  0x53   : > { %707 = vmatpush1.bf16.msra.mxu0 %v1019_v47 }
  0x54   : > { %708 = vmatprep.subr.bf16.mxu0 %v1020_v48 }
  0x57   : > { %709 = vmatpush1.bf16.msra.mxu0 %v1022_v49 }
  0x58   : > { %710 = vmatprep.subr.bf16.mxu0 %v1023_v50 }
  0x5b   : > { %711 = vmatpush2.bf16.msra.mxu0 %v1025_v51 }
  0x5c   : > { %712 = vmatprep.subr.bf16.mxu0 %v1026_v52 }
  0x5f   : > { %713 = vmatpush2.bf16.msra.mxu0 %v1028_v53 }
  0x60   : > { %714 = vmatprep.subr.bf16.mxu0 %v1029_v54 }
  0x63   : > { %715 = vmatpush2.bf16.msra.mxu0 %v1031_v55 }
  0x64   : > { %716 = vmatprep.subr.bf16.mxu0 %v1032_v56 }
  0x67   : > { %717 = vmatpush2.bf16.msra.mxu0 %v1034_v57 }
  0x68   : > { %718 = vmatprep.subr.bf16.mxu0 %v1035_v58 }
  0x6b   : > { %719 = vmatpush2.bf16.msra.mxu0 %v1037_v59 }
  0x6c   : > { %720 = vmatprep.subr.bf16.mxu0 %v1038_v60 }
  0x6f   : > { %721 = vmatpush2.bf16.msra.mxu0 %v1040_v61 }
  0x70   : > { %722 = vmatprep.subr.bf16.mxu0 %v1041_v62 }
  0x73   : > { %723 = vmatpush2.bf16.msra.mxu0 %v1043_v63 }
  0x74   : > { %724 = vmatprep.subr.bf16.mxu0 %v1044_v0 }
  0x77   : > { %725 = vmatpush2.bf16.msra.mxu0 %v1046_v1 }
  0x7a   : > { %727 = vmatmul.mubr.bf16.vlgmr.msra.gmra.mxu0 %v922_v2 }
 0x13a   : > { %v728_v10 = vpop.f32.mrf.mxu0 }
 0x13b   : > { %v756_v12 = vadd.f32 %v749_v8, %v728_v10 }
 0x13c   : > { %v730_v13 = vpop.f32.mrf.mxu0 }
 0x13d   : > { %v760_v15 = vadd.f32 %v758_v11, %v756_v12  ;;  %v757_v16 = vadd.f32 %v753_v9, %v730_v13 }
 0x13e   : > { %v732_v17 = vpop.f32.mrf.mxu0 }
 0x13f   : > { %v762_v18 = vmax.f32 %v760_v15, 0.0  ;;  %v761_v19 = vadd.f32 %v759_v14, %v757_v16 }
 0x140   : > { %v733_v20 = vpop.f32.mrf.mxu0 }
 0x141   : > { %764 = vst [vmem:[%s484_s25] sm:$0xff] %v762_v18  ;;  %v763_v21 = vmax.f32 %v761_v19, 0.0 }
 0x143   : > { %765 = vst [vmem:[%s484_s25 + $0x8] sm:$0xff] %v763_v21 }
 0x144 PF: > { %s14_s19 = sadd.s32 1, %s1087_s19   ;;  %s1301_s15 = smov %s1075_s16 }
 0x145   : > { %p11_p10 = scmp.ge.s32.totalorder %s14_s19, 6   ;;  %s1302_s16 = smov %s1149_s23 }
 0x146   : > { %s1303_s17 = smov %s1083_s18  ;;  %s1304_s18 = smov %s1306_s20 }
 0x147   :  { %13 = sbr.rel (!%p11_p10) target bundleno = 3 (0x3), region = 126 }

</bundles_post_ra>
